<compile_context>
chip_gen: v7x
topology: tpu7x:2x2x1
jax: 0.10.0
libtpu: 0.0.40
codegen_flags: <defaults>
</compile_context>

<pallas_src>
import functools

import jax
import jax.numpy as jnp
import numpy as np
from jax import lax
from jax.experimental import pallas as pl
from jax.experimental.pallas import tpu as pltpu


def _window_attn_kernel(x_ref, wqkv_ref, bqkv_ref, bias_ref, wproj_ref, bproj_ref, o_ref,
                        *, num_heads, head_dim, dim, bw, n_tok, scale):
    C, hd, Bw, N = dim, head_dim, bw, n_tok

    # Fused QKV projection: one (Bw*N, C) @ (C, 3C) GEMM. Operands stay in their input dtype;
    # the MXU accumulates in f32 via preferred_element_type (no per-step .astype of weights).
    x2d = x_ref[...].reshape(Bw * N, C)
    qkv = jnp.dot(x2d, wqkv_ref[...], preferred_element_type=jnp.float32) + bqkv_ref[...]
    qkv = qkv.reshape(Bw, N, 3 * C)                                   # (Bw, N, 3C) f32

    out_acc = jnp.zeros((Bw * N, C), jnp.float32)
    for h in range(num_heads):                                        # static unroll; each head now
        q = qkv[:, :, h * hd:(h + 1) * hd] * scale                    # processes all Bw windows.
        k = qkv[:, :, C + h * hd:C + (h + 1) * hd]                    # (Bw, N, hd)
        v = qkv[:, :, 2 * C + h * hd:2 * C + (h + 1) * hd]            # (Bw, N, hd)

        # Scores batched over windows; contract head_dim directly (no explicit transpose of K).
        attn = lax.dot_general(q, k, (((2,), (2,)), ((0,), (0,))),
                               preferred_element_type=jnp.float32)    # (Bw, N, N)
        attn = attn + bias_ref[h][None, :, :]                         # relative position bias
        # TODO(synk): optional shifted-window `mask` would be added here (before the max-subtract);
        # attn_drop / proj_drop are identity in eval / p=0.0 and are omitted.
        attn = attn - jnp.max(attn, axis=-1, keepdims=True)
        p = jnp.exp(attn)
        p = p * pl.reciprocal(jnp.sum(p, axis=-1, keepdims=True), approx=True)

        ctx = lax.dot_general(p, v, (((2,), (1,)), ((0,), (0,))),
                              preferred_element_type=jnp.float32)     # (Bw, N, hd)
        # Fused output projection: accumulate this head's contribution (drops heads_scratch and
        # the narrow per-head VMEM stores entirely).
        out_acc = out_acc + jnp.dot(ctx.reshape(Bw * N, hd), wproj_ref[h],
                                    preferred_element_type=jnp.float32)

    out = out_acc + bproj_ref[...]                                    # (Bw*N, C)
    o_ref[...] = out.reshape(Bw, N, C).astype(o_ref.dtype)


def _choose_block_windows(num_windows, n_tok, max_rows=256):
    """Largest divisor Bw of num_windows with Bw * n_tok <= max_rows (MXU-friendly M)."""
    best = 1
    for bw in range(1, num_windows + 1):
        if num_windows % bw == 0 and bw * n_tok <= max_rows:
            best = bw
    return best


def window_attention_pallas(x, wqkv, bqkv, rel_bias, wproj, bproj, *, num_heads, scale,
                            block_windows=None):
    B_, N, C = x.shape
    hd = C // num_heads
    Bw = block_windows if block_windows is not None else _choose_block_windows(B_, N)
    assert B_ % Bw == 0, (B_, Bw)

    # Pre-split the projection weight per head: (C, C) -> (num_heads, hd, C). Indexing the head
    # along the leading axis in-kernel avoids sublane slicing of the weight.
    wproj_h = wproj.reshape(num_heads, hd, C)

    kernel = functools.partial(_window_attn_kernel, num_heads=num_heads, head_dim=hd,
                               dim=C, bw=Bw, n_tok=N, scale=scale)
    return pl.pallas_call(
        kernel,
        out_shape=jax.ShapeDtypeStruct((B_, N, C), x.dtype),
        grid_spec=pltpu.PrefetchScalarGridSpec(
            num_scalar_prefetch=0,
            grid=(B_ // Bw,),
            in_specs=[
                pl.BlockSpec((Bw, N, C), lambda b: (b, 0, 0)),            # Bw windows per step
                pl.BlockSpec((C, 3 * C), lambda b: (0, 0)),               # qkv weight (resident)
                pl.BlockSpec((1, 3 * C), lambda b: (0, 0)),               # qkv bias
                pl.BlockSpec((num_heads, N, N), lambda b: (0, 0, 0)),     # relative position bias
                pl.BlockSpec((num_heads, hd, C), lambda b: (0, 0, 0)),    # proj weight, per head
                pl.BlockSpec((1, C), lambda b: (0, 0)),                   # proj bias
            ],
            out_specs=pl.BlockSpec((Bw, N, C), lambda b: (b, 0, 0)),
        ),
        # Window axis parallel: no-op on 1-TC chips, shards across the 2 TCs on v7x.
        compiler_params=pltpu.CompilerParams(dimension_semantics=("parallel",)),
    )(x, wqkv, bqkv, rel_bias, wproj_h, bproj)


def make_relative_position_index(window_size):
    """Same computation as the PyTorch __init__ (numpy)."""
    Wh, Ww = window_size
    coords_h = np.arange(Wh)
    coords_w = np.arange(Ww)
    coords = np.stack(np.meshgrid(coords_h, coords_w, indexing="ij"))   # (2, Wh, Ww)
    coords_flatten = coords.reshape(2, -1)                              # (2, N)
    relative_coords = coords_flatten[:, :, None] - coords_flatten[:, None, :]  # (2, N, N)
    relative_coords = relative_coords.transpose(1, 2, 0).copy()         # (N, N, 2)
    relative_coords[:, :, 0] += Wh - 1
    relative_coords[:, :, 1] += Ww - 1
    relative_coords[:, :, 0] *= 2 * Ww - 1
    return relative_coords.sum(-1)                                      # (N, N)


def reference_forward(x, wqkv, bqkv, rel_bias, wproj, bproj, num_heads, scale):
    """Pure-JAX reference mirroring the PyTorch forward (mask=None, eval dropout)."""
    B_, N, C = x.shape
    hd = C // num_heads
    qkv = x @ wqkv + bqkv[0]                                            # (B_, N, 3C)
    qkv = qkv.reshape(B_, N, 3, num_heads, hd).transpose(2, 0, 3, 1, 4)
    q, k, v = qkv[0], qkv[1], qkv[2]
    q = q * scale
    attn = jnp.einsum("bhnd,bhmd->bhnm", q, k) + rel_bias[None]
    attn = jax.nn.softmax(attn, axis=-1)
    out = jnp.einsum("bhnm,bhmd->bhnd", attn, v).transpose(0, 2, 1, 3).reshape(B_, N, C)
    return out @ wproj + bproj[0]


if __name__ == "__main__":
    # dim=32, window 4x4 -> N=16, 4 heads; 32 windows so the kernel batches Bw=16 windows/step
    # (M = Bw*N = 256 rows per GEMM) over a grid of 2 steps.
    dim = 32
    window_size = (4, 4)
    num_heads = 4
    head_dim = dim // num_heads
    scale = head_dim ** (-0.5)
    N = window_size[0] * window_size[1]
    B_ = 32

    key = jax.random.PRNGKey(0)
    k_x, k_tbl, k_wqkv, k_bqkv, k_wproj, k_bproj = jax.random.split(key, 6)

    x = jax.random.normal(k_x, (B_, N, dim), dtype=jnp.float32)

    # Parameters (deterministic, synthetic). Linear stored as (in, out) so y = x @ W + b.
    num_rel = (2 * window_size[0] - 1) * (2 * window_size[1] - 1)
    rel_table = 0.02 * jax.random.normal(k_tbl, (num_rel, num_heads), dtype=jnp.float32)
    wqkv = 0.05 * jax.random.normal(k_wqkv, (dim, 3 * dim), dtype=jnp.float32)
    bqkv = 0.05 * jax.random.normal(k_bqkv, (1, 3 * dim), dtype=jnp.float32)
    wproj = 0.05 * jax.random.normal(k_wproj, (dim, dim), dtype=jnp.float32)
    bproj = 0.05 * jax.random.normal(k_bproj, (1, dim), dtype=jnp.float32)

    # Gather relative position bias in plain JAX (glue); kernel consumes the (nH, N, N) tensor.
    rel_index = make_relative_position_index(window_size)               # (N, N) int
    rel_bias = rel_table[rel_index.reshape(-1)].reshape(N, N, num_heads)
    rel_bias = jnp.transpose(rel_bias, (2, 0, 1))                       # (num_heads, N, N)

    out = window_attention_pallas(x, wqkv, bqkv, rel_bias, wproj, bproj,
                                  num_heads=num_heads, scale=scale)
    out = jax.block_until_ready(out)

    ref = reference_forward(x, wqkv, bqkv, rel_bias, wproj, bproj, num_heads, scale)
    # Tolerance covers the EUP approximate-reciprocal softmax normalization.
    np.testing.assert_allclose(np.asarray(out), np.asarray(ref), atol=2e-3, rtol=2e-3)

    print("KERNEL_OK")
</pallas_src>

<mosaic_0001>
module attributes {stable_mosaic.version = 11 : i64} {
  func.func @_window_attn_kernel(%arg0: i32, %arg1: memref<16x16x32xf32, #tpu.memory_space<vmem>>, %arg2: memref<32x96xf32, #tpu.memory_space<vmem>>, %arg3: memref<1x96xf32, #tpu.memory_space<vmem>>, %arg4: memref<4x16x16xf32, #tpu.memory_space<vmem>>, %arg5: memref<4x8x32xf32, #tpu.memory_space<vmem>>, %arg6: memref<1x32xf32, #tpu.memory_space<vmem>>, %arg7: memref<16x16x32xf32, #tpu.memory_space<vmem>>) attributes {dimension_semantics = [#tpu.dimension_semantics<parallel>], iteration_bounds = array<i64: 2>, scalar_prefetch = 0 : i64, scratch_operands = 0 : i64, tpu.core_type = #tpu.core_type<tc>, window_params = [{transform_indices = @transform_0, window_bounds = array<i64: 16, 16, 32>}, {pipeline_mode = #tpu.pipeline_mode<synchronous>, transform_indices = @transform_1, window_bounds = array<i64: 32, 96>}, {pipeline_mode = #tpu.pipeline_mode<synchronous>, transform_indices = @transform_2, window_bounds = array<i64: 1, 96>}, {pipeline_mode = #tpu.pipeline_mode<synchronous>, transform_indices = @transform_3, window_bounds = array<i64: 4, 16, 16>}, {pipeline_mode = #tpu.pipeline_mode<synchronous>, transform_indices = @transform_4, window_bounds = array<i64: 4, 8, 32>}, {pipeline_mode = #tpu.pipeline_mode<synchronous>, transform_indices = @transform_5, window_bounds = array<i64: 1, 32>}, {transform_indices = @transform_6, window_bounds = array<i64: 16, 16, 32>}]} {
    %c0 = arith.constant 0 : index
    %c0_0 = arith.constant 0 : index
    %c0_1 = arith.constant 0 : index
    %0 = vector.load %arg1[%c0, %c0_0, %c0_1] : memref<16x16x32xf32, #tpu.memory_space<vmem>>, vector<16x16x32xf32>
    %1 = vector.shape_cast %0 : vector<16x16x32xf32> to vector<256x32xf32>
    %c0_2 = arith.constant 0 : index
    %c0_3 = arith.constant 0 : index
    %2 = vector.load %arg2[%c0_2, %c0_3] : memref<32x96xf32, #tpu.memory_space<vmem>>, vector<32x96xf32>
    %cst = arith.constant dense<0.000000e+00> : vector<256x96xf32>
    %3 = tpu.matmul %1, %2, %cst {dimension_numbers = #tpu.dot_dimension_numbers<[1], [0], [0], [1], [0, 0, 1, 1], [], []>} : vector<256x32xf32>, vector<32x96xf32>, vector<256x96xf32> -> vector<256x96xf32>
    %c0_4 = arith.constant 0 : index
    %c0_5 = arith.constant 0 : index
    %4 = vector.load %arg3[%c0_4, %c0_5] : memref<1x96xf32, #tpu.memory_space<vmem>>, vector<1x96xf32>
    %5 = vector.broadcast %4 : vector<1x96xf32> to vector<256x96xf32>
    %6 = arith.addf %3, %5 : vector<256x96xf32>
    %7 = vector.shape_cast %6 : vector<256x96xf32> to vector<16x16x96xf32>
    %cst_6 = arith.constant 0.000000e+00 : f32
    %8 = vector.broadcast %cst_6 : f32 to vector<256x32xf32>
    %9 = vector.extract_strided_slice %7 {offsets = [0, 0, 0], sizes = [16, 16, 8], strides = [1, 1, 1]} : vector<16x16x96xf32> to vector<16x16x8xf32>
    %cst_7 = arith.constant 0.353553385 : f32
    %10 = vector.broadcast %cst_7 : f32 to vector<16x16x8xf32>
    %11 = arith.mulf %9, %10 : vector<16x16x8xf32>
    %12 = vector.extract_strided_slice %7 {offsets = [0, 0, 32], sizes = [16, 16, 8], strides = [1, 1, 1]} : vector<16x16x96xf32> to vector<16x16x8xf32>
    %13 = vector.extract_strided_slice %7 {offsets = [0, 0, 64], sizes = [16, 16, 8], strides = [1, 1, 1]} : vector<16x16x96xf32> to vector<16x16x8xf32>
    %cst_8 = arith.constant dense<0.000000e+00> : vector<16x16x16xf32>
    %14 = tpu.matmul %11, %12, %cst_8 {dimension_numbers = #tpu.dot_dimension_numbers<[2], [2], [1], [1], [0, 0, 0, 1, 1, 1], [0], [0]>} : vector<16x16x8xf32>, vector<16x16x8xf32>, vector<16x16x16xf32> -> vector<16x16x16xf32>
    %c0_9 = arith.constant 0 : index
    %c0_10 = arith.constant 0 : index
    %c0_11 = arith.constant 0 : index
    %15 = vector.load %arg4[%c0_9, %c0_10, %c0_11] : memref<4x16x16xf32, #tpu.memory_space<vmem>>, vector<1x16x16xf32>
    %16 = vector.shape_cast %15 : vector<1x16x16xf32> to vector<16x16xf32>
    %17 = vector.shape_cast %16 : vector<16x16xf32> to vector<1x16x16xf32>
    %18 = vector.broadcast %17 : vector<1x16x16xf32> to vector<16x16x16xf32>
    %19 = arith.addf %14, %18 : vector<16x16x16xf32>
    %cst_12 = arith.constant dense<0xFF800000> : vector<16x16xf32>
    %20 = vector.multi_reduction <maximumf>, %19, %cst_12 [2] : vector<16x16x16xf32> to vector<16x16xf32>
    %21 = vector.shape_cast %20 : vector<16x16xf32> to vector<16x16x1xf32>
    %22 = vector.broadcast %21 : vector<16x16x1xf32> to vector<16x16x16xf32>
    %23 = arith.subf %19, %22 : vector<16x16x16xf32>
    %24 = math.exp %23 : vector<16x16x16xf32>
    %cst_13 = arith.constant dense<0.000000e+00> : vector<16x16xf32>
    %25 = vector.multi_reduction <add>, %24, %cst_13 [2] : vector<16x16x16xf32> to vector<16x16xf32>
    %26 = vector.shape_cast %25 : vector<16x16xf32> to vector<16x16x1xf32>
    %27 = tpu.reciprocal %26 {approx = true} : vector<16x16x1xf32> -> vector<16x16x1xf32>
    %28 = vector.broadcast %27 : vector<16x16x1xf32> to vector<16x16x16xf32>
    %29 = arith.mulf %24, %28 : vector<16x16x16xf32>
    %cst_14 = arith.constant dense<0.000000e+00> : vector<16x16x8xf32>
    %30 = tpu.matmul %29, %13, %cst_14 {dimension_numbers = #tpu.dot_dimension_numbers<[2], [1], [1], [2], [0, 0, 0, 1, 1, 2], [0], [0]>} : vector<16x16x16xf32>, vector<16x16x8xf32>, vector<16x16x8xf32> -> vector<16x16x8xf32>
    %31 = vector.shape_cast %30 : vector<16x16x8xf32> to vector<256x8xf32>
    %c0_15 = arith.constant 0 : index
    %c0_16 = arith.constant 0 : index
    %c0_17 = arith.constant 0 : index
    %32 = vector.load %arg5[%c0_15, %c0_16, %c0_17] : memref<4x8x32xf32, #tpu.memory_space<vmem>>, vector<1x8x32xf32>
    %33 = vector.shape_cast %32 : vector<1x8x32xf32> to vector<8x32xf32>
    %cst_18 = arith.constant dense<0.000000e+00> : vector<256x32xf32>
    %34 = tpu.matmul %31, %33, %cst_18 {dimension_numbers = #tpu.dot_dimension_numbers<[1], [0], [0], [1], [0, 0, 1, 1], [], []>} : vector<256x8xf32>, vector<8x32xf32>, vector<256x32xf32> -> vector<256x32xf32>
    %35 = arith.addf %8, %34 : vector<256x32xf32>
    %36 = vector.extract_strided_slice %7 {offsets = [0, 0, 8], sizes = [16, 16, 8], strides = [1, 1, 1]} : vector<16x16x96xf32> to vector<16x16x8xf32>
    %cst_19 = arith.constant 0.353553385 : f32
    %37 = vector.broadcast %cst_19 : f32 to vector<16x16x8xf32>
    %38 = arith.mulf %36, %37 : vector<16x16x8xf32>
    %39 = vector.extract_strided_slice %7 {offsets = [0, 0, 40], sizes = [16, 16, 8], strides = [1, 1, 1]} : vector<16x16x96xf32> to vector<16x16x8xf32>
    %40 = vector.extract_strided_slice %7 {offsets = [0, 0, 72], sizes = [16, 16, 8], strides = [1, 1, 1]} : vector<16x16x96xf32> to vector<16x16x8xf32>
    %cst_20 = arith.constant dense<0.000000e+00> : vector<16x16x16xf32>
    %41 = tpu.matmul %38, %39, %cst_20 {dimension_numbers = #tpu.dot_dimension_numbers<[2], [2], [1], [1], [0, 0, 0, 1, 1, 1], [0], [0]>} : vector<16x16x8xf32>, vector<16x16x8xf32>, vector<16x16x16xf32> -> vector<16x16x16xf32>
    %c1 = arith.constant 1 : index
    %c0_21 = arith.constant 0 : index
    %c0_22 = arith.constant 0 : index
    %42 = vector.load %arg4[%c1, %c0_21, %c0_22] : memref<4x16x16xf32, #tpu.memory_space<vmem>>, vector<1x16x16xf32>
    %43 = vector.shape_cast %42 : vector<1x16x16xf32> to vector<16x16xf32>
    %44 = vector.shape_cast %43 : vector<16x16xf32> to vector<1x16x16xf32>
    %45 = vector.broadcast %44 : vector<1x16x16xf32> to vector<16x16x16xf32>
    %46 = arith.addf %41, %45 : vector<16x16x16xf32>
    %cst_23 = arith.constant dense<0xFF800000> : vector<16x16xf32>
    %47 = vector.multi_reduction <maximumf>, %46, %cst_23 [2] : vector<16x16x16xf32> to vector<16x16xf32>
    %48 = vector.shape_cast %47 : vector<16x16xf32> to vector<16x16x1xf32>
    %49 = vector.broadcast %48 : vector<16x16x1xf32> to vector<16x16x16xf32>
    %50 = arith.subf %46, %49 : vector<16x16x16xf32>
    %51 = math.exp %50 : vector<16x16x16xf32>
    %cst_24 = arith.constant dense<0.000000e+00> : vector<16x16xf32>
    %52 = vector.multi_reduction <add>, %51, %cst_24 [2] : vector<16x16x16xf32> to vector<16x16xf32>
    %53 = vector.shape_cast %52 : vector<16x16xf32> to vector<16x16x1xf32>
    %54 = tpu.reciprocal %53 {approx = true} : vector<16x16x1xf32> -> vector<16x16x1xf32>
    %55 = vector.broadcast %54 : vector<16x16x1xf32> to vector<16x16x16xf32>
    %56 = arith.mulf %51, %55 : vector<16x16x16xf32>
    %cst_25 = arith.constant dense<0.000000e+00> : vector<16x16x8xf32>
    %57 = tpu.matmul %56, %40, %cst_25 {dimension_numbers = #tpu.dot_dimension_numbers<[2], [1], [1], [2], [0, 0, 0, 1, 1, 2], [0], [0]>} : vector<16x16x16xf32>, vector<16x16x8xf32>, vector<16x16x8xf32> -> vector<16x16x8xf32>
    %58 = vector.shape_cast %57 : vector<16x16x8xf32> to vector<256x8xf32>
    %c1_26 = arith.constant 1 : index
    %c0_27 = arith.constant 0 : index
    %c0_28 = arith.constant 0 : index
    %59 = vector.load %arg5[%c1_26, %c0_27, %c0_28] : memref<4x8x32xf32, #tpu.memory_space<vmem>>, vector<1x8x32xf32>
    %60 = vector.shape_cast %59 : vector<1x8x32xf32> to vector<8x32xf32>
    %cst_29 = arith.constant dense<0.000000e+00> : vector<256x32xf32>
    %61 = tpu.matmul %58, %60, %cst_29 {dimension_numbers = #tpu.dot_dimension_numbers<[1], [0], [0], [1], [0, 0, 1, 1], [], []>} : vector<256x8xf32>, vector<8x32xf32>, vector<256x32xf32> -> vector<256x32xf32>
    %62 = arith.addf %35, %61 : vector<256x32xf32>
    %63 = vector.extract_strided_slice %7 {offsets = [0, 0, 16], sizes = [16, 16, 8], strides = [1, 1, 1]} : vector<16x16x96xf32> to vector<16x16x8xf32>
    %cst_30 = arith.constant 0.353553385 : f32
    %64 = vector.broadcast %cst_30 : f32 to vector<16x16x8xf32>
    %65 = arith.mulf %63, %64 : vector<16x16x8xf32>
    %66 = vector.extract_strided_slice %7 {offsets = [0, 0, 48], sizes = [16, 16, 8], strides = [1, 1, 1]} : vector<16x16x96xf32> to vector<16x16x8xf32>
    %67 = vector.extract_strided_slice %7 {offsets = [0, 0, 80], sizes = [16, 16, 8], strides = [1, 1, 1]} : vector<16x16x96xf32> to vector<16x16x8xf32>
    %cst_31 = arith.constant dense<0.000000e+00> : vector<16x16x16xf32>
    %68 = tpu.matmul %65, %66, %cst_31 {dimension_numbers = #tpu.dot_dimension_numbers<[2], [2], [1], [1], [0, 0, 0, 1, 1, 1], [0], [0]>} : vector<16x16x8xf32>, vector<16x16x8xf32>, vector<16x16x16xf32> -> vector<16x16x16xf32>
    %c2 = arith.constant 2 : index
    %c0_32 = arith.constant 0 : index
    %c0_33 = arith.constant 0 : index
    %69 = vector.load %arg4[%c2, %c0_32, %c0_33] : memref<4x16x16xf32, #tpu.memory_space<vmem>>, vector<1x16x16xf32>
    %70 = vector.shape_cast %69 : vector<1x16x16xf32> to vector<16x16xf32>
    %71 = vector.shape_cast %70 : vector<16x16xf32> to vector<1x16x16xf32>
    %72 = vector.broadcast %71 : vector<1x16x16xf32> to vector<16x16x16xf32>
    %73 = arith.addf %68, %72 : vector<16x16x16xf32>
    %cst_34 = arith.constant dense<0xFF800000> : vector<16x16xf32>
    %74 = vector.multi_reduction <maximumf>, %73, %cst_34 [2] : vector<16x16x16xf32> to vector<16x16xf32>
    %75 = vector.shape_cast %74 : vector<16x16xf32> to vector<16x16x1xf32>
    %76 = vector.broadcast %75 : vector<16x16x1xf32> to vector<16x16x16xf32>
    %77 = arith.subf %73, %76 : vector<16x16x16xf32>
    %78 = math.exp %77 : vector<16x16x16xf32>
    %cst_35 = arith.constant dense<0.000000e+00> : vector<16x16xf32>
    %79 = vector.multi_reduction <add>, %78, %cst_35 [2] : vector<16x16x16xf32> to vector<16x16xf32>
    %80 = vector.shape_cast %79 : vector<16x16xf32> to vector<16x16x1xf32>
    %81 = tpu.reciprocal %80 {approx = true} : vector<16x16x1xf32> -> vector<16x16x1xf32>
    %82 = vector.broadcast %81 : vector<16x16x1xf32> to vector<16x16x16xf32>
    %83 = arith.mulf %78, %82 : vector<16x16x16xf32>
    %cst_36 = arith.constant dense<0.000000e+00> : vector<16x16x8xf32>
    %84 = tpu.matmul %83, %67, %cst_36 {dimension_numbers = #tpu.dot_dimension_numbers<[2], [1], [1], [2], [0, 0, 0, 1, 1, 2], [0], [0]>} : vector<16x16x16xf32>, vector<16x16x8xf32>, vector<16x16x8xf32> -> vector<16x16x8xf32>
    %85 = vector.shape_cast %84 : vector<16x16x8xf32> to vector<256x8xf32>
    %c2_37 = arith.constant 2 : index
    %c0_38 = arith.constant 0 : index
    %c0_39 = arith.constant 0 : index
    %86 = vector.load %arg5[%c2_37, %c0_38, %c0_39] : memref<4x8x32xf32, #tpu.memory_space<vmem>>, vector<1x8x32xf32>
    %87 = vector.shape_cast %86 : vector<1x8x32xf32> to vector<8x32xf32>
    %cst_40 = arith.constant dense<0.000000e+00> : vector<256x32xf32>
    %88 = tpu.matmul %85, %87, %cst_40 {dimension_numbers = #tpu.dot_dimension_numbers<[1], [0], [0], [1], [0, 0, 1, 1], [], []>} : vector<256x8xf32>, vector<8x32xf32>, vector<256x32xf32> -> vector<256x32xf32>
    %89 = arith.addf %62, %88 : vector<256x32xf32>
    %90 = vector.extract_strided_slice %7 {offsets = [0, 0, 24], sizes = [16, 16, 8], strides = [1, 1, 1]} : vector<16x16x96xf32> to vector<16x16x8xf32>
    %cst_41 = arith.constant 0.353553385 : f32
    %91 = vector.broadcast %cst_41 : f32 to vector<16x16x8xf32>
    %92 = arith.mulf %90, %91 : vector<16x16x8xf32>
    %93 = vector.extract_strided_slice %7 {offsets = [0, 0, 56], sizes = [16, 16, 8], strides = [1, 1, 1]} : vector<16x16x96xf32> to vector<16x16x8xf32>
    %94 = vector.extract_strided_slice %7 {offsets = [0, 0, 88], sizes = [16, 16, 8], strides = [1, 1, 1]} : vector<16x16x96xf32> to vector<16x16x8xf32>
    %cst_42 = arith.constant dense<0.000000e+00> : vector<16x16x16xf32>
    %95 = tpu.matmul %92, %93, %cst_42 {dimension_numbers = #tpu.dot_dimension_numbers<[2], [2], [1], [1], [0, 0, 0, 1, 1, 1], [0], [0]>} : vector<16x16x8xf32>, vector<16x16x8xf32>, vector<16x16x16xf32> -> vector<16x16x16xf32>
    %c3 = arith.constant 3 : index
    %c0_43 = arith.constant 0 : index
    %c0_44 = arith.constant 0 : index
    %96 = vector.load %arg4[%c3, %c0_43, %c0_44] : memref<4x16x16xf32, #tpu.memory_space<vmem>>, vector<1x16x16xf32>
    %97 = vector.shape_cast %96 : vector<1x16x16xf32> to vector<16x16xf32>
    %98 = vector.shape_cast %97 : vector<16x16xf32> to vector<1x16x16xf32>
    %99 = vector.broadcast %98 : vector<1x16x16xf32> to vector<16x16x16xf32>
    %100 = arith.addf %95, %99 : vector<16x16x16xf32>
    %cst_45 = arith.constant dense<0xFF800000> : vector<16x16xf32>
    %101 = vector.multi_reduction <maximumf>, %100, %cst_45 [2] : vector<16x16x16xf32> to vector<16x16xf32>
    %102 = vector.shape_cast %101 : vector<16x16xf32> to vector<16x16x1xf32>
    %103 = vector.broadcast %102 : vector<16x16x1xf32> to vector<16x16x16xf32>
    %104 = arith.subf %100, %103 : vector<16x16x16xf32>
    %105 = math.exp %104 : vector<16x16x16xf32>
    %cst_46 = arith.constant dense<0.000000e+00> : vector<16x16xf32>
    %106 = vector.multi_reduction <add>, %105, %cst_46 [2] : vector<16x16x16xf32> to vector<16x16xf32>
    %107 = vector.shape_cast %106 : vector<16x16xf32> to vector<16x16x1xf32>
    %108 = tpu.reciprocal %107 {approx = true} : vector<16x16x1xf32> -> vector<16x16x1xf32>
    %109 = vector.broadcast %108 : vector<16x16x1xf32> to vector<16x16x16xf32>
    %110 = arith.mulf %105, %109 : vector<16x16x16xf32>
    %cst_47 = arith.constant dense<0.000000e+00> : vector<16x16x8xf32>
    %111 = tpu.matmul %110, %94, %cst_47 {dimension_numbers = #tpu.dot_dimension_numbers<[2], [1], [1], [2], [0, 0, 0, 1, 1, 2], [0], [0]>} : vector<16x16x16xf32>, vector<16x16x8xf32>, vector<16x16x8xf32> -> vector<16x16x8xf32>
    %112 = vector.shape_cast %111 : vector<16x16x8xf32> to vector<256x8xf32>
    %c3_48 = arith.constant 3 : index
    %c0_49 = arith.constant 0 : index
    %c0_50 = arith.constant 0 : index
    %113 = vector.load %arg5[%c3_48, %c0_49, %c0_50] : memref<4x8x32xf32, #tpu.memory_space<vmem>>, vector<1x8x32xf32>
    %114 = vector.shape_cast %113 : vector<1x8x32xf32> to vector<8x32xf32>
    %cst_51 = arith.constant dense<0.000000e+00> : vector<256x32xf32>
    %115 = tpu.matmul %112, %114, %cst_51 {dimension_numbers = #tpu.dot_dimension_numbers<[1], [0], [0], [1], [0, 0, 1, 1], [], []>} : vector<256x8xf32>, vector<8x32xf32>, vector<256x32xf32> -> vector<256x32xf32>
    %116 = arith.addf %89, %115 : vector<256x32xf32>
    %c0_52 = arith.constant 0 : index
    %c0_53 = arith.constant 0 : index
    %117 = vector.load %arg6[%c0_52, %c0_53] : memref<1x32xf32, #tpu.memory_space<vmem>>, vector<1x32xf32>
    %118 = vector.broadcast %117 : vector<1x32xf32> to vector<256x32xf32>
    %119 = arith.addf %116, %118 : vector<256x32xf32>
    %120 = vector.shape_cast %119 : vector<256x32xf32> to vector<16x16x32xf32>
    %c0_54 = arith.constant 0 : index
    %c0_55 = arith.constant 0 : index
    %c0_56 = arith.constant 0 : index
    %121 = vector.load %arg7[%c0_54, %c0_55, %c0_56] : memref<16x16x32xf32, #tpu.memory_space<vmem>>, vector<16x16x32xf32>
    tpu.vector_store %arg7[%c0_54, %c0_55, %c0_56], %120 {strides = array<i32>} : memref<16x16x32xf32, #tpu.memory_space<vmem>>, vector<16x16x32xf32>,
    return
  }
  func.func @transform_0(%arg0: i32) -> (i32, i32, i32) {
    %c0_i32 = arith.constant 0 : i32
    %c0_i32_0 = arith.constant 0 : i32
    %c0_i32_1 = arith.constant 0 : i32
    return %arg0, %c0_i32, %c0_i32_0 : i32, i32, i32
  }
  func.func @transform_1(%arg0: i32) -> (i32, i32) {
    %c0_i32 = arith.constant 0 : i32
    %c0_i32_0 = arith.constant 0 : i32
    %c0_i32_1 = arith.constant 0 : i32
    return %c0_i32, %c0_i32_0 : i32, i32
  }
  func.func @transform_2(%arg0: i32) -> (i32, i32) {
    %c0_i32 = arith.constant 0 : i32
    %c0_i32_0 = arith.constant 0 : i32
    %c0_i32_1 = arith.constant 0 : i32
    return %c0_i32, %c0_i32_0 : i32, i32
  }
  func.func @transform_3(%arg0: i32) -> (i32, i32, i32) {
    %c0_i32 = arith.constant 0 : i32
    %c0_i32_0 = arith.constant 0 : i32
    %c0_i32_1 = arith.constant 0 : i32
    %c0_i32_2 = arith.constant 0 : i32
    return %c0_i32, %c0_i32_0, %c0_i32_1 : i32, i32, i32
  }
  func.func @transform_4(%arg0: i32) -> (i32, i32, i32) {
    %c0_i32 = arith.constant 0 : i32
    %c0_i32_0 = arith.constant 0 : i32
    %c0_i32_1 = arith.constant 0 : i32
    %c0_i32_2 = arith.constant 0 : i32
    return %c0_i32, %c0_i32_0, %c0_i32_1 : i32, i32, i32
  }
  func.func @transform_5(%arg0: i32) -> (i32, i32) {
    %c0_i32 = arith.constant 0 : i32
    %c0_i32_0 = arith.constant 0 : i32
    %c0_i32_1 = arith.constant 0 : i32
    return %c0_i32, %c0_i32_0 : i32, i32
  }
  func.func @transform_6(%arg0: i32) -> (i32, i32, i32) {
    %c0_i32 = arith.constant 0 : i32
    %c0_i32_0 = arith.constant 0 : i32
    %c0_i32_1 = arith.constant 0 : i32
    return %arg0, %c0_i32, %c0_i32_0 : i32, i32, i32
  }
}

</mosaic_0001>

<bundles_post_ra>
// kernel: tpu_custom_call.1
= control target key start
LH: loop header
LB: loop body
LE: loop exit
PB: predicated region body
PF: predicated region fallthrough
CT: control target
= control target key end

     0   :  { %11 = vsyncpa [#allocation3], 0  ;;  %s23499_s0 = inlined_call_operand.hbm [shape: f32[32,16,32], index: 0, kind: input, shape index: {}]   ;;  %s23500_s1 = inlined_call_operand.hbm [shape: f32[32,96], index: 1, kind: input, shape index: {}]   ;;  %s23501_s2 = inlined_call_operand.vmem [shape: f32[1,96], index: 2, kind: input, shape index: {}]   ;;  %s23502_s3 = inlined_call_operand.hbm [shape: f32[4,16,16], index: 3, kind: input, shape index: {}]   ;;  %s23503_s4 = inlined_call_operand.hbm [shape: f32[4,8,32], index: 4, kind: input, shape index: {}]   ;;  %s23504_s5 = inlined_call_operand.vmem [shape: f32[1,32], index: 5, kind: input, shape index: {}]   ;;  %s23505_s6 = inlined_call_operand.hbm [shape: f32[32,16,32], index: 6, kind: output, shape index: {}]  }
   0x1   :  { %13 = vsyncpa [#allocation3 + $0x1], 0 }
   0x2   :  { %14 = vsyncpa [#allocation6], 0 }
   0x3   :  { %15 = vsyncpa [#allocation9], 0 }
   0x4   :  { %16 = vsyncpa [#allocation4], 0 }
   0x5   :  { %18 = vsyncpa [#allocation4 + $0x1], 0  ;;  %s19709_s21 = smov 0   ;;  %s19711_s22 = smov 0  }
   0x6   :  { %s19713_s23 = smov 0   ;;  %s19715_s24 = smov 0  }
   0x7 LB: > { %s19730_s25 = sadd.s32 4294967295, %s19652_s24   ;;  %s15070_s26 = sadd.s32 4294967294, %s19652_s24   ;;  %s19652_s24 = sphi %s19715_s24, %s23956_s24   ;;  %s19648_s23 = sphi %s19713_s23, %s23955_s23   ;;  %s19644_s22 = sphi %s19711_s22, %s23954_s22   ;;  %s19640_s21 = sphi %s19709_s21, %s23953_s21  }
   0x8   : > { %p44_p0 = scmp.ne.s32.totalorder %s19644_s22, %s19640_s21  ;;  %p23506_p1 = scmp.eq.s32.totalorder %s19730_s25, 0 }
   0x9   : > { %p179_p3 = scmp.eq.s32.totalorder %s15070_s26, 1  ;;  %p15071_p5 = scmp.ge.s32.totalorder %s19652_s24, 1 }
   0xa   : > { %p19739_p4 = por %p23506_p1, %p44_p0  ;;  %p186_p7 = scmp.lt.s32.totalorder %s19652_s24, 3 }
   0xb   : > { %p19744_p6 = por %p179_p3, %p44_p0  ;;  %s19654_s30 = smov [#allocation5]  }
   0xc   : > { %s23633_s27 = scalar_select %p19739_p4, 1, 0 }
   0xd   : > { %s23634_s28 = scalar_select %p19744_p6, 1, 0 }
   0xe   : > { %p19749_p8 = pnand %p15071_p5, %p186_p7  ;;  %s198_s7 = sshll.u32 %s19654_s30, 4  ;;  %s19753_s7 = int_to_ptr.vmem [resolvable:$true] %s198_s7 }
   0xf   : > { %s19655_s9 = smov [#allocation7]   ;;  %s19656_s11 = smov [#allocation8]  }
  0x10   : > { %s23635_s29 = scalar_select %p19749_p8, 1, 0 }
  0x11   : > { %p18236_p9 = pneg %p19749_p8  ;;  %s214_s10 = sshll.u32 %s19655_s9, 4  ;;  %s19764_s10 = int_to_ptr.vmem [resolvable:$true] %s214_s10 }
  0x12   : > { %s19766_s12 = sshll.u32 %s19656_s11, 4  ;;  %s19464_s15 = scalar_lea.hbm %s23500_s1, 512  ;;  %s228_s12 = int_to_ptr.vmem [resolvable:$true] %s19766_s12 }
  0x13   : > { %p19760_p11 = pnand %p18236_p9, %p23506_p1  ;;  %p19465_p12 = scmp.ne.s32.totalorder %s23500_s1, %s19464_s15 }
  0x14   : > { %p19471_p5 = scmp.lt.u32.totalorder %s19464_s15, %s23500_s1 }
  0x15   : > { %p19776_p13 = pneg %p19760_p11 }
  0x17   : > { %p19467_p0 = pnand %p19776_p13, %p19465_p12 }
  0x19   : > { %p19468_p3 = pneg %p19467_p0 }
  0x1b   : > { %p19473_p7 = pnand %p19471_p5, %p19468_p3 }
  0x1d   : > { %19476 = shalt.err (!%p19473_p7)
}
  0x1e   : > { %s19477_s26 = scalar_lea.vmem %s19753_s7, 512  ;;  %p19485_p2 = scmp.lt.s32.totalorder %s19753_s7, %s19753_s7 }
  0x1f   : > { %p19478_p9 = scmp.ne.s32.totalorder %s19753_s7, %s19477_s26  ;;  %p19486_p6 = scmp.lt.s32.totalorder %s19477_s26, %s19477_s26 }
  0x21   : > { %p19480_p10 = pnand %p19478_p9, %p19776_p13  ;;  %p19487_p12 = por %p19486_p6, %p19485_p2 }
  0x23   : > { %p19481_p1 = pneg %p19480_p10 }
  0x25   : > { %p19488_p0 = pnand %p19487_p12, %p19481_p1 }
  0x27   : > { %19491 = shalt.err (!%p19488_p0)
}
  0x28   : > { %s19657_s30 = smov 128   ;;  %s19658_s9 = smov 8  }
  0x29   : > { %18239 = dma.hbm_to_vmem [thread:$0]  (!%p19760_p11), %s23500_s1, 512, %s19753_s7, [#allocation6], %s19657_s30, %s19657_s30, %s19658_s9  }
  0x2a   : > { %s19492_s16 = scalar_lea.hbm %s23502_s3, 1024 }
  0x2b   : > { %p19493_p1 = scmp.ne.s32.totalorder %s23502_s3, %s19492_s16  ;;  %p19499_p10 = scmp.lt.u32.totalorder %s19492_s16, %s23502_s3 }
  0x2d   : > { %p19495_p2 = pnand %p19493_p1, %p19776_p13 }
  0x2f   : > { %p19496_p6 = pneg %p19495_p2 }
  0x31   : > { %p19501_p3 = pnand %p19499_p10, %p19496_p6 }
  0x33   : > { %19504 = shalt.err (!%p19501_p3)
}
  0x34   : > { %s19505_s7 = scalar_lea.vmem %s19764_s10, 1024  ;;  %p19513_p12 = scmp.lt.s32.totalorder %s19764_s10, %s19764_s10 }
  0x35   : > { %p19506_p5 = scmp.ne.s32.totalorder %s19764_s10, %s19505_s7  ;;  %p19514_p0 = scmp.lt.s32.totalorder %s19505_s7, %s19505_s7 }
  0x37   : > { %p19508_p7 = pnand %p19506_p5, %p19776_p13  ;;  %p19515_p1 = por %p19514_p0, %p19513_p12 }
  0x39   : > { %p19509_p9 = pneg %p19508_p7 }
  0x3b   : > { %p19516_p2 = pnand %p19515_p1, %p19509_p9 }
  0x3d   : > { %19519 = shalt.err (!%p19516_p2)
}
  0x3e   : > { %18242 = dma.hbm_to_vmem [thread:$0]  (!%p19760_p11), %s23502_s3, 1024, %s19764_s10, [#allocation6], %s19657_s30, %s19657_s30, %s19658_s9  }
  0x3f   : > { %s19520_s16 = scalar_lea.hbm %s23503_s4, 512 }
  0x40   : > { %p19521_p6 = scmp.ne.s32.totalorder %s23503_s4, %s19520_s16  ;;  %p19527_p5 = scmp.lt.u32.totalorder %s19520_s16, %s23503_s4 }
  0x42   : > { %p19523_p10 = pnand %p19521_p6, %p19776_p13 }
  0x44   : > { %p19524_p3 = pneg %p19523_p10 }
  0x46   : > { %p19529_p7 = pnand %p19527_p5, %p19524_p3 }
  0x48   : > { %19532 = shalt.err (!%p19529_p7)
}
  0x49   : > { %s19533_s7 = scalar_lea.vmem %s228_s12, 512  ;;  %p19541_p1 = scmp.lt.s32.totalorder %s228_s12, %s228_s12 }
  0x4a   : > { %p19534_p9 = scmp.ne.s32.totalorder %s228_s12, %s19533_s7  ;;  %p19542_p2 = scmp.lt.s32.totalorder %s19533_s7, %s19533_s7 }
  0x4c   : > { %p19536_p12 = pnand %p19534_p9, %p19776_p13  ;;  %p19543_p4 = por %p19542_p2, %p19541_p1 }
  0x4e   : > { %p19537_p0 = pneg %p19536_p12 }
  0x50   : > { %p19544_p8 = pnand %p19543_p4, %p19537_p0 }
  0x52   : > { %19547 = shalt.err (!%p19544_p8)
}
  0x53   : > { %18245 = dma.hbm_to_vmem [thread:$0]  (!%p19760_p11), %s23503_s4, 512, %s228_s12, [#allocation9], %s19657_s30, %s19657_s30, %s19658_s9  }
  0x54   : > { %s19849_s18 = sadd.s32 1, %s19652_s24   ;;  %s31_s13 = sadd.s32 1, %s19648_s23 }
  0x55   : > { %s28_s8 = ssub.s32 %s19652_s24, %s19849_s18  ;;  %p38_p8 = scmp.ne.s32.totalorder %s19648_s23, %s19644_s22 }
  0x56   : > { %p29_p4 = scmp.eq.s32.totalorder %s28_s8, 0  ;;  %p39_p13 = scmp.eq.s32.totalorder %s19652_s24, 0 }
  0x57   : > { %p18257_p6 = scmp.lt.s32.totalorder %s19652_s24, 2  ;;  %p23638_p3 = scmp.eq.s32.totalorder %s19730_s25, 1 }
  0x58   : > { %s19859_s14 = scalar_select %p29_p4, %s19648_s23, %s31_s13  }
  0x59   : > { %p40_p10 = por %p39_p13, %p38_p8  ;;  %p19863_p5 = por %p23638_p3, %p38_p8 }
  0x5a   : > { %s244_s16 = sand.u32 1, %s19648_s23   ;;  %s15639_s17 = sshll.u32 %s19652_s24, 12 }
  0x5b   : > { %s15076_s12 = sshll.u32 %s244_s16, 8  ;;  %s19872_s26 = scalar_lea.hbm %s23499_s0, %s15639_s17 }
  0x5c   : > { %s248_s7 = scalar_lea.vmem [#allocation2], %s15076_s12  ;;  %p19874_p11 = pnand %p18257_p6, %p40_p10 }
  0x5d   : > { %s256_s10 = sshll.u32 %s248_s7, 4  ;;  %s19880_s8 = scalar_lea.sflag [#allocation3], %s244_s16  ;;  %s19878_s10 = int_to_ptr.vmem [resolvable:$true] %s256_s10 }
  0x5e   : > { %s19548_s13 = scalar_lea.hbm %s19872_s26, 4096  ;;  %p19550_p9 = pneg %p19874_p11 }
  0x5f   : > { %p19549_p7 = scmp.ne.s32.totalorder %s19872_s26, %s19548_s13  ;;  %s19553_s19 = scalar_lea.hbm %s23499_s0, 8192 }
  0x60   : > { %p19554_p1 = scmp.lt.u32.totalorder %s19872_s26, %s23499_s0  ;;  %p19555_p2 = scmp.lt.u32.totalorder %s19553_s19, %s19548_s13 }
  0x61   : > { %p19551_p12 = pnand %p19550_p9, %p19549_p7  ;;  %p19557_p8 = scmp.lt.u32.totalorder %s19548_s13, %s19872_s26 }
  0x62   : > { %p19556_p4 = por %p19555_p2, %p19554_p1 }
  0x63   : > { %p19552_p0 = pneg %p19551_p12 }
  0x64   : > { %p19558_p13 = por %p19557_p8, %p19556_p4 }
  0x66   : > { %p19559_p6 = pnand %p19558_p13, %p19552_p0 }
  0x68   : > { %19562 = shalt.err (!%p19559_p6)
}
  0x69   : > { %s19563_s16 = scalar_lea.vmem %s19878_s10, 4096  ;;  %s19659_s17 = smov [#allocation2]  }
  0x6a   : > { %p19564_p10 = scmp.ne.s32.totalorder %s19878_s10, %s19563_s16  ;;  %s19568_s12 = sshll.u32 %s19659_s17, 4  ;;  %s19569_s12 = int_to_ptr.vmem [resolvable:$false] %s19568_s12 }
  0x6b   : > { %s19570_s20 = scalar_lea.vmem %s19569_s12, 8192  ;;  %p19571_p12 = scmp.lt.s32.totalorder %s19878_s10, %s19569_s12 }
  0x6c   : > { %p19566_p3 = pnand %p19564_p10, %p19550_p9  ;;  %p19572_p1 = scmp.lt.s32.totalorder %s19570_s20, %s19563_s16 }
  0x6e   : > { %p19567_p7 = pneg %p19566_p3  ;;  %p19573_p2 = por %p19572_p1, %p19571_p12 }
  0x70   : > { %p19574_p4 = pnand %p19573_p2, %p19567_p7 }
  0x72   : > { %19577 = shalt.err (!%p19574_p4)
}
  0x73   : > { %18249 = dma.hbm_to_vmem [thread:$0]  (!%p19874_p11), %s19872_s26, 4096, %s19878_s10, %s19880_s8, %s19657_s30, %s19657_s30, %s19658_s9  }
  0x74   : > { %p23641_p9 = scmp.ne.s32.totalorder %s23635_s29, 0 }
  0x76   : > { %268 = sbr.rel (%p23641_p9) target bundleno = 3992 (0xf98), region = 44 }
  0x7d   : > { %s19914_s13 = sand.u32 1, %s19644_s22   ;;  %p23642_p0 = scmp.ne.s32.totalorder %s23633_s27, 0 }
  0x7e   : > { %s15081_s19 = sshll.u32 %s19914_s13, 8  ;;  %s271_s7 = scalar_lea.sflag [#allocation3], %s19914_s13 }
  0x7f   : > { %s19920_s11 = scalar_lea.vmem [#allocation2], %s15081_s19 }
  0x80   : > { %19623 = dma.done.wait (%p23642_p0), %s271_s7, 4096  }
  0x81   : > { %19625 = vsyncadd (%p23642_p0), %s271_s7, 4294963200  ;;  %p23643_p11 = scmp.eq.s32.totalorder %s19730_s25, 0 }
  0x83   : > { %19627 = dma.done.wait (%p23643_p11), [#allocation6], 1536   ;;  %p23644_p8 = pmov %p23643_p11 }
  0x85   : > { %19629 = vsyncadd (%p23644_p8), [#allocation6], 4294965760  ;;  %p23645_p13 = pmov %p23644_p8 }
  0x86   : > { %p23646_p6 = pmov %p23644_p8 }
  0x87   : > { %19631 = dma.done.wait (%p23645_p13), [#allocation9], 512  }
  0x88   : > { %19633 = vsyncadd (%p23646_p6), [#allocation9], 4294966784  ;;  %vm360_vm0 = vcmask 261120   ;;  %v349_v0 = vld [vmem:[#allocation5] sm:$0xff]  ;;  %v350_v1 = vld [vmem:[#allocation5 + $0x8] sm:$0xff]  ;;  %vm722_vm1 = vcmask 64512  }
  0x89   : > { %v351_v2 = vld [vmem:[#allocation5 + $0x10] sm:$0xff]  ;;  %v17474_v3 = vpack.c.bf16 %v350_v1, %v349_v0  ;;  %v352_v4 = vld [vmem:[#allocation5 + $0x18] sm:$0xff]  ;;  %v317_v5 = vld [vmem:[%s19920_s11] sm:$0xff]  ;;  %s19660_s30 = smov 96   ;;  %s19661_s9 = smov 64   ;;  %vm2173_vm3 = vcmask 130048  }
  0x8a   : > { %v17478_v6 = vpack.c.bf16 %v352_v4, %v351_v2  ;;  %16330 = vmatprep.mubr.msk.f32.mxu0 %vm360_vm0, %v317_v5  ;;  %v318_v7 = vld [vmem:[%s19920_s11 + $0x8] sm:$0xff]  ;;  %v319_v8 = vld [vmem:[%s19920_s11 + $0x10] sm:$0xff]  ;;  %v320_v9 = vld [vmem:[%s19920_s11 + $0x18] sm:$0xff]  ;;  %s19662_s26 = smov 88   ;;  %s19663_s10 = smov 120  }
  0x8b   : > { %17475 = vmatprep.subr.bf16.mxu0 %v17474_v3  ;;  %v321_v10 = vld [vmem:[%s19920_s11 + $0x20] sm:$0xff]  ;;  %v322_v11 = vld [vmem:[%s19920_s11 + $0x28] sm:$0xff]  ;;  %v323_v12 = vld [vmem:[%s19920_s11 + $0x30] sm:$0xff]  ;;  %s19664_s8 = smov 56   ;;  %s19665_s16 = smov 80  }
  0x8c   : > { %17477 = vmatpush3.bf16.msra.mxu0 %v17474_v3  ;;  %v324_v13 = vld [vmem:[%s19920_s11 + $0x38] sm:$0xff]  ;;  %v325_v14 = vld [vmem:[%s19920_s11 + $0x40] sm:$0xff]  ;;  %v326_v15 = vld [vmem:[%s19920_s11 + $0x48] sm:$0xff]  ;;  %s19666_s17 = smov 112   ;;  %s19667_s12 = smov 48  }
  0x8d   : > { %17479 = vmatprep.subr.bf16.mxu0 %v17478_v6  ;;  %v327_v16 = vld [vmem:[%s19920_s11 + $0x50] sm:$0xff]  ;;  %v328_v17 = vld [vmem:[%s19920_s11 + $0x58] sm:$0xff]  ;;  %v329_v18 = vld [vmem:[%s19920_s11 + $0x60] sm:$0xff]  ;;  %s19668_s20 = smov 72   ;;  %s19669_s7 = smov 104  }
  0x8e   : > { %v330_v19 = vld [vmem:[%s19920_s11 + $0x68] sm:$0xff]  ;;  %v331_v20 = vld [vmem:[%s19920_s11 + $0x70] sm:$0xff]  ;;  %v332_v21 = vld [vmem:[%s19920_s11 + $0x78] sm:$0xff] }
  0x8f   : > { %v333_v22 = vld [vmem:[%s19920_s11 + $0x80] sm:$0xff]  ;;  %v334_v23 = vld [vmem:[%s19920_s11 + $0x88] sm:$0xff]  ;;  %v335_v24 = vld [vmem:[%s19920_s11 + $0x90] sm:$0xff] }
  0x90   : > { %17481 = vmatpush3.bf16.msra.mxu0 %v17478_v6  ;;  %v336_v25 = vld [vmem:[%s19920_s11 + $0x98] sm:$0xff]  ;;  %v337_v26 = vld [vmem:[%s19920_s11 + $0xa0] sm:$0xff]  ;;  %v338_v27 = vld [vmem:[%s19920_s11 + $0xa8] sm:$0xff] }
  0x91   : > { %v339_v28 = vld [vmem:[%s19920_s11 + $0xb0] sm:$0xff]  ;;  %v340_v29 = vld [vmem:[%s19920_s11 + $0xb8] sm:$0xff]  ;;  %v341_v30 = vld [vmem:[%s19920_s11 + $0xc0] sm:$0xff] }
  0x92   : > { %v342_v31 = vld [vmem:[%s19920_s11 + $0xc8] sm:$0xff]  ;;  %v343_v32 = vld [vmem:[%s19920_s11 + $0xd0] sm:$0xff]  ;;  %v344_v33 = vld [vmem:[%s19920_s11 + $0xd8] sm:$0xff] }
  0x93   : > { %16331 = vmatmul.mubr.msk.f32.vlgmr.msra.gmra.mrb[0].mxu0 %vm360_vm0, %v318_v7  ;;  %v345_v34 = vld [vmem:[%s19920_s11 + $0xe0] sm:$0xff]  ;;  %v346_v35 = vld [vmem:[%s19920_s11 + $0xe8] sm:$0xff]  ;;  %v347_v36 = vld [vmem:[%s19920_s11 + $0xf0] sm:$0xff] }
  0x94   : > { %16333 = vmatprep.mubr.msk.f32.mxu0 %vm360_vm0, %v319_v8  ;;  %v348_v37 = vld [vmem:[%s19920_s11 + $0xf8] sm:$0xff]  ;;  %v20001_v38 = vld [vmem:[%s23501_s2] ss:$0 sm:$0xff]  ;;  %vm20266_vm2 = vmpackc.low %vm722_vm1, %vm722_vm1  ;;  %s19670_s11 = smov 40  }
  0x97   : > { %16334 = vmatmul.mubr.msk.f32.gmra.mrb[2].mxu0 %vm360_vm0, %v320_v9 }
  0x98   : > { %16336 = vmatprep.mubr.msk.f32.mxu0 %vm360_vm0, %v321_v10 }
  0x9b   : > { %16337 = vmatmul.mubr.msk.f32.gmra.mrb[4].mxu0 %vm360_vm0, %v322_v11 }
  0x9c   : > { %16339 = vmatprep.mubr.msk.f32.mxu0 %vm360_vm0, %v323_v12 }
  0x9f   : > { %16340 = vmatmul.mubr.msk.f32.gmra.mrb[6].mxu0 %vm360_vm0, %v324_v13 }
  0xa0   : > { %16342 = vmatprep.mubr.msk.f32.mxu0 %vm360_vm0, %v325_v14 }
  0xa3   : > { %16343 = vmatmul.mubr.msk.f32.gmra.mrb[8].mxu0 %vm360_vm0, %v326_v15 }
  0xa4   : > { %16345 = vmatprep.mubr.msk.f32.mxu0 %vm360_vm0, %v327_v16 }
  0xa7   : > { %16346 = vmatmul.mubr.msk.f32.gmra.mrb[10].mxu0 %vm360_vm0, %v328_v17 }
  0xa8   : > { %16348 = vmatprep.mubr.msk.f32.mxu0 %vm360_vm0, %v329_v18 }
  0xab   : > { %16349 = vmatmul.mubr.msk.f32.gmra.mrb[12].mxu0 %vm360_vm0, %v330_v19 }
  0xac   : > { %16351 = vmatprep.mubr.msk.f32.mxu0 %vm360_vm0, %v331_v20 }
  0xaf   : > { %16352 = vmatmul.mubr.msk.f32.gmra.mrb[14].mxu0 %vm360_vm0, %v332_v21 }
  0xb0   : > { %16354 = vmatprep.mubr.msk.f32.mxu0 %vm360_vm0, %v333_v22 }
  0xb3   : > { %16355 = vmatmul.mubr.msk.f32.gmra.mrb[16].mxu0 %vm360_vm0, %v334_v23 }
  0xb4   : > { %16357 = vmatprep.mubr.msk.f32.mxu0 %vm360_vm0, %v335_v24 }
  0xb7   : > { %16358 = vmatmul.mubr.msk.f32.gmra.mrb[18].mxu0 %vm360_vm0, %v336_v25 }
  0xb8   : > { %16360 = vmatprep.mubr.msk.f32.mxu0 %vm360_vm0, %v337_v26 }
  0xbb   : > { %16361 = vmatmul.mubr.msk.f32.gmra.mrb[20].mxu0 %vm360_vm0, %v338_v27 }
  0xbc   : > { %16363 = vmatprep.mubr.msk.f32.mxu0 %vm360_vm0, %v339_v28 }
  0xbf   : > { %16364 = vmatmul.mubr.msk.f32.gmra.mrb[22].mxu0 %vm360_vm0, %v340_v29 }
  0xc0   : > { %16366 = vmatprep.mubr.msk.f32.mxu0 %vm360_vm0, %v341_v30 }
  0xc3   : > { %16367 = vmatmul.mubr.msk.f32.gmra.mrb[24].mxu0 %vm360_vm0, %v342_v31 }
  0xc4   : > { %16369 = vmatprep.mubr.msk.f32.mxu0 %vm360_vm0, %v343_v32 }
  0xc7   : > { %16370 = vmatmul.mubr.msk.f32.gmra.mrb[26].mxu0 %vm360_vm0, %v344_v33 }
  0xc8   : > { %16372 = vmatprep.mubr.msk.f32.mxu0 %vm360_vm0, %v345_v34 }
  0xcb   : > { %16373 = vmatmul.mubr.msk.f32.gmra.mrb[28].mxu0 %vm360_vm0, %v346_v35 }
  0xcc   : > { %16375 = vmatprep.mubr.msk.f32.mxu0 %vm360_vm0, %v347_v36 }
  0xcf   : > { %16376 = vmatmul.mubr.msk.f32.gmra.mrb[30].mxu0 %vm360_vm0, %v348_v37 }
 0x166   : > { %v16332_v39 = vpop.f32.mrb[0].mxu0 }
 0x167   : > { %v20004_v40 = vadd.f32 %v16332_v39, %v20001_v38  ;;  %v523_v41 = vpop.f32.mrb[1].mxu0 }
 0x168   : > { %v524_v42 = vadd.f32 %v20001_v38, %v523_v41 }
 0x16a   : > { %v16335_v43 = vpop.f32.mrb[2].mxu0  ;;  %v20008_v44 = vpack.i.bf16 %v20004_v40, %v524_v42  ;;  %v20010_v45 = vmul.f32 0.35355338, %v524_v42 }
 0x16b   : > { %v20013_v46 = vadd.f32 %v16335_v43, %v20001_v38  ;;  %v533_v47 = vpop.f32.mrb[3].mxu0 }
 0x16c   : > { %23647 = vst [vmem:[#allocation15_spill] sm:$0xff] %v20008_v44  ;;  %23648 = vst [vmem:[#allocation16_spill] sm:$0xff] %v20010_v45  ;;  %v20016_v48 = vadd.f32 %v20001_v38, %v533_v47  ;;  %18313 = vrot.lane.b32.xlu0 %v20008_v44, %s19660_s30  ;;  %16382 = vmatprep.mubr.msk.f32.mxu1 %vm722_vm1, %v20010_v45 }
 0x16e   : > { %v16338_v49 = vpop.f32.mrb[4].mxu0  ;;  %v20024_v50 = vpack.i.bf16 %v20013_v46, %v20016_v48 }
 0x16f   : > { %v20027_v51 = vadd.f32 %v16338_v49, %v20001_v38  ;;  %v543_v52 = vpop.f32.mrb[5].mxu0 }
 0x170   : > { %23649 = vst [vmem:[#allocation17_spill] sm:$0xff] %v20024_v50  ;;  %v20030_v53 = vadd.f32 %v20001_v38, %v543_v52  ;;  %18318 = vrot.lane.b32.xlu0 %v20024_v50, %s19660_s30 }
 0x172   : > { %v16341_v54 = vpop.f32.mrb[6].mxu0  ;;  %v20036_v55 = vpack.i.bf16 %v20027_v51, %v20030_v53 }
 0x173   : > { %v20039_v56 = vadd.f32 %v16341_v54, %v20001_v38  ;;  %v553_v57 = vpop.f32.mrb[7].mxu0 }
 0x174   : > { %23650 = vst [vmem:[#allocation18_spill] sm:$0xff] %v20036_v55  ;;  %v20042_v58 = vadd.f32 %v20001_v38, %v553_v57  ;;  %18323 = vrot.lane.b32.xlu1 %v20036_v55, %s19660_s30 }
 0x176   : > { %v16344_v59 = vpop.f32.mrb[8].mxu0  ;;  %v20048_v60 = vpack.i.bf16 %v20039_v56, %v20042_v58 }
 0x177   : > { %v20051_v61 = vadd.f32 %v16344_v59, %v20001_v38  ;;  %v563_v62 = vpop.f32.mrb[9].mxu0 }
 0x178   : > { %23651 = vst [vmem:[#allocation19_spill] sm:$0xff] %v20048_v60  ;;  %v20054_v63 = vadd.f32 %v20001_v38, %v563_v62  ;;  %18328 = vrot.lane.b32.xlu1 %v20048_v60, %s19660_s30 }
 0x17a   : > { %v16347_v0 = vpop.f32.mrb[10].mxu0  ;;  %v20060_v1 = vpack.i.bf16 %v20051_v61, %v20054_v63 }
 0x17b   : > { %v20063_v2 = vadd.f32 %v16347_v0, %v20001_v38  ;;  %v573_v3 = vpop.f32.mrb[11].mxu0 }
 0x17c   : > { %23652 = vst [vmem:[#allocation20_spill] sm:$0xff] %v20060_v1  ;;  %v20066_v4 = vadd.f32 %v20001_v38, %v573_v3  ;;  %18333 = vrot.lane.b32.xlu0 %v20060_v1, %s19660_s30 }
 0x17e   : > { %v16350_v5 = vpop.f32.mrb[12].mxu0  ;;  %v20072_v6 = vpack.i.bf16 %v20063_v2, %v20066_v4 }
 0x17f   : > { %v20075_v7 = vadd.f32 %v16350_v5, %v20001_v38  ;;  %v583_v8 = vpop.f32.mrb[13].mxu0 }
 0x180   : > { %23653 = vst [vmem:[#allocation21_spill] sm:$0xff] %v20072_v6  ;;  %v20078_v9 = vadd.f32 %v20001_v38, %v583_v8  ;;  %18338 = vrot.lane.b32.xlu1 %v20072_v6, %s19660_s30 }
 0x182   : > { %v16353_v10 = vpop.f32.mrb[14].mxu0  ;;  %v20084_v11 = vpack.i.bf16 %v20075_v7, %v20078_v9 }
 0x183   : > { %v20087_v12 = vadd.f32 %v16353_v10, %v20001_v38  ;;  %v593_v13 = vpop.f32.mrb[15].mxu0 }
 0x184   : > { %v20090_v14 = vadd.f32 %v20001_v38, %v593_v13  ;;  %18343 = vrot.lane.b32.xlu0 %v20084_v11, %s19660_s30 }
 0x186   : > { %v16356_v15 = vpop.f32.mrb[16].mxu0  ;;  %v20096_v16 = vpack.i.bf16 %v20087_v12, %v20090_v14 }
 0x187   : > { %v20099_v17 = vadd.f32 %v16356_v15, %v20001_v38  ;;  %v603_v18 = vpop.f32.mrb[17].mxu0 }
 0x188   : > { %23654 = vst [vmem:[#allocation22_spill] sm:$0xff] %v20096_v16  ;;  %v604_v19 = vadd.f32 %v20001_v38, %v603_v18  ;;  %18348 = vrot.lane.b32.xlu1 %v20096_v16, %s19660_s30 }
 0x18a   : > { %v16359_v20 = vpop.f32.mrb[18].mxu0  ;;  %v20104_v21 = vmul.f32 0.35355338, %v604_v19  ;;  %v20107_v22 = vpack.i.bf16 %v20099_v17, %v604_v19  ;;  %v20231_v19 = vmul.f32 0.35355338, %v20016_v48 }
 0x18b   : > { %v20110_v23 = vadd.f32 %v16359_v20, %v20001_v38  ;;  %v613_v24 = vpop.f32.mrb[19].mxu0  ;;  %v20249_v48 = vmul.f32 0.35355338, %v20042_v58  ;;  %v20260_v20 = vmul.f32 0.35355338, %v20013_v46  ;;  %v23669_v58 = vmov 0 }
 0x18c   : > { %23655 = vst [vmem:[#allocation23_spill] sm:$0xff] %v20104_v21  ;;  %23656 = vst [vmem:[#allocation24_spill] sm:$0xff] %v20107_v22  ;;  %16438 = vmatprep.mubr.msk.f32.mxu0 %vm722_vm1, %v20104_v21  ;;  %18353 = vrot.lane.b32.xlu0 %v20107_v22, %s19660_s30  ;;  %v20117_v25 = vadd.f32 %v20001_v38, %v613_v24  ;;  %v23670_v58 = vsel %vm20266_vm2, 4294967295, %v23669_v58 }
 0x18d   : > { %23665 = vst [vmem:[#allocation33_spill] sm:$0xff] %v20231_v19  ;;  %23667 = vst [vmem:[#allocation35_spill] sm:$0xff] %v20249_v48 }
 0x18e   : > { %v16362_v26 = vpop.f32.mrb[20].mxu0  ;;  %v20121_v27 = vpack.i.bf16 %v20110_v23, %v20117_v25  ;;  %23668 = vst [vmem:[#allocation36_spill] sm:$0xff] %v20260_v20  ;;  %23671 = vst [vmem:[#allocation37_spill] sm:$0xff] %v23670_v58 }
 0x18f   : > { %v20124_v28 = vadd.f32 %v16362_v26, %v20001_v38  ;;  %v623_v29 = vpop.f32.mrb[21].mxu0 }
 0x190   : > { %23657 = vst [vmem:[#allocation25_spill] sm:$0xff] %v20121_v27  ;;  %v20127_v30 = vadd.f32 %v20001_v38, %v623_v29  ;;  %18358 = vrot.lane.b32.xlu1 %v20121_v27, %s19660_s30 }
 0x192   : > { %v16365_v31 = vpop.f32.mrb[22].mxu0  ;;  %v20133_v32 = vpack.i.bf16 %v20124_v28, %v20127_v30 }
 0x193   : > { %v20136_v33 = vadd.f32 %v16365_v31, %v20001_v38  ;;  %v633_v34 = vpop.f32.mrb[23].mxu0 }
 0x194   : > { %23658 = vst [vmem:[#allocation26_spill] sm:$0xff] %v20133_v32  ;;  %18363 = vrot.lane.b32.xlu0 %v20133_v32, %s19660_s30  ;;  %v20141_v35 = vadd.f32 %v20001_v38, %v633_v34  ;;  %v20271_v34 = vmul.f32 0.35355338, %v20030_v53 }
 0x196   : > { %v16368_v36 = vpop.f32.mrb[24].mxu0  ;;  %v20145_v37 = vpack.i.bf16 %v20136_v33, %v20141_v35  ;;  %23672 = vst [vmem:[#allocation38_spill] sm:$0xff] %v20271_v34 }
 0x197   : > { %v20148_v39 = vadd.f32 %v16368_v36, %v20001_v38  ;;  %v643_v41 = vpop.f32.mrb[25].mxu0 }
 0x198   : > { %23659 = vst [vmem:[#allocation27_spill] sm:$0xff] %v20145_v37  ;;  %v20151_v42 = vadd.f32 %v20001_v38, %v643_v41  ;;  %18368 = vrot.lane.b32.xlu1 %v20145_v37, %s19660_s30 }
 0x19a   : > { %v16371_v43 = vpop.f32.mrb[26].mxu0  ;;  %v20157_v47 = vpack.i.bf16 %v20148_v39, %v20151_v42 }
 0x19b   : > { %v20160_v49 = vadd.f32 %v16371_v43, %v20001_v38  ;;  %v653_v52 = vpop.f32.mrb[27].mxu0 }
 0x19c   : > { %23660 = vst [vmem:[#allocation28_spill] sm:$0xff] %v20157_v47  ;;  %18373 = vrot.lane.b32.xlu0 %v20157_v47, %s19660_s30  ;;  %v20165_v54 = vadd.f32 %v20001_v38, %v653_v52 }
 0x19e   : > { %v16374_v57 = vpop.f32.mrb[28].mxu0  ;;  %v20169_v59 = vpack.i.bf16 %v20160_v49, %v20165_v54 }
 0x19f   : > { %v20172_v62 = vadd.f32 %v16374_v57, %v20001_v38  ;;  %v663_v0 = vpop.f32.mrb[29].mxu0 }
 0x1a0   : > { %23661 = vst [vmem:[#allocation29_spill] sm:$0xff] %v20169_v59  ;;  %v20175_v3 = vadd.f32 %v20001_v38, %v663_v0  ;;  %18378 = vrot.lane.b32.xlu1 %v20169_v59, %s19660_s30 }
 0x1a2   : > { %v16377_v5 = vpop.f32.mrb[30].mxu0  ;;  %v20181_v8 = vpack.i.bf16 %v20172_v62, %v20175_v3 }
 0x1a3   : > { %v20184_v10 = vadd.f32 %v16377_v5, %v20001_v38  ;;  %v673_v13 = vpop.f32.mrb[31].mxu0  ;;  %v20284_v5 = vmul.f32 0.35355338, %v20039_v56 }
 0x1a4   : > { %23662 = vst [vmem:[#allocation30_spill] sm:$0xff] %v20181_v8  ;;  %v20187_v15 = vadd.f32 %v20001_v38, %v673_v13  ;;  %18383 = vrot.lane.b32.xlu0 %v20181_v8, %s19660_s30  ;;  %v20224_v38 = vmul.f32 0.35355338, %v20004_v40  ;;  %v20242_v40 = vmul.f32 0.35355338, %v20027_v51 }
 0x1a5   : > { %23673 = vst [vmem:[#allocation39_spill] sm:$0xff] %v20284_v5 }
 0x1a6   : > { %v20193_v18 = vpack.i.bf16 %v20184_v10, %v20187_v15  ;;  %23664 = vst [vmem:[#allocation32_spill] sm:$0xff] %v20224_v38  ;;  %23666 = vst [vmem:[#allocation34_spill] sm:$0xff] %v20242_v40 }
 0x1a8   : > { %23663 = vst [vmem:[#allocation31_spill] sm:$0xff] %v20193_v18  ;;  %18388 = vrot.lane.b32.xlu1 %v20193_v18, %s19660_s30  ;;  %18403 = vrot.lane.b32.xlu0 %v20036_v55, %s19661_s9  ;;  %s23334_s30 = scalar_lea.vmem [#allocation10], %s15081_s19  ;;  %s15641_s19 = sshll.u32 %s19730_s25, 12 }
 0x1a9   : > { %s14954_s25 = scalar_lea.sflag [#allocation4], %s19914_s13 }
 0x1ac   : > { %18393 = vrot.lane.b32.xlu1 %v20008_v44, %s19661_s9  ;;  %18413 = vrot.lane.b32.xlu0 %v20060_v1, %s19661_s9 }
 0x1b0   : > { %18398 = vrot.lane.b32.xlu1 %v20024_v50, %s19661_s9  ;;  %18418 = vrot.lane.b32.xlu0 %v20072_v6, %s19661_s9 }
 0x1b4   : > { %18408 = vrot.lane.b32.xlu1 %v20048_v60, %s19661_s9  ;;  %18423 = vrot.lane.b32.xlu0 %v20084_v11, %s19661_s9 }
 0x1b8   : > { %18428 = vrot.lane.b32.xlu1 %v20096_v16, %s19661_s9  ;;  %18443 = vrot.lane.b32.xlu0 %v20133_v32, %s19661_s9 }
 0x1bc   : > { %18433 = vrot.lane.b32.xlu1 %v20107_v22, %s19661_s9  ;;  %18468 = vrot.lane.b32.xlu0 %v20008_v44, %s19662_s26 }
 0x1c0   : > { %18438 = vrot.lane.b32.xlu1 %v20121_v27, %s19661_s9  ;;  %18478 = vrot.lane.b32.xlu0 %v20036_v55, %s19662_s26 }
 0x1c4   : > { %18448 = vrot.lane.b32.xlu1 %v20145_v37, %s19661_s9  ;;  %3924 = vrot.lane.b32.xlu0 %v20224_v38, %s19663_s10 }
 0x1c8   : > { %18453 = vrot.lane.b32.xlu1 %v20157_v47, %s19661_s9  ;;  %4013 = vrot.lane.b32.xlu0 %v20231_v19, %s19663_s10 }
 0x1cc   : > { %18458 = vrot.lane.b32.xlu1 %v20169_v59, %s19661_s9  ;;  %18488 = vrot.lane.b32.xlu0 %v20060_v1, %s19662_s26 }
 0x1d0   : > { %18463 = vrot.lane.b32.xlu1 %v20181_v8, %s19661_s9  ;;  %4106 = vrot.lane.b32.xlu0 %v20242_v40, %s19663_s10 }
 0x1d4   : > { %18473 = vrot.lane.b32.xlu1 %v20024_v50, %s19662_s26  ;;  %4195 = vrot.lane.b32.xlu0 %v20249_v48, %s19663_s10 }
 0x1d8   : > { %3922 = vrot.lane.b32.xlu1 %v20010_v45, %s19663_s10 }
 0x1dc   : > { %18483 = vrot.lane.b32.xlu1 %v20048_v60, %s19662_s26 }
 0x1de   : > { %v18314_v51 = vpop.permute.xlu0 %18313 }
 0x1df   : > { %v18316_v24 = vunpack.i.h.bf16 %v18314_v51  ;;  %v18315_v26 = vunpack.i.l.bf16 %v18314_v51 }
 0x1e0   : > { %4015 = vrot.lane.b32.xlu1 %v20260_v20, %s19663_s10 }
 0x1e1   : > { %v17482_v29 = vpack.c.bf16 %v18316_v24, %v18315_v26 }
 0x1e2   : > { %v18319_v31 = vpop.permute.xlu0 %18318 }
 0x1e3   : > { %v18321_v36 = vunpack.i.h.bf16 %v18319_v31  ;;  %v18320_v41 = vunpack.i.l.bf16 %v18319_v31  ;;  %17484 = vmatprep.subr.msk.bf16.mxu1 %vm20266_vm2, %v17482_v29 }
 0x1e4   : > { %17487 = vmatpush3.bf16.xpose.msk.msra.mxu1 %vm20266_vm2, %v17482_v29  ;;  %4104 = vrot.lane.b32.xlu1 %v20271_v34, %s19663_s10 }
 0x1e5   : > { %v17488_v46 = vpack.c.bf16 %v18321_v36, %v18320_v41 }
 0x1e6   : > { %v18324_v43 = vpop.permute.xlu1 %18323 }
 0x1e7   : > { %v18326_v52 = vunpack.i.h.bf16 %v18324_v43  ;;  %v18325_v57 = vunpack.i.l.bf16 %v18324_v43  ;;  %17490 = vmatprep.subr.msk.bf16.mxu1 %vm20266_vm2, %v17488_v46 }
 0x1e8   : > { %18493 = vrot.lane.b32.xlu1 %v20072_v6, %s19662_s26 }
 0x1e9   : > { %v17494_v53 = vpack.c.bf16 %v18326_v52, %v18325_v57 }
 0x1ea   : > { %v18329_v0 = vpop.permute.xlu1 %18328 }
 0x1eb   : > { %16383 = vmatmul.mubr.msk.f32.vlgmr.msra.gmra.mrb[0].mxu1 %vm722_vm1, %v20224_v38  ;;  %v18331_v13 = vunpack.i.h.bf16 %v18329_v0  ;;  %v18330_v51 = vunpack.i.l.bf16 %v18329_v0 }
 0x1ec   : > { %4197 = vrot.lane.b32.xlu1 %v20284_v5, %s19663_s10  ;;  %17493 = vmatpush3.bf16.xpose.msk.msra.mxu1 %vm20266_vm2, %v17488_v46 }
 0x1ed   : > { %16389 = vmatprep.mubr.msk.f32.mxu1 %vm722_vm1, %v20231_v19  ;;  %17496 = vmatprep.subr.msk.bf16.mxu1 %vm20266_vm2, %v17494_v53  ;;  %v17500_v56 = vpack.c.bf16 %v18331_v13, %v18330_v51  ;;  %v20315_v13 = vmul.f32 0.35355338, %v20054_v63 }
 0x1ee   : > { %v18334_v24 = vpop.permute.xlu0 %18333 }
 0x1ef   : > { %v18336_v26 = vunpack.i.h.bf16 %v18334_v24  ;;  %v18335_v29 = vunpack.i.l.bf16 %v18334_v24 }
 0x1f0   : > { %18498 = vrot.lane.b32.xlu1 %v20193_v18, %s19661_s9  ;;  %s14968_s9 = sshll.u32 %s23334_s30, 4  ;;  %s23450_s9 = int_to_ptr.vmem [resolvable:$true] %s14968_s9 }
 0x1f1   : > { %v17506_v36 = vpack.c.bf16 %v18336_v26, %v18335_v29 }
 0x1f2   : > { %v18339_v41 = vpop.permute.xlu1 %18338 }
 0x1f3   : > { %16390 = vmatmul.mubr.msk.f32.vlgmr.msra.gmra.mrb[2].mxu1 %vm722_vm1, %v20260_v20  ;;  %v18341_v43 = vunpack.i.h.bf16 %v18339_v41  ;;  %v18340_v52 = vunpack.i.l.bf16 %v18339_v41 }
 0x1f4   : > { %17499 = vmatpush3.bf16.xpose.msk.msra.mxu1 %vm20266_vm2, %v17494_v53  ;;  %16396 = vmatprep.mubr.msk.f32.mxu1 %vm722_vm1, %v20271_v34 }
 0x1f5   : > { %17502 = vmatprep.subr.msk.bf16.mxu1 %vm20266_vm2, %v17500_v56  ;;  %v17512_v51 = vpack.c.bf16 %v18341_v43, %v18340_v52  ;;  %v20330_v43 = vmul.f32 0.35355338, %v20051_v61  ;;  %v20340_v52 = vmul.f32 0.35355338, %v20066_v4  ;;  %v20347_v61 = vmul.f32 0.35355338, %v20127_v30 }
 0x1f6   : > { %v18344_v31 = vpop.permute.xlu0 %18343 }
 0x1f7   : > { %v18346_v26 = vunpack.i.h.bf16 %v18344_v31  ;;  %v18345_v29 = vunpack.i.l.bf16 %v18344_v31  ;;  %23674 = vst [vmem:[#allocation40_spill] sm:$0xff] %v20330_v43  ;;  %23676 = vst [vmem:[#allocation42_spill] sm:$0xff] %v20340_v52 }
 0x1f8   : > { %23677 = vst [vmem:[#allocation43_spill] sm:$0xff] %v20347_v61 }
 0x1fa   : > { %v18349_v41 = vpop.permute.xlu1 %18348 }
 0x1fb   : > { %16397 = vmatmul.mubr.msk.f32.vlgmr.msra.gmra.mrb[4].mxu1 %vm722_vm1, %v20242_v40 }
 0x1fc   : > { %17505 = vmatpush3.bf16.xpose.msk.msra.mxu1 %vm20266_vm2, %v17500_v56  ;;  %16403 = vmatprep.mubr.msk.f32.mxu1 %vm722_vm1, %v20249_v48  ;;  %v20417_v48 = vmul.f32 0.35355338, %v20172_v62 }
 0x1fd   : > { %17508 = vmatprep.subr.msk.bf16.mxu1 %vm20266_vm2, %v17506_v36 }
 0x1fe   : > { %v18354_v46 = vpop.permute.xlu0 %18353  ;;  %23687 = vst [vmem:[#allocation53_spill] sm:$0xff] %v20417_v48 }
 0x1ff   : > { %v18356_v57 = vunpack.i.h.bf16 %v18354_v46  ;;  %v18355_v53 = vunpack.i.l.bf16 %v18354_v46 }
 0x201   : > { %v17530_v0 = vpack.c.bf16 %v18356_v57, %v18355_v53  ;;  %v17518_v57 = vpack.c.bf16 %v18346_v26, %v18345_v29  ;;  %v20368_v26 = vmul.f32 0.35355338, %v20078_v9 }
 0x203   : > { %16404 = vmatmul.mubr.msk.f32.vlgmr.msra.gmra.mrb[6].mxu1 %vm722_vm1, %v20284_v5  ;;  %17532 = vmatprep.subr.msk.bf16.mxu0 %vm20266_vm2, %v17530_v0  ;;  %23680 = vst [vmem:[#allocation46_spill] sm:$0xff] %v20368_v26 }
 0x204   : > { %17511 = vmatpush3.bf16.xpose.msk.msra.mxu1 %vm20266_vm2, %v17506_v36  ;;  %16410 = vmatprep.mubr.msk.f32.mxu1 %vm722_vm1, %v20315_v13  ;;  %v20333_v36 = vmul.f32 0.35355338, %v20099_v17  ;;  %v18359_v17 = vpop.permute.xlu1 %18358 }
 0x205   : > { %17535 = vmatpush3.bf16.xpose.msk.msra.mxu0 %vm20266_vm2, %v17530_v0  ;;  %17514 = vmatprep.subr.msk.bf16.mxu1 %vm20266_vm2, %v17512_v51  ;;  %v18351_v0 = vunpack.i.h.bf16 %v18349_v41 }
 0x206   : > { %v18364_v63 = vpop.permute.xlu0 %18363  ;;  %23675 = vst [vmem:[#allocation41_spill] sm:$0xff] %v20333_v36 }
 0x207   : > { %v18366_v56 = vunpack.i.h.bf16 %v18364_v63  ;;  %v18365_v24 = vunpack.i.l.bf16 %v18364_v63 }
 0x209   : > { %v17542_v46 = vpack.c.bf16 %v18366_v56, %v18365_v24  ;;  %v20358_v56 = vmul.f32 0.35355338, %v20063_v2  ;;  %v20361_v24 = vmul.f32 0.35355338, %v20124_v28  ;;  %v20375_v2 = vmul.f32 0.35355338, %v20151_v42 }
 0x20a   : > { %v18369_v30 = vpop.permute.xlu1 %18368 }
 0x20b   : > { %16411 = vmatmul.mubr.msk.f32.vlgmr.msra.gmra.mrb[8].mxu1 %vm722_vm1, %v20330_v43  ;;  %17544 = vmatprep.subr.msk.bf16.mxu0 %vm20266_vm2, %v17542_v46  ;;  %23678 = vst [vmem:[#allocation44_spill] sm:$0xff] %v20358_v56  ;;  %23679 = vst [vmem:[#allocation45_spill] sm:$0xff] %v20361_v24 }
 0x20c   : > { %16439 = vmatmul.mubr.msk.f32.vlgmr.msra.gmra.mrb[32].mxu0 %vm722_vm1, %v20333_v36  ;;  %17517 = vmatpush3.bf16.xpose.msk.msra.mxu1 %vm20266_vm2, %v17512_v51  ;;  %v18350_v51 = vunpack.i.l.bf16 %v18349_v41  ;;  %23681 = vst [vmem:[#allocation47_spill] sm:$0xff] %v20375_v2 }
 0x20d   : > { %16417 = vmatprep.mubr.msk.f32.mxu1 %vm722_vm1, %v20340_v52  ;;  %17547 = vmatpush3.bf16.xpose.msk.msra.mxu0 %vm20266_vm2, %v17542_v46 }
 0x20e   : > { %16452 = vmatprep.mubr.msk.f32.mxu0 %vm722_vm1, %v20347_v61  ;;  %17520 = vmatprep.subr.msk.bf16.mxu1 %vm20266_vm2, %v17518_v57  ;;  %v18374_v4 = vpop.permute.xlu0 %18373  ;;  %v17524_v29 = vpack.c.bf16 %v18351_v0, %v18350_v51  ;;  %v20389_v0 = vmul.f32 0.35355338, %v20148_v39  ;;  %v20396_v51 = vmul.f32 0.35355338, %v20090_v14 }
 0x20f   : > { %v18376_v31 = vunpack.i.h.bf16 %v18374_v4  ;;  %v18375_v53 = vunpack.i.l.bf16 %v18374_v4  ;;  %v18360_v4 = vunpack.i.l.bf16 %v18359_v17 }
 0x210   : > { %23683 = vst [vmem:[#allocation49_spill] sm:$0xff] %v20389_v0  ;;  %23684 = vst [vmem:[#allocation50_spill] sm:$0xff] %v20396_v51 }
 0x211   : > { %v17554_v63 = vpack.c.bf16 %v18376_v31, %v18375_v53  ;;  %v20386_v31 = vmul.f32 0.35355338, %v20075_v7  ;;  %v20403_v7 = vmul.f32 0.35355338, %v20175_v3 }
 0x212   : > { %v18379_v28 = vpop.permute.xlu1 %18378 }
 0x213   : > { %16418 = vmatmul.mubr.msk.f32.vlgmr.msra.gmra.mrb[10].mxu1 %vm722_vm1, %v20358_v56  ;;  %17556 = vmatprep.subr.msk.bf16.mxu0 %vm20266_vm2, %v17554_v63  ;;  %23682 = vst [vmem:[#allocation48_spill] sm:$0xff] %v20386_v31  ;;  %23685 = vst [vmem:[#allocation51_spill] sm:$0xff] %v20403_v7  ;;  %v18380_v62 = vunpack.i.l.bf16 %v18379_v28 }
 0x214   : > { %16453 = vmatmul.mubr.msk.f32.vlgmr.msra.gmra.mrb[34].mxu0 %vm722_vm1, %v20361_v24  ;;  %17523 = vmatpush3.bf16.xpose.msk.msra.mxu1 %vm20266_vm2, %v17518_v57  ;;  %v18361_v57 = vunpack.i.h.bf16 %v18359_v17 }
 0x215   : > { %16424 = vmatprep.mubr.msk.f32.mxu1 %vm722_vm1, %v20368_v26  ;;  %17559 = vmatpush3.bf16.xpose.msk.msra.mxu0 %vm20266_vm2, %v17554_v63 }
 0x216   : > { %16466 = vmatprep.mubr.msk.f32.mxu0 %vm722_vm1, %v20375_v2  ;;  %17526 = vmatprep.subr.msk.bf16.mxu1 %vm20266_vm2, %v17524_v29  ;;  %v18384_v9 = vpop.permute.xlu0 %18383  ;;  %v17536_v63 = vpack.c.bf16 %v18361_v57, %v18360_v4  ;;  %v20414_v57 = vmul.f32 0.35355338, %v20087_v12 }
 0x217   : > { %v18386_v41 = vunpack.i.h.bf16 %v18384_v9  ;;  %v18385_v46 = vunpack.i.l.bf16 %v18384_v9 }
 0x218   : > { %23686 = vst [vmem:[#allocation52_spill] sm:$0xff] %v20414_v57 }
 0x219   : > { %v17566_v42 = vpack.c.bf16 %v18386_v41, %v18385_v46  ;;  %v18370_v41 = vunpack.i.l.bf16 %v18369_v30 }
 0x21a   : > { %v18389_v53 = vpop.permute.xlu1 %18388  ;;  %v18404_v39 = vpop.permute.xlu0 %18403 }
 0x21b   : > { %16425 = vmatmul.mubr.msk.f32.vlgmr.msra.gmra.mrb[12].mxu1 %vm722_vm1, %v20386_v31  ;;  %17568 = vmatprep.subr.msk.bf16.mxu0 %vm20266_vm2, %v17566_v42  ;;  %v18406_v3 = vunpack.i.h.bf16 %v18404_v39  ;;  %v18405_v46 = vunpack.i.l.bf16 %v18404_v39  ;;  %v20439_v39 = vmul.f32 0.35355338, %v20141_v35  ;;  %v20453_v35 = vmul.f32 0.35355338, %v20165_v54 }
 0x21c   : > { %16467 = vmatmul.mubr.msk.f32.vlgmr.msra.gmra.mrb[36].mxu0 %vm722_vm1, %v20389_v0  ;;  %17529 = vmatpush3.bf16.xpose.msk.msra.mxu1 %vm20266_vm2, %v17524_v29  ;;  %v18371_v29 = vunpack.i.h.bf16 %v18369_v30  ;;  %v20436_v30 = vmul.f32 0.35355338, %v20110_v23  ;;  %v20467_v54 = vmul.f32 0.35355338, %v20187_v15 }
 0x21d   : > { %16431 = vmatprep.mubr.msk.f32.mxu1 %vm722_vm1, %v20396_v51  ;;  %17571 = vmatpush3.bf16.xpose.msk.msra.mxu0 %vm20266_vm2, %v17566_v42  ;;  %v20422_v42 = vmul.f32 0.35355338, %v20117_v25  ;;  %v20428_v12 = vpack.c.bf16 %v18406_v3, %v18405_v46  ;;  %v18381_v25 = vunpack.i.h.bf16 %v18379_v28  ;;  %23690 = vst [vmem:[#allocation56_spill] sm:$0xff] %v20439_v39  ;;  %v20450_v28 = vmul.f32 0.35355338, %v20136_v33  ;;  %23692 = vst [vmem:[#allocation58_spill] sm:$0xff] %v20453_v35 }
 0x21e   : > { %16480 = vmatprep.mubr.msk.f32.mxu0 %vm722_vm1, %v20403_v7  ;;  %v18394_v14 = vpop.permute.xlu1 %18393  ;;  %17538 = vmatprep.subr.msk.bf16.mxu1 %vm20266_vm2, %v17536_v63  ;;  %v17548_v40 = vpack.c.bf16 %v18371_v29, %v18370_v41  ;;  %23689 = vst [vmem:[#allocation55_spill] sm:$0xff] %v20436_v30  ;;  %v20464_v33 = vmul.f32 0.35355338, %v20160_v49  ;;  %23694 = vst [vmem:[#allocation60_spill] sm:$0xff] %v20467_v54  ;;  %v20476_v49 = vmul.f32 0.35355338, %v20184_v10  ;;  %v20636_v21 = vpop.permute.xlu0 %18413 }
 0x21f   : > { %v18396_v17 = vunpack.i.h.bf16 %v18394_v14  ;;  %v18395_v9 = vunpack.i.l.bf16 %v18394_v14  ;;  %23688 = vst [vmem:[#allocation54_spill] sm:$0xff] %v20422_v42  ;;  %v18391_v14 = vunpack.i.h.bf16 %v18389_v53  ;;  %23691 = vst [vmem:[#allocation57_spill] sm:$0xff] %v20450_v28 }
 0x220   : > { %23693 = vst [vmem:[#allocation59_spill] sm:$0xff] %v20464_v33  ;;  %23695 = vst [vmem:[#allocation61_spill] sm:$0xff] %v20476_v49 }
 0x221   : > { %v17578_v4 = vpack.c.bf16 %v18396_v17, %v18395_v9  ;;  %v18390_v17 = vunpack.i.l.bf16 %v18389_v53 }
 0x222   : > { %v18399_v9 = vpop.permute.xlu1 %18398 }
 0x223   : > { %16432 = vmatmul.mubr.msk.f32.vlgmr.msra.gmra.mrb[14].mxu1 %vm722_vm1, %v20414_v57  ;;  %17579 = vmatprep.subr.bf16.mxu0 %v17578_v4  ;;  %v17572_v23 = vpack.c.bf16 %v18391_v14, %v18390_v17  ;;  %v18400_v53 = vunpack.i.l.bf16 %v18399_v9 }
 0x224   : > { %16481 = vmatmul.mubr.msk.f32.vlgmr.msra.gmra.mrb[38].mxu0 %vm722_vm1, %v20417_v48  ;;  %17541 = vmatpush3.bf16.xpose.msk.msra.mxu1 %vm20266_vm2, %v17536_v63  ;;  %v17560_v63 = vpack.c.bf16 %v18381_v25, %v18380_v62  ;;  %v20485_v25 = vld [vmem:[#allocation7] sm:$0xff] }
 0x225   : > { %16445 = vmatprep.mubr.msk.f32.mxu1 %vm722_vm1, %v20422_v42  ;;  %17581 = vmatpush3.bf16.msra.mxu0 %v17578_v4  ;;  %v20483_v4 = vld [vmem:[#allocation7 + $0x8] sm:$0xff] }
 0x226   : > { %17587 = vmatprep.subr.bf16.mxu0 %v20428_v12  ;;  %17550 = vmatprep.subr.msk.bf16.mxu1 %vm20266_vm2, %v17548_v40  ;;  %v18409_v41 = vpop.permute.xlu1 %18408 }
 0x227   : > { %v18411_v3 = vunpack.i.h.bf16 %v18409_v41  ;;  %v18410_v46 = vunpack.i.l.bf16 %v18409_v41 }
 0x229   : > { %v20480_v15 = vpack.c.bf16 %v18411_v3, %v18410_v46 }
 0x22b   : > { %16446 = vmatmul.mubr.msk.f32.vlgmr.msra.gmra.mrb[16].mxu1 %vm722_vm1, %v20436_v30 }
 0x22c   : > { %17553 = vmatpush3.bf16.xpose.msk.msra.mxu1 %vm20266_vm2, %v17548_v40  ;;  %16459 = vmatprep.mubr.msk.f32.mxu1 %vm722_vm1, %v20439_v39  ;;  %v18401_v40 = vunpack.i.h.bf16 %v18399_v9 }
 0x22d   : > { %17562 = vmatprep.subr.msk.bf16.mxu1 %vm20266_vm2, %v17560_v63 }
 0x22e   : > { %v17582_v29 = vpack.c.bf16 %v18401_v40, %v18400_v53 }
 0x233   : > { %16460 = vmatmul.mubr.msk.f32.vlgmr.msra.gmra.mrb[18].mxu1 %vm722_vm1, %v20450_v28 }
 0x234   : > { %17565 = vmatpush3.bf16.xpose.msk.msra.mxu1 %vm20266_vm2, %v17560_v63  ;;  %16473 = vmatprep.mubr.msk.f32.mxu1 %vm722_vm1, %v20453_v35 }
 0x235   : > { %17574 = vmatprep.subr.msk.bf16.mxu1 %vm20266_vm2, %v17572_v23 }
 0x23b   : > { %16474 = vmatmul.mubr.msk.f32.vlgmr.msra.gmra.mrb[20].mxu1 %vm722_vm1, %v20464_v33 }
 0x23c   : > { %17577 = vmatpush3.bf16.xpose.msk.msra.mxu1 %vm20266_vm2, %v17572_v23  ;;  %16487 = vmatprep.mubr.msk.f32.mxu1 %vm722_vm1, %v20467_v54 }
 0x23d   : > { %17583 = vmatprep.subr.bf16.mxu1 %v17582_v29 }
 0x243   : > { %16488 = vmatmul.mubr.msk.f32.vlgmr.msra.gmra.mrb[22].mxu1 %vm722_vm1, %v20476_v49 }
 0x244   : > { %17585 = vmatpush3.bf16.msra.mxu1 %v17582_v29 }
 0x245   : > { %17591 = vmatprep.subr.bf16.mxu1 %v20480_v15 }
 0x2be   : > { %v16384_v62 = vpop.f32.mrb[0].mxu1 }
 0x2bf   : > { %v20488_v63 = vadd.f32 %v16384_v62, %v20483_v4  ;;  %v799_v14 = vpop.f32.mrb[1].mxu1 }
 0x2c0   : > { %v20491_v10 = vadd.f32 %v799_v14, %v20485_v25 }
 0x2c1   : > { %v2177_v17 = vsel %vm2173_vm3, %v20488_v63, -inf }
 0x2c2   : > { %2178 = vmax.xlane.f32.xlu1 %v2177_v17  ;;  %v2174_v23 = vsel %vm2173_vm3, %v20491_v10, -inf }
 0x2c3   : > { %2175 = vmax.xlane.f32.xlu0 %v2174_v23 }
 0x2c6   : > { %v16391_v9 = vpop.f32.mrb[2].mxu1 }
 0x2c7   : > { %v20498_v40 = vadd.f32 %v16391_v9, %v20483_v4  ;;  %v890_v53 = vpop.f32.mrb[3].mxu1 }
 0x2c8   : > { %v20501_v29 = vadd.f32 %v890_v53, %v20485_v25 }
 0x2c9   : > { %v2183_v41 = vsel %vm2173_vm3, %v20498_v40, -inf }
 0x2ca   : > { %2184 = vmax.xlane.f32.xlu1 %v2183_v41  ;;  %v2180_v3 = vsel %vm2173_vm3, %v20501_v29, -inf }
 0x2cb   : > { %2181 = vmax.xlane.f32.xlu0 %v2180_v3 }
 0x2ce   : > { %v16398_v46 = vpop.f32.mrb[4].mxu1 }
 0x2cf   : > { %v20508_v62 = vadd.f32 %v16398_v46, %v20483_v4  ;;  %v981_v14 = vpop.f32.mrb[5].mxu1 }
 0x2d0   : > { %v20511_v17 = vadd.f32 %v981_v14, %v20485_v25 }
 0x2d1   : > { %v2189_v23 = vsel %vm2173_vm3, %v20508_v62, -inf }
 0x2d2   : > { %2190 = vmax.xlane.f32.xlu0 %v2189_v23  ;;  %v2186_v9 = vsel %vm2173_vm3, %v20511_v17, -inf }
 0x2d6   : > { %v16405_v53 = vpop.f32.mrb[6].mxu1  ;;  %2187 = vmax.xlane.f32.xlu0 %v2186_v9 }
 0x2d7   : > { %v20518_v41 = vadd.f32 %v16405_v53, %v20483_v4  ;;  %v1072_v3 = vpop.f32.mrb[7].mxu1 }
 0x2d8   : > { %v20521_v46 = vadd.f32 %v1072_v3, %v20485_v25 }
 0x2d9   : > { %v2195_v14 = vsel %vm2173_vm3, %v20518_v41, -inf }
 0x2da   : > { %2196 = vmax.xlane.f32.xlu1 %v2195_v14  ;;  %v2192_v19 = vsel %vm2173_vm3, %v20521_v46, -inf }
 0x2de   : > { %v16412_v23 = vpop.f32.mrb[8].mxu1  ;;  %2193 = vmax.xlane.f32.xlu1 %v2192_v19 }
 0x2df   : > { %v20528_v38 = vadd.f32 %v16412_v23, %v20483_v4  ;;  %v16440_v9 = vpop.f32.mrb[32].mxu0  ;;  %v1163_v5 = vpop.f32.mrb[9].mxu1 }
 0x2e0   : > { %v1527_v53 = vpop.f32.mrb[33].mxu0  ;;  %v20531_v34 = vadd.f32 %v16440_v9, %v20483_v4  ;;  %v20536_v14 = vadd.f32 %v1163_v5, %v20485_v25 }
 0x2e1   : > { %v2201_v3 = vsel %vm2173_vm3, %v20528_v38, -inf  ;;  %v20544_v9 = vadd.f32 %v1527_v53, %v20485_v25 }
 0x2e2   : > { %2202 = vmax.xlane.f32.xlu0 %v2201_v3  ;;  %v2225_v20 = vsel %vm2173_vm3, %v20531_v34, -inf  ;;  %v2198_v3 = vsel %vm2173_vm3, %v20536_v14, -inf }
 0x2e3   : > { %v2222_v53 = vsel %vm2173_vm3, %v20544_v9, -inf }
 0x2e6   : > { %v16419_v19 = vpop.f32.mrb[10].mxu1  ;;  %2226 = vmax.xlane.f32.xlu0 %v2225_v20 }
 0x2e7   : > { %v20541_v23 = vadd.f32 %v16419_v19, %v20483_v4  ;;  %v16454_v45 = vpop.f32.mrb[34].mxu0  ;;  %v1254_v1 = vpop.f32.mrb[11].mxu1 }
 0x2e8   : > { %v1709_v55 = vpop.f32.mrb[35].mxu0  ;;  %v20547_v44 = vadd.f32 %v1254_v1, %v20485_v25  ;;  %v20554_v20 = vadd.f32 %v16454_v45, %v20483_v4 }
 0x2e9   : > { %v2207_v5 = vsel %vm2173_vm3, %v20541_v23, -inf  ;;  %v20561_v18 = vadd.f32 %v1709_v55, %v20485_v25  ;;  %v20573_v55 = vpop.permute.xlu1 %18428 }
 0x2ea   : > { %2208 = vmax.xlane.f32.xlu1 %v2207_v5  ;;  %2199 = vmax.xlane.f32.xlu0 %v2198_v3  ;;  %v2204_v19 = vsel %vm2173_vm3, %v20547_v44, -inf  ;;  %v2237_v5 = vsel %vm2173_vm3, %v20554_v20, -inf }
 0x2eb   : > { %v2234_v3 = vsel %vm2173_vm3, %v20561_v18, -inf }
 0x2ed   : > { %v20595_v50 = vpop.permute.xlu1 %18433 }
 0x2ee   : > { %v16426_v49 = vpop.f32.mrb[12].mxu1  ;;  %2205 = vmax.xlane.f32.xlu1 %v2204_v19  ;;  %2223 = vmax.xlane.f32.xlu0 %v2222_v53 }
 0x2ef   : > { %v16468_v1 = vpop.f32.mrb[36].mxu0  ;;  %v1345_v48 = vpop.f32.mrb[13].mxu1  ;;  %v20566_v45 = vadd.f32 %v16426_v49, %v20483_v4 }
 0x2f0   : > { %v1891_v33 = vpop.f32.mrb[37].mxu0  ;;  %v20576_v28 = vadd.f32 %v16468_v1, %v20483_v4 }
 0x2f1   : > { %v20607_v54 = vpop.permute.xlu1 %18438 }
 0x2f2   : > { %2238 = vmax.xlane.f32.xlu0 %v2237_v5  ;;  %23696 = vst [vmem:[#allocation62_spill] sm:$0xff] %v20607_v54 }
 0x2f6   : > { %v16433_v2 = vpop.f32.mrb[14].mxu1  ;;  %2235 = vmax.xlane.f32.xlu0 %v2234_v3  ;;  %v2213_v3 = vsel %vm2173_vm3, %v20566_v45, -inf }
 0x2f7   : > { %v20571_v19 = vadd.f32 %v16433_v2, %v20483_v4  ;;  %v16482_v53 = vpop.f32.mrb[38].mxu0  ;;  %v1436_v58 = vpop.f32.mrb[15].mxu1  ;;  %v20586_v2 = vadd.f32 %v1345_v48, %v20485_v25 }
 0x2f8   : > { %v2073_v6 = vpop.f32.mrb[39].mxu0  ;;  %v20579_v5 = vadd.f32 %v1436_v58, %v20485_v25  ;;  %v2249_v58 = vsel %vm2173_vm3, %v20576_v28, -inf }
 0x2f9   : > { %v2219_v49 = vsel %vm2173_vm3, %v20571_v19, -inf  ;;  %v20589_v60 = vadd.f32 %v2073_v6, %v20485_v25 }
 0x2fa   : > { %2220 = vmax.xlane.f32.xlu1 %v2219_v49  ;;  %2214 = vmax.xlane.f32.xlu0 %v2213_v3  ;;  %v2216_v1 = vsel %vm2173_vm3, %v20579_v5, -inf  ;;  %v20598_v49 = vadd.f32 %v1891_v33, %v20485_v25  ;;  %v2210_v3 = vsel %vm2173_vm3, %v20586_v2, -inf }
 0x2fb   : > { %v2258_v6 = vsel %vm2173_vm3, %v20589_v60, -inf }
 0x2fc   : > { %v2246_v33 = vsel %vm2173_vm3, %v20598_v49, -inf }
 0x2fe   : > { %v16447_v59 = vpop.f32.mrb[16].mxu1  ;;  %2217 = vmax.xlane.f32.xlu1 %v2216_v1  ;;  %2250 = vmax.xlane.f32.xlu0 %v2249_v58  ;;  %v20610_v1 = vadd.f32 %v16482_v53, %v20483_v4 }
 0x2ff   : > { %v1618_v61 = vpop.f32.mrb[17].mxu1  ;;  %v20601_v48 = vadd.f32 %v16447_v59, %v20483_v4 }
 0x300   : > { %v20613_v58 = vadd.f32 %v1618_v61, %v20485_v25  ;;  %v2261_v61 = vsel %vm2173_vm3, %v20610_v1, -inf }
 0x301   : > { %v2231_v59 = vsel %vm2173_vm3, %v20601_v48, -inf }
 0x302   : > { %2259 = vmax.xlane.f32.xlu1 %v2258_v6  ;;  %2211 = vmax.xlane.f32.xlu0 %v2210_v3  ;;  %v2228_v53 = vsel %vm2173_vm3, %v20613_v58, -inf  ;;  %v20626_v3 = vpop.permute.xlu1 %18448 }
 0x303   : > { %23697 = vst [vmem:[#allocation63_spill] sm:$0xff] %v20626_v3 }
 0x306   : > { %v16461_v30 = vpop.f32.mrb[18].mxu1  ;;  %2232 = vmax.xlane.f32.xlu1 %v2231_v59  ;;  %2247 = vmax.xlane.f32.xlu0 %v2246_v33  ;;  %v20638_v0 = vpop.permute.xlu1 %18453 }
 0x307   : > { %v1800_v7 = vpop.f32.mrb[19].mxu1  ;;  %v20620_v6 = vadd.f32 %v16461_v30, %v20483_v4  ;;  %23698 = vst [vmem:[#allocation64_spill] sm:$0xff] %v20638_v0 }
 0x308   : > { %v20629_v37 = vadd.f32 %v1800_v7, %v20485_v25 }
 0x309   : > { %v2243_v59 = vsel %vm2173_vm3, %v20620_v6, -inf }
 0x30a   : > { %2229 = vmax.xlane.f32.xlu1 %v2228_v53  ;;  %2262 = vmax.xlane.f32.xlu0 %v2261_v61  ;;  %v2240_v7 = vsel %vm2173_vm3, %v20629_v37, -inf  ;;  %v20651_v57 = vpop.permute.xlu1 %18458 }
 0x30b   : > { %23699 = vst [vmem:[#allocation65_spill] sm:$0xff] %v20651_v57 }
 0x30e   : > { %v16475_v33 = vpop.f32.mrb[20].mxu1  ;;  %2244 = vmax.xlane.f32.xlu1 %v2243_v59 }
 0x30f   : > { %v20634_v30 = vadd.f32 %v16475_v33, %v20483_v4  ;;  %v1982_v35 = vpop.f32.mrb[21].mxu1  ;;  %v20649_v33 = vpop.permute.xlu0 %18418 }
 0x310   : > { %v20641_v53 = vadd.f32 %v1982_v35, %v20485_v25 }
 0x311   : > { %v2255_v61 = vsel %vm2173_vm3, %v20634_v30, -inf }
 0x312   : > { %2241 = vmax.xlane.f32.xlu1 %v2240_v7  ;;  %2256 = vmax.xlane.f32.xlu0 %v2255_v61  ;;  %v2252_v59 = vsel %vm2173_vm3, %v20641_v53, -inf }
 0x313   : > { %v20663_v27 = vpop.permute.xlu0 %18423 }
 0x316   : > { %v16489_v3 = vpop.f32.mrb[22].mxu1  ;;  %2253 = vmax.xlane.f32.xlu1 %v2252_v59  ;;  %v20665_v59 = vpop.permute.xlu1 %18463 }
 0x317   : > { %v20654_v35 = vadd.f32 %v16489_v3, %v20483_v4  ;;  %v2164_v0 = vpop.f32.mrb[23].mxu1  ;;  %23700 = vst [vmem:[#allocation66_spill] sm:$0xff] %v20665_v59  ;;  %v20667_v57 = vpop.permute.xlu0 %18443 }
 0x318   : > { %v20657_v8 = vadd.f32 %v2164_v0, %v20485_v25  ;;  %23701 = vst [vmem:[#allocation67_spill] sm:$0xff] %v20667_v57 }
 0x319   : > { %v2267_v7 = vsel %vm2173_vm3, %v20654_v35, -inf }
 0x31a   : > { %2268 = vmax.xlane.f32.xlu0 %v2267_v7  ;;  %v2264_v61 = vsel %vm2173_vm3, %v20657_v8, -inf  ;;  %v20669_v4 = vpop.permute.xlu1 %18473 }
 0x31b   : > { %2265 = vmax.xlane.f32.xlu1 %v2264_v61  ;;  %23702 = vst [vmem:[#allocation68_spill] sm:$0xff] %v20669_v4  ;;  %v20671_v3 = vpop.permute.xlu0 %18468 }
 0x31c   : > { %23703 = vst [vmem:[#allocation69_spill] sm:$0xff] %v20671_v3 }
 0x31e   : > { %v20673_v0 = vpop.permute.xlu1 %3922 }
 0x31f   : > { %23704 = vst [vmem:[#allocation70_spill] sm:$0xff] %v20673_v0  ;;  %v20675_v25 = vpop.permute.xlu0 %18478 }
 0x320   : > { %23705 = vst [vmem:[#allocation71_spill] sm:$0xff] %v20675_v25 }
 0x322   : > { %v20677_v39 = vpop.permute.xlu1 %18483 }
 0x323   : > { %23706 = vst [vmem:[#allocation72_spill] sm:$0xff] %v20677_v39  ;;  %v20679_v7 = vpop.permute.xlu0 %3924 }
 0x324   : > { %23707 = vst [vmem:[#allocation73_spill] sm:$0xff] %v20679_v7 }
 0x326   : > { %v20681_v26 = vpop.permute.xlu1 %4015 }
 0x327   : > { %23708 = vst [vmem:[#allocation74_spill] sm:$0xff] %v20681_v26  ;;  %v20683_v61 = vpop.permute.xlu0 %4013 }
 0x328   : > { %23709 = vst [vmem:[#allocation75_spill] sm:$0xff] %v20683_v61 }
 0x32a   : > { %v20685_v54 = vpop.permute.xlu1 %4104 }
 0x32b   : > { %23710 = vst [vmem:[#allocation76_spill] sm:$0xff] %v20685_v54  ;;  %v20687_v59 = vpop.permute.xlu0 %18488 }
 0x32c   : > { %23711 = vst [vmem:[#allocation77_spill] sm:$0xff] %v20687_v59 }
 0x32e   : > { %v20689_v57 = vpop.permute.xlu1 %18493 }
 0x32f   : > { %23712 = vst [vmem:[#allocation78_spill] sm:$0xff] %v20689_v57  ;;  %v20691_v4 = vpop.permute.xlu0 %4106 }
 0x330   : > { %23713 = vst [vmem:[#allocation79_spill] sm:$0xff] %v20691_v4 }
 0x332   : > { %v20693_v3 = vpop.permute.xlu1 %4197 }
 0x333   : > { %23714 = vst [vmem:[#allocation80_spill] sm:$0xff] %v20693_v3  ;;  %v20697_v25 = vpop.permute.xlu0 %4195 }
 0x334   : > { %23716 = vst [vmem:[#allocation82_spill] sm:$0xff] %v20697_v25 }
 0x336   : > { %v20695_v0 = vpop.permute.xlu1 %18498 }
 0x337   : > { %23715 = vst [vmem:[#allocation81_spill] sm:$0xff] %v20695_v0 }
 0x34f   : > { %v2179_v39 = vpop.xlane.xlu1 %2178 }
 0x350   : > { %v2271_v7 = vsub.f32 %v20488_v63, %v2179_v39  ;;  %v2176_v26 = vpop.xlane.xlu0 %2175 }
 0x351   : > { %v2270_v61 = vsub.f32 %v20491_v10, %v2176_v26 }
 0x352   : > { %v2304_v24 = vmul.f32 1.442695, %v2271_v7 }
 0x353   : > { %v2302_v54 = vmul.f32 1.442695, %v2270_v61 }
 0x354   : > { %18952 = vpow2.f32 %v2304_v24 }
 0x355   : > { %18954 = vpow2.f32 %v2302_v54 }
 0x357   : > { %v2185_v59 = vpop.xlane.xlu1 %2184 }
 0x358   : > { %v2273_v57 = vsub.f32 %v20498_v40, %v2185_v59  ;;  %v2182_v4 = vpop.xlane.xlu0 %2181 }
 0x359   : > { %v2272_v3 = vsub.f32 %v20501_v29, %v2182_v4 }
 0x35a   : > { %v2308_v56 = vmul.f32 1.442695, %v2273_v57 }
 0x35b   : > { %v2306_v0 = vmul.f32 1.442695, %v2272_v3 }
 0x35c   : > { %18956 = vpow2.f32 %v2308_v56 }
 0x35d   : > { %18958 = vpow2.f32 %v2306_v0 }
 0x35e   : > { %v20703_v25 = vpop.eup %18952 }
 0x35f   : > { %v20705_v39 = vpop.eup %18954  ;;  %v2191_v63 = vpop.xlane.xlu0 %2190  ;;  %v2369_v26 = vsel %vm2173_vm3, %v20703_v25, 0.0 }
 0x360   : > { %v2275_v24 = vsub.f32 %v20508_v62, %v2191_v63  ;;  %2370 = vadd.xlane.f32.xlu0 %v2369_v26  ;;  %v2366_v54 = vsel %vm2173_vm3, %v20705_v39, 0.0 }
 0x361   : > { %2367 = vadd.xlane.f32.xlu1 %v2366_v54 }
 0x362   : > { %v2312_v10 = vmul.f32 1.442695, %v2275_v24 }
 0x363   : > { %v2188_v57 = vpop.xlane.xlu0 %2187 }
 0x364   : > { %18960 = vpow2.f32 %v2312_v10  ;;  %v2274_v56 = vsub.f32 %v20511_v17, %v2188_v57 }
 0x366   : > { %v20713_v40 = vpop.eup %18956  ;;  %v2310_v29 = vmul.f32 1.442695, %v2274_v56 }
 0x367   : > { %v2197_v59 = vpop.xlane.xlu1 %2196  ;;  %v2375_v4 = vsel %vm2173_vm3, %v20713_v40, 0.0  ;;  %v20717_v3 = vpop.eup %18958 }
 0x368   : > { %18962 = vpow2.f32 %v2310_v29  ;;  %v2277_v62 = vsub.f32 %v20518_v41, %v2197_v59  ;;  %2376 = vadd.xlane.f32.xlu1 %v2375_v4  ;;  %v2372_v61 = vsel %vm2173_vm3, %v20717_v3, 0.0 }
 0x36a   : > { %v2316_v0 = vmul.f32 1.442695, %v2277_v62 }
 0x36b   : > { %v2194_v7 = vpop.xlane.xlu1 %2193 }
 0x36c   : > { %18964 = vpow2.f32 %v2316_v0  ;;  %v2276_v17 = vsub.f32 %v20521_v46, %v2194_v7  ;;  %2373 = vadd.xlane.f32.xlu1 %v2372_v61 }
 0x36e   : > { %v20723_v63 = vpop.eup %18960  ;;  %v2314_v26 = vmul.f32 1.442695, %v2276_v17 }
 0x36f   : > { %v2203_v24 = vpop.xlane.xlu0 %2202  ;;  %v2381_v54 = vsel %vm2173_vm3, %v20723_v63, 0.0 }
 0x370   : > { %18966 = vpow2.f32 %v2314_v26  ;;  %v2279_v41 = vsub.f32 %v20528_v38, %v2203_v24  ;;  %2382 = vadd.xlane.f32.xlu0 %v2381_v54 }
 0x372   : > { %v20728_v10 = vpop.eup %18962  ;;  %v2320_v57 = vmul.f32 1.442695, %v2279_v41 }
 0x373   : > { %v2227_v56 = vpop.xlane.xlu0 %2226  ;;  %v2378_v29 = vsel %vm2173_vm3, %v20728_v10, 0.0 }
 0x374   : > { %18968 = vpow2.f32 %v2320_v57  ;;  %v2287_v46 = vsub.f32 %v20531_v34, %v2227_v56  ;;  %2379 = vadd.xlane.f32.xlu0 %v2378_v29 }
 0x376   : > { %v20733_v59 = vpop.eup %18964  ;;  %v2336_v4 = vmul.f32 1.442695, %v2287_v46 }
 0x377   : > { %v2209_v62 = vpop.xlane.xlu1 %2208  ;;  %v2200_v0 = vpop.xlane.xlu0 %2199  ;;  %v2387_v38 = vsel %vm2173_vm3, %v20733_v59, 0.0 }
 0x378   : > { %18970 = vpow2.f32 %v2336_v4  ;;  %v2281_v7 = vsub.f32 %v20541_v23, %v2209_v62  ;;  %v2278_v61 = vsub.f32 %v20536_v14, %v2200_v0  ;;  %2388 = vadd.xlane.f32.xlu1 %v2387_v38 }
 0x37a   : > { %v20739_v17 = vpop.eup %18966  ;;  %v2324_v26 = vmul.f32 1.442695, %v2281_v7  ;;  %v2318_v24 = vmul.f32 1.442695, %v2278_v61 }
 0x37b   : > { %v2206_v34 = vpop.xlane.xlu1 %2205  ;;  %v2224_v54 = vpop.xlane.xlu0 %2223  ;;  %v2384_v41 = vsel %vm2173_vm3, %v20739_v17, 0.0 }
 0x37c   : > { %18972 = vpow2.f32 %v2324_v26  ;;  %v2280_v57 = vsub.f32 %v20547_v44, %v2206_v34  ;;  %v2286_v56 = vsub.f32 %v20544_v9, %v2224_v54  ;;  %2385 = vadd.xlane.f32.xlu1 %v2384_v41 }
 0x37d   : > { %18974 = vpow2.f32 %v2318_v24 }
 0x37e   : > { %v20745_v23 = vpop.eup %18968  ;;  %v2322_v14 = vmul.f32 1.442695, %v2280_v57  ;;  %v2334_v29 = vmul.f32 1.442695, %v2286_v56 }
 0x37f   : > { %v2239_v46 = vpop.xlane.xlu0 %2238  ;;  %v2393_v4 = vsel %vm2173_vm3, %v20745_v23, 0.0 }
 0x380   : > { %18976 = vpow2.f32 %v2322_v14  ;;  %v2291_v62 = vsub.f32 %v20554_v20, %v2239_v46  ;;  %2394 = vadd.xlane.f32.xlu0 %v2393_v4 }
 0x381   : > { %18978 = vpow2.f32 %v2334_v29 }
 0x382   : > { %v20750_v0 = vpop.eup %18970  ;;  %v2344_v44 = vmul.f32 1.442695, %v2291_v62 }
 0x383   : > { %v2236_v38 = vpop.xlane.xlu0 %2235  ;;  %v2417_v9 = vsel %vm2173_vm3, %v20750_v0, 0.0 }
 0x384   : > { %18980 = vpow2.f32 %v2344_v44  ;;  %v2290_v7 = vsub.f32 %v20561_v18, %v2236_v38  ;;  %2418 = vadd.xlane.f32.xlu0 %v2417_v9 }
 0x386   : > { %v20755_v61 = vpop.eup %18972  ;;  %v2342_v26 = vmul.f32 1.442695, %v2290_v7 }
 0x387   : > { %v20757_v24 = vpop.eup %18974  ;;  %v2221_v34 = vpop.xlane.xlu1 %2220  ;;  %v2399_v54 = vsel %vm2173_vm3, %v20755_v61, 0.0 }
 0x388   : > { %v2215_v20 = vpop.xlane.xlu0 %2214  ;;  %18982 = vpow2.f32 %v2342_v26  ;;  %v2285_v41 = vsub.f32 %v20571_v19, %v2221_v34  ;;  %2400 = vadd.xlane.f32.xlu1 %v2399_v54  ;;  %v2390_v18 = vsel %vm2173_vm3, %v20757_v24, 0.0 }
 0x389   : > { %v2283_v57 = vsub.f32 %v20566_v45, %v2215_v20  ;;  %2391 = vadd.xlane.f32.xlu0 %v2390_v18 }
 0x38a   : > { %v20765_v56 = vpop.eup %18976  ;;  %v2332_v14 = vmul.f32 1.442695, %v2285_v41 }
 0x38b   : > { %v2328_v29 = vmul.f32 1.442695, %v2283_v57  ;;  %v20767_v46 = vpop.eup %18978  ;;  %v2218_v4 = vpop.xlane.xlu1 %2217  ;;  %v2396_v44 = vsel %vm2173_vm3, %v20765_v56, 0.0 }
 0x38c   : > { %v2251_v62 = vpop.xlane.xlu0 %2250  ;;  %18984 = vpow2.f32 %v2332_v14  ;;  %v2284_v19 = vsub.f32 %v20579_v5, %v2218_v4  ;;  %2397 = vadd.xlane.f32.xlu1 %v2396_v44  ;;  %v2414_v38 = vsel %vm2173_vm3, %v20767_v46, 0.0 }
 0x38d   : > { %v2295_v45 = vsub.f32 %v20576_v28, %v2251_v62  ;;  %18986 = vpow2.f32 %v2328_v29  ;;  %2415 = vadd.xlane.f32.xlu0 %v2414_v38 }
 0x38e   : > { %v20775_v9 = vpop.eup %18980  ;;  %v2330_v7 = vmul.f32 1.442695, %v2284_v19 }
 0x38f   : > { %v2352_v26 = vmul.f32 1.442695, %v2295_v45  ;;  %v2260_v34 = vpop.xlane.xlu1 %2259  ;;  %v2429_v54 = vsel %vm2173_vm3, %v20775_v9, 0.0 }
 0x390   : > { %v2212_v20 = vpop.xlane.xlu0 %2211  ;;  %18988 = vpow2.f32 %v2330_v7  ;;  %v2298_v5 = vsub.f32 %v20589_v60, %v2260_v34 }
 0x391   : > { %v2282_v28 = vsub.f32 %v20586_v2, %v2212_v20  ;;  %18990 = vpow2.f32 %v2352_v26  ;;  %2430 = vadd.xlane.f32.xlu0 %v2429_v54 }
 0x392   : > { %v20781_v41 = vpop.eup %18982  ;;  %v2358_v57 = vmul.f32 1.442695, %v2298_v5 }
 0x393   : > { %v2326_v18 = vmul.f32 1.442695, %v2282_v28  ;;  %v2233_v14 = vpop.xlane.xlu1 %2232  ;;  %v2426_v4 = vsel %vm2173_vm3, %v20781_v41, 0.0 }
 0x394   : > { %v2248_v29 = vpop.xlane.xlu0 %2247  ;;  %18992 = vpow2.f32 %v2358_v57  ;;  %v2289_v62 = vsub.f32 %v20601_v48, %v2233_v14 }
 0x395   : > { %v2294_v44 = vsub.f32 %v20598_v49, %v2248_v29  ;;  %18994 = vpow2.f32 %v2326_v18  ;;  %2427 = vadd.xlane.f32.xlu0 %v2426_v4 }
 0x396   : > { %v20787_v60 = vpop.eup %18984  ;;  %v2340_v2 = vmul.f32 1.442695, %v2289_v62 }
 0x397   : > { %v2350_v19 = vmul.f32 1.442695, %v2294_v44  ;;  %v20789_v45 = vpop.eup %18986  ;;  %v2230_v38 = vpop.xlane.xlu1 %2229  ;;  %v2411_v26 = vsel %vm2173_vm3, %v20787_v60, 0.0 }
 0x398   : > { %v2263_v7 = vpop.xlane.xlu0 %2262  ;;  %18996 = vpow2.f32 %v2340_v2  ;;  %v2288_v34 = vsub.f32 %v20613_v58, %v2230_v38  ;;  %2412 = vadd.xlane.f32.xlu1 %v2411_v26  ;;  %v2405_v49 = vsel %vm2173_vm3, %v20789_v45, 0.0 }
 0x399   : > { %v2299_v48 = vsub.f32 %v20610_v1, %v2263_v7  ;;  %18998 = vpow2.f32 %v2350_v19  ;;  %2406 = vadd.xlane.f32.xlu0 %v2405_v49 }
 0x39a   : > { %v20797_v20 = vpop.eup %18988  ;;  %v2338_v54 = vmul.f32 1.442695, %v2288_v34 }
 0x39b   : > { %v2360_v5 = vmul.f32 1.442695, %v2299_v48  ;;  %v20799_v28 = vpop.eup %18990  ;;  %v2245_v57 = vpop.xlane.xlu1 %2244  ;;  %v2408_v18 = vsel %vm2173_vm3, %v20797_v20, 0.0 }
 0x39c   : > { %19000 = vpow2.f32 %v2338_v54  ;;  %v2293_v58 = vsub.f32 %v20620_v6, %v2245_v57  ;;  %2409 = vadd.xlane.f32.xlu1 %v2408_v18  ;;  %v2441_v1 = vsel %vm2173_vm3, %v20799_v28, 0.0 }
 0x39d   : > { %19002 = vpow2.f32 %v2360_v5  ;;  %2442 = vadd.xlane.f32.xlu0 %v2441_v1 }
 0x39e   : > { %v20806_v14 = vpop.eup %18992  ;;  %v2348_v29 = vmul.f32 1.442695, %v2293_v58 }
 0x39f   : > { %v20808_v4 = vpop.eup %18994  ;;  %v2242_v62 = vpop.xlane.xlu1 %2241  ;;  %v2450_v2 = vsel %vm2173_vm3, %v20806_v14, 0.0 }
 0x3a0   : > { %v2257_v44 = vpop.xlane.xlu0 %2256  ;;  %19004 = vpow2.f32 %v2348_v29  ;;  %v2292_v19 = vsub.f32 %v20629_v37, %v2242_v62  ;;  %2451 = vadd.xlane.f32.xlu1 %v2450_v2  ;;  %v2402_v38 = vsel %vm2173_vm3, %v20808_v4, 0.0 }
 0x3a1   : > { %v2297_v6 = vsub.f32 %v20634_v30, %v2257_v44  ;;  %2403 = vadd.xlane.f32.xlu0 %v2402_v38 }
 0x3a2   : > { %v20816_v7 = vpop.eup %18996  ;;  %v2346_v26 = vmul.f32 1.442695, %v2292_v19 }
 0x3a3   : > { %v20818_v34 = vpop.eup %18998  ;;  %v2356_v48 = vmul.f32 1.442695, %v2297_v6  ;;  %v2423_v49 = vsel %vm2173_vm3, %v20816_v7, 0.0  ;;  %v2254_v2 = vpop.xlane.xlu1 %2253 }
 0x3a4   : > { %19006 = vpow2.f32 %v2346_v26  ;;  %2424 = vadd.xlane.f32.xlu1 %v2423_v49  ;;  %v2438_v37 = vsel %vm2173_vm3, %v20818_v34, 0.0  ;;  %v2296_v19 = vsub.f32 %v20641_v53, %v2254_v2 }
 0x3a5   : > { %2439 = vadd.xlane.f32.xlu0 %v2438_v37  ;;  %19008 = vpow2.f32 %v2356_v48 }
 0x3a6   : > { %v20824_v30 = vpop.eup %19000  ;;  %v2354_v6 = vmul.f32 1.442695, %v2296_v19  ;;  %v18416_v19 = vunpack.i.h.bf16 %v20636_v21 }
 0x3a7   : > { %v20826_v54 = vpop.eup %19002  ;;  %v2420_v5 = vsel %vm2173_vm3, %v20824_v30, 0.0  ;;  %v2269_v38 = vpop.xlane.xlu0 %2268 }
 0x3a8   : > { %2421 = vadd.xlane.f32.xlu1 %v2420_v5  ;;  %v2453_v57 = vsel %vm2173_vm3, %v20826_v54, 0.0  ;;  %19010 = vpow2.f32 %v2354_v6  ;;  %v2301_v26 = vsub.f32 %v20654_v35, %v2269_v38  ;;  %v18415_v6 = vunpack.i.l.bf16 %v20636_v21 }
 0x3a9   : > { %2454 = vadd.xlane.f32.xlu0 %v2453_v57  ;;  %v2266_v57 = vpop.xlane.xlu1 %2265 }
 0x3aa   : > { %v20832_v18 = vpop.eup %19004  ;;  %v2364_v48 = vmul.f32 1.442695, %v2301_v26 }
 0x3ab   : > { %v2435_v58 = vsel %vm2173_vm3, %v20832_v18, 0.0 }
 0x3ac   : > { %19012 = vpow2.f32 %v2364_v48 }
 0x3ad   : > { %2436 = vadd.xlane.f32.xlu0 %v2435_v58 }
 0x3ae   : > { %v20836_v1 = vpop.eup %19006 }
 0x3af   : > { %v2432_v29 = vsel %vm2173_vm3, %v20836_v1, 0.0  ;;  %v20840_v62 = vpop.eup %19008 }
 0x3b0   : > { %v2447_v44 = vsel %vm2173_vm3, %v20840_v62, 0.0 }
 0x3b1   : > { %2433 = vadd.xlane.f32.xlu0 %v2432_v29 }
 0x3b2   : > { %v20850_v49 = vpop.eup %19010 }
 0x3b3   : > { %v2444_v37 = vsel %vm2173_vm3, %v20850_v49, 0.0 }
 0x3b5   : > { %2448 = vadd.xlane.f32.xlu0 %v2447_v44 }
 0x3b6   : > { %v20854_v5 = vpop.eup %19012 }
 0x3b7   : > { %v2459_v53 = vsel %vm2173_vm3, %v20854_v5, 0.0 }
 0x3b9   : > { %4286 = vrot.lane.b32.xlu1 %v20315_v13, %s19663_s10 }
 0x3cb   : > { %18503 = vrot.lane.b32.xlu0 %v20084_v11, %s19662_s26 }
 0x3dd   : > { %2445 = vadd.xlane.f32.xlu1 %v2444_v37  ;;  %v2300_v37 = vsub.f32 %v20657_v8, %v2266_v57  ;;  %v18421_v8 = vunpack.i.h.bf16 %v20649_v33  ;;  %v18420_v57 = vunpack.i.l.bf16 %v20649_v33 }
 0x3ea   : > { %2460 = vadd.xlane.f32.xlu0 %v2459_v53 }
 0x3ed   : > { %v2371_v58 = vpop.xlane.xlu0 %2370 }
 0x3ee   : > { %19014 = vrcp.f32 %v2371_v58  ;;  %v2368_v29 = vpop.xlane.xlu1 %2367  ;;  %18508 = vrot.lane.b32.xlu1 %v20096_v16, %s19662_s26  ;;  %v17594_v58 = vpack.c.bf16 %v18416_v19, %v18415_v6 }
 0x3ef   : > { %19016 = vrcp.f32 %v2368_v29  ;;  %v2362_v29 = vmul.f32 1.442695, %v2300_v37 }
 0x3f5   : > { %v2377_v35 = vpop.xlane.xlu1 %2376 }
 0x3f6   : > { %19018 = vrcp.f32 %v2377_v35 }
 0x3f8   : > { %v19015_v44 = vpop.eup %19014 }
 0x3f9   : > { %v19017_v2 = vpop.eup %19016  ;;  %v2374_v38 = vpop.xlane.xlu1 %2373  ;;  %v2495_v48 = vmul.f32 %v19015_v44, %v20703_v25 }
 0x3fa   : > { %19020 = vrcp.f32 %v2374_v38  ;;  %v2494_v26 = vmul.f32 %v19017_v2, %v20705_v39  ;;  %v17598_v2 = vpack.c.bf16 %v18421_v8, %v18420_v57 }
 0x3fc   : > { %16494 = vmatprep.mubr.msk.f32.mxu0 %vm2173_vm3, %v2494_v26 }
 0x3fd   : > { %16495 = vmatmul.mubr.msk.f32.vlgmr.msra.gmra.mrb[40].mxu0 %vm2173_vm3, %v2495_v48  ;;  %v2383_v53 = vpop.xlane.xlu0 %2382 }
 0x3fe   : > { %17589 = vmatpush3.bf16.msra.mxu0 %v20428_v12  ;;  %19022 = vrcp.f32 %v2383_v53 }
 0x3ff   : > { %17595 = vmatprep.subr.bf16.mxu0 %v17594_v58 }
 0x400   : > { %4288 = vrot.lane.b32.xlu0 %v20330_v43, %s19663_s10  ;;  %v19019_v39 = vpop.eup %19018 }
 0x401   : > { %v2380_v21 = vpop.xlane.xlu0 %2379  ;;  %v2497_v44 = vmul.f32 %v19019_v39, %v20713_v40  ;;  %v18425_v40 = vunpack.i.l.bf16 %v20663_v27 }
 0x402   : > { %19024 = vrcp.f32 %v2380_v21  ;;  %v18430_v21 = vunpack.i.l.bf16 %v20573_v55 }
 0x403   : > { %19026 = vpow2.f32 %v2362_v29 }
 0x404   : > { %v19021_v25 = vpop.eup %19020  ;;  %4377 = vrot.lane.b32.xlu0 %v20340_v52, %s19663_s10 }
 0x405   : > { %v2389_v35 = vpop.xlane.xlu1 %2388  ;;  %v2496_v12 = vmul.f32 %v19021_v25, %v20717_v3  ;;  %v18426_v3 = vunpack.i.h.bf16 %v20663_v27 }
 0x406   : > { %19028 = vrcp.f32 %v2389_v35 }
 0x407   : > { %16501 = vmatprep.mubr.msk.f32.mxu1 %vm2173_vm3, %v2496_v12 }
 0x408   : > { %18513 = vrot.lane.b32.xlu0 %v20107_v22, %s19662_s26  ;;  %16502 = vmatmul.mubr.msk.f32.vlgmr.msra.gmra.mrb[24].mxu1 %vm2173_vm3, %v2497_v44  ;;  %v19023_v19 = vpop.eup %19022  ;;  %v18436_v44 = vunpack.i.h.bf16 %v20595_v50 }
 0x409   : > { %17593 = vmatpush3.bf16.msra.mxu1 %v20480_v15  ;;  %v2386_v33 = vpop.xlane.xlu1 %2385  ;;  %v2499_v37 = vmul.f32 %v19023_v19, %v20723_v63  ;;  %v17602_v15 = vpack.c.bf16 %v18426_v3, %v18425_v40  ;;  %v18431_v63 = vunpack.i.h.bf16 %v20573_v55  ;;  %v23717_v3 = vld [vmem:[#allocation44_spill] sm:$0xff] }
 0x40a   : > { %17599 = vmatprep.subr.bf16.mxu1 %v17598_v2  ;;  %19030 = vrcp.f32 %v2386_v33  ;;  %v18435_v33 = vunpack.i.l.bf16 %v20595_v50 }
 0x40b   : > { %v17606_v57 = vpack.c.bf16 %v18431_v63, %v18430_v21 }
 0x40c   : > { %v19025_v6 = vpop.eup %19024  ;;  %4470 = vrot.lane.b32.xlu0 %v20386_v31, %s19663_s10 }
 0x40d   : > { %v2395_v38 = vpop.xlane.xlu0 %2394  ;;  %v2498_v26 = vmul.f32 %v19025_v6, %v20728_v10  ;;  %v20886_v48 = vpop.eup %19026 }
 0x40e   : > { %v2456_v53 = vsel %vm2173_vm3, %v20886_v48, 0.0  ;;  %19032 = vrcp.f32 %v2395_v38 }
 0x40f   : > { %16508 = vmatprep.mubr.msk.f32.mxu0 %vm2173_vm3, %v2498_v26  ;;  %v23718_v26 = vld [vmem:[#allocation45_spill] sm:$0xff] }
 0x410   : > { %4559 = vrot.lane.b32.xlu0 %v20396_v51, %s19663_s10  ;;  %16509 = vmatmul.mubr.msk.f32.vlgmr.msra.gmra.mrb[42].mxu0 %vm2173_vm3, %v2499_v37  ;;  %v19029_v10 = vpop.eup %19028  ;;  %v23719_v37 = vld [vmem:[#allocation62_spill] sm:$0xff] }
 0x411   : > { %17597 = vmatpush3.bf16.msra.mxu0 %v17594_v58  ;;  %v20893_v27 = vpop.xlane.xlu0 %2418  ;;  %v2501_v8 = vmul.f32 %v19029_v10, %v20733_v59  ;;  %v18440_v10 = vunpack.i.l.bf16 %v23719_v37 }
 0x412   : > { %17603 = vmatprep.subr.bf16.mxu0 %v17602_v15  ;;  %2457 = vadd.xlane.f32.xlu1 %v2456_v53  ;;  %v18441_v53 = vunpack.i.h.bf16 %v23719_v37  ;;  %v23728_v37 = vld [vmem:[#allocation58_spill] sm:$0xff] }
 0x414   : > { %v19031_v29 = vpop.eup %19030  ;;  %18523 = vrot.lane.b32.xlu0 %v20133_v32, %s19662_s26 }
 0x415   : > { %v2401_v39 = vpop.xlane.xlu1 %2400  ;;  %v2500_v25 = vmul.f32 %v19031_v29, %v20739_v17 }
 0x416   : > { %v2392_v58 = vpop.xlane.xlu0 %2391 }
 0x417   : > { %19034 = vrcp.f32 %v2392_v58  ;;  %16515 = vmatprep.mubr.msk.f32.mxu1 %vm2173_vm3, %v2500_v25  ;;  %v17614_v25 = vpack.c.bf16 %v18441_v53, %v18440_v10 }
 0x418   : > { %4652 = vrot.lane.b32.xlu0 %v20333_v36, %s19663_s10  ;;  %16516 = vmatmul.mubr.msk.f32.vlgmr.msra.gmra.mrb[26].mxu1 %vm2173_vm3, %v2501_v8  ;;  %19036 = vrcp.f32 %v2401_v39  ;;  %v19033_v59 = vpop.eup %19032  ;;  %v23721_v39 = vld [vmem:[#allocation56_spill] sm:$0xff]  ;;  %v23723_v8 = vld [vmem:[#allocation30_spill] sm:$0xff] }
 0x419   : > { %17601 = vmatpush3.bf16.msra.mxu1 %v17598_v2  ;;  %v2398_v55 = vpop.xlane.xlu1 %2397  ;;  %v2503_v40 = vmul.f32 %v19033_v59, %v20745_v23  ;;  %v23720_v23 = vld [vmem:[#allocation46_spill] sm:$0xff]  ;;  %v23724_v59 = vld [vmem:[#allocation52_spill] sm:$0xff] }
 0x41a   : > { %17607 = vmatprep.subr.bf16.mxu1 %v17606_v57  ;;  %19038 = vrcp.f32 %v2398_v55  ;;  %v2416_v35 = vpop.xlane.xlu0 %2415 }
 0x41c   : > { %4741 = vrot.lane.b32.xlu0 %v20422_v42, %s19663_s10 }
 0x41e   : > { %v2431_v17 = vpop.xlane.xlu0 %2430 }
 0x420   : > { %18533 = vrot.lane.b32.xlu0 %v20157_v47, %s19662_s26 }
 0x421   : > { %v19035_v12 = vpop.eup %19034 }
 0x422   : > { %v2428_v19 = vpop.xlane.xlu0 %2427  ;;  %v2502_v2 = vmul.f32 %v19035_v12, %v20757_v24  ;;  %v19037_v6 = vpop.eup %19036  ;;  %v20923_v24 = vpack.c.bf16 %v18436_v44, %v18435_v33  ;;  %v23725_v12 = vld [vmem:[#allocation49_spill] sm:$0xff] }
 0x423   : > { %4379 = vrot.lane.b32.xlu1 %v23717_v3, %s19663_s10  ;;  %v2505_v21 = vmul.f32 %v19037_v6, %v20755_v61  ;;  %v23727_v6 = vld [vmem:[#allocation63_spill] sm:$0xff] }
 0x424   : > { %v19039_v38 = vpop.eup %19038  ;;  %4834 = vrot.lane.b32.xlu0 %v23718_v26, %s19663_s10  ;;  %16522 = vmatprep.mubr.msk.f32.mxu0 %vm2173_vm3, %v2502_v2  ;;  %v23726_v2 = vld [vmem:[#allocation23_spill] sm:$0xff] }
 0x425   : > { %16523 = vmatmul.mubr.msk.f32.vlgmr.msra.gmra.mrb[44].mxu0 %vm2173_vm3, %v2503_v40  ;;  %v2413_v50 = vpop.xlane.xlu1 %2412  ;;  %v2504_v29 = vmul.f32 %v19039_v38, %v20765_v56  ;;  %v18451_v40 = vunpack.i.h.bf16 %v23727_v6  ;;  %v18450_v38 = vunpack.i.l.bf16 %v23727_v6 }
 0x426   : > { %17605 = vmatpush3.bf16.msra.mxu0 %v17602_v15  ;;  %v2407_v63 = vpop.xlane.xlu0 %2406  ;;  %19040 = vrcp.f32 %v2413_v50  ;;  %v23722_v15 = vld [vmem:[#allocation25_spill] sm:$0xff] }
 0x427   : > { %17611 = vmatprep.subr.bf16.mxu0 %v20923_v24  ;;  %4468 = vrot.lane.b32.xlu1 %v23720_v23, %s19663_s10 }
 0x428   : > { %16529 = vmatprep.mubr.msk.f32.mxu1 %vm2173_vm3, %v2504_v29  ;;  %4923 = vrot.lane.b32.xlu0 %v23721_v39, %s19663_s10  ;;  %v23729_v29 = vld [vmem:[#allocation27_spill] sm:$0xff] }
 0x429   : > { %16530 = vmatmul.mubr.msk.f32.vlgmr.msra.gmra.mrb[28].mxu1 %vm2173_vm3, %v2505_v21  ;;  %v2410_v58 = vpop.xlane.xlu1 %2409  ;;  %v17622_v21 = vpack.c.bf16 %v18451_v40, %v18450_v38  ;;  %v23733_v40 = vld [vmem:[#allocation60_spill] sm:$0xff] }
 0x42a   : > { %17609 = vmatpush3.bf16.msra.mxu1 %v17606_v57  ;;  %19042 = vrcp.f32 %v2410_v58  ;;  %v2443_v56 = vpop.xlane.xlu0 %2442 }
 0x42b   : > { %17615 = vmatprep.subr.bf16.mxu1 %v17614_v25  ;;  %18518 = vrot.lane.b32.xlu1 %v23722_v15, %s19662_s26  ;;  %19044 = vrcp.f32 %v2416_v35 }
 0x42c   : > { %18543 = vrot.lane.b32.xlu0 %v23723_v8, %s19662_s26  ;;  %19046 = vrcp.f32 %v2407_v63 }
 0x42d   : > { %v2452_v61 = vpop.xlane.xlu1 %2451 }
 0x42e   : > { %v2404_v55 = vpop.xlane.xlu0 %2403 }
 0x42f   : > { %19048 = vrcp.f32 %v2404_v55  ;;  %4561 = vrot.lane.b32.xlu1 %v23724_v59, %s19663_s10 }
 0x430   : > { %5016 = vrot.lane.b32.xlu0 %v23725_v12, %s19663_s10  ;;  %19050 = vrcp.f32 %v20893_v27  ;;  %v19041_v33 = vpop.eup %19040 }
 0x431   : > { %v2425_v57 = vpop.xlane.xlu1 %2424  ;;  %19052 = vrcp.f32 %v2428_v19  ;;  %v2509_v19 = vmul.f32 %v19041_v33, %v20787_v60 }
 0x432   : > { %v2440_v44 = vpop.xlane.xlu0 %2439  ;;  %19054 = vrcp.f32 %v2431_v17  ;;  %v23730_v17 = vld [vmem:[#allocation51_spill] sm:$0xff] }
 0x433   : > { %4650 = vrot.lane.b32.xlu1 %v23726_v2, %s19663_s10  ;;  %19056 = vrcp.f32 %v2425_v57 }
 0x434   : > { %v19043_v35 = vpop.eup %19042  ;;  %5105 = vrot.lane.b32.xlu0 %v23728_v37, %s19663_s10 }
 0x435   : > { %v2422_v53 = vpop.xlane.xlu1 %2421  ;;  %v2508_v10 = vmul.f32 %v19043_v35, %v20797_v20  ;;  %v19045_v50 = vpop.eup %19044  ;;  %v23731_v20 = vld [vmem:[#allocation67_spill] sm:$0xff] }
 0x436   : > { %19058 = vrcp.f32 %v2422_v53  ;;  %v2455_v27 = vpop.xlane.xlu0 %2454  ;;  %v19047_v63 = vpop.eup %19046  ;;  %v18446_v55 = vunpack.i.h.bf16 %v23731_v20  ;;  %v18445_v57 = vunpack.i.l.bf16 %v23731_v20  ;;  %v2510_v38 = vmul.f32 %v19045_v50, %v20767_v46  ;;  %v23735_v46 = vld [vmem:[#allocation43_spill] sm:$0xff]  ;;  %v23737_v20 = vld [vmem:[#allocation65_spill] sm:$0xff] }
 0x437   : > { %18528 = vrot.lane.b32.xlu1 %v23729_v29, %s19662_s26  ;;  %16543 = vmatprep.mubr.msk.f32.mxu1 %vm2173_vm3, %v2508_v10  ;;  %19060 = vrcp.f32 %v2440_v44  ;;  %v23732_v44 = vld [vmem:[#allocation55_spill] sm:$0xff]  ;;  %v2507_v35 = vmul.f32 %v19047_v63, %v20789_v45 }
 0x438   : > { %5196 = vrot.lane.b32.xlu0 %v23730_v17, %s19663_s10  ;;  %16544 = vmatmul.mubr.msk.f32.vlgmr.msra.gmra.mrb[30].mxu1 %vm2173_vm3, %v2509_v19  ;;  %19062 = vrcp.f32 %v2443_v56  ;;  %v23734_v56 = vld [vmem:[#allocation64_spill] sm:$0xff] }
 0x439   : > { %v19049_v58 = vpop.eup %19048  ;;  %17617 = vmatpush3.bf16.msra.mxu1 %v17614_v25  ;;  %19064 = vrcp.f32 %v2452_v61  ;;  %v18456_v53 = vunpack.i.h.bf16 %v23734_v56  ;;  %v18455_v10 = vunpack.i.l.bf16 %v23734_v56 }
 0x43a   : > { %17623 = vmatprep.subr.bf16.mxu1 %v17622_v21  ;;  %v2437_v60 = vpop.xlane.xlu0 %2436  ;;  %v2506_v33 = vmul.f32 %v19049_v58, %v20808_v4  ;;  %v19051_v6 = vpop.eup %19050  ;;  %19066 = vrcp.f32 %v2455_v27  ;;  %v17618_v4 = vpack.c.bf16 %v18446_v55, %v18445_v57  ;;  %v23736_v27 = vld [vmem:[#allocation17_spill] sm:$0xff]  ;;  %v18460_v55 = vunpack.i.l.bf16 %v23737_v20 }
 0x43b   : > { %4743 = vrot.lane.b32.xlu1 %v23732_v44, %s19663_s10  ;;  %v19053_v25 = vpop.eup %19052  ;;  %19068 = vrcp.f32 %v2437_v60  ;;  %v2511_v50 = vmul.f32 %v19051_v6, %v20750_v0  ;;  %v17626_v57 = vpack.c.bf16 %v18456_v53, %v18455_v10  ;;  %v23741_v10 = vld [vmem:[#allocation69_spill] sm:$0xff] }
 0x43c   : > { %5287 = vrot.lane.b32.xlu0 %v23733_v40, %s19663_s10  ;;  %16536 = vmatprep.mubr.msk.f32.mxu0 %vm2173_vm3, %v2506_v33  ;;  %v19055_v61 = vpop.eup %19054  ;;  %v2514_v58 = vmul.f32 %v19053_v25, %v20781_v41  ;;  %v23739_v41 = vld [vmem:[#allocation29_spill] sm:$0xff] }
 0x43d   : > { %16537 = vmatmul.mubr.msk.f32.vlgmr.msra.gmra.mrb[46].mxu0 %vm2173_vm3, %v2507_v35  ;;  %v19057_v19 = vpop.eup %19056  ;;  %v23738_v35 = vld [vmem:[#allocation66_spill] sm:$0xff]  ;;  %v2515_v25 = vmul.f32 %v19055_v61, %v20775_v9 }
 0x43e   : > { %17613 = vmatpush3.bf16.msra.mxu0 %v20923_v24  ;;  %16550 = vmatprep.mubr.msk.f32.mxu0 %vm2173_vm3, %v2510_v38  ;;  %v2434_v45 = vpop.xlane.xlu0 %2433  ;;  %v18461_v24 = vunpack.i.h.bf16 %v23737_v20  ;;  %v18466_v38 = vunpack.i.h.bf16 %v23738_v35  ;;  %v18465_v0 = vunpack.i.l.bf16 %v23738_v35  ;;  %v2513_v6 = vmul.f32 %v19057_v19, %v20816_v7 }
 0x43f   : > { %17619 = vmatprep.subr.bf16.mxu0 %v17618_v4  ;;  %19070 = vrcp.f32 %v2434_v45  ;;  %4832 = vrot.lane.b32.xlu1 %v23735_v46, %s19663_s10  ;;  %v18471_v45 = vunpack.i.h.bf16 %v23741_v10 }
 0x440   : > { %v19059_v63 = vpop.eup %19058  ;;  %18558 = vrot.lane.b32.xlu0 %v23736_v27, %s19664_s8  ;;  %v17630_v7 = vpack.c.bf16 %v18461_v24, %v18460_v55  ;;  %v17634_v9 = vpack.c.bf16 %v18466_v38, %v18465_v0  ;;  %v23744_v55 = vld [vmem:[#allocation21_spill] sm:$0xff] }
 0x441   : > { %16551 = vmatmul.mubr.msk.f32.vlgmr.msra.gmra.mrb[48].mxu0 %vm2173_vm3, %v2511_v50  ;;  %v2512_v60 = vmul.f32 %v19059_v63, %v20824_v30  ;;  %v19061_v33 = vpop.eup %19060  ;;  %v23740_v30 = vld [vmem:[#allocation19_spill] sm:$0xff] }
 0x442   : > { %17621 = vmatpush3.bf16.msra.mxu0 %v17618_v4  ;;  %16564 = vmatprep.mubr.msk.f32.mxu0 %vm2173_vm3, %v2514_v58  ;;  %v19063_v56 = vpop.eup %19062  ;;  %v18470_v4 = vunpack.i.l.bf16 %v23741_v10  ;;  %v2518_v50 = vmul.f32 %v19061_v33, %v20818_v34  ;;  %v23742_v58 = vld [vmem:[#allocation57_spill] sm:$0xff]  ;;  %v23746_v33 = vld [vmem:[#allocation47_spill] sm:$0xff]  ;;  %v2449_v10 = vpop.xlane.xlu0 %2448 }
 0x443   : > { %17627 = vmatprep.subr.bf16.mxu0 %v17626_v57  ;;  %18538 = vrot.lane.b32.xlu1 %v23739_v41, %s19662_s26  ;;  %v19065_v53 = vpop.eup %19064  ;;  %v2519_v19 = vmul.f32 %v19063_v56, %v20799_v28  ;;  %v23743_v34 = vld [vmem:[#allocation81_spill] sm:$0xff]  ;;  %v23749_v56 = vld [vmem:[#allocation31_spill] sm:$0xff]  ;;  %19072 = vrcp.f32 %v2449_v10 }
 0x444   : > { %16557 = vmatprep.mubr.msk.f32.mxu1 %vm2173_vm3, %v2512_v60  ;;  %18568 = vrot.lane.b32.xlu0 %v23740_v30, %s19664_s8  ;;  %v19067_v61 = vpop.eup %19066  ;;  %v2522_v20 = vmul.f32 %v19065_v53, %v20806_v14  ;;  %v17642_v35 = vpack.c.bf16 %v18471_v45, %v18470_v4  ;;  %v18501_v24 = vunpack.i.h.bf16 %v23743_v34  ;;  %v23750_v53 = vld [vmem:[#allocation59_spill] sm:$0xff]  ;;  %v23751_v45 = vld [vmem:[#allocation77_spill] sm:$0xff] }
 0x445   : > { %16558 = vmatmul.mubr.msk.f32.vlgmr.msra.gmra.mrb[32].mxu1 %vm2173_vm3, %v2513_v6  ;;  %16565 = vmatmul.mubr.msk.f32.vlgmr.msra.gmra.mrb[50].mxu0 %vm2173_vm3, %v2515_v25  ;;  %v19069_v63 = vpop.eup %19068  ;;  %v2523_v38 = vmul.f32 %v19067_v61, %v20826_v54  ;;  %v23747_v6 = vld [vmem:[#allocation71_spill] sm:$0xff]  ;;  %v18491_v4 = vunpack.i.h.bf16 %v23751_v45  ;;  %v23753_v61 = vld [vmem:[#allocation73_spill] sm:$0xff] }
 0x446   : > { %17625 = vmatpush3.bf16.msra.mxu1 %v17622_v21  ;;  %17629 = vmatpush3.bf16.msra.mxu0 %v17626_v57  ;;  %v18500_v21 = vunpack.i.l.bf16 %v23743_v34  ;;  %v2517_v14 = vmul.f32 %v19069_v63, %v20832_v18  ;;  %v18480_v25 = vunpack.i.l.bf16 %v23747_v6  ;;  %v23748_v18 = vld [vmem:[#allocation70_spill] sm:$0xff]  ;;  %v23754_v63 = vld [vmem:[#allocation76_spill] sm:$0xff]  ;;  %v23756_v34 = vld [vmem:[#allocation15_spill] sm:$0xff] }
 0x447   : > { %16578 = vmatprep.mubr.msk.f32.mxu0 %vm2173_vm3, %v2518_v50  ;;  %17631 = vmatprep.subr.bf16.mxu1 %v17630_v7  ;;  %v18490_v50 = vunpack.i.l.bf16 %v23751_v45 }
 0x448   : > { %17635 = vmatprep.subr.bf16.mxu0 %v17634_v9  ;;  %4925 = vrot.lane.b32.xlu1 %v23742_v58, %s19663_s10  ;;  %v17638_v0 = vpack.c.bf16 %v18501_v24, %v18500_v21  ;;  %v4287_v24 = vpop.permute.xlu1 %4286 }
 0x449   : > { %v19071_v60 = vpop.eup %19070  ;;  %18578 = vrot.lane.b32.xlu0 %v23744_v55, %s19664_s8  ;;  %16579 = vmatmul.mubr.msk.f32.vlgmr.msra.gmra.mrb[52].mxu0 %vm2173_vm3, %v2519_v19  ;;  %v18504_v19 = vpop.permute.xlu0 %18503 }
 0x44a   : > { %17637 = vmatpush3.bf16.msra.mxu0 %v17634_v9  ;;  %16592 = vmatprep.mubr.msk.f32.mxu0 %vm2173_vm3, %v2522_v20  ;;  %v2516_v28 = vmul.f32 %v19071_v60, %v20836_v1  ;;  %v18481_v1 = vunpack.i.h.bf16 %v23747_v6  ;;  %v17666_v9 = vpack.c.bf16 %v18491_v4, %v18490_v50  ;;  %v23755_v20 = vld [vmem:[#allocation61_spill] sm:$0xff]  ;;  %v18506_v60 = vunpack.i.h.bf16 %v18504_v19 }
 0x44b   : > { %17644 = vmatprep.subr.msk.bf16.mxu0 %vm20266_vm2, %v17642_v35 }
 0x44c   : > { %5014 = vrot.lane.b32.xlu1 %v23746_v33, %s19663_s10  ;;  %16571 = vmatprep.mubr.msk.f32.mxu1 %vm2173_vm3, %v2516_v28  ;;  %v17654_v54 = vpack.c.bf16 %v18481_v1, %v18480_v25  ;;  %v23757_v28 = vld [vmem:[#allocation79_spill] sm:$0xff] }
 0x44d   : > { %18588 = vrot.lane.b32.xlu0 %v20096_v16, %s19664_s8  ;;  %16572 = vmatmul.mubr.msk.f32.vlgmr.msra.gmra.mrb[34].mxu1 %vm2173_vm3, %v2517_v14  ;;  %v23758_v14 = vld [vmem:[#allocation18_spill] sm:$0xff]  ;;  %v19073_v1 = vpop.eup %19072 }
 0x44e   : > { %17633 = vmatpush3.bf16.msra.mxu1 %v17630_v7  ;;  %16593 = vmatmul.mubr.msk.f32.vlgmr.msra.gmra.mrb[54].mxu0 %vm2173_vm3, %v2523_v38  ;;  %v23752_v7 = vld [vmem:[#allocation53_spill] sm:$0xff]  ;;  %v23759_v38 = vld [vmem:[#allocation20_spill] sm:$0xff] }
 0x44f   : > { %17639 = vmatprep.subr.bf16.mxu1 %v17638_v0  ;;  %16606 = vmatprep.mubr.msk.f32.mxu0 %vm722_vm1, %v23748_v18  ;;  %v23760_v18 = vld [vmem:[#allocation68_spill] sm:$0xff] }
 0x450   : > { %18548 = vrot.lane.b32.xlu1 %v23749_v56, %s19662_s26  ;;  %v18475_v45 = vunpack.i.l.bf16 %v23760_v18 }
 0x453   : > { %17647 = vmatpush3.bf16.xpose.msk.msra.mxu0 %vm20266_vm2, %v17642_v35  ;;  %v18505_v35 = vunpack.i.l.bf16 %v18504_v19 }
 0x454   : > { %17656 = vmatprep.subr.msk.bf16.mxu0 %vm20266_vm2, %v17654_v54  ;;  %5107 = vrot.lane.b32.xlu1 %v23750_v53, %s19663_s10 }
 0x455   : > { %v17678_v21 = vpack.c.bf16 %v18506_v60, %v18505_v35 }
 0x458   : > { %5198 = vrot.lane.b32.xlu1 %v23752_v7, %s19663_s10 }
 0x45a   : > { %16607 = vmatmul.mubr.msk.f32.vlgmr.msra.gmra.mrb[56].mxu0 %vm722_vm1, %v23753_v61 }
 0x45b   : > { %17659 = vmatpush3.bf16.xpose.msk.msra.mxu0 %vm20266_vm2, %v17654_v54  ;;  %16620 = vmatprep.mubr.msk.f32.mxu0 %vm722_vm1, %v23754_v63  ;;  %v18476_v54 = vunpack.i.h.bf16 %v23760_v18 }
 0x45c   : > { %17668 = vmatprep.subr.msk.bf16.mxu0 %vm20266_vm2, %v17666_v9  ;;  %5289 = vrot.lane.b32.xlu1 %v23755_v20, %s19663_s10 }
 0x45d   : > { %v17648_v10 = vpack.c.bf16 %v18476_v54, %v18475_v45 }
 0x460   : > { %18553 = vrot.lane.b32.xlu1 %v23756_v34, %s19664_s8 }
 0x462   : > { %16621 = vmatmul.mubr.msk.f32.vlgmr.msra.gmra.mrb[58].mxu0 %vm722_vm1, %v23757_v28 }
 0x463   : > { %17671 = vmatpush3.bf16.xpose.msk.msra.mxu0 %vm20266_vm2, %v17666_v9  ;;  %16634 = vmatprep.mubr.msk.f32.mxu0 %vm722_vm1, %v4287_v24  ;;  %v2521_v9 = vmul.f32 %v19073_v1, %v20840_v62 }
 0x464   : > { %17680 = vmatprep.subr.msk.bf16.mxu0 %vm20266_vm2, %v17678_v21  ;;  %18563 = vrot.lane.b32.xlu1 %v23758_v14, %s19664_s8 }
 0x468   : > { %18573 = vrot.lane.b32.xlu1 %v23759_v38, %s19664_s8 }
 0x46a   : > { %v2446_v6 = vpop.xlane.xlu1 %2445 }
 0x46b   : > { %19074 = vrcp.f32 %v2446_v6 }
 0x46c   : > { %18583 = vrot.lane.b32.xlu1 %v20084_v11, %s19664_s8 }
 0x46e   : > { %v18509_v28 = vpop.permute.xlu1 %18508 }
 0x470   : > { %18593 = vrot.lane.b32.xlu1 %v20107_v22, %s19664_s8 }
 0x475   : > { %v19075_v25 = vpop.eup %19074 }
 0x476   : > { %v2520_v4 = vmul.f32 %v19075_v25, %v20850_v49 }
 0x477   : > { %v2461_v50 = vpop.xlane.xlu0 %2460 }
 0x478   : > { %16585 = vmatprep.mubr.msk.f32.mxu1 %vm2173_vm3, %v2520_v4  ;;  %19076 = vrcp.f32 %v2461_v50 }
 0x479   : > { %16586 = vmatmul.mubr.msk.f32.vlgmr.msra.gmra.mrb[36].mxu1 %vm2173_vm3, %v2521_v9 }
 0x47a   : > { %17641 = vmatpush3.bf16.msra.mxu1 %v17638_v0 }
 0x47b   : > { %17650 = vmatprep.subr.msk.bf16.mxu1 %vm20266_vm2, %v17648_v10  ;;  %v4289_v61 = vpop.permute.xlu0 %4288 }
 0x47c   : > { %16635 = vmatmul.mubr.msk.f32.vlgmr.msra.gmra.mrb[60].mxu0 %vm722_vm1, %v4289_v61 }
 0x47d   : > { %17683 = vmatpush3.bf16.xpose.msk.msra.mxu0 %vm20266_vm2, %v17678_v21 }
 0x47f   : > { %v21074_v19 = vpop.permute.xlu0 %4377 }
 0x482   : > { %v19077_v9 = vpop.eup %19076 }
 0x483   : > { %v18514_v49 = vpop.permute.xlu0 %18513 }
 0x484   : > { %v18516_v63 = vunpack.i.h.bf16 %v18514_v49  ;;  %v18515_v62 = vunpack.i.l.bf16 %v18514_v49 }
 0x486   : > { %v17690_v60 = vpack.c.bf16 %v18516_v63, %v18515_v62  ;;  %v23761_v63 = vld [vmem:[#allocation72_spill] sm:$0xff] }
 0x487   : > { %v4471_v35 = vpop.permute.xlu0 %4470  ;;  %v18486_v62 = vunpack.i.h.bf16 %v23761_v63  ;;  %v18485_v50 = vunpack.i.l.bf16 %v23761_v63  ;;  %v23762_v63 = vld [vmem:[#allocation75_spill] sm:$0xff] }
 0x488   : > { %17692 = vmatprep.subr.msk.bf16.mxu0 %vm20266_vm2, %v17690_v60 }
 0x48b   : > { %v21078_v0 = vpop.permute.xlu0 %4559 }
 0x48f   : > { %v18524_v24 = vpop.permute.xlu0 %18523 }
 0x490   : > { %v18526_v18 = vunpack.i.h.bf16 %v18524_v24  ;;  %v18525_v54 = vunpack.i.l.bf16 %v18524_v24 }
 0x492   : > { %v17702_v61 = vpack.c.bf16 %v18526_v18, %v18525_v54  ;;  %v17660_v18 = vpack.c.bf16 %v18486_v62, %v18485_v50 }
 0x493   : > { %v4653_v6 = vpop.permute.xlu0 %4652 }
 0x497   : > { %v21080_v25 = vpop.permute.xlu0 %4741 }
 0x49b   : > { %v18534_v4 = vpop.permute.xlu0 %18533 }
 0x49f   : > { %v2458_v1 = vpop.xlane.xlu1 %2457 }
 0x4a0   : > { %19078 = vrcp.f32 %v2458_v1 }
 0x4a3   : > { %v21082_v21 = vpop.permute.xlu1 %4379 }
 0x4a7   : > { %v4469_v45 = vpop.permute.xlu1 %4468 }
 0x4a8   : > { %16648 = vmatprep.mubr.msk.f32.mxu0 %vm722_vm1, %v4469_v45  ;;  %v2525_v45 = vmul.f32 %v19077_v9, %v20854_v5  ;;  %v18536_v9 = vunpack.i.h.bf16 %v18534_v4 }
 0x4a9   : > { %16649 = vmatmul.mubr.msk.f32.vlgmr.msra.gmra.mrb[62].mxu0 %vm722_vm1, %v4471_v35  ;;  %v4835_v35 = vpop.permute.xlu0 %4834 }
 0x4aa   : > { %v19079_v49 = vpop.eup %19078  ;;  %17695 = vmatpush3.bf16.xpose.msk.msra.mxu0 %vm20266_vm2, %v17690_v60  ;;  %v23763_v60 = vld [vmem:[#allocation78_spill] sm:$0xff] }
 0x4ab   : > { %17704 = vmatprep.subr.msk.bf16.mxu0 %vm20266_vm2, %v17702_v61  ;;  %v18519_v24 = vpop.permute.xlu1 %18518  ;;  %v2524_v1 = vmul.f32 %v19079_v49, %v20886_v48  ;;  %v18496_v48 = vunpack.i.h.bf16 %v23763_v60  ;;  %v18495_v5 = vunpack.i.l.bf16 %v23763_v60  ;;  %v18535_v49 = vunpack.i.l.bf16 %v18534_v4 }
 0x4ac   : > { %v18510_v60 = vunpack.i.l.bf16 %v18509_v28 }
 0x4ad   : > { %16599 = vmatprep.mubr.msk.f32.mxu1 %vm2173_vm3, %v2524_v1  ;;  %v4924_v50 = vpop.permute.xlu0 %4923  ;;  %v17714_v1 = vpack.c.bf16 %v18536_v9, %v18535_v49 }
 0x4ae   : > { %16600 = vmatmul.mubr.msk.f32.vlgmr.msra.gmra.mrb[38].mxu1 %vm2173_vm3, %v2525_v45  ;;  %v23764_v45 = vld [vmem:[#allocation74_spill] sm:$0xff] }
 0x4af   : > { %17653 = vmatpush3.bf16.xpose.msk.msra.mxu1 %vm20266_vm2, %v17648_v10  ;;  %v4562_v54 = vpop.permute.xlu1 %4561  ;;  %16613 = vmatprep.mubr.msk.f32.mxu1 %vm722_vm1, %v23762_v63  ;;  %v17672_v10 = vpack.c.bf16 %v18496_v48, %v18495_v5  ;;  %v23765_v63 = vld [vmem:[#allocation82_spill] sm:$0xff] }
 0x4b0   : > { %17662 = vmatprep.subr.msk.bf16.mxu1 %vm20266_vm2, %v17660_v18 }
 0x4b1   : > { %v18544_v48 = vpop.permute.xlu0 %18543 }
 0x4b2   : > { %v18546_v9 = vunpack.i.h.bf16 %v18544_v48  ;;  %v18545_v49 = vunpack.i.l.bf16 %v18544_v48 }
 0x4b3   : > { %v4651_v62 = vpop.permute.xlu1 %4650 }
 0x4b4   : > { %16662 = vmatprep.mubr.msk.f32.mxu0 %vm722_vm1, %v4651_v62  ;;  %v23766_v62 = vld [vmem:[#allocation80_spill] sm:$0xff] }
 0x4b5   : > { %16663 = vmatmul.mubr.msk.f32.vlgmr.msra.gmra.mrb[64].mxu0 %vm722_vm1, %v4653_v6  ;;  %v18511_v6 = vunpack.i.h.bf16 %v18509_v28  ;;  %v17726_v28 = vpack.c.bf16 %v18546_v9, %v18545_v49 }
 0x4b6   : > { %16614 = vmatmul.mubr.msk.f32.vlgmr.msra.gmra.mrb[40].mxu1 %vm722_vm1, %v23764_v45  ;;  %17707 = vmatpush3.bf16.xpose.msk.msra.mxu0 %vm20266_vm2, %v17702_v61  ;;  %v18521_v45 = vunpack.i.h.bf16 %v18519_v24 }
 0x4b7   : > { %17665 = vmatpush3.bf16.xpose.msk.msra.mxu1 %vm20266_vm2, %v17660_v18  ;;  %16627 = vmatprep.mubr.msk.f32.mxu1 %vm722_vm1, %v23765_v63  ;;  %v18529_v4 = vpop.permute.xlu1 %18528  ;;  %v17684_v61 = vpack.c.bf16 %v18511_v6, %v18510_v60  ;;  %v18520_v63 = vunpack.i.l.bf16 %v18519_v24  ;;  %v5017_v6 = vpop.permute.xlu0 %5016 }
 0x4b8   : > { %17716 = vmatprep.subr.msk.bf16.mxu0 %vm20266_vm2, %v17714_v1  ;;  %17674 = vmatprep.subr.msk.bf16.mxu1 %vm20266_vm2, %v17672_v10  ;;  %v18530_v60 = vunpack.i.l.bf16 %v18529_v4 }
 0x4bb   : > { %v4744_v5 = vpop.permute.xlu1 %4743  ;;  %v5106_v24 = vpop.permute.xlu0 %5105 }
 0x4be   : > { %16628 = vmatmul.mubr.msk.f32.vlgmr.msra.gmra.mrb[42].mxu1 %vm722_vm1, %v23766_v62 }
 0x4bf   : > { %17677 = vmatpush3.bf16.xpose.msk.msra.mxu1 %vm20266_vm2, %v17672_v10  ;;  %16641 = vmatprep.mubr.msk.f32.mxu1 %vm722_vm1, %v21074_v19  ;;  %v4833_v18 = vpop.permute.xlu1 %4832  ;;  %v17696_v19 = vpack.c.bf16 %v18521_v45, %v18520_v63 }
 0x4c0   : > { %17686 = vmatprep.subr.msk.bf16.mxu1 %vm20266_vm2, %v17684_v61  ;;  %16676 = vmatprep.mubr.msk.f32.mxu0 %vm722_vm1, %v4833_v18 }
 0x4c1   : > { %16677 = vmatmul.mubr.msk.f32.vlgmr.msra.gmra.mrb[66].mxu0 %vm722_vm1, %v4835_v35 }
 0x4c2   : > { %17719 = vmatpush3.bf16.xpose.msk.msra.mxu0 %vm20266_vm2, %v17714_v1  ;;  %v18531_v1 = vunpack.i.h.bf16 %v18529_v4 }
 0x4c3   : > { %17728 = vmatprep.subr.msk.bf16.mxu0 %vm20266_vm2, %v17726_v28  ;;  %v18539_v10 = vpop.permute.xlu1 %18538 }
 0x4c4   : > { %v17708_v9 = vpack.c.bf16 %v18531_v1, %v18530_v60 }
 0x4c6   : > { %16642 = vmatmul.mubr.msk.f32.vlgmr.msra.gmra.mrb[44].mxu1 %vm722_vm1, %v21082_v21  ;;  %v5197_v21 = vpop.permute.xlu0 %5196 }
 0x4c7   : > { %17689 = vmatpush3.bf16.xpose.msk.msra.mxu1 %vm20266_vm2, %v17684_v61  ;;  %16655 = vmatprep.mubr.msk.f32.mxu1 %vm722_vm1, %v21078_v0  ;;  %v4926_v35 = vpop.permute.xlu1 %4925  ;;  %v18540_v61 = vunpack.i.l.bf16 %v18539_v10 }
 0x4c8   : > { %17698 = vmatprep.subr.msk.bf16.mxu1 %vm20266_vm2, %v17696_v19 }
 0x4cb   : > { %v5015_v48 = vpop.permute.xlu1 %5014 }
 0x4cc   : > { %16690 = vmatprep.mubr.msk.f32.mxu0 %vm722_vm1, %v5015_v48 }
 0x4cd   : > { %16691 = vmatmul.mubr.msk.f32.vlgmr.msra.gmra.mrb[68].mxu0 %vm722_vm1, %v5017_v6 }
 0x4ce   : > { %16656 = vmatmul.mubr.msk.f32.vlgmr.msra.gmra.mrb[46].mxu1 %vm722_vm1, %v4562_v54  ;;  %17731 = vmatpush3.bf16.xpose.msk.msra.mxu0 %vm20266_vm2, %v17726_v28  ;;  %v18541_v54 = vunpack.i.h.bf16 %v18539_v10  ;;  %v5288_v28 = vpop.permute.xlu0 %5287 }
 0x4cf   : > { %17701 = vmatpush3.bf16.xpose.msk.msra.mxu1 %vm20266_vm2, %v17696_v19  ;;  %16669 = vmatprep.mubr.msk.f32.mxu1 %vm722_vm1, %v21080_v25  ;;  %v18549_v0 = vpop.permute.xlu1 %18548 }
 0x4d0   : > { %16704 = vmatprep.mubr.msk.f32.mxu0 %vm722_vm1, %v5197_v21  ;;  %17710 = vmatprep.subr.msk.bf16.mxu1 %vm20266_vm2, %v17708_v9  ;;  %v21152_v4 = vpop.f32.mrb[40].mxu0  ;;  %v17720_v18 = vpack.c.bf16 %v18541_v54, %v18540_v61  ;;  %v18551_v45 = vunpack.i.h.bf16 %v18549_v0  ;;  %v18550_v63 = vunpack.i.l.bf16 %v18549_v0 }
 0x4d1   : > { %23767 = vst [vmem:[#allocation62_spill] sm:$0xff] %v21152_v4  ;;  %v21154_v49 = vpop.f32.mrb[41].mxu0 }
 0x4d2   : > { %23768 = vst [vmem:[#allocation30_spill] sm:$0xff] %v21154_v49  ;;  %v18559_v1 = vpop.permute.xlu0 %18558 }
 0x4d3   : > { %v5108_v62 = vpop.permute.xlu1 %5107  ;;  %v18560_v21 = vunpack.i.l.bf16 %v18559_v1 }
 0x4d6   : > { %16670 = vmatmul.mubr.msk.f32.vlgmr.msra.gmra.mrb[48].mxu1 %vm722_vm1, %v4744_v5  ;;  %v17732_v5 = vpack.c.bf16 %v18551_v45, %v18550_v63  ;;  %v18569_v63 = vpop.permute.xlu0 %18568 }
 0x4d7   : > { %17713 = vmatpush3.bf16.xpose.msk.msra.mxu1 %vm20266_vm2, %v17708_v9  ;;  %16683 = vmatprep.mubr.msk.f32.mxu1 %vm722_vm1, %v4924_v50  ;;  %v5199_v25 = vpop.permute.xlu1 %5198  ;;  %v18561_v9 = vunpack.i.h.bf16 %v18559_v1  ;;  %v18571_v1 = vunpack.i.h.bf16 %v18569_v63 }
 0x4d8   : > { %17722 = vmatprep.subr.msk.bf16.mxu1 %vm20266_vm2, %v17720_v18  ;;  %16705 = vmatmul.mubr.msk.f32.vlgmr.msra.gmra.mrb[70].mxu0 %vm722_vm1, %v5199_v25 }
 0x4da   : > { %v21381_v58 = vpop.permute.xlu0 %18578 }
 0x4db   : > { %v21163_v6 = vpop.f32.mrb[24].mxu1  ;;  %v5290_v10 = vpop.permute.xlu1 %5289 }
 0x4dc   : > { %23769 = vst [vmem:[#allocation63_spill] sm:$0xff] %v21163_v6  ;;  %v21165_v19 = vpop.f32.mrb[25].mxu1 }
 0x4dd   : > { %23770 = vst [vmem:[#allocation67_spill] sm:$0xff] %v21165_v19 }
 0x4de   : > { %16684 = vmatmul.mubr.msk.f32.vlgmr.msra.gmra.mrb[50].mxu1 %vm722_vm1, %v4926_v35  ;;  %v21385_v43 = vpop.permute.xlu0 %18588 }
 0x4df   : > { %17725 = vmatpush3.bf16.xpose.msk.msra.mxu1 %vm20266_vm2, %v17720_v18  ;;  %16697 = vmatprep.mubr.msk.f32.mxu1 %vm722_vm1, %v5106_v24  ;;  %v18554_v50 = vpop.permute.xlu1 %18553  ;;  %v17742_v24 = vpack.c.bf16 %v18561_v9, %v18560_v21 }
 0x4e0   : > { %v18556_v60 = vunpack.i.h.bf16 %v18554_v50  ;;  %v18555_v48 = vunpack.i.l.bf16 %v18554_v50  ;;  %17734 = vmatprep.subr.msk.bf16.mxu1 %vm20266_vm2, %v17732_v5  ;;  %v18570_v50 = vunpack.i.l.bf16 %v18569_v63 }
 0x4e2   : > { %v17738_v0 = vpack.c.bf16 %v18556_v60, %v18555_v48 }
 0x4e3   : > { %v18564_v54 = vpop.permute.xlu1 %18563  ;;  %v21173_v61 = vpop.f32.mrb[42].mxu0 }
 0x4e4   : > { %23771 = vst [vmem:[#allocation64_spill] sm:$0xff] %v21173_v61  ;;  %v18566_v25 = vunpack.i.h.bf16 %v18564_v54  ;;  %v18565_v35 = vunpack.i.l.bf16 %v18564_v54  ;;  %v21175_v45 = vpop.f32.mrb[43].mxu0  ;;  %17739 = vmatprep.subr.bf16.mxu0 %v17738_v0 }
 0x4e5   : > { %23772 = vst [vmem:[#allocation65_spill] sm:$0xff] %v21175_v45  ;;  %17741 = vmatpush3.bf16.msra.mxu0 %v17738_v0 }
 0x4e6   : > { %16698 = vmatmul.mubr.msk.f32.vlgmr.msra.gmra.mrb[52].mxu1 %vm722_vm1, %v5108_v62  ;;  %v21178_v18 = vpack.c.bf16 %v18566_v25, %v18565_v35  ;;  %v21189_v62 = vpack.c.bf16 %v18571_v1, %v18570_v50 }
 0x4e7   : > { %17737 = vmatpush3.bf16.xpose.msk.msra.mxu1 %vm20266_vm2, %v17732_v5  ;;  %16711 = vmatprep.mubr.msk.f32.mxu1 %vm722_vm1, %v5288_v28 }
 0x4e8   : > { %17743 = vmatprep.subr.bf16.mxu1 %v17742_v24  ;;  %17747 = vmatprep.subr.bf16.mxu0 %v21178_v18 }
 0x4eb   : > { %v21184_v60 = vpop.f32.mrb[26].mxu1 }
 0x4ec   : > { %23773 = vst [vmem:[#allocation66_spill] sm:$0xff] %v21184_v60  ;;  %v21186_v48 = vpop.f32.mrb[27].mxu1 }
 0x4ed   : > { %23774 = vst [vmem:[#allocation69_spill] sm:$0xff] %v21186_v48 }
 0x4ee   : > { %16712 = vmatmul.mubr.msk.f32.vlgmr.msra.gmra.mrb[54].mxu1 %vm722_vm1, %v5290_v10 }
 0x4ef   : > { %17745 = vmatpush3.bf16.msra.mxu1 %v17742_v24 }
 0x4f0   : > { %17751 = vmatprep.subr.bf16.mxu1 %v21189_v62 }
 0x4f8   : > { %v21192_v9 = vpop.f32.mrb[44].mxu0 }
 0x4f9   : > { %23775 = vst [vmem:[#allocation81_spill] sm:$0xff] %v21192_v9  ;;  %v21194_v5 = vpop.f32.mrb[45].mxu0 }
 0x4fa   : > { %23776 = vst [vmem:[#allocation71_spill] sm:$0xff] %v21194_v5 }
 0x4fc   : > { %v21196_v28 = vpop.f32.mrb[28].mxu1 }
 0x4fd   : > { %23777 = vst [vmem:[#allocation70_spill] sm:$0xff] %v21196_v28  ;;  %v21198_v21 = vpop.f32.mrb[29].mxu1 }
 0x4fe   : > { %23778 = vst [vmem:[#allocation31_spill] sm:$0xff] %v21198_v21 }
 0x50b   : > { %v21200_v0 = vpop.f32.mrb[30].mxu1 }
 0x50c   : > { %23779 = vst [vmem:[#allocation77_spill] sm:$0xff] %v21200_v0  ;;  %v21202_v54 = vpop.f32.mrb[31].mxu1 }
 0x50d   : > { %23780 = vst [vmem:[#allocation73_spill] sm:$0xff] %v21202_v54 }
 0x510   : > { %v21204_v25 = vpop.f32.mrb[46].mxu0 }
 0x511   : > { %23781 = vst [vmem:[#allocation76_spill] sm:$0xff] %v21204_v25  ;;  %v21206_v10 = vpop.f32.mrb[47].mxu0 }
 0x512   : > { %23782 = vst [vmem:[#allocation15_spill] sm:$0xff] %v21206_v10 }
 0x514   : > { %v21208_v35 = vpop.f32.mrb[48].mxu0 }
 0x515   : > { %23783 = vst [vmem:[#allocation79_spill] sm:$0xff] %v21208_v35  ;;  %v21210_v24 = vpop.f32.mrb[49].mxu0 }
 0x516   : > { %23784 = vst [vmem:[#allocation18_spill] sm:$0xff] %v21210_v24  ;;  %v21232_v24 = vld [vmem:[#allocation7 + $0x18] sm:$0xff] }
 0x518   : > { %v21212_v63 = vpop.f32.mrb[32].mxu1  ;;  %v21214_v1 = vpop.f32.mrb[50].mxu0 }
 0x519   : > { %23785 = vst [vmem:[#allocation20_spill] sm:$0xff] %v21212_v63  ;;  %23786 = vst [vmem:[#allocation68_spill] sm:$0xff] %v21214_v1  ;;  %v21216_v50 = vpop.f32.mrb[33].mxu1  ;;  %v21218_v28 = vpop.f32.mrb[51].mxu0  ;;  %v21234_v1 = vld [vmem:[#allocation7 + $0x10] sm:$0xff] }
 0x51a   : > { %23787 = vst [vmem:[#allocation72_spill] sm:$0xff] %v21216_v50  ;;  %23788 = vst [vmem:[#allocation75_spill] sm:$0xff] %v21218_v28 }
 0x51c   : > { %v21220_v21 = vpop.f32.mrb[52].mxu0 }
 0x51d   : > { %23789 = vst [vmem:[#allocation78_spill] sm:$0xff] %v21220_v21  ;;  %v21222_v0 = vpop.f32.mrb[53].mxu0 }
 0x51e   : > { %23790 = vst [vmem:[#allocation74_spill] sm:$0xff] %v21222_v0 }
 0x520   : > { %v21224_v54 = vpop.f32.mrb[34].mxu1 }
 0x521   : > { %23791 = vst [vmem:[#allocation82_spill] sm:$0xff] %v21224_v54  ;;  %v21226_v25 = vpop.f32.mrb[54].mxu0  ;;  %v21228_v10 = vpop.f32.mrb[35].mxu1 }
 0x522   : > { %23792 = vst [vmem:[#allocation80_spill] sm:$0xff] %v21226_v25  ;;  %23793 = vst [vmem:[#allocation83_spill] sm:$0xff] %v21228_v10  ;;  %v21230_v35 = vpop.f32.mrb[55].mxu0 }
 0x523   : > { %23794 = vst [vmem:[#allocation84_spill] sm:$0xff] %v21230_v35 }
 0x52d   : > { %v16608_v63 = vpop.f32.mrb[56].mxu0 }
 0x52e   : > { %v21237_v50 = vadd.f32 %v16608_v63, %v21232_v24  ;;  %v4004_v28 = vpop.f32.mrb[57].mxu0 }
 0x52f   : > { %v21240_v21 = vadd.f32 %v4004_v28, %v21234_v1 }
 0x530   : > { %v5381_v0 = vsel %vm2173_vm3, %v21237_v50, -inf }
 0x531   : > { %5382 = vmax.xlane.f32.xlu0 %v5381_v0  ;;  %v5378_v25 = vsel %vm2173_vm3, %v21240_v21, -inf }
 0x535   : > { %v16622_v35 = vpop.f32.mrb[58].mxu0  ;;  %5379 = vmax.xlane.f32.xlu0 %v5378_v25 }
 0x536   : > { %v21247_v54 = vadd.f32 %v16622_v35, %v21232_v24  ;;  %v4186_v10 = vpop.f32.mrb[59].mxu0 }
 0x537   : > { %v21250_v63 = vadd.f32 %v4186_v10, %v21234_v1 }
 0x538   : > { %v5393_v28 = vsel %vm2173_vm3, %v21247_v54, -inf }
 0x539   : > { %5394 = vmax.xlane.f32.xlu1 %v5393_v28  ;;  %v5390_v9 = vsel %vm2173_vm3, %v21250_v63, -inf }
 0x53d   : > { %5391 = vmax.xlane.f32.xlu1 %v5390_v9 }
 0x54c   : > { %v21256_v0 = vpop.f32.mrb[36].mxu1 }
 0x54d   : > { %23795 = vst [vmem:[#allocation85_spill] sm:$0xff] %v21256_v0  ;;  %v21258_v5 = vpop.f32.mrb[37].mxu1 }
 0x54e   : > { %23796 = vst [vmem:[#allocation86_spill] sm:$0xff] %v21258_v5 }
 0x54f   : > { %v16636_v25 = vpop.f32.mrb[60].mxu0 }
 0x550   : > { %v21261_v35 = vadd.f32 %v16636_v25, %v21232_v24  ;;  %v4368_v60 = vpop.f32.mrb[61].mxu0 }
 0x551   : > { %v21264_v10 = vadd.f32 %v4368_v60, %v21234_v1 }
 0x552   : > { %v5405_v48 = vsel %vm2173_vm3, %v21261_v35, -inf }
 0x553   : > { %5406 = vmax.xlane.f32.xlu1 %v5405_v48  ;;  %v5402_v28 = vsel %vm2173_vm3, %v21264_v10, -inf }
 0x557   : > { %5403 = vmax.xlane.f32.xlu1 %v5402_v28 }
 0x57c   : > { %v16650_v9 = vpop.f32.mrb[62].mxu0 }
 0x57d   : > { %v4550_v0 = vpop.f32.mrb[63].mxu0  ;;  %v21283_v28 = vadd.f32 %v16650_v9, %v21232_v24 }
 0x57f   : > { %v5417_v49 = vsel %vm2173_vm3, %v21283_v28, -inf }
 0x581   : > { %v21270_v61 = vpop.f32.mrb[38].mxu1 }
 0x582   : > { %23797 = vst [vmem:[#allocation87_spill] sm:$0xff] %v21270_v61  ;;  %v21272_v5 = vpop.f32.mrb[39].mxu1 }
 0x583   : > { %23798 = vst [vmem:[#allocation88_spill] sm:$0xff] %v21272_v5  ;;  %v21288_v5 = vadd.f32 %v4550_v0, %v21234_v1 }
 0x585   : > { %v5414_v7 = vsel %vm2173_vm3, %v21288_v5, -inf }
 0x588   : > { %v16664_v25 = vpop.f32.mrb[64].mxu0 }
 0x589   : > { %v16615_v45 = vpop.f32.mrb[40].mxu1  ;;  %v4732_v6 = vpop.f32.mrb[65].mxu0 }
 0x58a   : > { %v21275_v60 = vadd.f32 %v16615_v45, %v21232_v24  ;;  %v4095_v19 = vpop.f32.mrb[41].mxu1 }
 0x58b   : > { %v21278_v4 = vadd.f32 %v4095_v19, %v21234_v1 }
 0x58c   : > { %v5387_v48 = vsel %vm2173_vm3, %v21275_v60, -inf }
 0x58d   : > { %5388 = vmax.xlane.f32.xlu0 %v5387_v48  ;;  %v5384_v61 = vsel %vm2173_vm3, %v21278_v4, -inf }
 0x58e   : > { %5385 = vmax.xlane.f32.xlu1 %v5384_v61  ;;  %v21301_v61 = vadd.f32 %v4732_v6, %v21234_v1 }
 0x590   : > { %v5426_v6 = vsel %vm2173_vm3, %v21301_v61, -inf }
 0x591   : > { %v16629_v45 = vpop.f32.mrb[42].mxu1 }
 0x592   : > { %v21293_v19 = vadd.f32 %v16629_v45, %v21232_v24  ;;  %v4277_v57 = vpop.f32.mrb[43].mxu1  ;;  %5418 = vmax.xlane.f32.xlu1 %v5417_v49  ;;  %v21306_v45 = vadd.f32 %v16664_v25, %v21232_v24 }
 0x593   : > { %v21296_v9 = vadd.f32 %v4277_v57, %v21234_v1 }
 0x594   : > { %v5399_v48 = vsel %vm2173_vm3, %v21293_v19, -inf  ;;  %v16678_v20 = vpop.f32.mrb[66].mxu0 }
 0x595   : > { %5400 = vmax.xlane.f32.xlu0 %v5399_v48  ;;  %v4914_v0 = vpop.f32.mrb[67].mxu0  ;;  %v5396_v57 = vsel %vm2173_vm3, %v21296_v9, -inf }
 0x596   : > { %5415 = vmax.xlane.f32.xlu1 %v5414_v7  ;;  %v21311_v49 = vadd.f32 %v4914_v0, %v21234_v1  ;;  %v5429_v7 = vsel %vm2173_vm3, %v21306_v45, -inf }
 0x598   : > { %v5438_v25 = vsel %vm2173_vm3, %v21311_v49, -inf }
 0x599   : > { %5397 = vmax.xlane.f32.xlu0 %v5396_v57  ;;  %v16643_v37 = vpop.f32.mrb[44].mxu1 }
 0x59a   : > { %v4459_v48 = vpop.f32.mrb[45].mxu1  ;;  %5427 = vmax.xlane.f32.xlu1 %v5426_v6  ;;  %v21316_v12 = vadd.f32 %v16643_v37, %v21232_v24 }
 0x59b   : > { %v21323_v0 = vadd.f32 %v4459_v48, %v21234_v1 }
 0x59c   : > { %v5411_v57 = vsel %vm2173_vm3, %v21316_v12, -inf }
 0x59d   : > { %5430 = vmax.xlane.f32.xlu0 %v5429_v7  ;;  %v21331_v7 = vadd.f32 %v16678_v20, %v21232_v24 }
 0x59e   : > { %5439 = vmax.xlane.f32.xlu1 %v5438_v25  ;;  %v5408_v25 = vsel %vm2173_vm3, %v21323_v0, -inf }
 0x5a0   : > { %v16692_v39 = vpop.f32.mrb[68].mxu0 }
 0x5a1   : > { %v16657_v26 = vpop.f32.mrb[46].mxu1  ;;  %5412 = vmax.xlane.f32.xlu0 %v5411_v57  ;;  %v5096_v6 = vpop.f32.mrb[69].mxu0  ;;  %v5441_v57 = vsel %vm2173_vm3, %v21331_v7, -inf }
 0x5a2   : > { %v4641_v37 = vpop.f32.mrb[47].mxu1  ;;  %v21328_v42 = vadd.f32 %v5096_v6, %v21234_v1  ;;  %v21338_v36 = vadd.f32 %v16657_v26, %v21232_v24 }
 0x5a3   : > { %v21346_v51 = vadd.f32 %v4641_v37, %v21234_v1 }
 0x5a4   : > { %v5450_v48 = vsel %vm2173_vm3, %v21328_v42, -inf }
 0x5a5   : > { %5409 = vmax.xlane.f32.xlu0 %v5408_v25  ;;  %5451 = vmax.xlane.f32.xlu1 %v5450_v48  ;;  %v5423_v25 = vsel %vm2173_vm3, %v21338_v36, -inf  ;;  %v5420_v37 = vsel %vm2173_vm3, %v21346_v51, -inf }
 0x5a9   : > { %v16671_v40 = vpop.f32.mrb[48].mxu1  ;;  %5442 = vmax.xlane.f32.xlu0 %v5441_v57 }
 0x5aa   : > { %v4823_v6 = vpop.f32.mrb[49].mxu1 }
 0x5ab   : > { %v21343_v20 = vadd.f32 %v4823_v6, %v21234_v1  ;;  %v16706_v17 = vpop.f32.mrb[70].mxu0  ;;  %v21358_v6 = vadd.f32 %v16692_v39, %v21232_v24 }
 0x5ac   : > { %v5278_v48 = vpop.f32.mrb[71].mxu0 }
 0x5ad   : > { %5424 = vmax.xlane.f32.xlu0 %v5423_v25  ;;  %v21351_v26 = vadd.f32 %v5278_v48, %v21234_v1  ;;  %v5432_v53 = vsel %vm2173_vm3, %v21343_v20, -inf  ;;  %v21363_v25 = vadd.f32 %v16671_v40, %v21232_v24  ;;  %v5453_v48 = vsel %vm2173_vm3, %v21358_v6, -inf }
 0x5ae   : > { %5433 = vmax.xlane.f32.xlu1 %v5432_v53  ;;  %v21368_v53 = vadd.f32 %v16706_v17, %v21232_v24 }
 0x5af   : > { %v5462_v57 = vsel %vm2173_vm3, %v21351_v26, -inf  ;;  %v5435_v39 = vsel %vm2173_vm3, %v21363_v25, -inf }
 0x5b0   : > { %v5465_v40 = vsel %vm2173_vm3, %v21368_v53, -inf }
 0x5b1   : > { %v16685_v31 = vpop.f32.mrb[50].mxu1  ;;  %5421 = vmax.xlane.f32.xlu0 %v5420_v37 }
 0x5b2   : > { %v5005_v16 = vpop.f32.mrb[51].mxu1  ;;  %5463 = vmax.xlane.f32.xlu1 %v5462_v57  ;;  %v21373_v37 = vadd.f32 %v16685_v31, %v21232_v24 }
 0x5b3   : > { %v21396_v2 = vadd.f32 %v5005_v16, %v21234_v1 }
 0x5b4   : > { %v5447_v57 = vsel %vm2173_vm3, %v21373_v37, -inf }
 0x5b5   : > { %5454 = vmax.xlane.f32.xlu0 %v5453_v48  ;;  %v5444_v23 = vsel %vm2173_vm3, %v21396_v2, -inf }
 0x5b9   : > { %v16699_v33 = vpop.f32.mrb[52].mxu1  ;;  %5436 = vmax.xlane.f32.xlu0 %v5435_v39  ;;  %v21383_v39 = vpop.permute.xlu1 %18573 }
 0x5ba   : > { %v5187_v52 = vpop.f32.mrb[53].mxu1 }
 0x5bd   : > { %5466 = vmax.xlane.f32.xlu0 %v5465_v40  ;;  %v21387_v31 = vpop.permute.xlu1 %18583 }
 0x5be   : > { %v5383_v40 = vpop.xlane.xlu0 %5382 }
 0x5c1   : > { %v16713_v48 = vpop.f32.mrb[54].mxu1  ;;  %5448 = vmax.xlane.f32.xlu0 %v5447_v57  ;;  %v21391_v55 = vpop.permute.xlu1 %18593  ;;  %v5475_v57 = vsub.f32 %v21237_v50, %v5383_v40 }
 0x5c2   : > { %v5369_v17 = vpop.f32.mrb[55].mxu1  ;;  %v5380_v46 = vpop.xlane.xlu0 %5379 }
 0x5c3   : > { %18603 = vrot.lane.b32.xlu1 %v20133_v32, %s19664_s8  ;;  %v5508_v30 = vmul.f32 1.442695, %v5475_v57  ;;  %v5474_v32 = vsub.f32 %v21240_v21, %v5380_v46  ;;  %v21406_v16 = vadd.f32 %v5369_v17, %v21234_v1 }
 0x5c5   : > { %19080 = vpow2.f32 %v5508_v30  ;;  %v5506_v22 = vmul.f32 1.442695, %v5474_v32 }
 0x5c6   : > { %v5395_v44 = vpop.xlane.xlu1 %5394 }
 0x5c7   : > { %v5479_v27 = vsub.f32 %v21247_v54, %v5395_v44  ;;  %19082 = vpow2.f32 %v5506_v22  ;;  %v21416_v22 = vadd.f32 %v16699_v33, %v21232_v24 }
 0x5c9   : > { %v5516_v40 = vmul.f32 1.442695, %v5479_v27  ;;  %v5459_v17 = vsel %vm2173_vm3, %v21416_v22, -inf }
 0x5ca   : > { %v5392_v59 = vpop.xlane.xlu1 %5391 }
 0x5cb   : > { %v5478_v46 = vsub.f32 %v21250_v63, %v5392_v59  ;;  %19084 = vpow2.f32 %v5516_v40  ;;  %v21424_v63 = vadd.f32 %v16713_v48, %v21232_v24 }
 0x5cd   : > { %v5514_v44 = vmul.f32 1.442695, %v5478_v46 }
 0x5cf   : > { %v21413_v21 = vpop.eup %19080  ;;  %19086 = vpow2.f32 %v5514_v44 }
 0x5d0   : > { %v5573_v54 = vsel %vm2173_vm3, %v21413_v21, 0.0 }
 0x5d7   : > { %18598 = vrot.lane.b32.xlu0 %v23722_v15, %s19664_s8  ;;  %v21400_v15 = vadd.f32 %v5187_v52, %v21234_v1  ;;  %v21421_v1 = vpop.eup %19082 }
 0x5d8   : > { %v5570_v33 = vsel %vm2173_vm3, %v21421_v1, 0.0  ;;  %v21430_v57 = vpop.eup %19084 }
 0x5d9   : > { %v5456_v32 = vsel %vm2173_vm3, %v21400_v15, -inf  ;;  %v5585_v24 = vsel %vm2173_vm3, %v21430_v57, 0.0  ;;  %v21436_v48 = vpop.eup %19086 }
 0x5e0   : > { %v5407_v50 = vpop.xlane.xlu1 %5406 }
 0x5e1   : > { %v5483_v52 = vsub.f32 %v21261_v35, %v5407_v50  ;;  %v5582_v50 = vsel %vm2173_vm3, %v21436_v48, 0.0 }
 0x5e3   : > { %v5524_v59 = vmul.f32 1.442695, %v5483_v52 }
 0x5e4   : > { %v5404_v30 = vpop.xlane.xlu1 %5403 }
 0x5e5   : > { %v5482_v27 = vsub.f32 %v21264_v10, %v5404_v30  ;;  %19088 = vpow2.f32 %v5524_v59  ;;  %v5471_v10 = vsel %vm2173_vm3, %v21424_v63, -inf }
 0x5e7   : > { %5445 = vmax.xlane.f32.xlu1 %v5444_v23  ;;  %v5468_v23 = vsel %vm2173_vm3, %v21406_v16, -inf  ;;  %v5522_v35 = vmul.f32 1.442695, %v5482_v27 }
 0x5e9   : > { %19090 = vpow2.f32 %v5522_v35 }
 0x5eb   : > { %5457 = vmax.xlane.f32.xlu1 %v5456_v32 }
 0x5ef   : > { %5469 = vmax.xlane.f32.xlu1 %v5468_v23  ;;  %v21440_v40 = vpop.eup %19088 }
 0x5f0   : > { %v5597_v46 = vsel %vm2173_vm3, %v21440_v40, 0.0 }
 0x5f3   : > { %5574 = vadd.xlane.f32.xlu1 %v5573_v54  ;;  %v21444_v32 = vpop.eup %19090 }
 0x5f4   : > { %v5594_v44 = vsel %vm2173_vm3, %v21444_v32, 0.0 }
 0x5f6   : > { %5460 = vmax.xlane.f32.xlu0 %v5459_v17 }
 0x5f7   : > { %5571 = vadd.xlane.f32.xlu1 %v5570_v33 }
 0x5fa   : > { %5472 = vmax.xlane.f32.xlu0 %v5471_v10 }
 0x5fb   : > { %5586 = vadd.xlane.f32.xlu1 %v5585_v24 }
 0x5ff   : > { %5583 = vadd.xlane.f32.xlu1 %v5582_v50 }
 0x603   : > { %5598 = vadd.xlane.f32.xlu1 %v5597_v46 }
 0x607   : > { %5595 = vadd.xlane.f32.xlu1 %v5594_v44 }
 0x61a   : > { %v5389_v52 = vpop.xlane.xlu0 %5388 }
 0x61b   : > { %v5477_v30 = vsub.f32 %v21275_v60, %v5389_v52  ;;  %v5386_v23 = vpop.xlane.xlu1 %5385 }
 0x61c   : > { %v5476_v59 = vsub.f32 %v21278_v4, %v5386_v23 }
 0x61d   : > { %v5512_v27 = vmul.f32 1.442695, %v5477_v30 }
 0x61e   : > { %v5510_v54 = vmul.f32 1.442695, %v5476_v59 }
 0x61f   : > { %19092 = vpow2.f32 %v5512_v27  ;;  %v5419_v35 = vpop.xlane.xlu1 %5418 }
 0x620   : > { %v5487_v17 = vsub.f32 %v21283_v28, %v5419_v35  ;;  %19094 = vpow2.f32 %v5510_v54 }
 0x622   : > { %v5532_v33 = vmul.f32 1.442695, %v5487_v17  ;;  %v5401_v10 = vpop.xlane.xlu0 %5400 }
 0x623   : > { %v5481_v24 = vsub.f32 %v21293_v19, %v5401_v10  ;;  %v5416_v50 = vpop.xlane.xlu1 %5415 }
 0x624   : > { %19096 = vpow2.f32 %v5532_v33  ;;  %v5486_v46 = vsub.f32 %v21288_v5, %v5416_v50 }
 0x625   : > { %v5520_v44 = vmul.f32 1.442695, %v5481_v24 }
 0x626   : > { %v5530_v60 = vmul.f32 1.442695, %v5486_v46  ;;  %v5398_v52 = vpop.xlane.xlu0 %5397 }
 0x627   : > { %19098 = vpow2.f32 %v5520_v44  ;;  %v5480_v4 = vsub.f32 %v21296_v9, %v5398_v52  ;;  %v5428_v30 = vpop.xlane.xlu1 %5427 }
 0x628   : > { %19100 = vpow2.f32 %v5530_v60  ;;  %v5490_v23 = vsub.f32 %v21301_v61, %v5428_v30 }
 0x629   : > { %v21455_v28 = vpop.eup %19092  ;;  %v5518_v59 = vmul.f32 1.442695, %v5480_v4 }
 0x62a   : > { %v5538_v27 = vmul.f32 1.442695, %v5490_v23  ;;  %v5431_v54 = vpop.xlane.xlu0 %5430  ;;  %v5579_v19 = vsel %vm2173_vm3, %v21455_v28, 0.0  ;;  %v21459_v35 = vpop.eup %19094 }
 0x62b   : > { %19102 = vpow2.f32 %v5518_v59  ;;  %v5491_v5 = vsub.f32 %v21306_v45, %v5431_v54  ;;  %5580 = vadd.xlane.f32.xlu0 %v5579_v19  ;;  %v5440_v17 = vpop.xlane.xlu1 %5439  ;;  %v5576_v50 = vsel %vm2173_vm3, %v21459_v35, 0.0 }
 0x62c   : > { %19104 = vpow2.f32 %v5538_v27  ;;  %v5494_v9 = vsub.f32 %v21311_v49, %v5440_v17 }
 0x62d   : > { %v5540_v33 = vmul.f32 1.442695, %v5491_v5 }
 0x62e   : > { %v21463_v61 = vpop.eup %19096  ;;  %v5546_v10 = vmul.f32 1.442695, %v5494_v9  ;;  %v5413_v24 = vpop.xlane.xlu0 %5412 }
 0x62f   : > { %19106 = vpow2.f32 %v5540_v33  ;;  %v5485_v46 = vsub.f32 %v21316_v12, %v5413_v24  ;;  %5577 = vadd.xlane.f32.xlu0 %v5576_v50  ;;  %v5609_v45 = vsel %vm2173_vm3, %v21463_v61, 0.0 }
 0x630   : > { %19108 = vpow2.f32 %v5546_v10  ;;  %5610 = vadd.xlane.f32.xlu1 %v5609_v45 }
 0x631   : > { %v21470_v44 = vpop.eup %19098  ;;  %v5528_v49 = vmul.f32 1.442695, %v5485_v46 }
 0x632   : > { %v21472_v60 = vpop.eup %19100  ;;  %v5410_v52 = vpop.xlane.xlu0 %5409  ;;  %v5591_v4 = vsel %vm2173_vm3, %v21470_v44, 0.0 }
 0x633   : > { %v5452_v30 = vpop.xlane.xlu1 %5451  ;;  %19110 = vpow2.f32 %v5528_v49  ;;  %v5484_v23 = vsub.f32 %v21323_v0, %v5410_v52  ;;  %5592 = vadd.xlane.f32.xlu0 %v5591_v4  ;;  %v5606_v59 = vsel %vm2173_vm3, %v21472_v60, 0.0 }
 0x634   : > { %v5498_v12 = vsub.f32 %v21328_v42, %v5452_v30  ;;  %5607 = vadd.xlane.f32.xlu1 %v5606_v59 }
 0x635   : > { %v21480_v27 = vpop.eup %19102  ;;  %v5526_v54 = vmul.f32 1.442695, %v5484_v23 }
 0x636   : > { %v5554_v19 = vmul.f32 1.442695, %v5498_v12  ;;  %v21482_v5 = vpop.eup %19104  ;;  %v5443_v17 = vpop.xlane.xlu0 %5442  ;;  %v5588_v9 = vsel %vm2173_vm3, %v21480_v27, 0.0 }
 0x637   : > { %19112 = vpow2.f32 %v5526_v54  ;;  %v5495_v0 = vsub.f32 %v21331_v7, %v5443_v17  ;;  %5589 = vadd.xlane.f32.xlu0 %v5588_v9  ;;  %v5618_v42 = vsel %vm2173_vm3, %v21482_v5, 0.0 }
 0x638   : > { %19114 = vpow2.f32 %v5554_v19  ;;  %5619 = vadd.xlane.f32.xlu1 %v5618_v42 }
 0x639   : > { %v21489_v33 = vpop.eup %19106  ;;  %v5548_v10 = vmul.f32 1.442695, %v5495_v0 }
 0x63a   : > { %v21491_v24 = vpop.eup %19108  ;;  %v5425_v50 = vpop.xlane.xlu0 %5424  ;;  %v5621_v46 = vsel %vm2173_vm3, %v21489_v33, 0.0 }
 0x63b   : > { %19116 = vpow2.f32 %v5548_v10  ;;  %v5489_v45 = vsub.f32 %v21338_v36, %v5425_v50  ;;  %5622 = vadd.xlane.f32.xlu0 %v5621_v46  ;;  %v5434_v7 = vpop.xlane.xlu1 %5433  ;;  %v5630_v49 = vsel %vm2173_vm3, %v21491_v24, 0.0 }
 0x63c   : > { %v5492_v52 = vsub.f32 %v21343_v20, %v5434_v7  ;;  %5631 = vadd.xlane.f32.xlu1 %v5630_v49 }
 0x63d   : > { %v21499_v4 = vpop.eup %19110  ;;  %v5536_v30 = vmul.f32 1.442695, %v5489_v45 }
 0x63e   : > { %v5542_v23 = vmul.f32 1.442695, %v5492_v52  ;;  %v5422_v12 = vpop.xlane.xlu0 %5421  ;;  %v5603_v59 = vsel %vm2173_vm3, %v21499_v4, 0.0 }
 0x63f   : > { %19118 = vpow2.f32 %v5536_v30  ;;  %v5488_v54 = vsub.f32 %v21346_v51, %v5422_v12  ;;  %5604 = vadd.xlane.f32.xlu0 %v5603_v59  ;;  %v5464_v50 = vpop.xlane.xlu1 %5463 }
 0x640   : > { %19120 = vpow2.f32 %v5542_v23 }
 0x641   : > { %v21504_v36 = vpop.eup %19112  ;;  %v5534_v19 = vmul.f32 1.442695, %v5488_v54 }
 0x642   : > { %v21506_v17 = vpop.eup %19114  ;;  %v5455_v20 = vpop.xlane.xlu0 %5454  ;;  %v5600_v9 = vsel %vm2173_vm3, %v21504_v36, 0.0 }
 0x643   : > { %19122 = vpow2.f32 %v5534_v19  ;;  %v5499_v0 = vsub.f32 %v21358_v6, %v5455_v20  ;;  %5601 = vadd.xlane.f32.xlu0 %v5600_v9  ;;  %v5642_v42 = vsel %vm2173_vm3, %v21506_v17, 0.0  ;;  %v5502_v6 = vsub.f32 %v21351_v26, %v5464_v50 }
 0x644   : > { %5643 = vadd.xlane.f32.xlu1 %v5642_v42 }
 0x645   : > { %v21513_v51 = vpop.eup %19116  ;;  %v5556_v10 = vmul.f32 1.442695, %v5499_v0  ;;  %v5562_v19 = vmul.f32 1.442695, %v5502_v6 }
 0x646   : > { %v5437_v46 = vpop.xlane.xlu0 %5436  ;;  %v5633_v45 = vsel %vm2173_vm3, %v21513_v51, 0.0 }
 0x647   : > { %19124 = vpow2.f32 %v5556_v10  ;;  %v5493_v7 = vsub.f32 %v21363_v25, %v5437_v46  ;;  %5634 = vadd.xlane.f32.xlu0 %v5633_v45 }
 0x649   : > { %v21518_v49 = vpop.eup %19118  ;;  %v5544_v52 = vmul.f32 1.442695, %v5493_v7 }
 0x64a   : > { %v21521_v30 = vpop.eup %19120  ;;  %v5467_v23 = vpop.xlane.xlu0 %5466  ;;  %v5615_v12 = vsel %vm2173_vm3, %v21518_v49, 0.0 }
 0x64b   : > { %19126 = vpow2.f32 %v5544_v52  ;;  %v5503_v59 = vsub.f32 %v21368_v53, %v5467_v23  ;;  %5616 = vadd.xlane.f32.xlu0 %v5615_v12  ;;  %v5624_v54 = vsel %vm2173_vm3, %v21521_v30, 0.0  ;;  %v21553_v12 = vpop.permute.xlu1 %18603 }
 0x64c   : > { %5625 = vadd.xlane.f32.xlu1 %v5624_v54 }
 0x64d   : > { %v21528_v25 = vpop.eup %19122  ;;  %v5564_v20 = vmul.f32 1.442695, %v5503_v59 }
 0x64e   : > { %v5449_v26 = vpop.xlane.xlu0 %5448  ;;  %v5612_v9 = vsel %vm2173_vm3, %v21528_v25, 0.0 }
 0x64f   : > { %19128 = vpow2.f32 %v5564_v20  ;;  %v5497_v0 = vsub.f32 %v21373_v37, %v5449_v26  ;;  %5613 = vadd.xlane.f32.xlu0 %v5612_v9 }
 0x650   : > { %19130 = vpow2.f32 %v5562_v19 }
 0x651   : > { %v21533_v42 = vpop.eup %19124  ;;  %v5552_v53 = vmul.f32 1.442695, %v5497_v0 }
 0x652   : > { %v5645_v10 = vsel %vm2173_vm3, %v21533_v42, 0.0 }
 0x653   : > { %5646 = vadd.xlane.f32.xlu0 %v5645_v10  ;;  %19132 = vpow2.f32 %v5552_v53  ;;  %v21559_v53 = vpop.permute.xlu0 %18598 }
 0x655   : > { %v21537_v50 = vpop.eup %19126 }
 0x656   : > { %v5627_v46 = vsel %vm2173_vm3, %v21537_v50, 0.0 }
 0x657   : > { %5628 = vadd.xlane.f32.xlu0 %v5627_v46 }
 0x659   : > { %v21541_v45 = vpop.eup %19128 }
 0x65a   : > { %v5657_v37 = vsel %vm2173_vm3, %v21541_v45, 0.0  ;;  %v21545_v7 = vpop.eup %19130 }
 0x65b   : > { %5658 = vadd.xlane.f32.xlu0 %v5657_v37  ;;  %v5654_v6 = vsel %vm2173_vm3, %v21545_v7, 0.0 }
 0x65d   : > { %v21549_v52 = vpop.eup %19132 }
 0x65e   : > { %v5639_v23 = vsel %vm2173_vm3, %v21549_v52, 0.0 }
 0x65f   : > { %5655 = vadd.xlane.f32.xlu0 %v5654_v6 }
 0x663   : > { %5640 = vadd.xlane.f32.xlu0 %v5639_v23 }
 0x674   : > { %v5446_v59 = vpop.xlane.xlu1 %5445 }
 0x675   : > { %v5496_v54 = vsub.f32 %v21396_v2, %v5446_v59 }
 0x677   : > { %v5550_v19 = vmul.f32 1.442695, %v5496_v54 }
 0x678   : > { %v5458_v20 = vpop.xlane.xlu1 %5457 }
 0x679   : > { %19134 = vpow2.f32 %v5550_v19  ;;  %v5500_v26 = vsub.f32 %v21400_v15, %v5458_v20 }
 0x67b   : > { %v5558_v9 = vmul.f32 1.442695, %v5500_v26 }
 0x67c   : > { %v21557_v0 = vpop.xlane.xlu1 %5469 }
 0x67d   : > { %19136 = vpow2.f32 %v5558_v9 }
 0x680   : > { %v5575_v10 = vpop.xlane.xlu1 %5574 }
 0x681   : > { %19138 = vrcp.f32 %v5575_v10 }
 0x683   : > { %v21561_v46 = vpop.eup %19134  ;;  %v5461_v37 = vpop.xlane.xlu0 %5460 }
 0x684   : > { %v5501_v6 = vsub.f32 %v21416_v22, %v5461_v37  ;;  %v5572_v23 = vpop.xlane.xlu1 %5571  ;;  %v5636_v2 = vsel %vm2173_vm3, %v21561_v46, 0.0 }
 0x685   : > { %19140 = vrcp.f32 %v5572_v23  ;;  %5637 = vadd.xlane.f32.xlu1 %v5636_v2  ;;  %v18575_v23 = vunpack.i.l.bf16 %v21383_v39 }
 0x686   : > { %v5560_v15 = vmul.f32 1.442695, %v5501_v6  ;;  %v18576_v6 = vunpack.i.h.bf16 %v21383_v39 }
 0x687   : > { %v21566_v59 = vpop.eup %19136  ;;  %v5473_v54 = vpop.xlane.xlu0 %5472 }
 0x688   : > { %19142 = vpow2.f32 %v5560_v15  ;;  %v5505_v19 = vsub.f32 %v21424_v63, %v5473_v54  ;;  %v5587_v20 = vpop.xlane.xlu1 %5586  ;;  %v5648_v26 = vsel %vm2173_vm3, %v21566_v59, 0.0 }
 0x689   : > { %5649 = vadd.xlane.f32.xlu1 %v5648_v26  ;;  %19144 = vrcp.f32 %v5587_v20  ;;  %v17754_v20 = vpack.c.bf16 %v18576_v6, %v18575_v23 }
 0x68a   : > { %v5568_v9 = vmul.f32 1.442695, %v5505_v19 }
 0x68b   : > { %v19139_v10 = vpop.eup %19138 }
 0x68c   : > { %19146 = vpow2.f32 %v5568_v9  ;;  %v5584_v22 = vpop.xlane.xlu1 %5583  ;;  %v5699_v63 = vmul.f32 %v19139_v10, %v21413_v21  ;;  %v18586_v9 = vunpack.i.h.bf16 %v21387_v31 }
 0x68d   : > { %19148 = vrcp.f32 %v5584_v22  ;;  %v18585_v22 = vunpack.i.l.bf16 %v21387_v31 }
 0x68f   : > { %v19141_v37 = vpop.eup %19140  ;;  %v17762_v6 = vpack.c.bf16 %v18586_v9, %v18585_v22  ;;  %v23801_v9 = vld [vmem:[#allocation38_spill] sm:$0xff] }
 0x690   : > { %v5599_v2 = vpop.xlane.xlu1 %5598  ;;  %v5698_v15 = vmul.f32 %v19141_v37, %v21421_v1 }
 0x691   : > { %19150 = vrcp.f32 %v5599_v2  ;;  %v18596_v2 = vunpack.i.h.bf16 %v21391_v55 }
 0x692   : > { %v21575_v54 = vpop.eup %19142  ;;  %16718 = vmatprep.mubr.msk.f32.mxu0 %vm2173_vm3, %v5698_v15 }
 0x693   : > { %16719 = vmatmul.mubr.msk.f32.vlgmr.msra.gmra.mrb[72].mxu0 %vm2173_vm3, %v5699_v63  ;;  %v5651_v19 = vsel %vm2173_vm3, %v21575_v54, 0.0  ;;  %v19145_v26 = vpop.eup %19144 }
 0x694   : > { %17749 = vmatpush3.bf16.msra.mxu0 %v21178_v18  ;;  %5652 = vadd.xlane.f32.xlu0 %v5651_v19  ;;  %v5596_v39 = vpop.xlane.xlu1 %5595  ;;  %v5703_v18 = vmul.f32 %v19145_v26, %v21430_v57 }
 0x695   : > { %17755 = vmatprep.subr.bf16.mxu0 %v17754_v20  ;;  %19152 = vrcp.f32 %v5596_v39 }
 0x696   : > { %v21582_v1 = vpop.eup %19146 }
 0x697   : > { %v19149_v21 = vpop.eup %19148  ;;  %v5663_v10 = vsel %vm2173_vm3, %v21582_v1, 0.0 }
 0x698   : > { %5664 = vadd.xlane.f32.xlu0 %v5663_v10  ;;  %v5702_v37 = vmul.f32 %v19149_v21, %v21436_v48  ;;  %v18595_v48 = vunpack.i.l.bf16 %v21391_v55  ;;  %v5504_v55 = vsub.f32 %v21406_v16, %v21557_v0  ;;  %v23800_v16 = vld [vmem:[#allocation36_spill] sm:$0xff] }
 0x69a   : > { %18613 = vrot.lane.b32.xlu1 %v20157_v47, %s19664_s8  ;;  %16732 = vmatprep.mubr.msk.f32.mxu0 %vm2173_vm3, %v5702_v37  ;;  %v21604_v63 = vpack.c.bf16 %v18596_v2, %v18595_v48 }
 0x69b   : > { %16733 = vmatmul.mubr.msk.f32.vlgmr.msra.gmra.mrb[74].mxu0 %vm2173_vm3, %v5703_v18  ;;  %v19151_v23 = vpop.eup %19150 }
 0x69c   : > { %17757 = vmatpush3.bf16.msra.mxu0 %v17754_v20  ;;  %v5707_v15 = vmul.f32 %v19151_v23, %v21440_v40  ;;  %v5566_v40 = vmul.f32 1.442695, %v5504_v55  ;;  %v18581_v23 = vunpack.i.h.bf16 %v21381_v58  ;;  %v23802_v55 = vld [vmem:[#allocation39_spill] sm:$0xff] }
 0x69d   : > { %17763 = vmatprep.subr.bf16.mxu0 %v17762_v6 }
 0x69e   : > { %18618 = vrot.lane.b32.xlu1 %v23739_v41, %s19664_s8  ;;  %19154 = vpow2.f32 %v5566_v40 }
 0x69f   : > { %v19153_v31 = vpop.eup %19152 }
 0x6a0   : > { %v5706_v57 = vmul.f32 %v19153_v31, %v21444_v32  ;;  %v23799_v32 = vld [vmem:[#allocation16_spill] sm:$0xff]  ;;  %v18580_v31 = vunpack.i.l.bf16 %v21381_v58  ;;  %v18606_v58 = vunpack.i.h.bf16 %v21553_v12 }
 0x6a2   : > { %18623 = vrot.lane.b32.xlu1 %v23723_v8, %s19664_s8  ;;  %16746 = vmatprep.mubr.msk.f32.mxu0 %vm2173_vm3, %v5706_v57 }
 0x6a3   : > { %16747 = vmatmul.mubr.msk.f32.vlgmr.msra.gmra.mrb[76].mxu0 %vm2173_vm3, %v5707_v15 }
 0x6a4   : > { %17765 = vmatpush3.bf16.msra.mxu0 %v17762_v6 }
 0x6a5   : > { %17771 = vmatprep.subr.bf16.mxu0 %v21604_v63 }
 0x6a8   : > { %v21619_v21 = vpop.eup %19154 }
 0x6a9   : > { %v5660_v37 = vsel %vm2173_vm3, %v21619_v21, 0.0 }
 0x6ae   : > { %18608 = vrot.lane.b32.xlu0 %v23729_v29, %s19664_s8 }
 0x6b2   : > { %18633 = vrot.lane.b32.xlu0 %v23756_v34, %s19665_s16 }
 0x6b6   : > { %7769 = vrot.lane.b32.xlu0 %v23799_v32, %s19666_s17 }
 0x6b8   : > { %v5581_v19 = vpop.xlane.xlu0 %5580 }
 0x6b9   : > { %19156 = vrcp.f32 %v5581_v19  ;;  %v17758_v19 = vpack.c.bf16 %v18581_v23, %v18580_v31 }
 0x6ba   : > { %18643 = vrot.lane.b32.xlu0 %v23758_v14, %s19665_s16 }
 0x6bc   : > { %v5578_v20 = vpop.xlane.xlu0 %5577 }
 0x6bd   : > { %19158 = vrcp.f32 %v5578_v20  ;;  %v5611_v39 = vpop.xlane.xlu1 %5610 }
 0x6be   : > { %7862 = vrot.lane.b32.xlu0 %v23800_v16, %s19666_s17  ;;  %19160 = vrcp.f32 %v5611_v39  ;;  %v18605_v39 = vunpack.i.l.bf16 %v21553_v12 }
 0x6c0   : > { %v5593_v0 = vpop.xlane.xlu0 %5592 }
 0x6c1   : > { %v5608_v26 = vpop.xlane.xlu1 %5607 }
 0x6c2   : > { %19162 = vrcp.f32 %v5608_v26  ;;  %7951 = vrot.lane.b32.xlu0 %v23801_v9, %s19666_s17 }
 0x6c3   : > { %19164 = vrcp.f32 %v5593_v0  ;;  %v19157_v18 = vpop.eup %19156 }
 0x6c4   : > { %v5590_v22 = vpop.xlane.xlu0 %5589  ;;  %v5701_v15 = vmul.f32 %v19157_v18, %v21455_v28  ;;  %v17778_v18 = vpack.c.bf16 %v18606_v58, %v18605_v39 }
 0x6c5   : > { %19166 = vrcp.f32 %v5590_v22  ;;  %v5620_v10 = vpop.xlane.xlu1 %5619 }
 0x6c6   : > { %19168 = vrcp.f32 %v5620_v10  ;;  %18653 = vrot.lane.b32.xlu0 %v23759_v38, %s19665_s16  ;;  %5661 = vadd.xlane.f32.xlu1 %v5660_v37  ;;  %v18591_v10 = vunpack.i.h.bf16 %v21385_v43  ;;  %v18590_v37 = vunpack.i.l.bf16 %v21385_v43 }
 0x6c7   : > { %v19159_v6 = vpop.eup %19158 }
 0x6c8   : > { %v5623_v2 = vpop.xlane.xlu0 %5622  ;;  %v5700_v48 = vmul.f32 %v19159_v6, %v21459_v35  ;;  %v19161_v40 = vpop.eup %19160  ;;  %v17766_v31 = vpack.c.bf16 %v18591_v10, %v18590_v37  ;;  %v23807_v10 = vld [vmem:[#allocation52_spill] sm:$0xff]  ;;  %v23808_v37 = vld [vmem:[#allocation33_spill] sm:$0xff] }
 0x6c9   : > { %19170 = vrcp.f32 %v5623_v2  ;;  %v5632_v57 = vpop.xlane.xlu1 %5631  ;;  %v5711_v26 = vmul.f32 %v19161_v40, %v21463_v61 }
 0x6ca   : > { %19172 = vrcp.f32 %v5632_v57  ;;  %16725 = vmatprep.mubr.msk.f32.mxu1 %vm2173_vm3, %v5700_v48  ;;  %8044 = vrot.lane.b32.xlu0 %v23802_v55, %s19666_s17 }
 0x6cb   : > { %16726 = vmatmul.mubr.msk.f32.vlgmr.msra.gmra.mrb[56].mxu1 %vm2173_vm3, %v5701_v15  ;;  %v18600_v15 = vunpack.i.l.bf16 %v21559_v53 }
 0x6cc   : > { %v19163_v20 = vpop.eup %19162  ;;  %17753 = vmatpush3.bf16.msra.mxu1 %v21189_v62  ;;  %v5605_v35 = vpop.xlane.xlu0 %5604 }
 0x6cd   : > { %17759 = vmatprep.subr.bf16.mxu1 %v17758_v19  ;;  %v5710_v28 = vmul.f32 %v19163_v20, %v21472_v60  ;;  %v19165_v0 = vpop.eup %19164  ;;  %19174 = vrcp.f32 %v5605_v35 }
 0x6ce   : > { %8133 = vrot.lane.b32.xlu0 %v20315_v13, %s19666_s17  ;;  %v5705_v61 = vmul.f32 %v19165_v0, %v21470_v44 }
 0x6cf   : > { %v19167_v22 = vpop.eup %19166  ;;  %16760 = vmatprep.mubr.msk.f32.mxu0 %vm2173_vm3, %v5710_v28 }
 0x6d0   : > { %v19169_v12 = vpop.eup %19168  ;;  %v5602_v62 = vpop.xlane.xlu0 %5601  ;;  %16761 = vmatmul.mubr.msk.f32.vlgmr.msra.gmra.mrb[78].mxu0 %vm2173_vm3, %v5711_v26  ;;  %v5704_v60 = vmul.f32 %v19167_v22, %v21480_v27  ;;  %v23806_v26 = vld [vmem:[#allocation32_spill] sm:$0xff] }
 0x6d1   : > { %19176 = vrcp.f32 %v5602_v62  ;;  %17773 = vmatpush3.bf16.msra.mxu0 %v21604_v63  ;;  %v5644_v6 = vpop.xlane.xlu1 %5643  ;;  %v5714_v23 = vmul.f32 %v19169_v12, %v21482_v5 }
 0x6d2   : > { %17779 = vmatprep.subr.bf16.mxu0 %v17778_v18  ;;  %16739 = vmatprep.mubr.msk.f32.mxu1 %vm2173_vm3, %v5704_v60  ;;  %19178 = vrcp.f32 %v5644_v6  ;;  %v23809_v60 = vld [vmem:[#allocation23_spill] sm:$0xff] }
 0x6d3   : > { %v19171_v43 = vpop.eup %19170  ;;  %18663 = vrot.lane.b32.xlu0 %v20084_v11, %s19665_s16  ;;  %16740 = vmatmul.mubr.msk.f32.vlgmr.msra.gmra.mrb[58].mxu1 %vm2173_vm3, %v5705_v61 }
 0x6d4   : > { %v19173_v2 = vpop.eup %19172  ;;  %17761 = vmatpush3.bf16.msra.mxu1 %v17758_v19  ;;  %16774 = vmatprep.mubr.msk.f32.mxu0 %vm2173_vm3, %v5714_v23  ;;  %v5635_v27 = vpop.xlane.xlu0 %5634  ;;  %v5715_v44 = vmul.f32 %v19171_v43, %v21489_v33  ;;  %v18601_v33 = vunpack.i.h.bf16 %v21559_v53  ;;  %v23804_v19 = vld [vmem:[#allocation17_spill] sm:$0xff]  ;;  %v23805_v53 = vld [vmem:[#allocation24_spill] sm:$0xff]  ;;  %v23811_v23 = vld [vmem:[#allocation26_spill] sm:$0xff] }
 0x6d5   : > { %17767 = vmatprep.subr.bf16.mxu1 %v17766_v31  ;;  %19180 = vrcp.f32 %v5635_v27  ;;  %v5718_v5 = vmul.f32 %v19173_v2, %v21491_v24  ;;  %v23803_v24 = vld [vmem:[#allocation46_spill] sm:$0xff] }
 0x6d6   : > { %16775 = vmatmul.mubr.msk.f32.vlgmr.msra.gmra.mrb[80].mxu0 %vm2173_vm3, %v5715_v44  ;;  %v17774_v0 = vpack.c.bf16 %v18601_v33, %v18600_v15  ;;  %v23815_v44 = vld [vmem:[#allocation43_spill] sm:$0xff]  ;;  %v23822_v33 = vld [vmem:[#allocation48_spill] sm:$0xff] }
 0x6d7   : > { %8226 = vrot.lane.b32.xlu0 %v23717_v3, %s19666_s17  ;;  %17781 = vmatpush3.bf16.msra.mxu0 %v17778_v18  ;;  %v19175_v48 = vpop.eup %19174  ;;  %v23823_v15 = vld [vmem:[#allocation59_spill] sm:$0xff] }
 0x6d8   : > { %18628 = vrot.lane.b32.xlu1 %v23749_v56, %s19664_s8  ;;  %16788 = vmatprep.mubr.msk.f32.mxu0 %vm2173_vm3, %v5718_v5  ;;  %v5617_v63 = vpop.xlane.xlu0 %5616  ;;  %v5709_v39 = vmul.f32 %v19175_v48, %v21499_v4  ;;  %v23817_v5 = vld [vmem:[#allocation40_spill] sm:$0xff]  ;;  %v23819_v48 = vld [vmem:[#allocation42_spill] sm:$0xff]  ;;  %s23448_s8 = scalar_lea.hbm %s23505_s6, %s15641_s19 }
 0x6d9   : > { %v5626_v40 = vpop.xlane.xlu1 %5625  ;;  %19182 = vrcp.f32 %v5617_v63  ;;  %v23818_v63 = vld [vmem:[#allocation57_spill] sm:$0xff] }
 0x6db   : > { %v19177_v57 = vpop.eup %19176  ;;  %8315 = vrot.lane.b32.xlu0 %v23803_v24, %s19666_s17 }
 0x6dc   : > { %18638 = vrot.lane.b32.xlu1 %v23804_v19, %s19665_s16  ;;  %v5614_v20 = vpop.xlane.xlu0 %5613  ;;  %v5708_v58 = vmul.f32 %v19177_v57, %v21504_v36  ;;  %v19179_v35 = vpop.eup %19178  ;;  %v23821_v57 = vld [vmem:[#allocation22_spill] sm:$0xff] }
 0x6dd   : > { %19184 = vrcp.f32 %v5614_v20  ;;  %v5722_v4 = vmul.f32 %v19179_v35, %v21506_v17  ;;  %v23810_v17 = vld [vmem:[#allocation19_spill] sm:$0xff]  ;;  %v23827_v35 = vld [vmem:[#allocation60_spill] sm:$0xff] }
 0x6de   : > { %19186 = vrcp.f32 %v5626_v40  ;;  %16753 = vmatprep.mubr.msk.f32.mxu1 %vm2173_vm3, %v5708_v58  ;;  %v23824_v40 = vld [vmem:[#allocation50_spill] sm:$0xff]  ;;  %v23825_v20 = vld [vmem:[#allocation51_spill] sm:$0xff]  ;;  %v23826_v58 = vld [vmem:[#allocation25_spill] sm:$0xff] }
 0x6df   : > { %v19181_v28 = vpop.eup %19180  ;;  %18673 = vrot.lane.b32.xlu0 %v23805_v53, %s19665_s16  ;;  %16754 = vmatmul.mubr.msk.f32.vlgmr.msra.gmra.mrb[60].mxu1 %vm2173_vm3, %v5709_v39 }
 0x6e0   : > { %17769 = vmatpush3.bf16.msra.mxu1 %v17766_v31  ;;  %7771 = vrot.lane.b32.xlu1 %v23806_v26, %s19666_s17  ;;  %v5647_v22 = vpop.xlane.xlu0 %5646  ;;  %v5719_v36 = vmul.f32 %v19181_v28, %v21513_v51  ;;  %v23812_v31 = vld [vmem:[#allocation34_spill] sm:$0xff]  ;;  %v23828_v28 = vld [vmem:[#allocation41_spill] sm:$0xff] }
 0x6e1   : > { %17775 = vmatprep.subr.bf16.mxu1 %v17774_v0 }
 0x6e2   : > { %16789 = vmatmul.mubr.msk.f32.vlgmr.msra.gmra.mrb[82].mxu0 %vm2173_vm3, %v5719_v36 }
 0x6e3   : > { %8408 = vrot.lane.b32.xlu0 %v23807_v10, %s19666_s17  ;;  %16802 = vmatprep.mubr.msk.f32.mxu0 %vm2173_vm3, %v5722_v4  ;;  %v19183_v62 = vpop.eup %19182  ;;  %v23829_v4 = vld [vmem:[#allocation54_spill] sm:$0xff] }
 0x6e4   : > { %7860 = vrot.lane.b32.xlu1 %v23808_v37, %s19666_s17  ;;  %v5629_v12 = vpop.xlane.xlu0 %5628  ;;  %v5713_v61 = vmul.f32 %v19183_v62, %v21518_v49  ;;  %v23814_v49 = vld [vmem:[#allocation35_spill] sm:$0xff] }
 0x6e5   : > { %19188 = vrcp.f32 %v5629_v12 }
 0x6e7   : > { %v19185_v18 = vpop.eup %19184  ;;  %8497 = vrot.lane.b32.xlu0 %v23809_v60, %s19666_s17 }
 0x6e8   : > { %v19187_v51 = vpop.eup %19186  ;;  %18648 = vrot.lane.b32.xlu1 %v23810_v17, %s19665_s16  ;;  %v5712_v6 = vmul.f32 %v19185_v18, %v21528_v25  ;;  %v23813_v25 = vld [vmem:[#allocation55_spill] sm:$0xff]  ;;  %v5659_v39 = vpop.xlane.xlu0 %5658 }
 0x6e9   : > { %v5716_v43 = vmul.f32 %v19187_v51, %v21521_v30  ;;  %v23816_v30 = vld [vmem:[#allocation21_spill] sm:$0xff] }
 0x6ea   : > { %16767 = vmatprep.mubr.msk.f32.mxu1 %vm2173_vm3, %v5712_v6  ;;  %v23830_v6 = vld [vmem:[#allocation45_spill] sm:$0xff] }
 0x6eb   : > { %18683 = vrot.lane.b32.xlu0 %v23811_v23, %s19665_s16  ;;  %16768 = vmatmul.mubr.msk.f32.vlgmr.msra.gmra.mrb[62].mxu1 %vm2173_vm3, %v5713_v61 }
 0x6ec   : > { %17777 = vmatpush3.bf16.msra.mxu1 %v17774_v0  ;;  %7953 = vrot.lane.b32.xlu1 %v23812_v31, %s19666_s17  ;;  %v5656_v36 = vpop.xlane.xlu0 %5655 }
 0x6ed   : > { %16781 = vmatprep.mubr.msk.f32.mxu1 %vm2173_vm3, %v5716_v43 }
 0x6ef   : > { %v19189_v2 = vpop.eup %19188  ;;  %8590 = vrot.lane.b32.xlu0 %v23813_v25, %s19666_s17 }
 0x6f0   : > { %8042 = vrot.lane.b32.xlu1 %v23814_v49, %s19666_s17  ;;  %v5717_v27 = vmul.f32 %v19189_v2, %v21537_v50  ;;  %v23820_v50 = vld [vmem:[#allocation47_spill] sm:$0xff] }
 0x6f1   : > { %v23839_v49 = vld [vmem:[#allocation67_spill] sm:$0xff] }
 0x6f2   : > { %16782 = vmatmul.mubr.msk.f32.vlgmr.msra.gmra.mrb[64].mxu1 %vm2173_vm3, %v5717_v27 }
 0x6f3   : > { %8679 = vrot.lane.b32.xlu0 %v23815_v44, %s19666_s17 }
 0x6f4   : > { %18658 = vrot.lane.b32.xlu1 %v23816_v30, %s19665_s16 }
 0x6f7   : > { %18693 = vrot.lane.b32.xlu0 %v20157_v47, %s19665_s16 }
 0x6f8   : > { %8135 = vrot.lane.b32.xlu1 %v23817_v5, %s19666_s17 }
 0x6fb   : > { %8772 = vrot.lane.b32.xlu0 %v23818_v63, %s19666_s17 }
 0x6fc   : > { %8224 = vrot.lane.b32.xlu1 %v23819_v48, %s19666_s17 }
 0x6ff   : > { %8861 = vrot.lane.b32.xlu0 %v23820_v50, %s19666_s17 }
 0x700   : > { %18668 = vrot.lane.b32.xlu1 %v23821_v57, %s19665_s16 }
 0x703   : > { %18703 = vrot.lane.b32.xlu0 %v23723_v8, %s19665_s16 }
 0x704   : > { %8317 = vrot.lane.b32.xlu1 %v23822_v33, %s19666_s17 }
 0x707   : > { %8954 = vrot.lane.b32.xlu0 %v23823_v15, %s19666_s17  ;;  %v23831_v15 = vld [vmem:[#allocation56_spill] sm:$0xff] }
 0x708   : > { %8406 = vrot.lane.b32.xlu1 %v23824_v40, %s19666_s17 }
 0x70b   : > { %9043 = vrot.lane.b32.xlu0 %v23825_v20, %s19666_s17 }
 0x70c   : > { %18678 = vrot.lane.b32.xlu1 %v23826_v58, %s19665_s16 }
 0x70f   : > { %9134 = vrot.lane.b32.xlu0 %v23827_v35, %s19666_s17 }
 0x710   : > { %8499 = vrot.lane.b32.xlu1 %v23828_v28, %s19666_s17 }
 0x712   : > { %v5638_v0 = vpop.xlane.xlu1 %5637 }
 0x713   : > { %18718 = vrot.lane.b32.xlu0 %v23804_v19, %s19667_s12  ;;  %19190 = vrcp.f32 %v5638_v0 }
 0x714   : > { %8588 = vrot.lane.b32.xlu1 %v23829_v4, %s19666_s17  ;;  %19192 = vrcp.f32 %v5647_v22  ;;  %v5641_v22 = vpop.xlane.xlu0 %5640 }
 0x715   : > { %19194 = vrcp.f32 %v5656_v36 }
 0x716   : > { %v5650_v12 = vpop.xlane.xlu1 %5649  ;;  %19196 = vrcp.f32 %v5659_v39 }
 0x717   : > { %18733 = vrot.lane.b32.xlu0 %v23759_v38, %s19667_s12  ;;  %19198 = vrcp.f32 %v5641_v22  ;;  %v7123_v22 = vld [vmem:[#allocation8 + $0x8] sm:$0xff] }
 0x718   : > { %18688 = vrot.lane.b32.xlu1 %v23729_v29, %s19665_s16  ;;  %19200 = vrcp.f32 %v5650_v12 }
 0x71a   : > { %v18614_v62 = vpop.permute.xlu1 %18613 }
 0x71b   : > { %18743 = vrot.lane.b32.xlu0 %v20084_v11, %s19667_s12  ;;  %v18616_v18 = vunpack.i.h.bf16 %v18614_v62  ;;  %v18615_v51 = vunpack.i.l.bf16 %v18614_v62 }
 0x71c   : > { %8681 = vrot.lane.b32.xlu1 %v23830_v6, %s19666_s17 }
 0x71d   : > { %v19191_v61 = vpop.eup %19190  ;;  %v17786_v43 = vpack.c.bf16 %v18616_v18, %v18615_v51 }
 0x71e   : > { %v18619_v2 = vpop.permute.xlu1 %18618  ;;  %v5720_v27 = vmul.f32 %v19191_v61, %v21561_v46  ;;  %v19193_v0 = vpop.eup %19192 }
 0x71f   : > { %18753 = vrot.lane.b32.xlu0 %v23805_v53, %s19667_s12  ;;  %17787 = vmatprep.subr.bf16.mxu0 %v17786_v43  ;;  %v19195_v36 = vpop.eup %19194  ;;  %v5723_v50 = vmul.f32 %v19193_v0, %v21533_v42  ;;  %v23832_v42 = vld [vmem:[#allocation49_spill] sm:$0xff]  ;;  %v18621_v12 = vunpack.i.h.bf16 %v18619_v2 }
 0x720   : > { %8770 = vrot.lane.b32.xlu1 %v23831_v15, %s19666_s17  ;;  %16795 = vmatprep.mubr.msk.f32.mxu1 %vm2173_vm3, %v5720_v27  ;;  %v5726_v46 = vmul.f32 %v19195_v36, %v21545_v7  ;;  %v18620_v36 = vunpack.i.l.bf16 %v18619_v2 }
 0x721   : > { %17789 = vmatpush3.bf16.msra.mxu0 %v17786_v43  ;;  %v5653_v39 = vpop.xlane.xlu0 %5652  ;;  %v19197_v43 = vpop.eup %19196 }
 0x722   : > { %v18624_v62 = vpop.permute.xlu1 %18623  ;;  %19202 = vrcp.f32 %v5653_v39  ;;  %v5727_v7 = vmul.f32 %v19197_v43, %v21541_v45 }
 0x723   : > { %v18626_v18 = vunpack.i.h.bf16 %v18624_v62  ;;  %v18625_v51 = vunpack.i.l.bf16 %v18624_v62 }
 0x724   : > { %18698 = vrot.lane.b32.xlu1 %v23739_v41, %s19665_s16  ;;  %16803 = vmatmul.mubr.msk.f32.vlgmr.msra.gmra.mrb[84].mxu0 %vm2173_vm3, %v5723_v50 }
 0x725   : > { %16816 = vmatprep.mubr.msk.f32.mxu0 %vm2173_vm3, %v5726_v46  ;;  %v5665_v61 = vpop.xlane.xlu0 %5664  ;;  %v17794_v27 = vpack.c.bf16 %v18626_v18, %v18625_v51  ;;  %v23833_v18 = vld [vmem:[#allocation58_spill] sm:$0xff]  ;;  %v19199_v51 = vpop.eup %19198 }
 0x726   : > { %v19201_v46 = vpop.eup %19200  ;;  %v5721_v45 = vmul.f32 %v19199_v51, %v21549_v52  ;;  %v3918_v52 = vld [vmem:[#allocation8] sm:$0xff]  ;;  %19204 = vrcp.f32 %v5665_v61 }
 0x727   : > { %17795 = vmatprep.subr.bf16.mxu0 %v17794_v27  ;;  %v5724_v43 = vmul.f32 %v19201_v46, %v21566_v59 }
 0x728   : > { %8863 = vrot.lane.b32.xlu1 %v23832_v42, %s19666_s17  ;;  %17797 = vmatpush3.bf16.msra.mxu0 %v17794_v27  ;;  %v17790_v27 = vpack.c.bf16 %v18621_v12, %v18620_v36  ;;  %v23835_v12 = vld [vmem:[#allocation61_spill] sm:$0xff] }
 0x729   : > { %v18609_v0 = vpop.permute.xlu0 %18608  ;;  %16826 = vmatprep.subr.mxu0 %v7123_v22 }
 0x72a   : > { %v18611_v62 = vunpack.i.h.bf16 %v18609_v0  ;;  %v18610_v50 = vunpack.i.l.bf16 %v18609_v0  ;;  %v23834_v0 = vld [vmem:[#allocation53_spill] sm:$0xff] }
 0x72b   : > { %16817 = vmatmul.mubr.msk.f32.vlgmr.msra.gmra.mrb[86].mxu0 %vm2173_vm3, %v5727_v7 }
 0x72c   : > { %8952 = vrot.lane.b32.xlu1 %v23833_v18, %s19666_s17  ;;  %v17782_v39 = vpack.c.bf16 %v18611_v62, %v18610_v50  ;;  %16827 = vmatpush3.msra.mxu0 %v7123_v22  ;;  %v19203_v2 = vpop.eup %19202 }
 0x72d   : > { %v5725_v7 = vmul.f32 %v19203_v2, %v21575_v54  ;;  %16876 = vmatprep.subr.mxu0 %v3918_v52 }
 0x72e   : > { %17783 = vmatprep.subr.bf16.mxu1 %v17782_v39 }
 0x72f   : > { %17785 = vmatpush3.bf16.msra.mxu1 %v17782_v39  ;;  %v18634_v39 = vpop.permute.xlu0 %18633 }
 0x730   : > { %18708 = vrot.lane.b32.xlu1 %v23749_v56, %s19665_s16  ;;  %17791 = vmatprep.subr.bf16.mxu1 %v17790_v27  ;;  %v19205_v46 = vpop.eup %19204  ;;  %v18635_v2 = vunpack.i.l.bf16 %v18634_v39  ;;  %s19578_s16 = scalar_lea.vmem %s23450_s9, 4096 }
 0x731   : > { %p19579_p10 = scmp.ne.s32.totalorder %s23450_s9, %s19578_s16 }
 0x732   : > { %16796 = vmatmul.mubr.msk.f32.vlgmr.msra.gmra.mrb[66].mxu1 %vm2173_vm3, %v5721_v45  ;;  %v18636_v45 = vunpack.i.h.bf16 %v18634_v39 }
 0x733   : > { %17793 = vmatpush3.bf16.msra.mxu1 %v17790_v27  ;;  %16809 = vmatprep.mubr.msk.f32.mxu1 %vm2173_vm3, %v5724_v43  ;;  %p19580_p3 = pnand %p19579_p10, %p19863_p5 }
 0x734   : > { %9045 = vrot.lane.b32.xlu1 %v23834_v0, %s19666_s17 }
 0x735   : > { %p19581_p7 = pneg %p19580_p3 }
 0x736   : > { %16810 = vmatmul.mubr.msk.f32.vlgmr.msra.gmra.mrb[68].mxu1 %vm2173_vm3, %v5725_v7  ;;  %v5729_v7 = vmul.f32 %v19205_v46, %v21582_v1 }
 0x738   : > { %9136 = vrot.lane.b32.xlu1 %v23835_v12, %s19666_s17  ;;  %s19671_s17 = smov [#allocation10]  }
 0x73c   : > { %18713 = vrot.lane.b32.xlu1 %v23756_v34, %s19667_s12 }
 0x740   : > { %18723 = vrot.lane.b32.xlu1 %v23758_v14, %s19667_s12 }
 0x744   : > { %18728 = vrot.lane.b32.xlu1 %v23810_v17, %s19667_s12 }
 0x748   : > { %18738 = vrot.lane.b32.xlu1 %v23816_v30, %s19667_s12  ;;  %v23838_v30 = vld [vmem:[#allocation62_spill] sm:$0xff] }
 0x74c   : > { %18748 = vrot.lane.b32.xlu1 %v23821_v57, %s19667_s12 }
 0x753   : > { %v5662_v59 = vpop.xlane.xlu1 %5661 }
 0x754   : > { %19206 = vrcp.f32 %v5662_v59  ;;  %v21796_v59 = vpack.c.bf16 %v18636_v45, %v18635_v2 }
 0x757   : > { %v18629_v54 = vpop.permute.xlu1 %18628 }
 0x758   : > { %v18631_v36 = vunpack.i.h.bf16 %v18629_v54  ;;  %v18630_v62 = vunpack.i.l.bf16 %v18629_v54 }
 0x75a   : > { %v17798_v50 = vpack.c.bf16 %v18631_v36, %v18630_v62 }
 0x75b   : > { %v21789_v51 = vpop.permute.xlu1 %18638 }
 0x75c   : > { %17799 = vmatprep.subr.bf16.mxu1 %v17798_v50 }
 0x75d   : > { %17801 = vmatpush3.bf16.msra.mxu1 %v17798_v50 }
 0x75e   : > { %v19207_v27 = vpop.eup %19206  ;;  %18122 = vmatprep.subr.mxu1 %v7123_v22 }
 0x75f   : > { %v21791_v43 = vpop.permute.xlu1 %7771  ;;  %v5728_v61 = vmul.f32 %v19207_v27, %v21619_v21 }
 0x761   : > { %16823 = vmatprep.mubr.msk.f32.mxu1 %vm2173_vm3, %v5728_v61 }
 0x762   : > { %16824 = vmatmul.mubr.msk.f32.vlgmr.msra.gmra.mrb[70].mxu1 %vm2173_vm3, %v5729_v7 }
 0x763   : > { %18123 = vmatpush3.msra.mxu1 %v7123_v22  ;;  %v21799_v54 = vpop.permute.xlu1 %7860 }
 0x764   : > { %17804 = vmatprep.subr.msk.bf16.mxu1 %vm20266_vm2, %v21796_v59 }
 0x766   : > { %v16720_v62 = vpop.f32.mrb[72].mxu0 }
 0x767   : > { %v5808_v50 = vpop.f32.mrb[73].mxu0  ;;  %v21804_v39 = vpop.permute.xlu1 %18648 }
 0x768   : > { %16828 = vmatprep.mubr.msk.f32.mxu0 %vm722_vm1, %v5808_v50 }
 0x769   : > { %16829 = vmatmul.mubr.msk.f32.vlgmr.msra.gmra.mrb[88].mxu0 %vm722_vm1, %v16720_v62 }
 0x76a   : > { %16877 = vmatpush3.msra.mxu0 %v3918_v52 }
 0x76b   : > { %v21808_v1 = vpop.permute.xlu1 %7953 }
 0x76e   : > { %v16734_v21 = vpop.f32.mrb[74].mxu0 }
 0x76f   : > { %v5982_v46 = vpop.f32.mrb[75].mxu0  ;;  %v21810_v22 = vpop.permute.xlu1 %8042 }
 0x773   : > { %v21812_v27 = vpop.permute.xlu1 %18658 }
 0x776   : > { %v16748_v45 = vpop.f32.mrb[76].mxu0 }
 0x777   : > { %v6156_v2 = vpop.f32.mrb[77].mxu0  ;;  %v21814_v61 = vpop.permute.xlu1 %8135 }
 0x77b   : > { %v21816_v7 = vpop.permute.xlu1 %8224 }
 0x77f   : > { %v21818_v12 = vpop.permute.xlu1 %18668 }
 0x783   : > { %v21820_v50 = vpop.permute.xlu1 %8317 }
 0x787   : > { %v21822_v62 = vpop.permute.xlu1 %8406 }
 0x78b   : > { %v21824_v52 = vpop.permute.xlu1 %18678 }
 0x78f   : > { %v21826_v0 = vpop.permute.xlu1 %8499 }
 0x793   : > { %v21828_v63 = vpop.permute.xlu1 %8588 }
 0x797   : > { %v21830_v35 = vpop.permute.xlu1 %18688 }
 0x79b   : > { %v21832_v20 = vpop.permute.xlu1 %8681 }
 0x79e   : > { %v16727_v44 = vpop.f32.mrb[56].mxu1 }
 0x79f   : > { %v5895_v18 = vpop.f32.mrb[57].mxu1  ;;  %v21834_v25 = vpop.permute.xlu1 %8770 }
 0x7a0   : > { %16831 = vmatprep.mubr.msk.f32.mxu0 %vm722_vm1, %v5895_v18 }
 0x7a1   : > { %16832 = vmatmul.mubr.msk.f32.gmra.mrb[90].mxu0 %vm722_vm1, %v16727_v44 }
 0x7a2   : > { %16834 = vmatprep.mubr.msk.f32.mxu0 %vm722_vm1, %v5982_v46 }
 0x7a3   : > { %v16762_v42 = vpop.f32.mrb[78].mxu0  ;;  %v21839_v60 = vpop.permute.xlu1 %18698 }
 0x7a4   : > { %v6330_v15 = vpop.f32.mrb[79].mxu0 }
 0x7a5   : > { %16835 = vmatmul.mubr.msk.f32.gmra.mrb[92].mxu0 %vm722_vm1, %v16734_v21 }
 0x7a6   : > { %v16741_v10 = vpop.f32.mrb[58].mxu1 }
 0x7a7   : > { %v6069_v6 = vpop.f32.mrb[59].mxu1  ;;  %v21842_v33 = vpop.permute.xlu1 %8863 }
 0x7a8   : > { %16837 = vmatprep.mubr.msk.f32.mxu0 %vm722_vm1, %v6069_v6 }
 0x7a9   : > { %v16776_v4 = vpop.f32.mrb[80].mxu0  ;;  %16838 = vmatmul.mubr.msk.f32.gmra.mrb[94].mxu0 %vm722_vm1, %v16741_v10 }
 0x7aa   : > { %v6504_v18 = vpop.f32.mrb[81].mxu0  ;;  %16840 = vmatprep.mubr.msk.f32.mxu0 %vm722_vm1, %v6156_v2  ;;  %v23837_v2 = vld [vmem:[#allocation30_spill] sm:$0xff] }
 0x7ab   : > { %v21847_v44 = vpop.permute.xlu1 %8952 }
 0x7ad   : > { %16841 = vmatmul.mubr.msk.f32.gmra.mrb[96].mxu0 %vm722_vm1, %v16748_v45 }
 0x7af   : > { %v21850_v46 = vpop.permute.xlu1 %18708 }
 0x7b2   : > { %v16755_v57 = vpop.f32.mrb[60].mxu1 }
 0x7b3   : > { %v6243_v21 = vpop.f32.mrb[61].mxu1  ;;  %v21852_v28 = vpop.permute.xlu1 %9045 }
 0x7b4   : > { %16843 = vmatprep.mubr.msk.f32.mxu0 %vm722_vm1, %v6243_v21  ;;  %v18641_v21 = vunpack.i.h.bf16 %v21789_v51 }
 0x7b5   : > { %v16790_v48 = vpop.f32.mrb[82].mxu0  ;;  %16844 = vmatmul.mubr.msk.f32.gmra.mrb[98].mxu0 %vm722_vm1, %v16755_v57  ;;  %v18640_v57 = vunpack.i.l.bf16 %v21789_v51  ;;  %v23846_v51 = vld [vmem:[#allocation71_spill] sm:$0xff] }
 0x7b6   : > { %v6678_v6 = vpop.f32.mrb[83].mxu0  ;;  %16846 = vmatprep.mubr.msk.f32.mxu0 %vm722_vm1, %v6330_v15 }
 0x7b7   : > { %v21857_v10 = vpop.permute.xlu1 %9136 }
 0x7b9   : > { %16847 = vmatmul.mubr.msk.f32.gmra.mrb[100].mxu0 %vm722_vm1, %v16762_v42 }
 0x7ba   : > { %16878 = vmatprep.mubr.msk.f32.mxu0 %vm722_vm1, %v23837_v2  ;;  %v23840_v2 = vld [vmem:[#allocation63_spill] sm:$0xff] }
 0x7bb   : > { %v18714_v45 = vpop.permute.xlu1 %18713 }
 0x7bc   : > { %v18716_v5 = vunpack.i.h.bf16 %v18714_v45  ;;  %v18715_v40 = vunpack.i.l.bf16 %v18714_v45  ;;  %v23850_v45 = vld [vmem:[#allocation15_spill] sm:$0xff] }
 0x7bd   : > { %16879 = vmatmul.mubr.msk.f32.vlgmr.msra.gmra.mrb[88].mxu0 %vm722_vm1, %v23838_v30  ;;  %v21872_v30 = vpack.c.bf16 %v18641_v21, %v18640_v57  ;;  %v23851_v21 = vld [vmem:[#allocation76_spill] sm:$0xff]  ;;  %v23853_v57 = vld [vmem:[#allocation77_spill] sm:$0xff] }
 0x7be   : > { %v16769_v53 = vpop.f32.mrb[62].mxu1  ;;  %16881 = vmatprep.mubr.msk.f32.mxu0 %vm722_vm1, %v23839_v49  ;;  %v17898_v15 = vpack.c.bf16 %v18716_v5, %v18715_v40  ;;  %v23842_v5 = vld [vmem:[#allocation65_spill] sm:$0xff] }
 0x7bf   : > { %v6417_v24 = vpop.f32.mrb[63].mxu1  ;;  %v18724_v42 = vpop.permute.xlu1 %18723 }
 0x7c0   : > { %v18726_v31 = vunpack.i.h.bf16 %v18724_v42  ;;  %v18725_v3 = vunpack.i.l.bf16 %v18724_v42  ;;  %16849 = vmatprep.mubr.msk.f32.mxu1 %vm722_vm1, %v6417_v24  ;;  %17899 = vmatprep.subr.bf16.mxu0 %v17898_v15  ;;  %v23856_v42 = vld [vmem:[#allocation72_spill] sm:$0xff] }
 0x7c1   : > { %16850 = vmatmul.mubr.msk.f32.vlgmr.msra.gmra.mrb[72].mxu1 %vm722_vm1, %v16769_v53  ;;  %16882 = vmatmul.mubr.msk.f32.gmra.mrb[90].mxu0 %vm722_vm1, %v23840_v2  ;;  %v23843_v53 = vld [vmem:[#allocation64_spill] sm:$0xff] }
 0x7c2   : > { %17807 = vmatpush3.bf16.xpose.msk.msra.mxu1 %vm20266_vm2, %v21796_v59  ;;  %17901 = vmatpush3.bf16.msra.mxu0 %v17898_v15  ;;  %v21877_v49 = vpack.c.bf16 %v18726_v31, %v18725_v3  ;;  %v23844_v3 = vld [vmem:[#allocation69_spill] sm:$0xff]  ;;  %v23845_v31 = vld [vmem:[#allocation66_spill] sm:$0xff]  ;;  %v23848_v59 = vld [vmem:[#allocation31_spill] sm:$0xff] }
 0x7c3   : > { %16852 = vmatprep.mubr.msk.f32.mxu1 %vm722_vm1, %v6504_v18  ;;  %16884 = vmatprep.mubr.msk.f32.mxu0 %vm722_vm1, %v23842_v5  ;;  %v23849_v18 = vld [vmem:[#allocation70_spill] sm:$0xff]  ;;  %v23855_v15 = vld [vmem:[#allocation79_spill] sm:$0xff]  ;;  %v23857_v2 = vld [vmem:[#allocation20_spill] sm:$0xff] }
 0x7c4   : > { %23841 = vst [vmem:[#allocation16_spill] sm:$0xff] %v21877_v49  ;;  %17810 = vmatprep.subr.msk.bf16.mxu1 %vm20266_vm2, %v21872_v30  ;;  %17907 = vmatprep.subr.bf16.mxu0 %v21877_v49  ;;  %v23858_v5 = vld [vmem:[#allocation75_spill] sm:$0xff] }
 0x7c5   : > { %v16783_v24 = vpop.f32.mrb[64].mxu1  ;;  %16853 = vmatmul.mubr.msk.f32.gmra.mrb[74].mxu1 %vm722_vm1, %v16776_v4  ;;  %16885 = vmatmul.mubr.msk.f32.gmra.mrb[92].mxu0 %vm722_vm1, %v23843_v53  ;;  %v23847_v4 = vld [vmem:[#allocation81_spill] sm:$0xff]  ;;  %v23860_v53 = vld [vmem:[#allocation83_spill] sm:$0xff] }
 0x7c6   : > { %v6591_v40 = vpop.f32.mrb[65].mxu1  ;;  %16887 = vmatprep.mubr.msk.f32.mxu0 %vm722_vm1, %v23844_v3  ;;  %v23862_v3 = vld [vmem:[#allocation74_spill] sm:$0xff] }
 0x7c7   : > { %16855 = vmatprep.mubr.msk.f32.mxu1 %vm722_vm1, %v6591_v40  ;;  %v23861_v40 = vld [vmem:[#allocation82_spill] sm:$0xff] }
 0x7c9   : > { %16856 = vmatmul.mubr.msk.f32.gmra.mrb[76].mxu1 %vm722_vm1, %v16783_v24  ;;  %16888 = vmatmul.mubr.msk.f32.gmra.mrb[94].mxu0 %vm722_vm1, %v23845_v31  ;;  %v23859_v24 = vld [vmem:[#allocation68_spill] sm:$0xff]  ;;  %v23863_v31 = vld [vmem:[#allocation78_spill] sm:$0xff] }
 0x7ca   : > { %16858 = vmatprep.mubr.msk.f32.mxu1 %vm722_vm1, %v6678_v6  ;;  %16890 = vmatprep.mubr.msk.f32.mxu0 %vm722_vm1, %v23846_v51  ;;  %v23852_v6 = vld [vmem:[#allocation73_spill] sm:$0xff]  ;;  %v23864_v51 = vld [vmem:[#allocation86_spill] sm:$0xff] }
 0x7cd   : > { %16859 = vmatmul.mubr.msk.f32.gmra.mrb[78].mxu1 %vm722_vm1, %v16790_v48  ;;  %16891 = vmatmul.mubr.msk.f32.gmra.mrb[96].mxu0 %vm722_vm1, %v23847_v4  ;;  %v23854_v48 = vld [vmem:[#allocation18_spill] sm:$0xff]  ;;  %v23865_v4 = vld [vmem:[#allocation85_spill] sm:$0xff] }
 0x7ce   : > { %16893 = vmatprep.mubr.msk.f32.mxu0 %vm722_vm1, %v23848_v59  ;;  %v23866_v59 = vld [vmem:[#allocation84_spill] sm:$0xff] }
 0x7d1   : > { %16894 = vmatmul.mubr.msk.f32.gmra.mrb[98].mxu0 %vm722_vm1, %v23849_v18  ;;  %v23867_v18 = vld [vmem:[#allocation80_spill] sm:$0xff] }
 0x7d2   : > { %16896 = vmatprep.mubr.msk.f32.mxu0 %vm722_vm1, %v23850_v45  ;;  %v23868_v45 = vld [vmem:[#allocation88_spill] sm:$0xff] }
 0x7d5   : > { %16897 = vmatmul.mubr.msk.f32.gmra.mrb[100].mxu0 %vm722_vm1, %v23851_v21 }
 0x7d6   : > { %16899 = vmatprep.mubr.msk.f32.mxu0 %vm722_vm1, %v23852_v6 }
 0x7d9   : > { %16900 = vmatmul.mubr.msk.f32.gmra.mrb[102].mxu0 %vm722_vm1, %v23853_v57  ;;  %v23869_v57 = vld [vmem:[#allocation87_spill] sm:$0xff] }
 0x7da   : > { %16902 = vmatprep.mubr.msk.f32.mxu0 %vm722_vm1, %v23854_v48 }
 0x7dd   : > { %16903 = vmatmul.mubr.msk.f32.gmra.mrb[104].mxu0 %vm722_vm1, %v23855_v15 }
 0x7de   : > { %16905 = vmatprep.mubr.msk.f32.mxu0 %vm722_vm1, %v23856_v42 }
 0x7e1   : > { %16906 = vmatmul.mubr.msk.f32.gmra.mrb[106].mxu0 %vm722_vm1, %v23857_v2 }
 0x7e2   : > { %16908 = vmatprep.mubr.msk.f32.mxu0 %vm722_vm1, %v23858_v5 }
 0x7e5   : > { %16909 = vmatmul.mubr.msk.f32.gmra.mrb[108].mxu0 %vm722_vm1, %v23859_v24 }
 0x7e6   : > { %16911 = vmatprep.mubr.msk.f32.mxu0 %vm722_vm1, %v23860_v53  ;;  %v7770_v53 = vpop.permute.xlu0 %7769 }
 0x7e9   : > { %16912 = vmatmul.mubr.msk.f32.gmra.mrb[110].mxu0 %vm722_vm1, %v23861_v40 }
 0x7ea   : > { %16914 = vmatprep.mubr.msk.f32.mxu0 %vm722_vm1, %v23862_v3  ;;  %v18644_v40 = vpop.permute.xlu0 %18643 }
 0x7ed   : > { %16915 = vmatmul.mubr.msk.f32.gmra.mrb[112].mxu0 %vm722_vm1, %v23863_v31 }
 0x7ee   : > { %16917 = vmatprep.mubr.msk.f32.mxu0 %vm722_vm1, %v23864_v51  ;;  %v7863_v3 = vpop.permute.xlu0 %7862 }
 0x7f1   : > { %16918 = vmatmul.mubr.msk.f32.gmra.mrb[114].mxu0 %vm722_vm1, %v23865_v4 }
 0x7f2   : > { %16920 = vmatprep.mubr.msk.f32.mxu0 %vm722_vm1, %v23866_v59  ;;  %v7952_v31 = vpop.permute.xlu0 %7951 }
 0x7f5   : > { %16921 = vmatmul.mubr.msk.f32.gmra.mrb[116].mxu0 %vm722_vm1, %v23867_v18  ;;  %v18646_v18 = vunpack.i.h.bf16 %v18644_v40 }
 0x7f6   : > { %16923 = vmatprep.mubr.msk.f32.mxu0 %vm722_vm1, %v23868_v45  ;;  %v18654_v51 = vpop.permute.xlu0 %18653  ;;  %v18645_v45 = vunpack.i.l.bf16 %v18644_v40 }
 0x7f7   : > { %v16804_v21 = vpop.f32.mrb[84].mxu0 }
 0x7f8   : > { %v6852_v6 = vpop.f32.mrb[85].mxu0 }
 0x7f9   : > { %16924 = vmatmul.mubr.msk.f32.gmra.mrb[118].mxu0 %vm722_vm1, %v23869_v57 }
 0x7fe   : > { %v16818_v48 = vpop.f32.mrb[86].mxu0 }
 0x7ff   : > { %v7026_v15 = vpop.f32.mrb[87].mxu0 }
 0x805   : > { %v16797_v42 = vpop.f32.mrb[66].mxu1 }
 0x806   : > { %v6765_v2 = vpop.f32.mrb[67].mxu1 }
 0x807   : > { %16861 = vmatprep.mubr.msk.f32.mxu1 %vm722_vm1, %v6765_v2 }
 0x808   : > { %16862 = vmatmul.mubr.msk.f32.gmra.mrb[80].mxu1 %vm722_vm1, %v16797_v42 }
 0x809   : > { %v16811_v5 = vpop.f32.mrb[68].mxu1  ;;  %16864 = vmatprep.mubr.msk.f32.mxu1 %vm722_vm1, %v6852_v6  ;;  %v17814_v6 = vpack.c.bf16 %v18646_v18, %v18645_v45 }
 0x80a   : > { %v6939_v24 = vpop.f32.mrb[69].mxu1 }
 0x80c   : > { %16865 = vmatmul.mubr.msk.f32.gmra.mrb[82].mxu1 %vm722_vm1, %v16804_v21  ;;  %v8045_v21 = vpop.permute.xlu0 %8044 }
 0x80d   : > { %16867 = vmatprep.mubr.msk.f32.mxu1 %vm722_vm1, %v6939_v24  ;;  %v18660_v24 = vunpack.i.l.bf16 %v21812_v27 }
 0x810   : > { %16868 = vmatmul.mubr.msk.f32.gmra.mrb[84].mxu1 %vm722_vm1, %v16811_v5  ;;  %v8134_v57 = vpop.permute.xlu0 %8133 }
 0x811   : > { %16870 = vmatprep.mubr.msk.f32.mxu1 %vm722_vm1, %v7026_v15  ;;  %v18650_v15 = vunpack.i.l.bf16 %v21804_v39 }
 0x814   : > { %16871 = vmatmul.mubr.msk.f32.gmra.mrb[86].mxu1 %vm722_vm1, %v16818_v48  ;;  %v18651_v48 = vunpack.i.h.bf16 %v21804_v39  ;;  %v18664_v2 = vpop.permute.xlu0 %18663  ;;  %v18661_v39 = vunpack.i.h.bf16 %v21812_v27 }
 0x816   : > { %v17820_v42 = vpack.c.bf16 %v18651_v48, %v18650_v15  ;;  %v17832_v40 = vpack.c.bf16 %v18661_v39, %v18660_v24  ;;  %v18701_v24 = vunpack.i.h.bf16 %v21839_v60 }
 0x835   : > { %v16825_v4 = vpop.f32.mrb[70].mxu1 }
 0x836   : > { %v7113_v59 = vpop.f32.mrb[71].mxu1 }
 0x837   : > { %16873 = vmatprep.mubr.msk.f32.mxu1 %vm722_vm1, %v7113_v59 }
 0x838   : > { %16874 = vmatmul.mubr.msk.f32.gmra.mrb[88].mxu1 %vm722_vm1, %v16825_v4  ;;  %v18670_v4 = vunpack.i.l.bf16 %v21818_v12 }
 0x839   : > { %16930 = vmatprep.mubr.msk.f32.mxu1 %vm722_vm1, %v7770_v53 }
 0x83c   : > { %16931 = vmatmul.mubr.msk.f32.vlgmr.msra.gmra.mrb[90].mxu1 %vm722_vm1, %v21791_v43  ;;  %v18656_v43 = vunpack.i.h.bf16 %v18654_v51 }
 0x83d   : > { %17813 = vmatpush3.bf16.xpose.msk.msra.mxu1 %vm20266_vm2, %v21872_v30  ;;  %16937 = vmatprep.mubr.msk.f32.mxu1 %vm722_vm1, %v21799_v54  ;;  %v18655_v54 = vunpack.i.l.bf16 %v18654_v51  ;;  %v8227_v30 = vpop.permute.xlu0 %8226  ;;  %v18671_v51 = vunpack.i.h.bf16 %v21818_v12 }
 0x83e   : > { %17816 = vmatprep.subr.msk.bf16.mxu1 %vm20266_vm2, %v17814_v6 }
 0x83f   : > { %v17826_v5 = vpack.c.bf16 %v18656_v43, %v18655_v54  ;;  %v17844_v18 = vpack.c.bf16 %v18671_v51, %v18670_v4  ;;  %v18690_v43 = vunpack.i.l.bf16 %v21830_v35 }
 0x841   : > { %v8316_v53 = vpop.permute.xlu0 %8315 }
 0x844   : > { %16938 = vmatmul.mubr.msk.f32.vlgmr.msra.gmra.mrb[92].mxu1 %vm722_vm1, %v7863_v3  ;;  %v18665_v3 = vunpack.i.l.bf16 %v18664_v2 }
 0x845   : > { %17819 = vmatpush3.bf16.xpose.msk.msra.mxu1 %vm20266_vm2, %v17814_v6  ;;  %16944 = vmatprep.mubr.msk.f32.mxu1 %vm722_vm1, %v7952_v31  ;;  %v18681_v6 = vunpack.i.h.bf16 %v21824_v52 }
 0x846   : > { %17822 = vmatprep.subr.msk.bf16.mxu1 %vm20266_vm2, %v17820_v42 }
 0x84c   : > { %16945 = vmatmul.mubr.msk.f32.vlgmr.msra.gmra.mrb[94].mxu1 %vm722_vm1, %v21808_v1  ;;  %v18674_v1 = vpop.permute.xlu0 %18673 }
 0x84d   : > { %17825 = vmatpush3.bf16.xpose.msk.msra.mxu1 %vm20266_vm2, %v17820_v42  ;;  %16951 = vmatprep.mubr.msk.f32.mxu1 %vm722_vm1, %v21810_v22  ;;  %v18666_v22 = vunpack.i.h.bf16 %v18664_v2 }
 0x84e   : > { %17828 = vmatprep.subr.msk.bf16.mxu1 %vm20266_vm2, %v17826_v5 }
 0x84f   : > { %v17838_v31 = vpack.c.bf16 %v18666_v22, %v18665_v3 }
 0x850   : > { %v8409_v27 = vpop.permute.xlu0 %8408 }
 0x854   : > { %16952 = vmatmul.mubr.msk.f32.vlgmr.msra.gmra.mrb[96].mxu1 %vm722_vm1, %v8045_v21  ;;  %v8498_v59 = vpop.permute.xlu0 %8497 }
 0x855   : > { %17831 = vmatpush3.bf16.xpose.msk.msra.mxu1 %vm20266_vm2, %v17826_v5  ;;  %16958 = vmatprep.mubr.msk.f32.mxu1 %vm722_vm1, %v8134_v57  ;;  %v18680_v57 = vunpack.i.l.bf16 %v21824_v52  ;;  %v18691_v52 = vunpack.i.h.bf16 %v21830_v35 }
 0x856   : > { %17834 = vmatprep.subr.msk.bf16.mxu1 %vm20266_vm2, %v17832_v40 }
 0x857   : > { %v17856_v48 = vpack.c.bf16 %v18681_v6, %v18680_v57  ;;  %v18729_v57 = vpop.permute.xlu1 %18728 }
 0x858   : > { %v18684_v45 = vpop.permute.xlu0 %18683 }
 0x85c   : > { %16959 = vmatmul.mubr.msk.f32.vlgmr.msra.gmra.mrb[98].mxu1 %vm722_vm1, %v21814_v61  ;;  %v18676_v61 = vunpack.i.h.bf16 %v18674_v1  ;;  %v8591_v12 = vpop.permute.xlu0 %8590 }
 0x85d   : > { %17837 = vmatpush3.bf16.xpose.msk.msra.mxu1 %vm20266_vm2, %v17832_v40  ;;  %16965 = vmatprep.mubr.msk.f32.mxu1 %vm722_vm1, %v21816_v7  ;;  %v18675_v7 = vunpack.i.l.bf16 %v18674_v1 }
 0x85e   : > { %17840 = vmatprep.subr.msk.bf16.mxu1 %vm20266_vm2, %v17838_v31 }
 0x85f   : > { %v17850_v21 = vpack.c.bf16 %v18676_v61, %v18675_v7  ;;  %v18711_v61 = vunpack.i.h.bf16 %v21850_v46  ;;  %v18710_v7 = vunpack.i.l.bf16 %v21850_v46 }
 0x860   : > { %v8680_v15 = vpop.permute.xlu0 %8679 }
 0x864   : > { %16966 = vmatmul.mubr.msk.f32.vlgmr.msra.gmra.mrb[100].mxu1 %vm722_vm1, %v8227_v30  ;;  %v18694_v42 = vpop.permute.xlu0 %18693  ;;  %v17868_v30 = vpack.c.bf16 %v18691_v52, %v18690_v43 }
 0x865   : > { %17843 = vmatpush3.bf16.xpose.msk.msra.mxu1 %vm20266_vm2, %v17838_v31  ;;  %16972 = vmatprep.mubr.msk.f32.mxu1 %vm722_vm1, %v8316_v53  ;;  %v18695_v5 = vunpack.i.l.bf16 %v18694_v42  ;;  %v18700_v53 = vunpack.i.l.bf16 %v21839_v60 }
 0x866   : > { %17846 = vmatprep.subr.msk.bf16.mxu1 %vm20266_vm2, %v17844_v18 }
 0x867   : > { %v17880_v1 = vpack.c.bf16 %v18701_v24, %v18700_v53 }
 0x868   : > { %v8773_v54 = vpop.permute.xlu0 %8772 }
 0x86c   : > { %16973 = vmatmul.mubr.msk.f32.vlgmr.msra.gmra.mrb[102].mxu1 %vm722_vm1, %v21820_v50  ;;  %v18686_v50 = vunpack.i.h.bf16 %v18684_v45 }
 0x86d   : > { %17849 = vmatpush3.bf16.xpose.msk.msra.mxu1 %vm20266_vm2, %v17844_v18  ;;  %16979 = vmatprep.mubr.msk.f32.mxu1 %vm722_vm1, %v21822_v62  ;;  %v18685_v62 = vunpack.i.l.bf16 %v18684_v45 }
 0x86e   : > { %17852 = vmatprep.subr.msk.bf16.mxu1 %vm20266_vm2, %v17850_v21 }
 0x86f   : > { %v17862_v2 = vpack.c.bf16 %v18686_v50, %v18685_v62 }
 0x874   : > { %16980 = vmatmul.mubr.msk.f32.vlgmr.msra.gmra.mrb[104].mxu1 %vm722_vm1, %v8409_v27 }
 0x875   : > { %17855 = vmatpush3.bf16.xpose.msk.msra.mxu1 %vm20266_vm2, %v17850_v21  ;;  %16986 = vmatprep.mubr.msk.f32.mxu1 %vm722_vm1, %v8498_v59  ;;  %v17892_v21 = vpack.c.bf16 %v18711_v61, %v18710_v7 }
 0x876   : > { %17858 = vmatprep.subr.msk.bf16.mxu1 %vm20266_vm2, %v17856_v48 }
 0x87c   : > { %16987 = vmatmul.mubr.msk.f32.vlgmr.msra.gmra.mrb[106].mxu1 %vm722_vm1, %v21826_v0  ;;  %v18696_v0 = vunpack.i.h.bf16 %v18694_v42 }
 0x87d   : > { %17861 = vmatpush3.bf16.xpose.msk.msra.mxu1 %vm20266_vm2, %v17856_v48  ;;  %16993 = vmatprep.mubr.msk.f32.mxu1 %vm722_vm1, %v21828_v63  ;;  %v8862_v63 = vpop.permute.xlu0 %8861  ;;  %v18731_v48 = vunpack.i.h.bf16 %v18729_v57 }
 0x87e   : > { %17864 = vmatprep.subr.msk.bf16.mxu1 %vm20266_vm2, %v17862_v2  ;;  %v17874_v39 = vpack.c.bf16 %v18696_v0, %v18695_v5  ;;  %v22115_v0 = vld [vmem:[#allocation7 + $0x28] sm:$0xff]  ;;  %v22117_v5 = vld [vmem:[#allocation7 + $0x20] sm:$0xff] }
 0x881   : > { %v18704_v35 = vpop.permute.xlu0 %18703 }
 0x882   : > { %v18705_v3 = vunpack.i.l.bf16 %v18704_v35 }
 0x884   : > { %16994 = vmatmul.mubr.msk.f32.vlgmr.msra.gmra.mrb[108].mxu1 %vm722_vm1, %v8591_v12 }
 0x885   : > { %17867 = vmatpush3.bf16.xpose.msk.msra.mxu1 %vm20266_vm2, %v17862_v2  ;;  %17000 = vmatprep.mubr.msk.f32.mxu1 %vm722_vm1, %v8680_v15  ;;  %v8955_v40 = vpop.permute.xlu0 %8954  ;;  %v18730_v15 = vunpack.i.l.bf16 %v18729_v57 }
 0x886   : > { %17870 = vmatprep.subr.msk.bf16.mxu1 %vm20266_vm2, %v17868_v30 }
 0x887   : > { %v22092_v50 = vpack.c.bf16 %v18731_v48, %v18730_v15 }
 0x889   : > { %v9044_v60 = vpop.permute.xlu0 %9043  ;;  %23878 = vst [vmem:[#allocation62_spill] sm:$0xff] %v22092_v50 }
 0x88c   : > { %17001 = vmatmul.mubr.msk.f32.vlgmr.msra.gmra.mrb[110].mxu1 %vm722_vm1, %v21832_v20 }
 0x88d   : > { %17873 = vmatpush3.bf16.xpose.msk.msra.mxu1 %vm20266_vm2, %v17868_v30  ;;  %17007 = vmatprep.mubr.msk.f32.mxu1 %vm722_vm1, %v21834_v25  ;;  %v18706_v25 = vunpack.i.h.bf16 %v18704_v35  ;;  %v9135_v18 = vpop.permute.xlu0 %9134 }
 0x88e   : > { %17876 = vmatprep.subr.msk.bf16.mxu1 %vm20266_vm2, %v17874_v39 }
 0x88f   : > { %v17886_v51 = vpack.c.bf16 %v18706_v25, %v18705_v3 }
 0x891   : > { %v18719_v12 = vpop.permute.xlu0 %18718 }
 0x892   : > { %v18720_v6 = vunpack.i.l.bf16 %v18719_v12 }
 0x894   : > { %17008 = vmatmul.mubr.msk.f32.vlgmr.msra.gmra.mrb[112].mxu1 %vm722_vm1, %v8773_v54  ;;  %v22048_v22 = vpop.f32.mrb[72].mxu1 }
 0x895   : > { %23870 = vst [vmem:[#allocation36_spill] sm:$0xff] %v22048_v22  ;;  %17879 = vmatpush3.bf16.xpose.msk.msra.mxu1 %vm20266_vm2, %v17874_v39  ;;  %17014 = vmatprep.mubr.msk.f32.mxu1 %vm722_vm1, %v8862_v63  ;;  %v22053_v20 = vpop.f32.mrb[73].mxu1 }
 0x896   : > { %23871 = vst [vmem:[#allocation38_spill] sm:$0xff] %v22053_v20  ;;  %17882 = vmatprep.subr.msk.bf16.mxu1 %vm20266_vm2, %v17880_v1 }
 0x898   : > { %v22057_v31 = vpop.f32.mrb[74].mxu1 }
 0x899   : > { %23872 = vst [vmem:[#allocation39_spill] sm:$0xff] %v22057_v31  ;;  %v22059_v27 = vpop.f32.mrb[75].mxu1 }
 0x89a   : > { %23873 = vst [vmem:[#allocation17_spill] sm:$0xff] %v22059_v27 }
 0x89c   : > { %17015 = vmatmul.mubr.msk.f32.vlgmr.msra.gmra.mrb[114].mxu1 %vm722_vm1, %v21842_v33  ;;  %v22063_v4 = vpop.f32.mrb[76].mxu1 }
 0x89d   : > { %23874 = vst [vmem:[#allocation32_spill] sm:$0xff] %v22063_v4  ;;  %17885 = vmatpush3.bf16.xpose.msk.msra.mxu1 %vm20266_vm2, %v17880_v1  ;;  %17021 = vmatprep.mubr.msk.f32.mxu1 %vm722_vm1, %v21847_v44  ;;  %v22069_v59 = vpop.f32.mrb[77].mxu1  ;;  %v18721_v44 = vunpack.i.h.bf16 %v18719_v12 }
 0x89e   : > { %23875 = vst [vmem:[#allocation33_spill] sm:$0xff] %v22069_v59  ;;  %17888 = vmatprep.subr.msk.bf16.mxu1 %vm20266_vm2, %v17886_v51 }
 0x89f   : > { %v17902_v46 = vpack.c.bf16 %v18721_v44, %v18720_v6 }
 0x8a0   : > { %v22075_v45 = vpop.f32.mrb[78].mxu1 }
 0x8a1   : > { %23876 = vst [vmem:[#allocation19_spill] sm:$0xff] %v22075_v45  ;;  %v22077_v33 = vpop.f32.mrb[79].mxu1 }
 0x8a2   : > { %23877 = vst [vmem:[#allocation30_spill] sm:$0xff] %v22077_v33 }
 0x8a4   : > { %17022 = vmatmul.mubr.msk.f32.vlgmr.msra.gmra.mrb[116].mxu1 %vm722_vm1, %v8955_v40 }
 0x8a5   : > { %17891 = vmatpush3.bf16.xpose.msk.msra.mxu1 %vm20266_vm2, %v17886_v51  ;;  %17028 = vmatprep.mubr.msk.f32.mxu1 %vm722_vm1, %v9044_v60 }
 0x8a6   : > { %17894 = vmatprep.subr.msk.bf16.mxu1 %vm20266_vm2, %v17892_v21 }
 0x8ac   : > { %17029 = vmatmul.mubr.msk.f32.vlgmr.msra.gmra.mrb[118].mxu1 %vm722_vm1, %v21852_v28 }
 0x8ad   : > { %17897 = vmatpush3.bf16.xpose.msk.msra.mxu1 %vm20266_vm2, %v17892_v21  ;;  %17035 = vmatprep.mubr.msk.f32.mxu1 %vm722_vm1, %v9135_v18 }
 0x8ae   : > { %17903 = vmatprep.subr.bf16.mxu1 %v17902_v46 }
 0x8b4   : > { %17036 = vmatmul.mubr.msk.f32.vlgmr.msra.gmra.mrb[120].mxu1 %vm722_vm1, %v21857_v10 }
 0x8b5   : > { %17905 = vmatpush3.bf16.msra.mxu1 %v17902_v46 }
 0x8b6   : > { %17911 = vmatprep.subr.bf16.mxu1 %v22092_v50 }
 0x8db   : > { %v22095_v62 = vpop.f32.mrb[80].mxu1 }
 0x8dc   : > { %23879 = vst [vmem:[#allocation67_spill] sm:$0xff] %v22095_v62  ;;  %v22097_v28 = vpop.f32.mrb[81].mxu1 }
 0x8dd   : > { %23880 = vst [vmem:[#allocation63_spill] sm:$0xff] %v22097_v28 }
 0x8df   : > { %v22099_v42 = vpop.f32.mrb[82].mxu1 }
 0x8e0   : > { %23881 = vst [vmem:[#allocation65_spill] sm:$0xff] %v22099_v42  ;;  %v22101_v2 = vpop.f32.mrb[83].mxu1 }
 0x8e1   : > { %23882 = vst [vmem:[#allocation64_spill] sm:$0xff] %v22101_v2 }
 0x8e3   : > { %v22103_v52 = vpop.f32.mrb[84].mxu1 }
 0x8e4   : > { %23883 = vst [vmem:[#allocation69_spill] sm:$0xff] %v22103_v52  ;;  %v22105_v43 = vpop.f32.mrb[85].mxu1 }
 0x8e5   : > { %23884 = vst [vmem:[#allocation66_spill] sm:$0xff] %v22105_v43 }
 0x8e7   : > { %v22107_v54 = vpop.f32.mrb[86].mxu1 }
 0x8e8   : > { %23885 = vst [vmem:[#allocation71_spill] sm:$0xff] %v22107_v54  ;;  %v22109_v10 = vpop.f32.mrb[87].mxu1 }
 0x8e9   : > { %23886 = vst [vmem:[#allocation81_spill] sm:$0xff] %v22109_v10 }
 0x90b   : > { %v22111_v30 = vpop.f32.mrb[88].mxu1 }
 0x90c   : > { %23887 = vst [vmem:[#allocation31_spill] sm:$0xff] %v22111_v30  ;;  %v22113_v63 = vpop.f32.mrb[89].mxu1 }
 0x90d   : > { %23888 = vst [vmem:[#allocation70_spill] sm:$0xff] %v22113_v63 }
 0x90f   : > { %v16932_v39 = vpop.f32.mrb[90].mxu1 }
 0x910   : > { %v22120_v35 = vadd.f32 %v16932_v39, %v22115_v0  ;;  %v7851_v24 = vpop.f32.mrb[91].mxu1 }
 0x911   : > { %v22123_v53 = vadd.f32 %v7851_v24, %v22117_v5 }
 0x912   : > { %v9228_v40 = vsel %vm2173_vm3, %v22120_v35, -inf }
 0x913   : > { %9229 = vmax.xlane.f32.xlu1 %v9228_v40  ;;  %v9225_v1 = vsel %vm2173_vm3, %v22123_v53, -inf }
 0x914   : > { %9226 = vmax.xlane.f32.xlu0 %v9225_v1 }
 0x917   : > { %v16939_v25 = vpop.f32.mrb[92].mxu1 }
 0x918   : > { %v22130_v3 = vadd.f32 %v16939_v25, %v22115_v0  ;;  %v7942_v60 = vpop.f32.mrb[93].mxu1 }
 0x919   : > { %v22133_v51 = vadd.f32 %v7942_v60, %v22117_v5 }
 0x91a   : > { %v9234_v18 = vsel %vm2173_vm3, %v22130_v3, -inf }
 0x91b   : > { %9235 = vmax.xlane.f32.xlu0 %v9234_v18  ;;  %v9231_v61 = vsel %vm2173_vm3, %v22133_v51, -inf }
 0x91f   : > { %v16946_v7 = vpop.f32.mrb[94].mxu1  ;;  %9232 = vmax.xlane.f32.xlu0 %v9231_v61 }
 0x920   : > { %v22140_v21 = vadd.f32 %v16946_v7, %v22115_v0  ;;  %v8033_v12 = vpop.f32.mrb[95].mxu1 }
 0x921   : > { %v22143_v44 = vadd.f32 %v8033_v12, %v22117_v5 }
 0x922   : > { %v9240_v6 = vsel %vm2173_vm3, %v22140_v21, -inf }
 0x923   : > { %9241 = vmax.xlane.f32.xlu0 %v9240_v6  ;;  %v9237_v46 = vsel %vm2173_vm3, %v22143_v44, -inf }
 0x924   : > { %9238 = vmax.xlane.f32.xlu1 %v9237_v46 }
 0x927   : > { %v16953_v57 = vpop.f32.mrb[96].mxu1 }
 0x928   : > { %v22150_v48 = vadd.f32 %v16953_v57, %v22115_v0  ;;  %v8124_v15 = vpop.f32.mrb[97].mxu1 }
 0x929   : > { %v22153_v39 = vadd.f32 %v8124_v15, %v22117_v5 }
 0x92a   : > { %v9246_v24 = vsel %vm2173_vm3, %v22150_v48, -inf }
 0x92b   : > { %9247 = vmax.xlane.f32.xlu0 %v9246_v24  ;;  %v9243_v40 = vsel %vm2173_vm3, %v22153_v39, -inf }
 0x92c   : > { %9244 = vmax.xlane.f32.xlu1 %v9243_v40 }
 0x92f   : > { %v16960_v1 = vpop.f32.mrb[98].mxu1 }
 0x930   : > { %v22160_v25 = vadd.f32 %v16960_v1, %v22115_v0  ;;  %v8215_v60 = vpop.f32.mrb[99].mxu1 }
 0x931   : > { %v22163_v18 = vadd.f32 %v8215_v60, %v22117_v5 }
 0x932   : > { %v9252_v61 = vsel %vm2173_vm3, %v22160_v25, -inf }
 0x933   : > { %9253 = vmax.xlane.f32.xlu0 %v9252_v61  ;;  %v9249_v7 = vsel %vm2173_vm3, %v22163_v18, -inf }
 0x934   : > { %9250 = vmax.xlane.f32.xlu1 %v9249_v7 }
 0x937   : > { %v16967_v12 = vpop.f32.mrb[100].mxu1 }
 0x938   : > { %v22170_v6 = vadd.f32 %v16967_v12, %v22115_v0  ;;  %v8306_v46 = vpop.f32.mrb[101].mxu1 }
 0x939   : > { %v22173_v57 = vadd.f32 %v8306_v46, %v22117_v5 }
 0x93a   : > { %v9258_v15 = vsel %vm2173_vm3, %v22170_v6, -inf }
 0x93b   : > { %9259 = vmax.xlane.f32.xlu0 %v9258_v15  ;;  %v9255_v24 = vsel %vm2173_vm3, %v22173_v57, -inf }
 0x93c   : > { %9256 = vmax.xlane.f32.xlu1 %v9255_v24 }
 0x93f   : > { %v16974_v40 = vpop.f32.mrb[102].mxu1 }
 0x940   : > { %v22180_v1 = vadd.f32 %v16974_v40, %v22115_v0  ;;  %v8397_v60 = vpop.f32.mrb[103].mxu1 }
 0x941   : > { %v22183_v61 = vadd.f32 %v8397_v60, %v22117_v5 }
 0x942   : > { %v9264_v7 = vsel %vm2173_vm3, %v22180_v1, -inf }
 0x943   : > { %9265 = vmax.xlane.f32.xlu0 %v9264_v7  ;;  %v9261_v12 = vsel %vm2173_vm3, %v22183_v61, -inf }
 0x944   : > { %9262 = vmax.xlane.f32.xlu1 %v9261_v12 }
 0x947   : > { %v16981_v46 = vpop.f32.mrb[104].mxu1 }
 0x948   : > { %v22190_v15 = vadd.f32 %v16981_v46, %v22115_v0  ;;  %v8488_v24 = vpop.f32.mrb[105].mxu1 }
 0x949   : > { %v22193_v40 = vadd.f32 %v8488_v24, %v22117_v5 }
 0x94a   : > { %v9270_v60 = vsel %vm2173_vm3, %v22190_v15, -inf }
 0x94b   : > { %9271 = vmax.xlane.f32.xlu0 %v9270_v60  ;;  %v9267_v63 = vsel %vm2173_vm3, %v22193_v40, -inf }
 0x94c   : > { %9268 = vmax.xlane.f32.xlu1 %v9267_v63 }
 0x94f   : > { %v16988_v7 = vpop.f32.mrb[106].mxu1 }
 0x950   : > { %v22200_v30 = vadd.f32 %v16988_v7, %v22115_v0  ;;  %v8579_v12 = vpop.f32.mrb[107].mxu1 }
 0x951   : > { %v22203_v46 = vadd.f32 %v8579_v12, %v22117_v5 }
 0x952   : > { %v9276_v24 = vsel %vm2173_vm3, %v22200_v30, -inf }
 0x953   : > { %9277 = vmax.xlane.f32.xlu0 %v9276_v24  ;;  %v9273_v10 = vsel %vm2173_vm3, %v22203_v46, -inf }
 0x954   : > { %9274 = vmax.xlane.f32.xlu1 %v9273_v10 }
 0x957   : > { %v16995_v60 = vpop.f32.mrb[108].mxu1 }
 0x958   : > { %v22210_v54 = vadd.f32 %v16995_v60, %v22115_v0  ;;  %v8670_v63 = vpop.f32.mrb[109].mxu1 }
 0x959   : > { %v22213_v7 = vadd.f32 %v8670_v63, %v22117_v5 }
 0x95a   : > { %v9282_v12 = vsel %vm2173_vm3, %v22210_v54, -inf }
 0x95b   : > { %9283 = vmax.xlane.f32.xlu0 %v9282_v12  ;;  %v9279_v43 = vsel %vm2173_vm3, %v22213_v7, -inf }
 0x95c   : > { %9280 = vmax.xlane.f32.xlu1 %v9279_v43 }
 0x95f   : > { %v17002_v24 = vpop.f32.mrb[110].mxu1 }
 0x960   : > { %v22220_v52 = vadd.f32 %v17002_v24, %v22115_v0  ;;  %v8761_v10 = vpop.f32.mrb[111].mxu1 }
 0x961   : > { %v22223_v60 = vadd.f32 %v8761_v10, %v22117_v5 }
 0x962   : > { %v9288_v63 = vsel %vm2173_vm3, %v22220_v52, -inf }
 0x963   : > { %9289 = vmax.xlane.f32.xlu0 %v9288_v63  ;;  %v9285_v2 = vsel %vm2173_vm3, %v22223_v60, -inf }
 0x964   : > { %9286 = vmax.xlane.f32.xlu1 %v9285_v2 }
 0x967   : > { %v17009_v12 = vpop.f32.mrb[112].mxu1 }
 0x968   : > { %v22230_v42 = vadd.f32 %v17009_v12, %v22115_v0  ;;  %v8852_v43 = vpop.f32.mrb[113].mxu1 }
 0x969   : > { %v22233_v24 = vadd.f32 %v8852_v43, %v22117_v5 }
 0x96a   : > { %v9294_v10 = vsel %vm2173_vm3, %v22230_v42, -inf }
 0x96b   : > { %9295 = vmax.xlane.f32.xlu0 %v9294_v10  ;;  %v9291_v28 = vsel %vm2173_vm3, %v22233_v24, -inf }
 0x96c   : > { %9292 = vmax.xlane.f32.xlu1 %v9291_v28 }
 0x96f   : > { %v17016_v63 = vpop.f32.mrb[114].mxu1 }
 0x970   : > { %v22240_v62 = vadd.f32 %v17016_v63, %v22115_v0  ;;  %v8943_v2 = vpop.f32.mrb[115].mxu1 }
 0x971   : > { %v22243_v12 = vadd.f32 %v8943_v2, %v22117_v5 }
 0x972   : > { %v9300_v43 = vsel %vm2173_vm3, %v22240_v62, -inf }
 0x973   : > { %9301 = vmax.xlane.f32.xlu0 %v9300_v43  ;;  %v9297_v33 = vsel %vm2173_vm3, %v22243_v12, -inf }
 0x974   : > { %9298 = vmax.xlane.f32.xlu1 %v9297_v33 }
 0x977   : > { %v17023_v10 = vpop.f32.mrb[116].mxu1 }
 0x978   : > { %v22250_v45 = vadd.f32 %v17023_v10, %v22115_v0  ;;  %v9034_v28 = vpop.f32.mrb[117].mxu1 }
 0x979   : > { %v22253_v63 = vadd.f32 %v9034_v28, %v22117_v5 }
 0x97a   : > { %v9306_v2 = vsel %vm2173_vm3, %v22250_v45, -inf }
 0x97b   : > { %9307 = vmax.xlane.f32.xlu0 %v9306_v2  ;;  %v9303_v59 = vsel %vm2173_vm3, %v22253_v63, -inf }
 0x97c   : > { %9304 = vmax.xlane.f32.xlu1 %v9303_v59 }
 0x97f   : > { %v17030_v43 = vpop.f32.mrb[118].mxu1 }
 0x980   : > { %v22260_v4 = vadd.f32 %v17030_v43, %v22115_v0  ;;  %v9125_v33 = vpop.f32.mrb[119].mxu1 }
 0x981   : > { %v22263_v10 = vadd.f32 %v9125_v33, %v22117_v5 }
 0x982   : > { %v9312_v28 = vsel %vm2173_vm3, %v22260_v4, -inf }
 0x983   : > { %9313 = vmax.xlane.f32.xlu0 %v9312_v28  ;;  %v9309_v27 = vsel %vm2173_vm3, %v22263_v10, -inf  ;;  %v22279_v28 = vpop.permute.xlu0 %18733 }
 0x984   : > { %9310 = vmax.xlane.f32.xlu1 %v9309_v27 }
 0x987   : > { %v17037_v2 = vpop.f32.mrb[120].mxu1  ;;  %v22281_v22 = vpop.permute.xlu0 %18743 }
 0x988   : > { %v22270_v31 = vadd.f32 %v17037_v2, %v22115_v0  ;;  %v9216_v59 = vpop.f32.mrb[121].mxu1  ;;  %23889 = vst [vmem:[#allocation15_spill] sm:$0xff] %v22281_v22  ;;  %v22289_v0 = vpop.permute.xlu1 %18738 }
 0x989   : > { %v22273_v43 = vadd.f32 %v9216_v59, %v22117_v5  ;;  %23891 = vst [vmem:[#allocation73_spill] sm:$0xff] %v22289_v0 }
 0x98a   : > { %v9318_v33 = vsel %vm2173_vm3, %v22270_v31, -inf }
 0x98b   : > { %9319 = vmax.xlane.f32.xlu0 %v9318_v33  ;;  %v9315_v20 = vsel %vm2173_vm3, %v22273_v43, -inf  ;;  %v22285_v27 = vpop.permute.xlu0 %18753 }
 0x98c   : > { %9316 = vmax.xlane.f32.xlu1 %v9315_v20  ;;  %23890 = vst [vmem:[#allocation76_spill] sm:$0xff] %v22285_v27  ;;  %v22293_v20 = vpop.permute.xlu1 %18748 }
 0x98d   : > { %23892 = vst [vmem:[#allocation77_spill] sm:$0xff] %v22293_v20 }
 0x99d   : > { %18758 = vrot.lane.b32.xlu1 %v23826_v58, %s19667_s12 }
 0x9a0   : > { %v9230_v36 = vpop.xlane.xlu1 %9229 }
 0x9a1   : > { %18763 = vrot.lane.b32.xlu0 %v23811_v23, %s19667_s12  ;;  %v9227_v5 = vpop.xlane.xlu0 %9226  ;;  %v9322_v20 = vsub.f32 %v22120_v35, %v9230_v36 }
 0x9a2   : > { %v9321_v59 = vsub.f32 %v22123_v53, %v9227_v5 }
 0x9a3   : > { %v9355_v49 = vmul.f32 1.442695, %v9322_v20 }
 0x9a4   : > { %v9353_v58 = vmul.f32 1.442695, %v9321_v59 }
 0x9a5   : > { %18768 = vrot.lane.b32.xlu0 %v23729_v29, %s19667_s12 }
 0x9a6   : > { %19208 = vpow2.f32 %v9353_v58 }
 0x9a8   : > { %v9236_v2 = vpop.xlane.xlu0 %9235 }
 0x9a9   : > { %18773 = vrot.lane.b32.xlu0 %v20157_v47, %s19667_s12  ;;  %v9324_v53 = vsub.f32 %v22130_v3, %v9236_v2 }
 0x9ac   : > { %v9233_v33 = vpop.xlane.xlu0 %9232 }
 0x9ad   : > { %18778 = vrot.lane.b32.xlu0 %v23739_v41, %s19667_s12  ;;  %v9323_v27 = vsub.f32 %v22133_v51, %v9233_v33  ;;  %v9359_v51 = vmul.f32 1.442695, %v9324_v53 }
 0x9af   : > { %v9357_v22 = vmul.f32 1.442695, %v9323_v27 }
 0x9b0   : > { %v9242_v5 = vpop.xlane.xlu0 %9241  ;;  %v22305_v41 = vpop.eup %19208 }
 0x9b1   : > { %v9239_v50 = vpop.xlane.xlu1 %9238  ;;  %19210 = vpow2.f32 %v9357_v22  ;;  %v9326_v58 = vsub.f32 %v22140_v21, %v9242_v5 }
 0x9b2   : > { %v9325_v29 = vsub.f32 %v22143_v44, %v9239_v50 }
 0x9b3   : > { %v9363_v22 = vmul.f32 1.442695, %v9326_v58 }
 0x9b4   : > { %v9361_v23 = vmul.f32 1.442695, %v9325_v29  ;;  %v9417_v29 = vsel %vm2173_vm3, %v22305_v41, 0.0 }
 0x9b6   : > { %19212 = vpow2.f32 %v9361_v23 }
 0x9b7   : > { %19214 = vpow2.f32 %v9355_v49 }
 0x9b8   : > { %v9248_v50 = vpop.xlane.xlu0 %9247 }
 0x9b9   : > { %v9245_v47 = vpop.xlane.xlu1 %9244 }
 0x9ba   : > { %v9327_v0 = vsub.f32 %v22153_v39, %v9245_v47  ;;  %v9328_v47 = vsub.f32 %v22150_v48, %v9248_v50 }
 0x9bb   : > { %v22310_v36 = vpop.eup %19210 }
 0x9bc   : > { %v9365_v59 = vmul.f32 1.442695, %v9327_v0  ;;  %v9423_v49 = vsel %vm2173_vm3, %v22310_v36, 0.0  ;;  %v9367_v27 = vmul.f32 1.442695, %v9328_v47 }
 0x9be   : > { %19216 = vpow2.f32 %v9365_v59 }
 0x9bf   : > { %19218 = vpow2.f32 %v9359_v51 }
 0x9c0   : > { %v9254_v23 = vpop.xlane.xlu0 %9253  ;;  %v22316_v21 = vpop.eup %19212  ;;  %19220 = vpow2.f32 %v9363_v22 }
 0x9c1   : > { %v9251_v35 = vpop.xlane.xlu1 %9250  ;;  %9418 = vadd.xlane.f32.xlu1 %v9417_v29  ;;  %v9330_v39 = vsub.f32 %v22160_v25, %v9254_v23  ;;  %v22319_v0 = vpop.eup %19214  ;;  %v9429_v48 = vsel %vm2173_vm3, %v22316_v21, 0.0 }
 0x9c2   : > { %v9329_v3 = vsub.f32 %v22163_v18, %v9251_v35  ;;  %v9420_v25 = vsel %vm2173_vm3, %v22319_v0, 0.0 }
 0x9c3   : > { %v9371_v18 = vmul.f32 1.442695, %v9330_v39 }
 0x9c4   : > { %v9369_v44 = vmul.f32 1.442695, %v9329_v3 }
 0x9c5   : > { %9424 = vadd.xlane.f32.xlu1 %v9423_v49 }
 0x9c6   : > { %19222 = vpow2.f32 %v9369_v44 }
 0x9c7   : > { %19224 = vpow2.f32 %v9367_v27 }
 0x9c8   : > { %v9260_v2 = vpop.xlane.xlu0 %9259  ;;  %v22323_v20 = vpop.eup %19216  ;;  %19226 = vpow2.f32 %v9371_v18 }
 0x9c9   : > { %v9257_v33 = vpop.xlane.xlu1 %9256  ;;  %9430 = vadd.xlane.f32.xlu1 %v9429_v48  ;;  %v9332_v53 = vsub.f32 %v22170_v6, %v9260_v2  ;;  %v22329_v59 = vpop.eup %19218  ;;  %v9435_v51 = vsel %vm2173_vm3, %v22323_v20, 0.0 }
 0x9ca   : > { %v9331_v5 = vsub.f32 %v22173_v57, %v9257_v33  ;;  %v22333_v29 = vpop.eup %19220  ;;  %v9426_v6 = vsel %vm2173_vm3, %v22329_v59, 0.0 }
 0x9cb   : > { %v9375_v50 = vmul.f32 1.442695, %v9332_v53  ;;  %v9432_v49 = vsel %vm2173_vm3, %v22333_v29, 0.0 }
 0x9cc   : > { %v9373_v58 = vmul.f32 1.442695, %v9331_v5  ;;  %9421 = vadd.xlane.f32.xlu0 %v9420_v25 }
 0x9cd   : > { %9436 = vadd.xlane.f32.xlu1 %v9435_v51 }
 0x9ce   : > { %19228 = vpow2.f32 %v9373_v58 }
 0x9cf   : > { %19230 = vpow2.f32 %v9375_v50 }
 0x9d0   : > { %v22337_v57 = vpop.eup %19222  ;;  %9427 = vadd.xlane.f32.xlu0 %v9426_v6  ;;  %v9266_v22 = vpop.xlane.xlu0 %9265 }
 0x9d1   : > { %v9334_v35 = vsub.f32 %v22180_v1, %v9266_v22  ;;  %v9263_v47 = vpop.xlane.xlu1 %9262  ;;  %v9441_v23 = vsel %vm2173_vm3, %v22337_v57, 0.0  ;;  %v22345_v39 = vpop.eup %19224 }
 0x9d2   : > { %v9333_v3 = vsub.f32 %v22183_v61, %v9263_v47  ;;  %9442 = vadd.xlane.f32.xlu1 %v9441_v23  ;;  %v22347_v2 = vpop.eup %19226  ;;  %v9438_v1 = vsel %vm2173_vm3, %v22345_v39, 0.0 }
 0x9d3   : > { %v9379_v44 = vmul.f32 1.442695, %v9334_v35  ;;  %v9444_v58 = vsel %vm2173_vm3, %v22347_v2, 0.0 }
 0x9d4   : > { %9433 = vadd.xlane.f32.xlu0 %v9432_v49  ;;  %v9377_v27 = vmul.f32 1.442695, %v9333_v3 }
 0x9d5   : > { %19232 = vpow2.f32 %v9379_v44 }
 0x9d6   : > { %19234 = vpow2.f32 %v9377_v27 }
 0x9d8   : > { %v22351_v48 = vpop.eup %19228  ;;  %9439 = vadd.xlane.f32.xlu0 %v9438_v1  ;;  %v9272_v18 = vpop.xlane.xlu0 %9271 }
 0x9d9   : > { %v9336_v61 = vsub.f32 %v22190_v15, %v9272_v18  ;;  %v9269_v33 = vpop.xlane.xlu1 %9268  ;;  %v9447_v53 = vsel %vm2173_vm3, %v22351_v48, 0.0  ;;  %v22359_v51 = vpop.eup %19230 }
 0x9da   : > { %v9335_v5 = vsub.f32 %v22193_v40, %v9269_v33  ;;  %9448 = vadd.xlane.f32.xlu1 %v9447_v53  ;;  %v9450_v15 = vsel %vm2173_vm3, %v22359_v51, 0.0 }
 0x9db   : > { %v9383_v25 = vmul.f32 1.442695, %v9336_v61 }
 0x9dc   : > { %v9381_v50 = vmul.f32 1.442695, %v9335_v5  ;;  %9445 = vadd.xlane.f32.xlu0 %v9444_v58 }
 0x9dd   : > { %19236 = vpow2.f32 %v9383_v25 }
 0x9de   : > { %19238 = vpow2.f32 %v9381_v50 }
 0x9df   : > { %v22363_v6 = vpop.eup %19232 }
 0x9e0   : > { %9451 = vadd.xlane.f32.xlu0 %v9450_v15  ;;  %v9278_v22 = vpop.xlane.xlu0 %9277  ;;  %v9456_v3 = vsel %vm2173_vm3, %v22363_v6, 0.0  ;;  %v22369_v44 = vpop.eup %19234 }
 0x9e1   : > { %v9338_v40 = vsub.f32 %v22200_v30, %v9278_v22  ;;  %v9275_v35 = vpop.xlane.xlu1 %9274  ;;  %v9453_v1 = vsel %vm2173_vm3, %v22369_v44, 0.0 }
 0x9e2   : > { %v9337_v47 = vsub.f32 %v22203_v46, %v9275_v35 }
 0x9e3   : > { %v9387_v23 = vmul.f32 1.442695, %v9338_v40 }
 0x9e4   : > { %v9385_v49 = vmul.f32 1.442695, %v9337_v47  ;;  %9457 = vadd.xlane.f32.xlu0 %v9456_v3 }
 0x9e5   : > { %19240 = vpow2.f32 %v9387_v23 }
 0x9e6   : > { %19242 = vpow2.f32 %v9385_v49 }
 0x9e7   : > { %v22371_v27 = vpop.eup %19236 }
 0x9e8   : > { %v22375_v18 = vpop.eup %19238  ;;  %9454 = vadd.xlane.f32.xlu0 %v9453_v1  ;;  %v9284_v30 = vpop.xlane.xlu0 %9283  ;;  %v9462_v25 = vsel %vm2173_vm3, %v22371_v27, 0.0 }
 0x9e9   : > { %v9340_v46 = vsub.f32 %v22210_v54, %v9284_v30  ;;  %v9281_v61 = vpop.xlane.xlu1 %9280  ;;  %v9459_v33 = vsel %vm2173_vm3, %v22375_v18, 0.0 }
 0x9ea   : > { %v9339_v53 = vsub.f32 %v22213_v7, %v9281_v61  ;;  %9460 = vadd.xlane.f32.xlu1 %v9459_v33 }
 0x9eb   : > { %v9391_v5 = vmul.f32 1.442695, %v9340_v46 }
 0x9ec   : > { %v9389_v58 = vmul.f32 1.442695, %v9339_v53  ;;  %9463 = vadd.xlane.f32.xlu0 %v9462_v25 }
 0x9ed   : > { %19244 = vpow2.f32 %v9391_v5 }
 0x9ee   : > { %19246 = vpow2.f32 %v9389_v58 }
 0x9ef   : > { %v22383_v50 = vpop.eup %19240 }
 0x9f0   : > { %v9290_v15 = vpop.xlane.xlu0 %9289  ;;  %v9468_v54 = vsel %vm2173_vm3, %v22383_v50, 0.0  ;;  %v22387_v22 = vpop.eup %19242 }
 0x9f1   : > { %v9342_v40 = vsub.f32 %v22220_v52, %v9290_v15  ;;  %v9287_v7 = vpop.xlane.xlu1 %9286  ;;  %9469 = vadd.xlane.f32.xlu0 %v9468_v54  ;;  %v9465_v3 = vsel %vm2173_vm3, %v22387_v22, 0.0 }
 0x9f2   : > { %v9341_v35 = vsub.f32 %v22223_v60, %v9287_v7 }
 0x9f3   : > { %v9395_v47 = vmul.f32 1.442695, %v9342_v40 }
 0x9f4   : > { %v9393_v23 = vmul.f32 1.442695, %v9341_v35 }
 0x9f5   : > { %19248 = vpow2.f32 %v9395_v47  ;;  %9466 = vadd.xlane.f32.xlu0 %v9465_v3 }
 0x9f6   : > { %19250 = vpow2.f32 %v9393_v23 }
 0x9f7   : > { %v22393_v49 = vpop.eup %19244 }
 0x9f8   : > { %v22395_v1 = vpop.eup %19246  ;;  %v9296_v30 = vpop.xlane.xlu0 %9295  ;;  %v9474_v52 = vsel %vm2173_vm3, %v22393_v49, 0.0 }
 0x9f9   : > { %v9344_v46 = vsub.f32 %v22230_v42, %v9296_v30  ;;  %v9293_v61 = vpop.xlane.xlu1 %9292  ;;  %9475 = vadd.xlane.f32.xlu1 %v9474_v52  ;;  %v9471_v60 = vsel %vm2173_vm3, %v22395_v1, 0.0 }
 0x9fa   : > { %v9343_v33 = vsub.f32 %v22233_v24, %v9293_v61  ;;  %9472 = vadd.xlane.f32.xlu0 %v9471_v60 }
 0x9fb   : > { %v9399_v53 = vmul.f32 1.442695, %v9344_v46 }
 0x9fc   : > { %v9397_v5 = vmul.f32 1.442695, %v9343_v33 }
 0x9fd   : > { %19252 = vpow2.f32 %v9399_v53 }
 0x9fe   : > { %19254 = vpow2.f32 %v9397_v5 }
 0x9ff   : > { %v22403_v25 = vpop.eup %19248 }
 0xa00   : > { %v22405_v58 = vpop.eup %19250  ;;  %v9302_v15 = vpop.xlane.xlu0 %9301  ;;  %v9480_v42 = vsel %vm2173_vm3, %v22403_v25, 0.0 }
 0xa01   : > { %v9346_v54 = vsub.f32 %v22240_v62, %v9302_v15  ;;  %v9299_v40 = vpop.xlane.xlu1 %9298  ;;  %9481 = vadd.xlane.f32.xlu1 %v9480_v42  ;;  %v9477_v24 = vsel %vm2173_vm3, %v22405_v58, 0.0 }
 0xa02   : > { %v9345_v7 = vsub.f32 %v22243_v12, %v9299_v40  ;;  %9478 = vadd.xlane.f32.xlu0 %v9477_v24 }
 0xa03   : > { %v9403_v35 = vmul.f32 1.442695, %v9346_v54 }
 0xa04   : > { %v9401_v47 = vmul.f32 1.442695, %v9345_v7 }
 0xa05   : > { %19256 = vpow2.f32 %v9403_v35 }
 0xa06   : > { %19258 = vpow2.f32 %v9401_v47 }
 0xa07   : > { %v22413_v23 = vpop.eup %19252 }
 0xa08   : > { %v22415_v3 = vpop.eup %19254  ;;  %v9308_v30 = vpop.xlane.xlu0 %9307  ;;  %v9486_v62 = vsel %vm2173_vm3, %v22413_v23, 0.0 }
 0xa09   : > { %v9348_v52 = vsub.f32 %v22250_v45, %v9308_v30  ;;  %v9305_v46 = vpop.xlane.xlu1 %9304  ;;  %9487 = vadd.xlane.f32.xlu1 %v9486_v62  ;;  %v9483_v12 = vsel %vm2173_vm3, %v22415_v3, 0.0 }
 0xa0a   : > { %v9347_v61 = vsub.f32 %v22253_v63, %v9305_v46  ;;  %9484 = vadd.xlane.f32.xlu0 %v9483_v12 }
 0xa0b   : > { %v9407_v60 = vmul.f32 1.442695, %v9348_v52 }
 0xa0c   : > { %v9405_v33 = vmul.f32 1.442695, %v9347_v61 }
 0xa0d   : > { %19260 = vpow2.f32 %v9407_v60 }
 0xa0e   : > { %19262 = vpow2.f32 %v9405_v33 }
 0xa0f   : > { %v22423_v53 = vpop.eup %19256 }
 0xa10   : > { %v22425_v5 = vpop.eup %19258  ;;  %v9314_v15 = vpop.xlane.xlu0 %9313  ;;  %v9492_v45 = vsel %vm2173_vm3, %v22423_v53, 0.0 }
 0xa11   : > { %v9350_v42 = vsub.f32 %v22260_v4, %v9314_v15  ;;  %v9311_v54 = vpop.xlane.xlu1 %9310  ;;  %9493 = vadd.xlane.f32.xlu1 %v9492_v45  ;;  %v9489_v63 = vsel %vm2173_vm3, %v22425_v5, 0.0 }
 0xa12   : > { %v9349_v40 = vsub.f32 %v22263_v10, %v9311_v54  ;;  %9490 = vadd.xlane.f32.xlu0 %v9489_v63 }
 0xa13   : > { %v9411_v24 = vmul.f32 1.442695, %v9350_v42 }
 0xa14   : > { %v9409_v7 = vmul.f32 1.442695, %v9349_v40 }
 0xa15   : > { %19264 = vpow2.f32 %v9411_v24 }
 0xa16   : > { %19266 = vpow2.f32 %v9409_v7 }
 0xa17   : > { %v22433_v35 = vpop.eup %19260 }
 0xa18   : > { %v22435_v47 = vpop.eup %19262  ;;  %v9320_v30 = vpop.xlane.xlu0 %9319  ;;  %v9498_v4 = vsel %vm2173_vm3, %v22433_v35, 0.0 }
 0xa19   : > { %v9352_v62 = vsub.f32 %v22270_v31, %v9320_v30  ;;  %v9317_v52 = vpop.xlane.xlu1 %9316  ;;  %9499 = vadd.xlane.f32.xlu1 %v9498_v4  ;;  %v9495_v10 = vsel %vm2173_vm3, %v22435_v47, 0.0 }
 0xa1a   : > { %v9351_v46 = vsub.f32 %v22273_v43, %v9317_v52  ;;  %9496 = vadd.xlane.f32.xlu0 %v9495_v10 }
 0xa1b   : > { %v9415_v12 = vmul.f32 1.442695, %v9352_v62 }
 0xa1c   : > { %v9413_v61 = vmul.f32 1.442695, %v9351_v46  ;;  %v22467_v63 = vpop.permute.xlu0 %18763  ;;  %v23895_v46 = vld [vmem:[#allocation46_spill] sm:$0xff] }
 0xa1d   : > { %19268 = vpow2.f32 %v9415_v12  ;;  %v22477_v24 = vpop.permute.xlu1 %18758 }
 0xa1e   : > { %19270 = vpow2.f32 %v9413_v61 }
 0xa1f   : > { %v22443_v60 = vpop.eup %19264 }
 0xa20   : > { %v22445_v33 = vpop.eup %19266  ;;  %v9504_v15 = vsel %vm2173_vm3, %v22443_v60, 0.0  ;;  %v22475_v40 = vpop.permute.xlu0 %18768 }
 0xa21   : > { %9505 = vadd.xlane.f32.xlu1 %v9504_v15  ;;  %v9501_v31 = vsel %vm2173_vm3, %v22445_v33, 0.0  ;;  %v23896_v15 = vld [vmem:[#allocation35_spill] sm:$0xff] }
 0xa22   : > { %9502 = vadd.xlane.f32.xlu0 %v9501_v31  ;;  %v23897_v31 = vld [vmem:[#allocation24_spill] sm:$0xff] }
 0xa24   : > { %v22485_v7 = vpop.permute.xlu0 %18773 }
 0xa27   : > { %v22451_v45 = vpop.eup %19268 }
 0xa28   : > { %v22453_v43 = vpop.eup %19270  ;;  %v9510_v42 = vsel %vm2173_vm3, %v22451_v45, 0.0  ;;  %v22493_v30 = vpop.permute.xlu0 %18778 }
 0xa29   : > { %9511 = vadd.xlane.f32.xlu1 %v9510_v42  ;;  %v9507_v54 = vsel %vm2173_vm3, %v22453_v43, 0.0 }
 0xa2a   : > { %9508 = vadd.xlane.f32.xlu0 %v9507_v54  ;;  %v18736_v54 = vunpack.i.h.bf16 %v22279_v28 }
 0xa3a   : > { %18788 = vrot.lane.b32.xlu1 %v23749_v56, %s19667_s12 }
 0xa3e   : > { %18803 = vrot.lane.b32.xlu1 %v23758_v14, %s19668_s20 }
 0xa40   : > { %18783 = vrot.lane.b32.xlu0 %v23723_v8, %s19667_s12  ;;  %s19582_s12 = sshll.u32 %s19671_s17, 4  ;;  %s19583_s12 = int_to_ptr.vmem [resolvable:$false] %s19582_s12 }
 0xa41   : > { %p19585_p12 = scmp.lt.s32.totalorder %s23450_s9, %s19583_s12 }
 0xa42   : > { %11420 = vrot.lane.b32.xlu1 %v23800_v16, %s19669_s7 }
 0xa44   : > { %18793 = vrot.lane.b32.xlu0 %v23756_v34, %s19668_s20 }
 0xa46   : > { %11509 = vrot.lane.b32.xlu1 %v23801_v9, %s19669_s7 }
 0xa48   : > { %18798 = vrot.lane.b32.xlu0 %v23804_v19, %s19668_s20 }
 0xa4a   : > { %18813 = vrot.lane.b32.xlu1 %v23759_v38, %s19668_s20 }
 0xa4c   : > { %11327 = vrot.lane.b32.xlu0 %v23799_v32, %s19669_s7 }
 0xa4e   : > { %v9419_v16 = vpop.xlane.xlu1 %9418  ;;  %11602 = vrot.lane.b32.xlu1 %v23802_v55, %s19669_s7 }
 0xa4f   : > { %19272 = vrcp.f32 %v9419_v16  ;;  %v18735_v16 = vunpack.i.l.bf16 %v22279_v28 }
 0xa50   : > { %11329 = vrot.lane.b32.xlu0 %v23806_v26, %s19669_s7 }
 0xa52   : > { %v9425_v9 = vpop.xlane.xlu1 %9424  ;;  %11691 = vrot.lane.b32.xlu1 %v20315_v13, %s19669_s7  ;;  %v23893_v13 = vld [vmem:[#allocation44_spill] sm:$0xff] }
 0xa53   : > { %19274 = vrcp.f32 %v9425_v9 }
 0xa54   : > { %11418 = vrot.lane.b32.xlu0 %v23808_v37, %s19669_s7  ;;  %v23894_v37 = vld [vmem:[#allocation34_spill] sm:$0xff] }
 0xa56   : > { %v9431_v32 = vpop.xlane.xlu1 %9430  ;;  %18823 = vrot.lane.b32.xlu1 %v20084_v11, %s19668_s20 }
 0xa57   : > { %19276 = vrcp.f32 %v9431_v32 }
 0xa58   : > { %18808 = vrot.lane.b32.xlu0 %v23810_v17, %s19668_s20 }
 0xa59   : > { %v19273_v55 = vpop.eup %19272  ;;  %v9422_v26 = vpop.xlane.xlu0 %9421 }
 0xa5a   : > { %19278 = vrcp.f32 %v9422_v26  ;;  %v9437_v4 = vpop.xlane.xlu1 %9436  ;;  %11784 = vrot.lane.b32.xlu1 %v23893_v13, %s19669_s7  ;;  %v9545_v62 = vmul.f32 %v19273_v55, %v22305_v41  ;;  %v23899_v26 = vld [vmem:[#allocation50_spill] sm:$0xff]  ;;  %v23900_v13 = vld [vmem:[#allocation73_spill] sm:$0xff] }
 0xa5b   : > { %19280 = vrcp.f32 %v9437_v4 }
 0xa5c   : > { %17042 = vmatprep.mubr.msk.f32.mxu0 %vm2173_vm3, %v9545_v62  ;;  %11511 = vrot.lane.b32.xlu0 %v23894_v37, %s19669_s7  ;;  %v18741_v62 = vunpack.i.h.bf16 %v23900_v13  ;;  %v18740_v37 = vunpack.i.l.bf16 %v23900_v13  ;;  %v23906_v13 = vld [vmem:[#allocation42_spill] sm:$0xff] }
 0xa5d   : > { %v19275_v52 = vpop.eup %19274  ;;  %v9428_v10 = vpop.xlane.xlu0 %9427 }
 0xa5e   : > { %19282 = vrcp.f32 %v9428_v10  ;;  %11873 = vrot.lane.b32.xlu1 %v23895_v46, %s19669_s7  ;;  %v9547_v12 = vmul.f32 %v19275_v52, %v22310_v36  ;;  %v23898_v36 = vld [vmem:[#allocation21_spill] sm:$0xff]  ;;  %v17914_v10 = vpack.c.bf16 %v18736_v54, %v18735_v16 }
 0xa5f   : > { %v9443_v61 = vpop.xlane.xlu1 %9442 }
 0xa60   : > { %17049 = vmatprep.mubr.msk.f32.mxu1 %vm2173_vm3, %v9547_v12  ;;  %11600 = vrot.lane.b32.xlu0 %v23896_v15, %s19669_s7  ;;  %19284 = vrcp.f32 %v9443_v61  ;;  %v23901_v12 = vld [vmem:[#allocation16_spill] sm:$0xff] }
 0xa61   : > { %v9434_v41 = vpop.xlane.xlu0 %9433  ;;  %v19277_v42 = vpop.eup %19276 }
 0xa62   : > { %19286 = vrcp.f32 %v9434_v41  ;;  %18833 = vrot.lane.b32.xlu1 %v23897_v31, %s19668_s20  ;;  %v9549_v28 = vmul.f32 %v19277_v42, %v22316_v21  ;;  %v23903_v41 = vld [vmem:[#allocation26_spill] sm:$0xff]  ;;  %v23904_v21 = vld [vmem:[#allocation15_spill] sm:$0xff] }
 0xa63   : > { %v18746_v42 = vunpack.i.h.bf16 %v23904_v21  ;;  %v18745_v54 = vunpack.i.l.bf16 %v23904_v21  ;;  %v23910_v21 = vld [vmem:[#allocation54_spill] sm:$0xff] }
 0xa64   : > { %v19279_v9 = vpop.eup %19278  ;;  %18818 = vrot.lane.b32.xlu0 %v23898_v36, %s19668_s20 }
 0xa65   : > { %v9546_v32 = vmul.f32 %v19279_v9, %v22319_v0  ;;  %v9440_v55 = vpop.xlane.xlu0 %9439  ;;  %v19281_v4 = vpop.eup %19280  ;;  %v23902_v0 = vld [vmem:[#allocation40_spill] sm:$0xff] }
 0xa66   : > { %19288 = vrcp.f32 %v9440_v55  ;;  %11964 = vrot.lane.b32.xlu1 %v23899_v26, %s19669_s7  ;;  %v9551_v16 = vmul.f32 %v19281_v4, %v22323_v20  ;;  %v23905_v26 = vld [vmem:[#allocation62_spill] sm:$0xff] }
 0xa67   : > { %v9449_v52 = vpop.xlane.xlu1 %9448  ;;  %17043 = vmatmul.mubr.msk.f32.vlgmr.msra.gmra.mrb[120].mxu0 %vm2173_vm3, %v9546_v32  ;;  %v17918_v32 = vpack.c.bf16 %v18741_v62, %v18740_v37  ;;  %v17922_v62 = vpack.c.bf16 %v18746_v42, %v18745_v54  ;;  %v23912_v54 = vld [vmem:[#allocation48_spill] sm:$0xff] }
 0xa68   : > { %v19283_v46 = vpop.eup %19282  ;;  %19290 = vrcp.f32 %v9449_v52  ;;  %17909 = vmatpush3.bf16.msra.mxu0 %v23901_v12  ;;  %11693 = vrot.lane.b32.xlu0 %v23902_v0, %s19669_s7  ;;  %v23909_v0 = vld [vmem:[#allocation22_spill] sm:$0xff] }
 0xa69   : > { %17056 = vmatprep.mubr.msk.f32.mxu0 %vm2173_vm3, %v9549_v28  ;;  %17915 = vmatprep.subr.bf16.mxu0 %v17914_v10  ;;  %v9446_v61 = vpop.xlane.xlu0 %9445  ;;  %v9548_v15 = vmul.f32 %v19283_v46, %v22329_v59  ;;  %v23907_v28 = vld [vmem:[#allocation41_spill] sm:$0xff] }
 0xa6a   : > { %19292 = vrcp.f32 %v9446_v61  ;;  %18843 = vrot.lane.b32.xlu1 %v23903_v41, %s19668_s20  ;;  %v19285_v9 = vpop.eup %19284  ;;  %v23908_v46 = vld [vmem:[#allocation77_spill] sm:$0xff] }
 0xa6b   : > { %17050 = vmatmul.mubr.msk.f32.vlgmr.msra.gmra.mrb[122].mxu1 %vm2173_vm3, %v9548_v15  ;;  %v18751_v12 = vunpack.i.h.bf16 %v23908_v46  ;;  %v18750_v20 = vunpack.i.l.bf16 %v23908_v46  ;;  %v9553_v4 = vmul.f32 %v19285_v9, %v22337_v57  ;;  %v23914_v46 = vld [vmem:[#allocation25_spill] sm:$0xff] }
 0xa6c   : > { %v19287_v55 = vpop.eup %19286  ;;  %17913 = vmatpush3.bf16.msra.mxu1 %v23905_v26  ;;  %11782 = vrot.lane.b32.xlu0 %v23906_v13, %s19669_s7  ;;  %v23913_v13 = vld [vmem:[#allocation28_spill] sm:$0xff] }
 0xa6d   : > { %17063 = vmatprep.mubr.msk.f32.mxu1 %vm2173_vm3, %v9551_v16  ;;  %17919 = vmatprep.subr.bf16.mxu1 %v17918_v32  ;;  %v9452_v59 = vpop.xlane.xlu0 %9451  ;;  %v9550_v52 = vmul.f32 %v19287_v55, %v22333_v29  ;;  %v23911_v16 = vld [vmem:[#allocation76_spill] sm:$0xff] }
 0xa6e   : > { %19294 = vrcp.f32 %v9452_v59  ;;  %12057 = vrot.lane.b32.xlu1 %v23907_v28, %s19669_s7  ;;  %v18756_v55 = vunpack.i.h.bf16 %v23911_v16  ;;  %v18755_v57 = vunpack.i.l.bf16 %v23911_v16  ;;  %v18761_v59 = vunpack.i.h.bf16 %v22477_v24 }
 0xa6f   : > { %17057 = vmatmul.mubr.msk.f32.vlgmr.msra.gmra.mrb[122].mxu0 %vm2173_vm3, %v9550_v52 }
 0xa70   : > { %v19289_v37 = vpop.eup %19288  ;;  %17917 = vmatpush3.bf16.msra.mxu0 %v17914_v10  ;;  %18828 = vrot.lane.b32.xlu0 %v23909_v0, %s19668_s20  ;;  %v17926_v10 = vpack.c.bf16 %v18751_v12, %v18750_v20  ;;  %v23915_v20 = vld [vmem:[#allocation45_spill] sm:$0xff] }
 0xa71   : > { %17070 = vmatprep.mubr.msk.f32.mxu0 %vm2173_vm3, %v9553_v4  ;;  %17923 = vmatprep.subr.bf16.mxu0 %v17922_v62  ;;  %v9458_v29 = vpop.xlane.xlu0 %9457  ;;  %v9552_v61 = vmul.f32 %v19289_v37, %v22345_v39  ;;  %v23916_v4 = vld [vmem:[#allocation52_spill] sm:$0xff] }
 0xa72   : > { %v19291_v15 = vpop.eup %19290  ;;  %12146 = vrot.lane.b32.xlu1 %v23910_v21, %s19669_s7  ;;  %19296 = vrcp.f32 %v9458_v29  ;;  %v23918_v21 = vld [vmem:[#allocation23_spill] sm:$0xff] }
 0xa73   : > { %17064 = vmatmul.mubr.msk.f32.vlgmr.msra.gmra.mrb[124].mxu1 %vm2173_vm3, %v9552_v61  ;;  %v9555_v9 = vmul.f32 %v19291_v15, %v22351_v48  ;;  %v18760_v48 = vunpack.i.l.bf16 %v22477_v24  ;;  %v18765_v15 = vunpack.i.l.bf16 %v22467_v63 }
 0xa74   : > { %v19293_v42 = vpop.eup %19292  ;;  %17921 = vmatpush3.bf16.msra.mxu1 %v17918_v32  ;;  %11875 = vrot.lane.b32.xlu0 %v23912_v54, %s19669_s7  ;;  %v17930_v32 = vpack.c.bf16 %v18756_v55, %v18755_v57 }
 0xa75   : > { %17927 = vmatprep.subr.bf16.mxu1 %v17926_v10  ;;  %17077 = vmatprep.mubr.msk.f32.mxu1 %vm2173_vm3, %v9555_v9  ;;  %v9455_v39 = vpop.xlane.xlu0 %9454  ;;  %v9554_v26 = vmul.f32 %v19293_v42, %v22347_v2  ;;  %v17934_v24 = vpack.c.bf16 %v18761_v59, %v18760_v48  ;;  %v18771_v9 = vunpack.i.h.bf16 %v22475_v40  ;;  %v18770_v42 = vunpack.i.l.bf16 %v22475_v40  ;;  %v23920_v40 = vld [vmem:[#allocation49_spill] sm:$0xff]  ;;  %v23921_v48 = vld [vmem:[#allocation55_spill] sm:$0xff] }
 0xa76   : > { %19298 = vrcp.f32 %v9455_v39  ;;  %18853 = vrot.lane.b32.xlu1 %v23913_v13, %s19668_s20 }
 0xa77   : > { %v9461_v52 = vpop.xlane.xlu1 %9460  ;;  %17071 = vmatmul.mubr.msk.f32.vlgmr.msra.gmra.mrb[124].mxu0 %vm2173_vm3, %v9554_v26  ;;  %v17942_v59 = vpack.c.bf16 %v18771_v9, %v18770_v42 }
 0xa78   : > { %v19295_v28 = vpop.eup %19294  ;;  %19300 = vrcp.f32 %v9461_v52  ;;  %17925 = vmatpush3.bf16.msra.mxu0 %v17922_v62  ;;  %18838 = vrot.lane.b32.xlu0 %v23914_v46, %s19668_s20  ;;  %v23917_v62 = vld [vmem:[#allocation56_spill] sm:$0xff]  ;;  %v23922_v52 = vld [vmem:[#allocation58_spill] sm:$0xff] }
 0xa79   : > { %17931 = vmatprep.subr.bf16.mxu0 %v17930_v32  ;;  %v9464_v2 = vpop.xlane.xlu0 %9463  ;;  %v9556_v12 = vmul.f32 %v19295_v28, %v22359_v51  ;;  %v18766_v51 = vunpack.i.h.bf16 %v22467_v63 }
 0xa7a   : > { %19302 = vrcp.f32 %v9464_v2  ;;  %12239 = vrot.lane.b32.xlu1 %v23915_v20, %s19669_s7  ;;  %v18776_v2 = vunpack.i.h.bf16 %v22485_v7 }
 0xa7b   : > { %17078 = vmatmul.mubr.msk.f32.vlgmr.msra.gmra.mrb[126].mxu1 %vm2173_vm3, %v9556_v12  ;;  %v17938_v39 = vpack.c.bf16 %v18766_v51, %v18765_v15  ;;  %v18775_v12 = vunpack.i.l.bf16 %v22485_v7  ;;  %v18781_v15 = vunpack.i.h.bf16 %v22493_v30 }
 0xa7c   : > { %17929 = vmatpush3.bf16.msra.mxu1 %v17926_v10  ;;  %11966 = vrot.lane.b32.xlu0 %v23916_v4, %s19669_s7  ;;  %v19297_v29 = vpop.eup %19296 }
 0xa7d   : > { %17935 = vmatprep.subr.bf16.mxu1 %v17934_v24  ;;  %v9558_v10 = vmul.f32 %v19297_v29, %v22363_v6  ;;  %v23925_v29 = vld [vmem:[#allocation29_spill] sm:$0xff]  ;;  %v17946_v7 = vpack.c.bf16 %v18776_v2, %v18775_v12 }
 0xa7e   : > { %12328 = vrot.lane.b32.xlu1 %v23917_v62, %s19669_s7  ;;  %v9470_v37 = vpop.xlane.xlu0 %9469 }
 0xa7f   : > { %19304 = vrcp.f32 %v9470_v37 }
 0xa80   : > { %v19299_v61 = vpop.eup %19298  ;;  %12055 = vrot.lane.b32.xlu0 %v23918_v21, %s19669_s7  ;;  %v18780_v21 = vunpack.i.l.bf16 %v22493_v30 }
 0xa81   : > { %v9557_v16 = vmul.f32 %v19299_v61, %v22369_v44  ;;  %v23919_v44 = vld [vmem:[#allocation27_spill] sm:$0xff] }
 0xa82   : > { %v19301_v55 = vpop.eup %19300  ;;  %18863 = vrot.lane.b32.xlu1 %v23723_v8, %s19668_s20  ;;  %v9467_v57 = vpop.xlane.xlu0 %9466  ;;  %v17950_v30 = vpack.c.bf16 %v18781_v15, %v18780_v21 }
 0xa83   : > { %19306 = vrcp.f32 %v9467_v57  ;;  %17084 = vmatprep.mubr.msk.f32.mxu0 %vm2173_vm3, %v9557_v16  ;;  %v9559_v63 = vmul.f32 %v19301_v55, %v22375_v18  ;;  %v23927_v16 = vld [vmem:[#allocation57_spill] sm:$0xff] }
 0xa84   : > { %v19303_v54 = vpop.eup %19302  ;;  %18848 = vrot.lane.b32.xlu0 %v23919_v44, %s19668_s20  ;;  %17085 = vmatmul.mubr.msk.f32.vlgmr.msra.gmra.mrb[126].mxu0 %vm2173_vm3, %v9558_v10 }
 0xa85   : > { %17933 = vmatpush3.bf16.msra.mxu0 %v17930_v32  ;;  %17091 = vmatprep.mubr.msk.f32.mxu1 %vm2173_vm3, %v9559_v63  ;;  %v9560_v6 = vmul.f32 %v19303_v54, %v22371_v27  ;;  %v23923_v32 = vld [vmem:[#allocation43_spill] sm:$0xff] }
 0xa86   : > { %17939 = vmatprep.subr.bf16.mxu0 %v17938_v39  ;;  %v9476_v26 = vpop.xlane.xlu1 %9475  ;;  %12421 = vrot.lane.b32.xlu1 %v23920_v40, %s19669_s7 }
 0xa87   : > { %19308 = vrcp.f32 %v9476_v26  ;;  %17092 = vmatmul.mubr.msk.f32.vlgmr.msra.gmra.mrb[128].mxu1 %vm2173_vm3, %v9560_v6  ;;  %v9473_v18 = vpop.xlane.xlu0 %9472  ;;  %v23930_v6 = vld [vmem:[#allocation53_spill] sm:$0xff] }
 0xa88   : > { %17937 = vmatpush3.bf16.msra.mxu1 %v17934_v24  ;;  %19310 = vrcp.f32 %v9473_v18  ;;  %12148 = vrot.lane.b32.xlu0 %v23921_v48, %s19669_s7  ;;  %v23924_v24 = vld [vmem:[#allocation51_spill] sm:$0xff]  ;;  %v23931_v18 = vld [vmem:[#allocation61_spill] sm:$0xff] }
 0xa89   : > { %17943 = vmatprep.subr.bf16.mxu1 %v17942_v59  ;;  %v19305_v27 = vpop.eup %19304 }
 0xa8a   : > { %12510 = vrot.lane.b32.xlu1 %v23922_v52, %s19669_s7  ;;  %v9562_v37 = vmul.f32 %v19305_v27, %v22383_v50 }
 0xa8c   : > { %12237 = vrot.lane.b32.xlu0 %v23923_v32, %s19669_s7 }
 0xa8d   : > { %v19307_v28 = vpop.eup %19306 }
 0xa8e   : > { %v9482_v20 = vpop.xlane.xlu1 %9481  ;;  %12601 = vrot.lane.b32.xlu1 %v23924_v24, %s19669_s7  ;;  %v9561_v4 = vmul.f32 %v19307_v28, %v22387_v22  ;;  %v23926_v22 = vld [vmem:[#allocation60_spill] sm:$0xff] }
 0xa8f   : > { %19312 = vrcp.f32 %v9482_v20  ;;  %v9479_v62 = vpop.xlane.xlu0 %9478 }
 0xa90   : > { %19314 = vrcp.f32 %v9479_v62  ;;  %18858 = vrot.lane.b32.xlu0 %v23925_v29, %s19668_s20  ;;  %17098 = vmatprep.mubr.msk.f32.mxu0 %vm2173_vm3, %v9561_v4 }
 0xa91   : > { %v19309_v61 = vpop.eup %19308  ;;  %17099 = vmatmul.mubr.msk.f32.vlgmr.msra.gmra.mrb[128].mxu0 %vm2173_vm3, %v9562_v37 }
 0xa92   : > { %v19311_v51 = vpop.eup %19310  ;;  %17941 = vmatpush3.bf16.msra.mxu0 %v17938_v39  ;;  %12692 = vrot.lane.b32.xlu1 %v23926_v22, %s19669_s7  ;;  %v9564_v55 = vmul.f32 %v19309_v61, %v22393_v49 }
 0xa93   : > { %17947 = vmatprep.subr.bf16.mxu0 %v17946_v7  ;;  %v9563_v50 = vmul.f32 %v19311_v51, %v22395_v1  ;;  %v23928_v1 = vld [vmem:[#allocation47_spill] sm:$0xff]  ;;  %v10970_v51 = vld [vmem:[#allocation8 + $0x10] sm:$0xff] }
 0xa94   : > { %12330 = vrot.lane.b32.xlu0 %v23927_v16, %s19669_s7 }
 0xa95   : > { %17105 = vmatprep.mubr.msk.f32.mxu1 %vm2173_vm3, %v9563_v50 }
 0xa96   : > { %v9488_v57 = vpop.xlane.xlu1 %9487  ;;  %18878 = vrot.lane.b32.xlu1 %v23804_v19, %s19670_s11  ;;  %17106 = vmatmul.mubr.msk.f32.vlgmr.msra.gmra.mrb[130].mxu1 %vm2173_vm3, %v9564_v55 }
 0xa97   : > { %19316 = vrcp.f32 %v9488_v57  ;;  %17945 = vmatpush3.bf16.msra.mxu1 %v17942_v59  ;;  %v9485_v10 = vpop.xlane.xlu0 %9484 }
 0xa98   : > { %19318 = vrcp.f32 %v9485_v10  ;;  %17951 = vmatprep.subr.bf16.mxu1 %v17950_v30  ;;  %12419 = vrot.lane.b32.xlu0 %v23928_v1, %s19669_s7 }
 0xa99   : > { %v19313_v9 = vpop.eup %19312 }
 0xa9a   : > { %v19315_v49 = vpop.eup %19314  ;;  %18888 = vrot.lane.b32.xlu1 %v23810_v17, %s19670_s11  ;;  %v9566_v19 = vmul.f32 %v19313_v9, %v22403_v25  ;;  %v23929_v17 = vld [vmem:[#allocation59_spill] sm:$0xff] }
 0xa9b   : > { %v9565_v42 = vmul.f32 %v19315_v49, %v22405_v58 }
 0xa9c   : > { %18868 = vrot.lane.b32.xlu0 %v23749_v56, %s19668_s20  ;;  %s19584_s20 = scalar_lea.vmem %s19583_s12, 8192 }
 0xa9d   : > { %17112 = vmatprep.mubr.msk.f32.mxu0 %vm2173_vm3, %v9565_v42  ;;  %p19586_p1 = scmp.lt.s32.totalorder %s19584_s20, %s19578_s16 }
 0xa9e   : > { %v9494_v63 = vpop.xlane.xlu1 %9493  ;;  %18898 = vrot.lane.b32.xlu1 %v23898_v36, %s19670_s11  ;;  %17113 = vmatmul.mubr.msk.f32.vlgmr.msra.gmra.mrb[130].mxu0 %vm2173_vm3, %v9566_v19 }
 0xa9f   : > { %19320 = vrcp.f32 %v9494_v63  ;;  %17949 = vmatpush3.bf16.msra.mxu0 %v17946_v7  ;;  %v9491_v54 = vpop.xlane.xlu0 %9490  ;;  %p19587_p2 = por %p19586_p1, %p19585_p12 }
 0xaa0   : > { %19322 = vrcp.f32 %v9491_v54  ;;  %12512 = vrot.lane.b32.xlu0 %v23929_v17, %s19669_s7 }
 0xaa1   : > { %v19317_v58 = vpop.eup %19316  ;;  %p19588_p4 = pnand %p19587_p2, %p19581_p7 }
 0xaa2   : > { %v19319_v39 = vpop.eup %19318  ;;  %18908 = vrot.lane.b32.xlu1 %v23909_v0, %s19670_s11  ;;  %v9568_v36 = vmul.f32 %v19317_v58, %v22413_v23 }
 0xaa3   : > { %v9567_v25 = vmul.f32 %v19319_v39, %v22415_v3 }
 0xaa4   : > { %12603 = vrot.lane.b32.xlu0 %v23930_v6, %s19669_s7 }
 0xaa5   : > { %17119 = vmatprep.mubr.msk.f32.mxu1 %vm2173_vm3, %v9567_v25 }
 0xaa6   : > { %v9500_v26 = vpop.xlane.xlu1 %9499  ;;  %17120 = vmatmul.mubr.msk.f32.vlgmr.msra.gmra.mrb[132].mxu1 %vm2173_vm3, %v9568_v36 }
 0xaa7   : > { %19324 = vrcp.f32 %v9500_v26  ;;  %17953 = vmatpush3.bf16.msra.mxu1 %v17950_v30  ;;  %v9497_v40 = vpop.xlane.xlu0 %9496 }
 0xaa8   : > { %19326 = vrcp.f32 %v9497_v40  ;;  %12694 = vrot.lane.b32.xlu0 %v23931_v18, %s19669_s7 }
 0xaa9   : > { %v19321_v0 = vpop.eup %19320 }
 0xaaa   : > { %v19323_v59 = vpop.eup %19322  ;;  %v9570_v23 = vmul.f32 %v19321_v0, %v22423_v53 }
 0xaab   : > { %v9569_v3 = vmul.f32 %v19323_v59, %v22425_v5 }
 0xaac   : > { %18873 = vrot.lane.b32.xlu0 %v23756_v34, %s19670_s11 }
 0xaad   : > { %17126 = vmatprep.mubr.msk.f32.mxu0 %vm2173_vm3, %v9569_v3 }
 0xaae   : > { %17127 = vmatmul.mubr.msk.f32.vlgmr.msra.gmra.mrb[132].mxu0 %vm2173_vm3, %v9570_v23  ;;  %v9506_v32 = vpop.xlane.xlu1 %9505 }
 0xaaf   : > { %v9503_v48 = vpop.xlane.xlu0 %9502 }
 0xab0   : > { %19328 = vrcp.f32 %v9503_v48  ;;  %18883 = vrot.lane.b32.xlu0 %v23758_v14, %s19670_s11 }
 0xab1   : > { %v19325_v52 = vpop.eup %19324  ;;  %19330 = vrcp.f32 %v9506_v32 }
 0xab2   : > { %v19327_v27 = vpop.eup %19326  ;;  %v9572_v34 = vmul.f32 %v19325_v52, %v22433_v35 }
 0xab3   : > { %v9571_v28 = vmul.f32 %v19327_v27, %v22435_v47 }
 0xab4   : > { %18893 = vrot.lane.b32.xlu0 %v23759_v38, %s19670_s11 }
 0xab5   : > { %17133 = vmatprep.mubr.msk.f32.mxu1 %vm2173_vm3, %v9571_v28 }
 0xab6   : > { %v9512_v53 = vpop.xlane.xlu1 %9511  ;;  %17134 = vmatmul.mubr.msk.f32.vlgmr.msra.gmra.mrb[134].mxu1 %vm2173_vm3, %v9572_v34 }
 0xab7   : > { %19332 = vrcp.f32 %v9512_v53  ;;  %v9509_v5 = vpop.xlane.xlu0 %9508 }
 0xab8   : > { %19334 = vrcp.f32 %v9509_v5  ;;  %18903 = vrot.lane.b32.xlu0 %v20084_v11, %s19670_s11 }
 0xaba   : > { %v19329_v14 = vpop.eup %19328  ;;  %v18789_v2 = vpop.permute.xlu1 %18788 }
 0xabb   : > { %v18791_v47 = vunpack.i.h.bf16 %v18789_v2  ;;  %v18790_v12 = vunpack.i.l.bf16 %v18789_v2  ;;  %v18784_v20 = vpop.permute.xlu0 %18783  ;;  %v9573_v38 = vmul.f32 %v19329_v14, %v22445_v33  ;;  %v19331_v61 = vpop.eup %19330 }
 0xabc   : > { %v18786_v35 = vunpack.i.h.bf16 %v18784_v20  ;;  %v18785_v24 = vunpack.i.l.bf16 %v18784_v20  ;;  %v9574_v16 = vmul.f32 %v19331_v61, %v22443_v60 }
 0xabd   : > { %17140 = vmatprep.mubr.msk.f32.mxu0 %vm2173_vm3, %v9573_v38  ;;  %v17958_v4 = vpack.c.bf16 %v18791_v47, %v18790_v12 }
 0xabe   : > { %v18804_v62 = vpop.permute.xlu1 %18803  ;;  %v17954_v37 = vpack.c.bf16 %v18786_v35, %v18785_v24 }
 0xabf   : > { %v18794_v7 = vpop.permute.xlu0 %18793  ;;  %17959 = vmatprep.subr.bf16.mxu1 %v17958_v4  ;;  %v18806_v63 = vunpack.i.h.bf16 %v18804_v62 }
 0xac0   : > { %v18796_v15 = vunpack.i.h.bf16 %v18794_v7  ;;  %v18795_v11 = vunpack.i.l.bf16 %v18794_v7  ;;  %17955 = vmatprep.subr.bf16.mxu0 %v17954_v37  ;;  %17961 = vmatpush3.bf16.msra.mxu1 %v17958_v4 }
 0xac1   : > { %v19333_v21 = vpop.eup %19332  ;;  %17957 = vmatpush3.bf16.msra.mxu0 %v17954_v37 }
 0xac2   : > { %v19335_v22 = vpop.eup %19334  ;;  %v17962_v50 = vpack.c.bf16 %v18796_v15, %v18795_v11  ;;  %v11421_v33 = vpop.permute.xlu1 %11420  ;;  %17150 = vmatprep.subr.mxu0 %v10970_v51  ;;  %v9576_v9 = vmul.f32 %v19333_v21, %v22451_v45  ;;  %v18805_v45 = vunpack.i.l.bf16 %v18804_v62 }
 0xac3   : > { %v18799_v55 = vpop.permute.xlu0 %18798  ;;  %v9575_v57 = vmul.f32 %v19335_v22, %v22453_v43 }
 0xac4   : > { %v18801_v30 = vunpack.i.h.bf16 %v18799_v55  ;;  %v18800_v10 = vunpack.i.l.bf16 %v18799_v55  ;;  %17141 = vmatmul.mubr.msk.f32.vlgmr.msra.gmra.mrb[134].mxu0 %vm2173_vm3, %v9574_v16  ;;  %17964 = vmatprep.subr.msk.bf16.mxu1 %vm20266_vm2, %v17962_v50  ;;  %v17974_v58 = vpack.c.bf16 %v18806_v63, %v18805_v45 }
 0xac5   : > { %17147 = vmatprep.mubr.msk.f32.mxu1 %vm2173_vm3, %v9575_v57  ;;  %17151 = vmatpush3.msra.mxu0 %v10970_v51 }
 0xac6   : > { %v11510_v49 = vpop.permute.xlu1 %11509  ;;  %17148 = vmatmul.mubr.msk.f32.vlgmr.msra.gmra.mrb[136].mxu1 %vm2173_vm3, %v9576_v9  ;;  %v17968_v42 = vpack.c.bf16 %v18801_v30, %v18800_v10 }
 0xac7   : > { %v11328_v60 = vpop.permute.xlu0 %11327 }
 0xac8   : > { %17204 = vmatprep.mubr.msk.f32.mxu1 %vm722_vm1, %v11328_v60 }
 0xac9   : > { %17967 = vmatpush3.bf16.xpose.msk.msra.mxu1 %vm20266_vm2, %v17962_v50 }
 0xaca   : > { %v18814_v43 = vpop.permute.xlu1 %18813  ;;  %17970 = vmatprep.subr.msk.bf16.mxu1 %vm20266_vm2, %v17968_v42 }
 0xacb   : > { %v11330_v19 = vpop.permute.xlu0 %11329  ;;  %v18816_v3 = vunpack.i.h.bf16 %v18814_v43  ;;  %v18815_v23 = vunpack.i.l.bf16 %v18814_v43 }
 0xacd   : > { %v17986_v27 = vpack.c.bf16 %v18816_v3, %v18815_v23 }
 0xace   : > { %v11603_v54 = vpop.permute.xlu1 %11602 }
 0xacf   : > { %v11419_v17 = vpop.permute.xlu0 %11418 }
 0xad0   : > { %17205 = vmatmul.mubr.msk.f32.vlgmr.msra.gmra.mrb[138].mxu1 %vm722_vm1, %v11330_v19 }
 0xad1   : > { %17973 = vmatpush3.bf16.xpose.msk.msra.mxu1 %vm20266_vm2, %v17968_v42  ;;  %17211 = vmatprep.mubr.msk.f32.mxu1 %vm722_vm1, %v11419_v17 }
 0xad2   : > { %v11692_v39 = vpop.permute.xlu1 %11691  ;;  %17976 = vmatprep.subr.msk.bf16.mxu1 %vm20266_vm2, %v17974_v58 }
 0xad3   : > { %v18809_v25 = vpop.permute.xlu0 %18808 }
 0xad4   : > { %v18811_v6 = vunpack.i.h.bf16 %v18809_v25  ;;  %v18810_v36 = vunpack.i.l.bf16 %v18809_v25 }
 0xad6   : > { %v18824_v26 = vpop.permute.xlu1 %18823  ;;  %v17980_v18 = vpack.c.bf16 %v18811_v6, %v18810_v36 }
 0xad7   : > { %v11512_v40 = vpop.permute.xlu0 %11511  ;;  %v18826_v24 = vunpack.i.h.bf16 %v18824_v26  ;;  %v18825_v4 = vunpack.i.l.bf16 %v18824_v26 }
 0xad8   : > { %17212 = vmatmul.mubr.msk.f32.vlgmr.msra.gmra.mrb[140].mxu1 %vm722_vm1, %v11421_v33 }
 0xad9   : > { %17979 = vmatpush3.bf16.xpose.msk.msra.mxu1 %vm20266_vm2, %v17974_v58  ;;  %17218 = vmatprep.mubr.msk.f32.mxu1 %vm722_vm1, %v11510_v49  ;;  %v17998_v61 = vpack.c.bf16 %v18826_v24, %v18825_v4 }
 0xada   : > { %v11785_v0 = vpop.permute.xlu1 %11784  ;;  %17982 = vmatprep.subr.msk.bf16.mxu1 %vm20266_vm2, %v17980_v18 }
 0xadb   : > { %v11601_v59 = vpop.permute.xlu0 %11600 }
 0xade   : > { %v11874_v48 = vpop.permute.xlu1 %11873 }
 0xadf   : > { %v18819_v52 = vpop.permute.xlu0 %18818 }
 0xae0   : > { %17219 = vmatmul.mubr.msk.f32.vlgmr.msra.gmra.mrb[142].mxu1 %vm722_vm1, %v11512_v40  ;;  %v18821_v5 = vunpack.i.h.bf16 %v18819_v52  ;;  %v18820_v14 = vunpack.i.l.bf16 %v18819_v52 }
 0xae1   : > { %17985 = vmatpush3.bf16.xpose.msk.msra.mxu1 %vm20266_vm2, %v17980_v18  ;;  %17225 = vmatprep.mubr.msk.f32.mxu1 %vm722_vm1, %v11601_v59 }
 0xae2   : > { %v18834_v32 = vpop.permute.xlu1 %18833  ;;  %17988 = vmatprep.subr.msk.bf16.mxu1 %vm20266_vm2, %v17986_v27  ;;  %v17992_v20 = vpack.c.bf16 %v18821_v5, %v18820_v14 }
 0xae3   : > { %v18836_v28 = vunpack.i.h.bf16 %v18834_v32  ;;  %v18835_v34 = vunpack.i.l.bf16 %v18834_v32  ;;  %v11694_v53 = vpop.permute.xlu0 %11693 }
 0xae5   : > { %v22696_v2 = vpack.c.bf16 %v18836_v28, %v18835_v34 }
 0xae6   : > { %v11965_v47 = vpop.permute.xlu1 %11964 }
 0xae7   : > { %v11783_v12 = vpop.permute.xlu0 %11782  ;;  %18012 = vmatprep.subr.msk.bf16.mxu0 %vm20266_vm2, %v22696_v2 }
 0xae8   : > { %17226 = vmatmul.mubr.msk.f32.vlgmr.msra.gmra.mrb[144].mxu1 %vm722_vm1, %v11603_v54 }
 0xae9   : > { %17991 = vmatpush3.bf16.xpose.msk.msra.mxu1 %vm20266_vm2, %v17986_v27  ;;  %17232 = vmatprep.mubr.msk.f32.mxu1 %vm722_vm1, %v11692_v39 }
 0xaea   : > { %v22705_v38 = vpop.permute.xlu1 %18843  ;;  %17994 = vmatprep.subr.msk.bf16.mxu1 %vm20266_vm2, %v17992_v20 }
 0xaeb   : > { %v18829_v35 = vpop.permute.xlu0 %18828 }
 0xaec   : > { %v18831_v15 = vunpack.i.h.bf16 %v18829_v35  ;;  %v18830_v11 = vunpack.i.l.bf16 %v18829_v35  ;;  %v18845_v35 = vunpack.i.l.bf16 %v22705_v38 }
 0xaee   : > { %v22709_v62 = vpop.permute.xlu1 %12057  ;;  %v18004_v50 = vpack.c.bf16 %v18831_v15, %v18830_v11 }
 0xaef   : > { %v11876_v37 = vpop.permute.xlu0 %11875 }
 0xaf0   : > { %17233 = vmatmul.mubr.msk.f32.vlgmr.msra.gmra.mrb[146].mxu1 %vm722_vm1, %v11694_v53 }
 0xaf1   : > { %17997 = vmatpush3.bf16.xpose.msk.msra.mxu1 %vm20266_vm2, %v17992_v20  ;;  %17239 = vmatprep.mubr.msk.f32.mxu1 %vm722_vm1, %v11783_v12  ;;  %v18846_v20 = vunpack.i.h.bf16 %v22705_v38 }
 0xaf2   : > { %v12147_v7 = vpop.permute.xlu1 %12146  ;;  %18000 = vmatprep.subr.msk.bf16.mxu1 %vm20266_vm2, %v17998_v61 }
 0xaf3   : > { %v18839_v51 = vpop.permute.xlu0 %18838 }
 0xaf4   : > { %v18841_v16 = vunpack.i.h.bf16 %v18839_v51  ;;  %v18840_v55 = vunpack.i.l.bf16 %v18839_v51 }
 0xaf6   : > { %v22717_v21 = vpop.permute.xlu1 %18853  ;;  %v18016_v10 = vpack.c.bf16 %v18841_v16, %v18840_v55 }
 0xaf7   : > { %v11967_v22 = vpop.permute.xlu0 %11966 }
 0xaf8   : > { %17240 = vmatmul.mubr.msk.f32.vlgmr.msra.gmra.mrb[148].mxu1 %vm722_vm1, %v11785_v0 }
 0xaf9   : > { %18003 = vmatpush3.bf16.xpose.msk.msra.mxu1 %vm20266_vm2, %v17998_v61  ;;  %17246 = vmatprep.mubr.msk.f32.mxu1 %vm722_vm1, %v11874_v48 }
 0xafa   : > { %18006 = vmatprep.subr.msk.bf16.mxu1 %vm20266_vm2, %v18004_v50  ;;  %v22727_v57 = vpop.permute.xlu1 %12239 }
 0xafb   : > { %v22725_v33 = vpop.permute.xlu0 %12055 }
 0xafe   : > { %v12329_v9 = vpop.permute.xlu1 %12328 }
 0xaff   : > { %v18849_v30 = vpop.permute.xlu0 %18848 }
 0xb00   : > { %17247 = vmatmul.mubr.msk.f32.vlgmr.msra.gmra.mrb[150].mxu1 %vm722_vm1, %v11876_v37  ;;  %v18851_v60 = vunpack.i.h.bf16 %v18849_v30  ;;  %v18850_v42 = vunpack.i.l.bf16 %v18849_v30  ;;  %v22778_v37 = vpack.c.bf16 %v18846_v20, %v18845_v35 }
 0xb01   : > { %18009 = vmatpush3.bf16.xpose.msk.msra.mxu1 %vm20266_vm2, %v18004_v50  ;;  %17253 = vmatprep.mubr.msk.f32.mxu1 %vm722_vm1, %v11965_v47 }
 0xb02   : > { %18018 = vmatprep.subr.msk.bf16.mxu1 %vm20266_vm2, %v18016_v10  ;;  %v18028_v19 = vpack.c.bf16 %v18851_v60, %v18850_v42  ;;  %v22737_v63 = vpop.permute.xlu1 %18863 }
 0xb03   : > { %v12149_v49 = vpop.permute.xlu0 %12148 }
 0xb06   : > { %v22745_v58 = vpop.permute.xlu1 %12421 }
 0xb07   : > { %v22735_v43 = vpop.permute.xlu0 %12237 }
 0xb08   : > { %17254 = vmatmul.mubr.msk.f32.vlgmr.msra.gmra.mrb[152].mxu1 %vm722_vm1, %v11967_v22 }
 0xb09   : > { %18021 = vmatpush3.bf16.xpose.msk.msra.mxu1 %vm20266_vm2, %v18016_v10  ;;  %17267 = vmatprep.mubr.msk.f32.mxu1 %vm722_vm1, %v12147_v7 }
 0xb0a   : > { %18030 = vmatprep.subr.msk.bf16.mxu1 %vm20266_vm2, %v18028_v19  ;;  %v12511_v36 = vpop.permute.xlu1 %12510 }
 0xb0b   : > { %v18859_v45 = vpop.permute.xlu0 %18858 }
 0xb0c   : > { %v18861_v54 = vunpack.i.h.bf16 %v18859_v45  ;;  %v18860_v17 = vunpack.i.l.bf16 %v18859_v45 }
 0xb0e   : > { %v18040_v25 = vpack.c.bf16 %v18861_v54, %v18860_v17  ;;  %v22759_v0 = vpop.permute.xlu1 %12601 }
 0xb0f   : > { %v12331_v39 = vpop.permute.xlu0 %12330 }
 0xb10   : > { %17268 = vmatmul.mubr.msk.f32.vlgmr.msra.gmra.mrb[154].mxu1 %vm722_vm1, %v12149_v49 }
 0xb11   : > { %18033 = vmatpush3.bf16.xpose.msk.msra.mxu1 %vm20266_vm2, %v18028_v19  ;;  %17281 = vmatprep.mubr.msk.f32.mxu1 %vm722_vm1, %v12329_v9 }
 0xb12   : > { %18042 = vmatprep.subr.msk.bf16.mxu1 %vm20266_vm2, %v18040_v25  ;;  %v12693_v48 = vpop.permute.xlu1 %12692 }
 0xb13   : > { %v22753_v6 = vpop.permute.xlu0 %12419 }
 0xb17   : > { %v18869_v26 = vpop.permute.xlu0 %18868 }
 0xb18   : > { %v18871_v40 = vunpack.i.h.bf16 %v18869_v26  ;;  %v18870_v18 = vunpack.i.l.bf16 %v18869_v26  ;;  %17282 = vmatmul.mubr.msk.f32.vlgmr.msra.gmra.mrb[156].mxu1 %vm722_vm1, %v12331_v39 }
 0xb19   : > { %18045 = vmatpush3.bf16.xpose.msk.msra.mxu1 %vm20266_vm2, %v18040_v25  ;;  %17295 = vmatprep.mubr.msk.f32.mxu1 %vm722_vm1, %v12511_v36 }
 0xb1a   : > { %v18052_v59 = vpack.c.bf16 %v18871_v40, %v18870_v18 }
 0xb1b   : > { %v12513_v3 = vpop.permute.xlu0 %12512 }
 0xb1c   : > { %18054 = vmatprep.subr.msk.bf16.mxu1 %vm20266_vm2, %v18052_v59 }
 0xb1f   : > { %v22763_v23 = vpop.permute.xlu0 %12603 }
 0xb20   : > { %17296 = vmatmul.mubr.msk.f32.vlgmr.msra.gmra.mrb[158].mxu1 %vm722_vm1, %v12513_v3 }
 0xb21   : > { %18057 = vmatpush3.bf16.xpose.msk.msra.mxu1 %vm20266_vm2, %v18052_v59  ;;  %17309 = vmatprep.mubr.msk.f32.mxu1 %vm722_vm1, %v12693_v48 }
 0xb23   : > { %v12695_v52 = vpop.permute.xlu0 %12694 }
 0xb27   : > { %v22769_v27 = vpop.permute.xlu0 %18873 }
 0xb28   : > { %17310 = vmatmul.mubr.msk.f32.vlgmr.msra.gmra.mrb[160].mxu1 %vm722_vm1, %v12695_v52  ;;  %v18856_v52 = vunpack.i.h.bf16 %v22717_v21 }
 0xb2b   : > { %v18884_v32 = vpop.permute.xlu0 %18883 }
 0xb2c   : > { %v18886_v28 = vunpack.i.h.bf16 %v18884_v32  ;;  %v18885_v34 = vunpack.i.l.bf16 %v18884_v32  ;;  %v18855_v32 = vunpack.i.l.bf16 %v22717_v21 }
 0xb2e   : > { %v18066_v53 = vpack.c.bf16 %v18886_v28, %v18885_v34  ;;  %v22821_v28 = vld [vmem:[#allocation7 + $0x38] sm:$0xff]  ;;  %v18034_v34 = vpack.c.bf16 %v18856_v52, %v18855_v32 }
 0xb2f   : > { %v18894_v5 = vpop.permute.xlu0 %18893 }
 0xb30   : > { %v18896_v14 = vunpack.i.h.bf16 %v18894_v5  ;;  %v18895_v47 = vunpack.i.l.bf16 %v18894_v5  ;;  %18067 = vmatprep.subr.bf16.mxu1 %v18066_v53 }
 0xb31   : > { %18069 = vmatpush3.bf16.msra.mxu1 %v18066_v53  ;;  %v22825_v53 = vld [vmem:[#allocation7 + $0x30] sm:$0xff] }
 0xb32   : > { %v22772_v12 = vpack.c.bf16 %v18896_v14, %v18895_v47  ;;  %v18865_v47 = vunpack.i.l.bf16 %v22737_v63 }
 0xb34   : > { %18075 = vmatprep.subr.bf16.mxu1 %v22772_v12 }
 0xb3a   : > { %v17044_v24 = vpop.f32.mrb[120].mxu0 }
 0xb3b   : > { %v9655_v4 = vpop.f32.mrb[121].mxu0 }
 0xb3c   : > { %17152 = vmatprep.mubr.msk.f32.mxu0 %vm722_vm1, %v9655_v4 }
 0xb3d   : > { %17153 = vmatmul.mubr.msk.f32.vlgmr.msra.gmra.mrb[88].mxu0 %vm722_vm1, %v17044_v24 }
 0xb3e   : > { %18015 = vmatpush3.bf16.xpose.msk.msra.mxu0 %vm20266_vm2, %v22696_v2  ;;  %v17051_v61 = vpop.f32.mrb[122].mxu1 }
 0xb3f   : > { %18024 = vmatprep.subr.msk.bf16.mxu0 %vm20266_vm2, %v22778_v37  ;;  %v9742_v7 = vpop.f32.mrb[123].mxu1 }
 0xb40   : > { %17155 = vmatprep.mubr.msk.f32.mxu0 %vm722_vm1, %v9742_v7 }
 0xb41   : > { %17156 = vmatmul.mubr.msk.f32.gmra.mrb[90].mxu0 %vm722_vm1, %v17051_v61  ;;  %v18876_v61 = vunpack.i.h.bf16 %v22769_v27 }
 0xb42   : > { %v17058_v38 = vpop.f32.mrb[122].mxu0 }
 0xb43   : > { %v9829_v51 = vpop.f32.mrb[123].mxu0 }
 0xb44   : > { %17158 = vmatprep.mubr.msk.f32.mxu0 %vm722_vm1, %v9829_v51  ;;  %v18879_v51 = vpop.permute.xlu1 %18878 }
 0xb45   : > { %17159 = vmatmul.mubr.msk.f32.gmra.mrb[92].mxu0 %vm722_vm1, %v17058_v38 }
 0xb46   : > { %v17065_v15 = vpop.f32.mrb[124].mxu1 }
 0xb47   : > { %v9916_v11 = vpop.f32.mrb[125].mxu1 }
 0xb48   : > { %17161 = vmatprep.mubr.msk.f32.mxu0 %vm722_vm1, %v9916_v11 }
 0xb49   : > { %17162 = vmatmul.mubr.msk.f32.gmra.mrb[94].mxu0 %vm722_vm1, %v17065_v15 }
 0xb4a   : > { %v17072_v2 = vpop.f32.mrb[124].mxu0 }
 0xb4b   : > { %v10003_v22 = vpop.f32.mrb[125].mxu0 }
 0xb4c   : > { %17164 = vmatprep.mubr.msk.f32.mxu0 %vm722_vm1, %v10003_v22  ;;  %v18881_v22 = vunpack.i.h.bf16 %v18879_v51 }
 0xb4d   : > { %17165 = vmatmul.mubr.msk.f32.gmra.mrb[96].mxu0 %vm722_vm1, %v17072_v2 }
 0xb4e   : > { %v17079_v50 = vpop.f32.mrb[126].mxu1 }
 0xb4f   : > { %v10090_v16 = vpop.f32.mrb[127].mxu1 }
 0xb50   : > { %17167 = vmatprep.mubr.msk.f32.mxu0 %vm722_vm1, %v10090_v16 }
 0xb51   : > { %17168 = vmatmul.mubr.msk.f32.gmra.mrb[98].mxu0 %vm722_vm1, %v17079_v50  ;;  %v18880_v50 = vunpack.i.l.bf16 %v18879_v51 }
 0xb57   : > { %v17086_v55 = vpop.f32.mrb[126].mxu0 }
 0xb58   : > { %v10177_v30 = vpop.f32.mrb[127].mxu0 }
 0xb59   : > { %17170 = vmatprep.mubr.msk.f32.mxu0 %vm722_vm1, %v10177_v30 }
 0xb5a   : > { %v17093_v10 = vpop.f32.mrb[128].mxu1  ;;  %17171 = vmatmul.mubr.msk.f32.gmra.mrb[100].mxu0 %vm722_vm1, %v17086_v55 }
 0xb5b   : > { %v10264_v9 = vpop.f32.mrb[129].mxu1 }
 0xb5c   : > { %17173 = vmatprep.mubr.msk.f32.mxu0 %vm722_vm1, %v10264_v9 }
 0xb5e   : > { %17174 = vmatmul.mubr.msk.f32.gmra.mrb[102].mxu0 %vm722_vm1, %v17093_v10 }
 0xb64   : > { %v17100_v49 = vpop.f32.mrb[128].mxu0 }
 0xb65   : > { %v10351_v60 = vpop.f32.mrb[129].mxu0 }
 0xb66   : > { %17176 = vmatprep.mubr.msk.f32.mxu0 %vm722_vm1, %v10351_v60 }
 0xb67   : > { %17177 = vmatmul.mubr.msk.f32.gmra.mrb[104].mxu0 %vm722_vm1, %v17100_v49 }
 0xb69   : > { %v17107_v42 = vpop.f32.mrb[130].mxu1 }
 0xb6a   : > { %v10438_v19 = vpop.f32.mrb[131].mxu1 }
 0xb6b   : > { %17179 = vmatprep.mubr.msk.f32.mxu0 %vm722_vm1, %v10438_v19 }
 0xb6c   : > { %17180 = vmatmul.mubr.msk.f32.gmra.mrb[106].mxu0 %vm722_vm1, %v17107_v42 }
 0xb71   : > { %v17114_v45 = vpop.f32.mrb[130].mxu0 }
 0xb72   : > { %v10525_v54 = vpop.f32.mrb[131].mxu0 }
 0xb73   : > { %17182 = vmatprep.mubr.msk.f32.mxu0 %vm722_vm1, %v10525_v54 }
 0xb74   : > { %17183 = vmatmul.mubr.msk.f32.gmra.mrb[108].mxu0 %vm722_vm1, %v17114_v45 }
 0xb79   : > { %v17121_v17 = vpop.f32.mrb[132].mxu1 }
 0xb7a   : > { %v10612_v39 = vpop.f32.mrb[133].mxu1 }
 0xb7b   : > { %17185 = vmatprep.mubr.msk.f32.mxu0 %vm722_vm1, %v10612_v39 }
 0xb7c   : > { %17186 = vmatmul.mubr.msk.f32.gmra.mrb[110].mxu0 %vm722_vm1, %v17121_v17 }
 0xb81   : > { %v17128_v25 = vpop.f32.mrb[132].mxu0 }
 0xb82   : > { %v10699_v36 = vpop.f32.mrb[133].mxu0 }
 0xb83   : > { %17188 = vmatprep.mubr.msk.f32.mxu0 %vm722_vm1, %v10699_v36 }
 0xb84   : > { %17189 = vmatmul.mubr.msk.f32.gmra.mrb[112].mxu0 %vm722_vm1, %v17128_v25 }
 0xb89   : > { %v17135_v26 = vpop.f32.mrb[134].mxu1 }
 0xb8a   : > { %v10786_v40 = vpop.f32.mrb[135].mxu1 }
 0xb8b   : > { %17191 = vmatprep.mubr.msk.f32.mxu0 %vm722_vm1, %v10786_v40 }
 0xb8c   : > { %17192 = vmatmul.mubr.msk.f32.gmra.mrb[114].mxu0 %vm722_vm1, %v17135_v26 }
 0xb97   : > { %v17142_v18 = vpop.f32.mrb[134].mxu0 }
 0xb98   : > { %v10873_v59 = vpop.f32.mrb[135].mxu0 }
 0xb99   : > { %v17149_v3 = vpop.f32.mrb[136].mxu1  ;;  %17194 = vmatprep.mubr.msk.f32.mxu0 %vm722_vm1, %v10873_v59 }
 0xb9a   : > { %v10960_v48 = vpop.f32.mrb[137].mxu1  ;;  %17195 = vmatmul.mubr.msk.f32.gmra.mrb[116].mxu0 %vm722_vm1, %v17142_v18 }
 0xb9b   : > { %17197 = vmatprep.mubr.msk.f32.mxu0 %vm722_vm1, %v10960_v48 }
 0xb9e   : > { %17198 = vmatmul.mubr.msk.f32.gmra.mrb[118].mxu0 %vm722_vm1, %v17149_v3 }
 0xb9f   : > { %17260 = vmatprep.mubr.msk.f32.mxu0 %vm722_vm1, %v22725_v33 }
 0xba2   : > { %17261 = vmatmul.mubr.msk.f32.vlgmr.msra.gmra.mrb[136].mxu0 %vm722_vm1, %v22709_v62  ;;  %v18866_v62 = vunpack.i.h.bf16 %v22737_v63 }
 0xba3   : > { %18027 = vmatpush3.bf16.xpose.msk.msra.mxu0 %vm20266_vm2, %v22778_v37  ;;  %v17206_v5 = vpop.f32.mrb[138].mxu1  ;;  %17274 = vmatprep.mubr.msk.f32.mxu0 %vm722_vm1, %v22735_v43 }
 0xba4   : > { %v22833_v21 = vadd.f32 %v17206_v5, %v22821_v28  ;;  %18036 = vmatprep.subr.msk.bf16.mxu0 %vm20266_vm2, %v18034_v34  ;;  %v11409_v33 = vpop.f32.mrb[139].mxu1  ;;  %v18046_v35 = vpack.c.bf16 %v18866_v62, %v18865_v47 }
 0xba5   : > { %v22838_v14 = vadd.f32 %v11409_v33, %v22825_v53 }
 0xba6   : > { %v12786_v20 = vsel %vm2173_vm3, %v22833_v21, -inf }
 0xba7   : > { %12787 = vmax.xlane.f32.xlu0 %v12786_v20  ;;  %v12783_v43 = vsel %vm2173_vm3, %v22838_v14, -inf }
 0xba8   : > { %12784 = vmax.xlane.f32.xlu1 %v12783_v43 }
 0xbaa   : > { %17275 = vmatmul.mubr.msk.f32.vlgmr.msra.gmra.mrb[138].mxu0 %vm722_vm1, %v22727_v57  ;;  %v18875_v57 = vunpack.i.l.bf16 %v22769_v27 }
 0xbab   : > { %18039 = vmatpush3.bf16.xpose.msk.msra.mxu0 %vm20266_vm2, %v18034_v34  ;;  %17288 = vmatprep.mubr.msk.f32.mxu0 %vm722_vm1, %v22753_v6  ;;  %v17213_v24 = vpop.f32.mrb[140].mxu1 }
 0xbac   : > { %v22853_v63 = vadd.f32 %v17213_v24, %v22821_v28  ;;  %18048 = vmatprep.subr.msk.bf16.mxu0 %vm20266_vm2, %v18046_v35  ;;  %v11500_v4 = vpop.f32.mrb[141].mxu1  ;;  %v18058_v38 = vpack.c.bf16 %v18876_v61, %v18875_v57 }
 0xbad   : > { %v22858_v37 = vadd.f32 %v11500_v4, %v22825_v53 }
 0xbae   : > { %v12792_v7 = vsel %vm2173_vm3, %v22853_v63, -inf }
 0xbaf   : > { %12793 = vmax.xlane.f32.xlu1 %v12792_v7  ;;  %v12789_v6 = vsel %vm2173_vm3, %v22858_v37, -inf }
 0xbb0   : > { %12790 = vmax.xlane.f32.xlu0 %v12789_v6 }
 0xbb2   : > { %17289 = vmatmul.mubr.msk.f32.vlgmr.msra.gmra.mrb[140].mxu0 %vm722_vm1, %v22745_v58 }
 0xbb3   : > { %18051 = vmatpush3.bf16.xpose.msk.msra.mxu0 %vm20266_vm2, %v18046_v35  ;;  %17302 = vmatprep.mubr.msk.f32.mxu0 %vm722_vm1, %v22759_v0  ;;  %v17220_v27 = vpop.f32.mrb[142].mxu1  ;;  %v22882_v0 = vpack.c.bf16 %v18881_v22, %v18880_v50 }
 0xbb4   : > { %v22873_v15 = vadd.f32 %v17220_v27, %v22821_v28  ;;  %18059 = vmatprep.subr.bf16.mxu0 %v18058_v38  ;;  %v11591_v11 = vpop.f32.mrb[143].mxu1 }
 0xbb5   : > { %v22876_v2 = vadd.f32 %v11591_v11, %v22825_v53 }
 0xbb6   : > { %v12798_v58 = vsel %vm2173_vm3, %v22873_v15, -inf }
 0xbb7   : > { %12799 = vmax.xlane.f32.xlu1 %v12798_v58  ;;  %v12795_v1 = vsel %vm2173_vm3, %v22876_v2, -inf }
 0xbb8   : > { %12796 = vmax.xlane.f32.xlu0 %v12795_v1 }
 0xbba   : > { %17303 = vmatmul.mubr.msk.f32.vlgmr.msra.gmra.mrb[142].mxu0 %vm722_vm1, %v22763_v23 }
 0xbbb   : > { %18061 = vmatpush3.bf16.msra.mxu0 %v18058_v38  ;;  %v17227_v16 = vpop.f32.mrb[144].mxu1 }
 0xbbc   : > { %v22887_v55 = vadd.f32 %v17227_v16, %v22821_v28  ;;  %18063 = vmatprep.subr.bf16.mxu0 %v22882_v0  ;;  %v11682_v30 = vpop.f32.mrb[145].mxu1 }
 0xbbd   : > { %v22891_v10 = vadd.f32 %v11682_v30, %v22825_v53 }
 0xbbe   : > { %v12804_v9 = vsel %vm2173_vm3, %v22887_v55, -inf }
 0xbbf   : > { %12805 = vmax.xlane.f32.xlu1 %v12804_v9  ;;  %v12801_v49 = vsel %vm2173_vm3, %v22891_v10, -inf }
 0xbc0   : > { %12802 = vmax.xlane.f32.xlu0 %v12801_v49 }
 0xbc3   : > { %v17234_v23 = vpop.f32.mrb[146].mxu1 }
 0xbc4   : > { %v22898_v60 = vadd.f32 %v17234_v23, %v22821_v28  ;;  %v11773_v42 = vpop.f32.mrb[147].mxu1 }
 0xbc5   : > { %v22901_v19 = vadd.f32 %v11773_v42, %v22825_v53 }
 0xbc6   : > { %v12810_v45 = vsel %vm2173_vm3, %v22898_v60, -inf }
 0xbc7   : > { %12811 = vmax.xlane.f32.xlu1 %v12810_v45  ;;  %v12807_v54 = vsel %vm2173_vm3, %v22901_v19, -inf }
 0xbc8   : > { %12808 = vmax.xlane.f32.xlu0 %v12807_v54 }
 0xbcb   : > { %v17241_v17 = vpop.f32.mrb[148].mxu1 }
 0xbcc   : > { %v22908_v39 = vadd.f32 %v17241_v17, %v22821_v28  ;;  %v11864_v25 = vpop.f32.mrb[149].mxu1  ;;  %v22977_v17 = vpop.permute.xlu1 %18888 }
 0xbcd   : > { %v22911_v36 = vadd.f32 %v11864_v25, %v22825_v53 }
 0xbce   : > { %v12816_v26 = vsel %vm2173_vm3, %v22908_v39, -inf }
 0xbcf   : > { %12817 = vmax.xlane.f32.xlu1 %v12816_v26  ;;  %v12813_v40 = vsel %vm2173_vm3, %v22911_v36, -inf  ;;  %v22981_v26 = vpop.permute.xlu0 %18903 }
 0xbd0   : > { %12814 = vmax.xlane.f32.xlu0 %v12813_v40  ;;  %v22979_v25 = vpop.permute.xlu1 %18898 }
 0xbd3   : > { %v17248_v18 = vpop.f32.mrb[150].mxu1 }
 0xbd4   : > { %v22918_v59 = vadd.f32 %v17248_v18, %v22821_v28  ;;  %v11955_v3 = vpop.f32.mrb[151].mxu1  ;;  %v22983_v40 = vpop.permute.xlu1 %18908 }
 0xbd5   : > { %v22921_v48 = vadd.f32 %v11955_v3, %v22825_v53 }
 0xbd6   : > { %v12822_v52 = vsel %vm2173_vm3, %v22918_v59, -inf }
 0xbd7   : > { %12823 = vmax.xlane.f32.xlu1 %v12822_v52  ;;  %v12819_v32 = vsel %vm2173_vm3, %v22921_v48, -inf }
 0xbd8   : > { %12820 = vmax.xlane.f32.xlu0 %v12819_v32 }
 0xbdb   : > { %v17255_v34 = vpop.f32.mrb[152].mxu1 }
 0xbdc   : > { %v22928_v5 = vadd.f32 %v17255_v34, %v22821_v28  ;;  %v12046_v33 = vpop.f32.mrb[153].mxu1 }
 0xbdd   : > { %v22931_v62 = vadd.f32 %v12046_v33, %v22825_v53 }
 0xbde   : > { %v12828_v47 = vsel %vm2173_vm3, %v22928_v5, -inf }
 0xbdf   : > { %12829 = vmax.xlane.f32.xlu1 %v12828_v47  ;;  %v12825_v20 = vsel %vm2173_vm3, %v22931_v62, -inf }
 0xbe0   : > { %12826 = vmax.xlane.f32.xlu0 %v12825_v20 }
 0xbe3   : > { %v17269_v43 = vpop.f32.mrb[154].mxu1 }
 0xbe4   : > { %v22938_v35 = vadd.f32 %v17269_v43, %v22821_v28  ;;  %v12228_v24 = vpop.f32.mrb[155].mxu1 }
 0xbe5   : > { %v22941_v4 = vadd.f32 %v12228_v24, %v22825_v53 }
 0xbe6   : > { %v12840_v61 = vsel %vm2173_vm3, %v22938_v35, -inf }
 0xbe7   : > { %12841 = vmax.xlane.f32.xlu1 %v12840_v61  ;;  %v12837_v57 = vsel %vm2173_vm3, %v22941_v4, -inf }
 0xbe8   : > { %12838 = vmax.xlane.f32.xlu0 %v12837_v57 }
 0xbeb   : > { %v17283_v7 = vpop.f32.mrb[156].mxu1 }
 0xbec   : > { %v22948_v6 = vadd.f32 %v17283_v7, %v22821_v28  ;;  %v12410_v38 = vpop.f32.mrb[157].mxu1 }
 0xbed   : > { %v22951_v51 = vadd.f32 %v12410_v38, %v22825_v53 }
 0xbee   : > { %v12852_v27 = vsel %vm2173_vm3, %v22948_v6, -inf }
 0xbef   : > { %12853 = vmax.xlane.f32.xlu1 %v12852_v27  ;;  %v12849_v11 = vsel %vm2173_vm3, %v22951_v51, -inf }
 0xbf0   : > { %12850 = vmax.xlane.f32.xlu0 %v12849_v11 }
 0xbf3   : > { %v17297_v22 = vpop.f32.mrb[158].mxu1 }
 0xbf4   : > { %v22958_v50 = vadd.f32 %v17297_v22, %v22821_v28  ;;  %v12592_v58 = vpop.f32.mrb[159].mxu1 }
 0xbf5   : > { %v22961_v1 = vadd.f32 %v12592_v58, %v22825_v53 }
 0xbf6   : > { %v12864_v16 = vsel %vm2173_vm3, %v22958_v50, -inf }
 0xbf7   : > { %12865 = vmax.xlane.f32.xlu1 %v12864_v16  ;;  %v12861_v30 = vsel %vm2173_vm3, %v22961_v1, -inf }
 0xbf8   : > { %12862 = vmax.xlane.f32.xlu0 %v12861_v30 }
 0xbfb   : > { %v17311_v9 = vpop.f32.mrb[160].mxu1 }
 0xbfc   : > { %v22968_v49 = vadd.f32 %v17311_v9, %v22821_v28  ;;  %v12774_v23 = vpop.f32.mrb[161].mxu1 }
 0xbfd   : > { %v22971_v42 = vadd.f32 %v12774_v23, %v22825_v53 }
 0xbfe   : > { %v12876_v45 = vsel %vm2173_vm3, %v22968_v49, -inf }
 0xbff   : > { %12877 = vmax.xlane.f32.xlu1 %v12876_v45  ;;  %v12873_v54 = vsel %vm2173_vm3, %v22971_v42, -inf }
 0xc00   : > { %12874 = vmax.xlane.f32.xlu0 %v12873_v54 }
 0xc34   : > { %v12788_v18 = vpop.xlane.xlu0 %12787 }
 0xc35   : > { %v12880_v3 = vsub.f32 %v22833_v21, %v12788_v18  ;;  %v12785_v52 = vpop.xlane.xlu1 %12784 }
 0xc36   : > { %v12879_v32 = vsub.f32 %v22838_v14, %v12785_v52 }
 0xc37   : > { %v12913_v34 = vmul.f32 1.442695, %v12880_v3 }
 0xc38   : > { %v12911_v33 = vmul.f32 1.442695, %v12879_v32 }
 0xc39   : > { %19336 = vpow2.f32 %v12913_v34 }
 0xc3a   : > { %19338 = vpow2.f32 %v12911_v33 }
 0xc3c   : > { %v12794_v47 = vpop.xlane.xlu1 %12793 }
 0xc3d   : > { %v12882_v20 = vsub.f32 %v22853_v63, %v12794_v47  ;;  %v12791_v43 = vpop.xlane.xlu0 %12790 }
 0xc3e   : > { %v12881_v24 = vsub.f32 %v22858_v37, %v12791_v43 }
 0xc3f   : > { %v12917_v61 = vmul.f32 1.442695, %v12882_v20 }
 0xc40   : > { %v12915_v57 = vmul.f32 1.442695, %v12881_v24 }
 0xc41   : > { %19340 = vpow2.f32 %v12917_v61 }
 0xc42   : > { %19342 = vpow2.f32 %v12915_v57 }
 0xc43   : > { %v22989_v7 = vpop.eup %19336 }
 0xc44   : > { %v22991_v21 = vpop.eup %19338  ;;  %v12800_v38 = vpop.xlane.xlu1 %12799  ;;  %v12978_v14 = vsel %vm2173_vm3, %v22989_v7, 0.0 }
 0xc45   : > { %v12884_v27 = vsub.f32 %v22873_v15, %v12800_v38  ;;  %v12797_v11 = vpop.xlane.xlu0 %12796  ;;  %12979 = vadd.xlane.f32.xlu1 %v12978_v14  ;;  %v12975_v63 = vsel %vm2173_vm3, %v22991_v21, 0.0 }
 0xc46   : > { %v12883_v37 = vsub.f32 %v22876_v2, %v12797_v11  ;;  %12976 = vadd.xlane.f32.xlu0 %v12975_v63 }
 0xc47   : > { %v12921_v22 = vmul.f32 1.442695, %v12884_v27 }
 0xc48   : > { %v12919_v58 = vmul.f32 1.442695, %v12883_v37 }
 0xc49   : > { %19344 = vpow2.f32 %v12921_v22 }
 0xc4a   : > { %19346 = vpow2.f32 %v12919_v58 }
 0xc4b   : > { %v22999_v16 = vpop.eup %19340 }
 0xc4c   : > { %v23001_v30 = vpop.eup %19342  ;;  %v12806_v9 = vpop.xlane.xlu1 %12805  ;;  %v12984_v15 = vsel %vm2173_vm3, %v22999_v16, 0.0 }
 0xc4d   : > { %v12886_v23 = vsub.f32 %v22887_v55, %v12806_v9  ;;  %v12803_v45 = vpop.xlane.xlu0 %12802  ;;  %12985 = vadd.xlane.f32.xlu1 %v12984_v15  ;;  %v12981_v2 = vsel %vm2173_vm3, %v23001_v30, 0.0 }
 0xc4e   : > { %v12885_v54 = vsub.f32 %v22891_v10, %v12803_v45  ;;  %12982 = vadd.xlane.f32.xlu0 %v12981_v2 }
 0xc4f   : > { %v12925_v18 = vmul.f32 1.442695, %v12886_v23 }
 0xc50   : > { %v12923_v3 = vmul.f32 1.442695, %v12885_v54 }
 0xc51   : > { %19348 = vpow2.f32 %v12925_v18 }
 0xc52   : > { %19350 = vpow2.f32 %v12923_v3 }
 0xc53   : > { %v23009_v52 = vpop.eup %19344 }
 0xc54   : > { %v23011_v32 = vpop.eup %19346  ;;  %v12812_v34 = vpop.xlane.xlu1 %12811  ;;  %v12990_v55 = vsel %vm2173_vm3, %v23009_v52, 0.0 }
 0xc55   : > { %v12888_v33 = vsub.f32 %v22898_v60, %v12812_v34  ;;  %v12809_v47 = vpop.xlane.xlu0 %12808  ;;  %12991 = vadd.xlane.f32.xlu1 %v12990_v55  ;;  %v12987_v10 = vsel %vm2173_vm3, %v23011_v32, 0.0 }
 0xc56   : > { %v12887_v20 = vsub.f32 %v22901_v19, %v12809_v47  ;;  %12988 = vadd.xlane.f32.xlu0 %v12987_v10 }
 0xc57   : > { %v12929_v43 = vmul.f32 1.442695, %v12888_v33 }
 0xc58   : > { %v12927_v24 = vmul.f32 1.442695, %v12887_v20 }
 0xc59   : > { %19352 = vpow2.f32 %v12929_v43 }
 0xc5a   : > { %19354 = vpow2.f32 %v12927_v24 }
 0xc5b   : > { %v23019_v61 = vpop.eup %19348 }
 0xc5c   : > { %v23021_v57 = vpop.eup %19350  ;;  %v12818_v38 = vpop.xlane.xlu1 %12817  ;;  %v12996_v60 = vsel %vm2173_vm3, %v23019_v61, 0.0 }
 0xc5d   : > { %v12890_v14 = vsub.f32 %v22908_v39, %v12818_v38  ;;  %v12815_v27 = vpop.xlane.xlu0 %12814  ;;  %12997 = vadd.xlane.f32.xlu1 %v12996_v60  ;;  %v12993_v19 = vsel %vm2173_vm3, %v23021_v57, 0.0 }
 0xc5e   : > { %v12889_v11 = vsub.f32 %v22911_v36, %v12815_v27  ;;  %12994 = vadd.xlane.f32.xlu0 %v12993_v19 }
 0xc5f   : > { %v12933_v63 = vmul.f32 1.442695, %v12890_v14 }
 0xc60   : > { %v12931_v37 = vmul.f32 1.442695, %v12889_v11 }
 0xc61   : > { %19356 = vpow2.f32 %v12933_v63 }
 0xc62   : > { %19358 = vpow2.f32 %v12931_v37 }
 0xc63   : > { %v23029_v22 = vpop.eup %19352 }
 0xc64   : > { %v23031_v58 = vpop.eup %19354  ;;  %v12824_v9 = vpop.xlane.xlu1 %12823  ;;  %v13002_v39 = vsel %vm2173_vm3, %v23029_v22, 0.0 }
 0xc65   : > { %v12892_v15 = vsub.f32 %v22918_v59, %v12824_v9  ;;  %v12821_v23 = vpop.xlane.xlu0 %12820  ;;  %13003 = vadd.xlane.f32.xlu1 %v13002_v39  ;;  %v12999_v36 = vsel %vm2173_vm3, %v23031_v58, 0.0 }
 0xc66   : > { %v12891_v45 = vsub.f32 %v22921_v48, %v12821_v23  ;;  %13000 = vadd.xlane.f32.xlu0 %v12999_v36 }
 0xc67   : > { %v12937_v2 = vmul.f32 1.442695, %v12892_v15 }
 0xc68   : > { %v12935_v54 = vmul.f32 1.442695, %v12891_v45 }
 0xc69   : > { %19360 = vpow2.f32 %v12937_v2 }
 0xc6a   : > { %19362 = vpow2.f32 %v12935_v54 }
 0xc6b   : > { %v23039_v18 = vpop.eup %19356 }
 0xc6c   : > { %v23041_v3 = vpop.eup %19358  ;;  %v12830_v34 = vpop.xlane.xlu1 %12829  ;;  %v13008_v59 = vsel %vm2173_vm3, %v23039_v18, 0.0 }
 0xc6d   : > { %v12894_v55 = vsub.f32 %v22928_v5, %v12830_v34  ;;  %v12827_v33 = vpop.xlane.xlu0 %12826  ;;  %13009 = vadd.xlane.f32.xlu1 %v13008_v59  ;;  %v13005_v48 = vsel %vm2173_vm3, %v23041_v3, 0.0 }
 0xc6e   : > { %v12893_v47 = vsub.f32 %v22931_v62, %v12827_v33  ;;  %13006 = vadd.xlane.f32.xlu0 %v13005_v48 }
 0xc6f   : > { %v12941_v10 = vmul.f32 1.442695, %v12894_v55 }
 0xc70   : > { %v12939_v20 = vmul.f32 1.442695, %v12893_v47 }
 0xc72   : > { %19364 = vpow2.f32 %v12939_v20 }
 0xc73   : > { %v23049_v43 = vpop.eup %19360  ;;  %19366 = vpow2.f32 %v12941_v10 }
 0xc74   : > { %v12842_v24 = vpop.xlane.xlu1 %12841  ;;  %v13014_v38 = vsel %vm2173_vm3, %v23049_v43, 0.0  ;;  %v23053_v60 = vpop.eup %19362 }
 0xc75   : > { %v12898_v5 = vsub.f32 %v22938_v35, %v12842_v24  ;;  %v12839_v14 = vpop.xlane.xlu0 %12838  ;;  %13015 = vadd.xlane.f32.xlu1 %v13014_v38  ;;  %v17262_v27 = vpop.f32.mrb[136].mxu0  ;;  %v13011_v39 = vsel %vm2173_vm3, %v23053_v60, 0.0 }
 0xc76   : > { %v12897_v62 = vsub.f32 %v22941_v4, %v12839_v14  ;;  %v12137_v19 = vpop.f32.mrb[137].mxu0  ;;  %v23061_v9 = vadd.f32 %v17262_v27, %v22821_v28 }
 0xc77   : > { %v12949_v11 = vmul.f32 1.442695, %v12898_v5  ;;  %v23058_v63 = vadd.f32 %v12137_v19, %v22825_v53 }
 0xc78   : > { %v12947_v37 = vmul.f32 1.442695, %v12897_v62  ;;  %v12834_v23 = vsel %vm2173_vm3, %v23061_v9, -inf }
 0xc79   : > { %13012 = vadd.xlane.f32.xlu1 %v13011_v39  ;;  %v12831_v35 = vsel %vm2173_vm3, %v23058_v63, -inf }
 0xc7a   : > { %19368 = vpow2.f32 %v12947_v37  ;;  %12832 = vmax.xlane.f32.xlu0 %v12831_v35 }
 0xc7b   : > { %19370 = vpow2.f32 %v12949_v11 }
 0xc7c   : > { %v23067_v4 = vpop.eup %19364  ;;  %v12854_v15 = vpop.xlane.xlu1 %12853 }
 0xc7d   : > { %v23071_v36 = vpop.eup %19366  ;;  %v12902_v45 = vsub.f32 %v22948_v6, %v12854_v15  ;;  %v17276_v2 = vpop.f32.mrb[138].mxu0  ;;  %12835 = vmax.xlane.f32.xlu1 %v12834_v23  ;;  %v13017_v34 = vsel %vm2173_vm3, %v23067_v4, 0.0 }
 0xc7e   : > { %v12851_v54 = vpop.xlane.xlu0 %12850  ;;  %v12319_v55 = vpop.f32.mrb[139].mxu0  ;;  %13018 = vadd.xlane.f32.xlu0 %v13017_v34  ;;  %v23081_v47 = vadd.f32 %v17276_v2, %v22821_v28  ;;  %v13020_v6 = vsel %vm2173_vm3, %v23071_v36, 0.0 }
 0xc7f   : > { %v12901_v59 = vsub.f32 %v22951_v51, %v12851_v54  ;;  %v12957_v33 = vmul.f32 1.442695, %v12902_v45  ;;  %v23078_v48 = vadd.f32 %v12319_v55, %v22825_v53 }
 0xc80   : > { %v12846_v24 = vsel %vm2173_vm3, %v23081_v47, -inf }
 0xc81   : > { %v12955_v10 = vmul.f32 1.442695, %v12901_v59  ;;  %19372 = vpow2.f32 %v12957_v33  ;;  %13021 = vadd.xlane.f32.xlu1 %v13020_v6  ;;  %v12843_v20 = vsel %vm2173_vm3, %v23078_v48, -inf }
 0xc82   : > { %12844 = vmax.xlane.f32.xlu0 %v12843_v20 }
 0xc83   : > { %19374 = vpow2.f32 %v12955_v10 }
 0xc84   : > { %v23087_v51 = vpop.eup %19368 }
 0xc85   : > { %v23091_v38 = vpop.eup %19370  ;;  %v17290_v5 = vpop.f32.mrb[140].mxu0  ;;  %12847 = vmax.xlane.f32.xlu1 %v12846_v24  ;;  %v13029_v14 = vsel %vm2173_vm3, %v23087_v51, 0.0 }
 0xc86   : > { %v12501_v27 = vpop.f32.mrb[141].mxu0  ;;  %13030 = vadd.xlane.f32.xlu0 %v13029_v14  ;;  %v23099_v19 = vadd.f32 %v17290_v5, %v22821_v28  ;;  %v13032_v11 = vsel %vm2173_vm3, %v23091_v38, 0.0 }
 0xc87   : > { %v23096_v62 = vadd.f32 %v12501_v27, %v22825_v53 }
 0xc88   : > { %v12858_v35 = vsel %vm2173_vm3, %v23099_v19, -inf }
 0xc89   : > { %13033 = vadd.xlane.f32.xlu1 %v13032_v11  ;;  %v12855_v37 = vsel %vm2173_vm3, %v23096_v62, -inf }
 0xc8a   : > { %12856 = vmax.xlane.f32.xlu0 %v12855_v37 }
 0xc8b   : > { %v23105_v39 = vpop.eup %19372 }
 0xc8c   : > { %v13044_v15 = vsel %vm2173_vm3, %v23105_v39, 0.0 }
 0xc8d   : > { %v23111_v23 = vpop.eup %19374  ;;  %v17304_v45 = vpop.f32.mrb[142].mxu0  ;;  %12859 = vmax.xlane.f32.xlu1 %v12858_v35 }
 0xc8e   : > { %v12683_v2 = vpop.f32.mrb[143].mxu0  ;;  %13045 = vadd.xlane.f32.xlu0 %v13044_v15  ;;  %v23117_v34 = vadd.f32 %v17304_v45, %v22821_v28  ;;  %v13041_v59 = vsel %vm2173_vm3, %v23111_v23, 0.0  ;;  %v12863_v28 = vpop.xlane.xlu0 %12862 }
 0xc8f   : > { %v23114_v54 = vadd.f32 %v12683_v2, %v22825_v53  ;;  %v12866_v53 = vpop.xlane.xlu1 %12865  ;;  %v12905_v10 = vsub.f32 %v22961_v1, %v12863_v28 }
 0xc90   : > { %v12870_v33 = vsel %vm2173_vm3, %v23117_v34, -inf  ;;  %v12906_v6 = vsub.f32 %v22958_v50, %v12866_v53  ;;  %v18891_v53 = vunpack.i.h.bf16 %v22977_v17 }
 0xc91   : > { %13042 = vadd.xlane.f32.xlu1 %v13041_v59  ;;  %v12867_v55 = vsel %vm2173_vm3, %v23114_v54, -inf  ;;  %v12963_v5 = vmul.f32 1.442695, %v12905_v10  ;;  %v18890_v10 = vunpack.i.l.bf16 %v22977_v17  ;;  %v18901_v17 = vunpack.i.h.bf16 %v22979_v25 }
 0xc92   : > { %12868 = vmax.xlane.f32.xlu0 %v12867_v55  ;;  %v12875_v20 = vpop.xlane.xlu0 %12874  ;;  %v12965_v27 = vmul.f32 1.442695, %v12906_v6 }
 0xc93   : > { %v12878_v24 = vpop.xlane.xlu1 %12877  ;;  %v12909_v14 = vsub.f32 %v22971_v42, %v12875_v20  ;;  %19376 = vpow2.f32 %v12963_v5 }
 0xc94   : > { %19378 = vpow2.f32 %v12965_v27 }
 0xc95   : > { %12871 = vmax.xlane.f32.xlu1 %v12870_v33  ;;  %v12971_v11 = vmul.f32 1.442695, %v12909_v14 }
 0xc97   : > { %19380 = vpow2.f32 %v12971_v11 }
 0xca6   : > { %18918 = vrot.lane.b32.xlu1 %v23914_v46, %s19670_s11  ;;  %v12910_v46 = vsub.f32 %v22968_v49, %v12878_v24  ;;  %v18070_v24 = vpack.c.bf16 %v18891_v53, %v18890_v10 }
 0xca8   : > { %18913 = vrot.lane.b32.xlu0 %v23897_v31, %s19670_s11  ;;  %v12973_v31 = vmul.f32 1.442695, %v12910_v46 }
 0xcaa   : > { %19382 = vpow2.f32 %v12973_v31 }
 0xcac   : > { %18923 = vrot.lane.b32.xlu0 %v23903_v41, %s19670_s11  ;;  %v23135_v41 = vpop.eup %19376 }
 0xcad   : > { %v23137_v37 = vpop.eup %19378  ;;  %v13053_v50 = vsel %vm2173_vm3, %v23135_v41, 0.0 }
 0xcae   : > { %v23141_v1 = vpop.eup %19380  ;;  %v13056_v42 = vsel %vm2173_vm3, %v23137_v37, 0.0 }
 0xcaf   : > { %v13065_v35 = vsel %vm2173_vm3, %v23141_v1, 0.0 }
 0xcb4   : > { %v23145_v49 = vpop.eup %19382 }
 0xcb5   : > { %v13068_v15 = vsel %vm2173_vm3, %v23145_v49, 0.0 }
 0xcca   : > { %13054 = vadd.xlane.f32.xlu1 %v13053_v50 }
 0xccb   : > { %13057 = vadd.xlane.f32.xlu0 %v13056_v42 }
 0xcce   : > { %13066 = vadd.xlane.f32.xlu1 %v13065_v35 }
 0xccf   : > { %13069 = vadd.xlane.f32.xlu0 %v13068_v15  ;;  %v18906_v15 = vunpack.i.h.bf16 %v22981_v26 }
 0xcd2   : > { %v12980_v45 = vpop.xlane.xlu1 %12979 }
 0xcd3   : > { %19384 = vrcp.f32 %v12980_v45  ;;  %v12977_v2 = vpop.xlane.xlu0 %12976 }
 0xcd4   : > { %19386 = vrcp.f32 %v12977_v2 }
 0xcda   : > { %v12986_v59 = vpop.xlane.xlu1 %12985 }
 0xcdb   : > { %19388 = vrcp.f32 %v12986_v59  ;;  %v12983_v55 = vpop.xlane.xlu0 %12982 }
 0xcdc   : > { %19390 = vrcp.f32 %v12983_v55 }
 0xcdd   : > { %v19385_v33 = vpop.eup %19384 }
 0xcde   : > { %v19387_v28 = vpop.eup %19386  ;;  %v13104_v20 = vmul.f32 %v19385_v33, %v22989_v7 }
 0xcdf   : > { %v13103_v6 = vmul.f32 %v19387_v28, %v22991_v21  ;;  %v18900_v21 = vunpack.i.l.bf16 %v22979_v25  ;;  %v18905_v25 = vunpack.i.l.bf16 %v22981_v26  ;;  %v18911_v26 = vunpack.i.h.bf16 %v22983_v40 }
 0xce1   : > { %17316 = vmatprep.mubr.msk.f32.mxu0 %vm2173_vm3, %v13103_v6  ;;  %v18078_v31 = vpack.c.bf16 %v18901_v17, %v18900_v21  ;;  %v18082_v45 = vpack.c.bf16 %v18906_v15, %v18905_v25 }
 0xce2   : > { %v12992_v5 = vpop.xlane.xlu1 %12991  ;;  %17317 = vmatmul.mubr.msk.f32.vlgmr.msra.gmra.mrb[144].mxu0 %vm2173_vm3, %v13104_v20 }
 0xce3   : > { %19392 = vrcp.f32 %v12992_v5  ;;  %18065 = vmatpush3.bf16.msra.mxu0 %v22882_v0  ;;  %v12989_v14 = vpop.xlane.xlu0 %12988 }
 0xce4   : > { %19394 = vrcp.f32 %v12989_v14  ;;  %18071 = vmatprep.subr.bf16.mxu0 %v18070_v24 }
 0xce5   : > { %v19389_v27 = vpop.eup %19388 }
 0xce6   : > { %v19391_v46 = vpop.eup %19390  ;;  %v13106_v11 = vmul.f32 %v19389_v27, %v22999_v16 }
 0xce7   : > { %v13105_v7 = vmul.f32 %v19391_v46, %v23001_v30 }
 0xce9   : > { %17323 = vmatprep.mubr.msk.f32.mxu0 %vm2173_vm3, %v13105_v7 }
 0xcea   : > { %v12998_v50 = vpop.xlane.xlu1 %12997  ;;  %17324 = vmatmul.mubr.msk.f32.vlgmr.msra.gmra.mrb[146].mxu0 %vm2173_vm3, %v13106_v11 }
 0xceb   : > { %19396 = vrcp.f32 %v12998_v50  ;;  %18073 = vmatpush3.bf16.msra.mxu0 %v18070_v24  ;;  %v12995_v0 = vpop.xlane.xlu0 %12994 }
 0xcec   : > { %19398 = vrcp.f32 %v12995_v0  ;;  %18079 = vmatprep.subr.bf16.mxu0 %v18078_v31 }
 0xced   : > { %v19393_v42 = vpop.eup %19392 }
 0xcee   : > { %v19395_v35 = vpop.eup %19394  ;;  %v13108_v16 = vmul.f32 %v19393_v42, %v23009_v52 }
 0xcef   : > { %v13107_v30 = vmul.f32 %v19395_v35, %v23011_v32  ;;  %v18910_v32 = vunpack.i.l.bf16 %v22983_v40 }
 0xcf1   : > { %17330 = vmatprep.mubr.msk.f32.mxu1 %vm2173_vm3, %v13107_v30  ;;  %v18086_v53 = vpack.c.bf16 %v18911_v26, %v18910_v32 }
 0xcf2   : > { %17331 = vmatmul.mubr.msk.f32.vlgmr.msra.gmra.mrb[162].mxu1 %vm2173_vm3, %v13108_v16  ;;  %v13004_v2 = vpop.xlane.xlu1 %13003 }
 0xcf3   : > { %18077 = vmatpush3.bf16.msra.mxu1 %v22772_v12  ;;  %19400 = vrcp.f32 %v13004_v2  ;;  %v13001_v59 = vpop.xlane.xlu0 %13000 }
 0xcf4   : > { %19402 = vrcp.f32 %v13001_v59  ;;  %18083 = vmatprep.subr.bf16.mxu1 %v18082_v45 }
 0xcf5   : > { %v19397_v55 = vpop.eup %19396 }
 0xcf6   : > { %v19399_v33 = vpop.eup %19398  ;;  %v13110_v28 = vmul.f32 %v19397_v55, %v23019_v61 }
 0xcf7   : > { %v13109_v52 = vmul.f32 %v19399_v33, %v23021_v57 }
 0xcf9   : > { %17337 = vmatprep.mubr.msk.f32.mxu0 %vm2173_vm3, %v13109_v52 }
 0xcfa   : > { %v13010_v10 = vpop.xlane.xlu1 %13009  ;;  %17338 = vmatmul.mubr.msk.f32.vlgmr.msra.gmra.mrb[148].mxu0 %vm2173_vm3, %v13110_v28 }
 0xcfb   : > { %19404 = vrcp.f32 %v13010_v10  ;;  %18081 = vmatpush3.bf16.msra.mxu0 %v18078_v31  ;;  %v13007_v12 = vpop.xlane.xlu0 %13006 }
 0xcfc   : > { %19406 = vrcp.f32 %v13007_v12  ;;  %18087 = vmatprep.subr.bf16.mxu0 %v18086_v53 }
 0xcfd   : > { %v19401_v6 = vpop.eup %19400 }
 0xcfe   : > { %v19403_v20 = vpop.eup %19402  ;;  %v13112_v40 = vmul.f32 %v19401_v6, %v23029_v22 }
 0xcff   : > { %v13111_v24 = vmul.f32 %v19403_v20, %v23031_v58 }
 0xd01   : > { %17344 = vmatprep.mubr.msk.f32.mxu1 %vm2173_vm3, %v13111_v24 }
 0xd02   : > { %17345 = vmatmul.mubr.msk.f32.vlgmr.msra.gmra.mrb[164].mxu1 %vm2173_vm3, %v13112_v40  ;;  %v13016_v61 = vpop.xlane.xlu1 %13015 }
 0xd03   : > { %18085 = vmatpush3.bf16.msra.mxu1 %v18082_v45  ;;  %19408 = vrcp.f32 %v13016_v61 }
 0xd05   : > { %v19405_v57 = vpop.eup %19404 }
 0xd06   : > { %v19407_v5 = vpop.eup %19406  ;;  %v13013_v14 = vpop.xlane.xlu1 %13012  ;;  %v13114_v17 = vmul.f32 %v19405_v57, %v23039_v18 }
 0xd07   : > { %19410 = vrcp.f32 %v13013_v14  ;;  %v12833_v27 = vpop.xlane.xlu0 %12832  ;;  %v13113_v46 = vmul.f32 %v19407_v5, %v23041_v3 }
 0xd08   : > { %v12895_v58 = vsub.f32 %v23058_v63, %v12833_v27 }
 0xd09   : > { %17351 = vmatprep.mubr.msk.f32.mxu0 %vm2173_vm3, %v13113_v46 }
 0xd0a   : > { %17352 = vmatmul.mubr.msk.f32.vlgmr.msra.gmra.mrb[150].mxu0 %vm2173_vm3, %v13114_v17  ;;  %v12836_v22 = vpop.xlane.xlu1 %12835  ;;  %v12943_v11 = vmul.f32 1.442695, %v12895_v58 }
 0xd0b   : > { %18089 = vmatpush3.bf16.msra.mxu0 %v18086_v53  ;;  %v12896_v21 = vsub.f32 %v23061_v9, %v12836_v22  ;;  %v13019_v7 = vpop.xlane.xlu0 %13018 }
 0xd0c   : > { %19412 = vrcp.f32 %v13019_v7 }
 0xd0d   : > { %v12945_v31 = vmul.f32 1.442695, %v12896_v21  ;;  %v19409_v3 = vpop.eup %19408 }
 0xd0e   : > { %v13022_v50 = vpop.xlane.xlu1 %13021  ;;  %v13116_v25 = vmul.f32 %v19409_v3, %v23049_v43 }
 0xd0f   : > { %19414 = vpow2.f32 %v12945_v31  ;;  %v12845_v0 = vpop.xlane.xlu0 %12844 }
 0xd10   : > { %19416 = vrcp.f32 %v13022_v50  ;;  %v12899_v18 = vsub.f32 %v23078_v48, %v12845_v0 }
 0xd11   : > { %v19411_v63 = vpop.eup %19410  ;;  %19418 = vpow2.f32 %v12943_v11 }
 0xd12   : > { %v12951_v42 = vmul.f32 1.442695, %v12899_v18  ;;  %v12848_v35 = vpop.xlane.xlu1 %12847  ;;  %v13115_v15 = vmul.f32 %v19411_v63, %v23053_v60 }
 0xd13   : > { %v12900_v9 = vsub.f32 %v23081_v47, %v12848_v35  ;;  %v13031_v30 = vpop.xlane.xlu0 %13030 }
 0xd14   : > { %19420 = vpow2.f32 %v12951_v42  ;;  %17358 = vmatprep.mubr.msk.f32.mxu1 %vm2173_vm3, %v13115_v15 }
 0xd15   : > { %v12953_v16 = vmul.f32 1.442695, %v12900_v9  ;;  %19422 = vrcp.f32 %v13031_v30  ;;  %17359 = vmatmul.mubr.msk.f32.vlgmr.msra.gmra.mrb[166].mxu1 %vm2173_vm3, %v13116_v25 }
 0xd16   : > { %v13034_v45 = vpop.xlane.xlu1 %13033  ;;  %v19413_v48 = vpop.eup %19412 }
 0xd17   : > { %19424 = vpow2.f32 %v12953_v16  ;;  %v12857_v2 = vpop.xlane.xlu0 %12856  ;;  %v13117_v60 = vmul.f32 %v19413_v48, %v23067_v4 }
 0xd18   : > { %v12903_v59 = vsub.f32 %v23096_v62, %v12857_v2 }
 0xd19   : > { %v23195_v55 = vpop.eup %19414  ;;  %17365 = vmatprep.mubr.msk.f32.mxu0 %vm2173_vm3, %v13117_v60 }
 0xd1a   : > { %v19417_v43 = vpop.eup %19416  ;;  %v12959_v47 = vmul.f32 1.442695, %v12903_v59  ;;  %v12860_v33 = vpop.xlane.xlu1 %12859  ;;  %v13026_v26 = vsel %vm2173_vm3, %v23195_v55, 0.0 }
 0xd1b   : > { %v23200_v32 = vpop.eup %19418  ;;  %v13118_v52 = vmul.f32 %v19417_v43, %v23071_v36  ;;  %v12904_v28 = vsub.f32 %v23099_v19, %v12860_v33  ;;  %13027 = vadd.xlane.f32.xlu1 %v13026_v26  ;;  %v23204_v62 = vpop.xlane.xlu0 %13045 }
 0xd1c   : > { %19426 = vpow2.f32 %v12959_v47  ;;  %v13023_v12 = vsel %vm2173_vm3, %v23200_v32, 0.0 }
 0xd1d   : > { %v12961_v4 = vmul.f32 1.442695, %v12904_v28  ;;  %17366 = vmatmul.mubr.msk.f32.vlgmr.msra.gmra.mrb[152].mxu0 %vm2173_vm3, %v13118_v52 }
 0xd1e   : > { %v23207_v53 = vpop.eup %19420  ;;  %v13043_v10 = vpop.xlane.xlu1 %13042 }
 0xd1f   : > { %v19423_v6 = vpop.eup %19422  ;;  %19428 = vpow2.f32 %v12961_v4  ;;  %13024 = vadd.xlane.f32.xlu1 %v13023_v12  ;;  %v12869_v20 = vpop.xlane.xlu0 %12868  ;;  %v13035_v5 = vsel %vm2173_vm3, %v23207_v53, 0.0 }
 0xd20   : > { %19430 = vrcp.f32 %v13034_v45  ;;  %v12907_v36 = vsub.f32 %v23114_v54, %v12869_v20  ;;  %v13121_v19 = vmul.f32 %v19423_v6, %v23087_v51 }
 0xd21   : > { %v23213_v24 = vpop.eup %19424  ;;  %19432 = vrcp.f32 %v13043_v10 }
 0xd22   : > { %v12967_v40 = vmul.f32 1.442695, %v12907_v36  ;;  %17379 = vmatprep.mubr.msk.f32.mxu0 %vm2173_vm3, %v13121_v19  ;;  %v12872_v61 = vpop.xlane.xlu1 %12871  ;;  %v13038_v57 = vsel %vm2173_vm3, %v23213_v24, 0.0 }
 0xd23   : > { %v12908_v14 = vsub.f32 %v23117_v34, %v12872_v61  ;;  %13039 = vadd.xlane.f32.xlu0 %v13038_v57  ;;  %13036 = vadd.xlane.f32.xlu1 %v13035_v5  ;;  %v18914_v54 = vpop.permute.xlu0 %18913 }
 0xd24   : > { %19434 = vpow2.f32 %v12967_v40  ;;  %v18916_v51 = vunpack.i.h.bf16 %v18914_v54  ;;  %v18915_v27 = vunpack.i.l.bf16 %v18914_v54 }
 0xd25   : > { %v12969_v46 = vmul.f32 1.442695, %v12908_v14 }
 0xd26   : > { %v23221_v17 = vpop.eup %19426  ;;  %v18090_v58 = vpack.c.bf16 %v18916_v51, %v18915_v27  ;;  %v18919_v22 = vpop.permute.xlu1 %18918 }
 0xd27   : > { %19436 = vpow2.f32 %v12969_v46  ;;  %v18921_v21 = vunpack.i.h.bf16 %v18919_v22  ;;  %v18920_v7 = vunpack.i.l.bf16 %v18919_v22  ;;  %v18924_v11 = vpop.permute.xlu0 %18923  ;;  %v13047_v31 = vsel %vm2173_vm3, %v23221_v17, 0.0 }
 0xd28   : > { %v18926_v50 = vunpack.i.h.bf16 %v18924_v11  ;;  %v18925_v34 = vunpack.i.l.bf16 %v18924_v11  ;;  %13048 = vadd.xlane.f32.xlu1 %v13047_v31  ;;  %18091 = vmatprep.subr.bf16.mxu1 %v18090_v58 }
 0xd29   : > { %v23225_v0 = vpop.eup %19428  ;;  %v18094_v3 = vpack.c.bf16 %v18921_v21, %v18920_v7  ;;  %18093 = vmatpush3.bf16.msra.mxu1 %v18090_v58 }
 0xd2a   : > { %v19431_v18 = vpop.eup %19430  ;;  %v18098_v63 = vpack.c.bf16 %v18926_v50, %v18925_v34  ;;  %v13050_v42 = vsel %vm2173_vm3, %v23225_v0, 0.0 }
 0xd2b   : > { %v19433_v35 = vpop.eup %19432  ;;  %18095 = vmatprep.subr.bf16.mxu0 %v18094_v3  ;;  %13051 = vadd.xlane.f32.xlu0 %v13050_v42  ;;  %v13122_v15 = vmul.f32 %v19431_v18, %v23091_v38 }
 0xd2c   : > { %18097 = vmatpush3.bf16.msra.mxu0 %v18094_v3  ;;  %18099 = vmatprep.subr.bf16.mxu1 %v18098_v63  ;;  %v13125_v9 = vmul.f32 %v19433_v35, %v23111_v23 }
 0xd2e   : > { %v23230_v25 = vpop.eup %19434 }
 0xd2f   : > { %17380 = vmatmul.mubr.msk.f32.vlgmr.msra.gmra.mrb[154].mxu0 %vm2173_vm3, %v13122_v15  ;;  %v13059_v30 = vsel %vm2173_vm3, %v23230_v25, 0.0 }
 0xd30   : > { %17393 = vmatprep.mubr.msk.f32.mxu0 %vm2173_vm3, %v13125_v9  ;;  %13060 = vadd.xlane.f32.xlu1 %v13059_v30 }
 0xd31   : > { %v23237_v16 = vpop.eup %19436 }
 0xd32   : > { %v13062_v45 = vsel %vm2173_vm3, %v23237_v16, 0.0 }
 0xd33   : > { %13063 = vadd.xlane.f32.xlu0 %v13062_v45 }
 0xd41   : > { %18928 = vrot.lane.b32.xlu1 %v23919_v44, %s19670_s11 }
 0xd49   : > { %18933 = vrot.lane.b32.xlu0 %v23913_v13, %s19670_s11 }
 0xd4d   : > { %18938 = vrot.lane.b32.xlu0 %v23925_v29, %s19670_s11 }
 0xd51   : > { %18943 = vrot.lane.b32.xlu0 %v23723_v8, %s19670_s11 }
 0xd55   : > { %18948 = vrot.lane.b32.xlu0 %v23749_v56, %s19670_s11 }
 0xd57   : > { %v13055_v38 = vpop.xlane.xlu1 %13054 }
 0xd58   : > { %v13058_v48 = vpop.xlane.xlu0 %13057 }
 0xd5b   : > { %v13067_v23 = vpop.xlane.xlu1 %13066 }
 0xd5c   : > { %v13070_v59 = vpop.xlane.xlu0 %13069 }
 0xda8   : > { %v13028_v2 = vpop.xlane.xlu1 %13027 }
 0xda9   : > { %19438 = vrcp.f32 %v13028_v2 }
 0xdac   : > { %v13025_v60 = vpop.xlane.xlu1 %13024 }
 0xdad   : > { %19440 = vrcp.f32 %v13025_v60  ;;  %v14528_v60 = vld [vmem:[#allocation8 + $0x18] sm:$0xff] }
 0xdb0   : > { %v13037_v44 = vpop.xlane.xlu1 %13036  ;;  %v13040_v43 = vpop.xlane.xlu0 %13039 }
 0xdb1   : > { %19442 = vrcp.f32 %v13037_v44 }
 0xdb2   : > { %19444 = vrcp.f32 %v13040_v43 }
 0xdb3   : > { %v19439_v47 = vpop.eup %19438 }
 0xdb4   : > { %v13120_v26 = vmul.f32 %v19439_v47, %v23195_v55 }
 0xdb5   : > { %v23251_v13 = vpop.f32.mrb[144].mxu0  ;;  %v13049_v29 = vpop.xlane.xlu1 %13048 }
 0xdb6   : > { %19446 = vrcp.f32 %v13049_v29  ;;  %v23253_v8 = vpop.f32.mrb[145].mxu0 }
 0xdb7   : > { %v19441_v56 = vpop.eup %19440  ;;  %19448 = vrcp.f32 %v23204_v62 }
 0xdb8   : > { %v13119_v33 = vmul.f32 %v19441_v56, %v23200_v32  ;;  %v13052_v28 = vpop.xlane.xlu0 %13051  ;;  %19450 = vrcp.f32 %v13055_v38 }
 0xdb9   : > { %19452 = vrcp.f32 %v13052_v28 }
 0xdba   : > { %17372 = vmatprep.mubr.msk.f32.mxu1 %vm2173_vm3, %v13119_v33 }
 0xdbb   : > { %v19443_v52 = vpop.eup %19442  ;;  %17373 = vmatmul.mubr.msk.f32.vlgmr.msra.gmra.mrb[168].mxu1 %vm2173_vm3, %v13120_v26 }
 0xdbc   : > { %v19445_v4 = vpop.eup %19444  ;;  %18101 = vmatpush3.bf16.msra.mxu1 %v18098_v63  ;;  %v13123_v10 = vmul.f32 %v19443_v52, %v23207_v53 }
 0xdbd   : > { %v13124_v12 = vmul.f32 %v19445_v4, %v23213_v24  ;;  %v23262_v6 = vpop.f32.mrb[146].mxu0  ;;  %v13061_v32 = vpop.xlane.xlu1 %13060 }
 0xdbe   : > { %v23264_v55 = vpop.f32.mrb[147].mxu0  ;;  %17386 = vmatprep.mubr.msk.f32.mxu1 %vm2173_vm3, %v13123_v10  ;;  %19454 = vrcp.f32 %v13061_v32 }
 0xdbf   : > { %17387 = vmatmul.mubr.msk.f32.vlgmr.msra.gmra.mrb[170].mxu1 %vm2173_vm3, %v13124_v12  ;;  %19456 = vrcp.f32 %v13058_v48 }
 0xdc0   : > { %v19447_v62 = vpop.eup %19446  ;;  %v13064_v20 = vpop.xlane.xlu0 %13063  ;;  %19458 = vrcp.f32 %v13067_v23 }
 0xdc1   : > { %v18929_v36 = vpop.permute.xlu1 %18928  ;;  %v13127_v19 = vmul.f32 %v19447_v62, %v23221_v17  ;;  %v19449_v57 = vpop.eup %19448  ;;  %19460 = vrcp.f32 %v13064_v20 }
 0xdc2   : > { %v18931_v53 = vunpack.i.h.bf16 %v18929_v36  ;;  %v18930_v40 = vunpack.i.l.bf16 %v18929_v36  ;;  %v19451_v51 = vpop.eup %19450  ;;  %v13126_v58 = vmul.f32 %v19449_v57, %v23105_v39  ;;  %19462 = vrcp.f32 %v13070_v59 }
 0xdc3   : > { %17400 = vmatprep.mubr.msk.f32.mxu1 %vm2173_vm3, %v13127_v19  ;;  %v19453_v17 = vpop.eup %19452  ;;  %v13129_v31 = vmul.f32 %v19451_v51, %v23135_v41 }
 0xdc4   : > { %v18102_v24 = vpack.c.bf16 %v18931_v53, %v18930_v40  ;;  %v18934_v61 = vpop.permute.xlu0 %18933  ;;  %v13128_v50 = vmul.f32 %v19453_v17, %v23225_v0  ;;  %v23327_v53 = vld [vmem:[%s23504_s5] ss:$0 sm:$0xff] }
 0xdc5   : > { %v18936_v5 = vunpack.i.h.bf16 %v18934_v61  ;;  %v18935_v14 = vunpack.i.l.bf16 %v18934_v61  ;;  %v23270_v54 = vpop.f32.mrb[162].mxu1 }
 0xdc6   : > { %v13387_v27 = vpop.f32.mrb[163].mxu1  ;;  %18103 = vmatprep.subr.bf16.mxu0 %v18102_v24 }
 0xdc7   : > { %v18106_v46 = vpack.c.bf16 %v18936_v5, %v18935_v14  ;;  %18105 = vmatpush3.bf16.msra.mxu0 %v18102_v24 }
 0xdc8   : > { %v18939_v22 = vpop.permute.xlu0 %18938  ;;  %v19455_v21 = vpop.eup %19454 }
 0xdc9   : > { %v18941_v7 = vunpack.i.h.bf16 %v18939_v22  ;;  %v18940_v11 = vunpack.i.l.bf16 %v18939_v22  ;;  %18107 = vmatprep.subr.bf16.mxu1 %v18106_v46  ;;  %v19457_v3 = vpop.eup %19456  ;;  %v13131_v39 = vmul.f32 %v19455_v21, %v23230_v25 }
 0xdca   : > { %17394 = vmatmul.mubr.msk.f32.vlgmr.msra.gmra.mrb[156].mxu0 %vm2173_vm3, %v13126_v58  ;;  %18109 = vmatpush3.bf16.msra.mxu1 %v18106_v46  ;;  %v19459_v63 = vpop.eup %19458  ;;  %v13130_v0 = vmul.f32 %v19457_v3, %v23137_v37 }
 0xdcb   : > { %v18110_v34 = vpack.c.bf16 %v18941_v7, %v18940_v11  ;;  %17407 = vmatprep.mubr.msk.f32.mxu0 %vm2173_vm3, %v13129_v31  ;;  %v19461_v30 = vpop.eup %19460  ;;  %v13133_v38 = vmul.f32 %v19459_v63, %v23141_v1 }
 0xdcc   : > { %v18944_v18 = vpop.permute.xlu0 %18943  ;;  %v13132_v48 = vmul.f32 %v19461_v30, %v23237_v16  ;;  %v19463_v59 = vpop.eup %19462  ;;  %v23933_v30 = vld [vmem:[#allocation36_spill] sm:$0xff] }
 0xdcd   : > { %v18946_v42 = vunpack.i.h.bf16 %v18944_v18  ;;  %v18945_v35 = vunpack.i.l.bf16 %v18944_v18  ;;  %v17339_v15 = vpop.f32.mrb[148].mxu0  ;;  %17401 = vmatmul.mubr.msk.f32.vlgmr.msra.gmra.mrb[172].mxu1 %vm2173_vm3, %v13128_v50  ;;  %18111 = vmatprep.subr.bf16.mxu0 %v18110_v34  ;;  %v13134_v1 = vmul.f32 %v19463_v59, %v23145_v49 }
 0xdce   : > { %v13474_v41 = vpop.f32.mrb[149].mxu0  ;;  %18113 = vmatpush3.bf16.msra.mxu0 %v18110_v34  ;;  %17414 = vmatprep.mubr.msk.f32.mxu1 %vm2173_vm3, %v13131_v39 }
 0xdcf   : > { %v18114_v9 = vpack.c.bf16 %v18946_v42, %v18945_v35 }
 0xdd0   : > { %v18949_v45 = vpop.permute.xlu0 %18948 }
 0xdd1   : > { %v18951_v23 = vunpack.i.h.bf16 %v18949_v45  ;;  %v18950_v25 = vunpack.i.l.bf16 %v18949_v45  ;;  %17408 = vmatmul.mubr.msk.f32.vlgmr.msra.gmra.mrb[158].mxu0 %vm2173_vm3, %v13130_v0  ;;  %18115 = vmatprep.subr.bf16.mxu1 %v18114_v9 }
 0xdd2   : > { %18117 = vmatpush3.bf16.msra.mxu1 %v18114_v9  ;;  %17421 = vmatprep.mubr.msk.f32.mxu0 %vm2173_vm3, %v13133_v38 }
 0xdd3   : > { %v18118_v2 = vpack.c.bf16 %v18951_v23, %v18950_v25  ;;  %v23934_v23 = vld [vmem:[#allocation38_spill] sm:$0xff] }
 0xdd5   : > { %v17346_v44 = vpop.f32.mrb[164].mxu1  ;;  %17415 = vmatmul.mubr.msk.f32.vlgmr.msra.gmra.mrb[174].mxu1 %vm2173_vm3, %v13132_v48  ;;  %18119 = vmatprep.subr.bf16.mxu0 %v18118_v2 }
 0xdd6   : > { %v13561_v37 = vpop.f32.mrb[165].mxu1  ;;  %18121 = vmatpush3.bf16.msra.mxu0 %v18118_v2 }
 0xdd7   : > { %17424 = vmatprep.subr.mxu0 %v14528_v60 }
 0xdd9   : > { %17422 = vmatmul.mubr.msk.f32.vlgmr.msra.gmra.mrb[160].mxu0 %vm2173_vm3, %v13134_v1  ;;  %v23936_v1 = vld [vmem:[#allocation17_spill] sm:$0xff] }
 0xdda   : > { %17426 = vmatprep.mubr.msk.f32.mxu0 %vm722_vm1, %v23253_v8  ;;  %17425 = vmatpush3.msra.mxu0 %v14528_v60  ;;  %v23935_v60 = vld [vmem:[#allocation39_spill] sm:$0xff] }
 0xddd   : > { %v17353_v43 = vpop.f32.mrb[150].mxu0  ;;  %17427 = vmatmul.mubr.msk.f32.vlgmr.msra.gmra.mrb[88].mxu0 %vm722_vm1, %v23251_v13 }
 0xdde   : > { %v13648_v16 = vpop.f32.mrb[151].mxu0  ;;  %17429 = vmatprep.mubr.msk.f32.mxu0 %vm722_vm1, %v23264_v55 }
 0xde1   : > { %17430 = vmatmul.mubr.msk.f32.gmra.mrb[90].mxu0 %vm722_vm1, %v23262_v6 }
 0xde2   : > { %17432 = vmatprep.mubr.msk.f32.mxu0 %vm722_vm1, %v13387_v27 }
 0xde5   : > { %17433 = vmatmul.mubr.msk.f32.gmra.mrb[92].mxu0 %vm722_vm1, %v23270_v54 }
 0xde6   : > { %17435 = vmatprep.mubr.msk.f32.mxu0 %vm722_vm1, %v13474_v41 }
 0xde8   : > { %v17360_v49 = vpop.f32.mrb[166].mxu1 }
 0xde9   : > { %v13735_v29 = vpop.f32.mrb[167].mxu1  ;;  %17436 = vmatmul.mubr.msk.f32.gmra.mrb[94].mxu0 %vm722_vm1, %v17339_v15 }
 0xdea   : > { %17438 = vmatprep.mubr.msk.f32.mxu0 %vm722_vm1, %v13561_v37 }
 0xded   : > { %17439 = vmatmul.mubr.msk.f32.gmra.mrb[96].mxu0 %vm722_vm1, %v17346_v44 }
 0xdee   : > { %17441 = vmatprep.mubr.msk.f32.mxu0 %vm722_vm1, %v13648_v16 }
 0xdf0   : > { %v17367_v13 = vpop.f32.mrb[152].mxu0 }
 0xdf1   : > { %v13822_v47 = vpop.f32.mrb[153].mxu0  ;;  %17442 = vmatmul.mubr.msk.f32.gmra.mrb[98].mxu0 %vm722_vm1, %v17353_v43 }
 0xdf2   : > { %17444 = vmatprep.mubr.msk.f32.mxu0 %vm722_vm1, %v13735_v29 }
 0xdf5   : > { %17445 = vmatmul.mubr.msk.f32.gmra.mrb[100].mxu0 %vm722_vm1, %v17360_v49 }
 0xdf6   : > { %17447 = vmatprep.mubr.msk.f32.mxu0 %vm722_vm1, %v13822_v47 }
 0xdf9   : > { %17448 = vmatmul.mubr.msk.f32.gmra.mrb[102].mxu0 %vm722_vm1, %v17367_v13  ;;  %v23937_v13 = vld [vmem:[#allocation32_spill] sm:$0xff] }
 0xe02   : > { %v17381_v8 = vpop.f32.mrb[154].mxu0 }
 0xe03   : > { %v13996_v56 = vpop.f32.mrb[155].mxu0 }
 0xe8e   : > { %v17374_v33 = vpop.f32.mrb[168].mxu1 }
 0xe8f   : > { %v13909_v26 = vpop.f32.mrb[169].mxu1 }
 0xe90   : > { %17450 = vmatprep.mubr.msk.f32.mxu0 %vm722_vm1, %v13909_v26 }
 0xe91   : > { %17451 = vmatmul.mubr.msk.f32.gmra.mrb[104].mxu0 %vm722_vm1, %v17374_v33 }
 0xe92   : > { %v17388_v52 = vpop.f32.mrb[170].mxu1  ;;  %17453 = vmatprep.mubr.msk.f32.mxu0 %vm722_vm1, %v13996_v56  ;;  %v23938_v56 = vld [vmem:[#allocation33_spill] sm:$0xff] }
 0xe93   : > { %v14083_v28 = vpop.f32.mrb[171].mxu1 }
 0xe95   : > { %17454 = vmatmul.mubr.msk.f32.gmra.mrb[106].mxu0 %vm722_vm1, %v17381_v8 }
 0xe96   : > { %17456 = vmatprep.mubr.msk.f32.mxu0 %vm722_vm1, %v14083_v28 }
 0xe99   : > { %17457 = vmatmul.mubr.msk.f32.gmra.mrb[108].mxu0 %vm722_vm1, %v17388_v52 }
 0xe9d   : > { %v17395_v4 = vpop.f32.mrb[156].mxu0 }
 0xe9e   : > { %v14170_v10 = vpop.f32.mrb[157].mxu0 }
 0xe9f   : > { %17459 = vmatprep.mubr.msk.f32.mxu0 %vm722_vm1, %v14170_v10 }
 0xea0   : > { %v17402_v12 = vpop.f32.mrb[172].mxu1  ;;  %17460 = vmatmul.mubr.msk.f32.gmra.mrb[110].mxu0 %vm722_vm1, %v17395_v4  ;;  %v23939_v4 = vld [vmem:[#allocation19_spill] sm:$0xff] }
 0xea1   : > { %v14257_v6 = vpop.f32.mrb[173].mxu1 }
 0xea2   : > { %17462 = vmatprep.mubr.msk.f32.mxu0 %vm722_vm1, %v14257_v6  ;;  %v23940_v6 = vld [vmem:[#allocation30_spill] sm:$0xff] }
 0xea4   : > { %v17409_v32 = vpop.f32.mrb[158].mxu0  ;;  %17463 = vmatmul.mubr.msk.f32.gmra.mrb[112].mxu0 %vm722_vm1, %v17402_v12 }
 0xea5   : > { %v14344_v55 = vpop.f32.mrb[159].mxu0 }
 0xea6   : > { %17465 = vmatprep.mubr.msk.f32.mxu0 %vm722_vm1, %v14344_v55 }
 0xea8   : > { %v17416_v62 = vpop.f32.mrb[174].mxu1  ;;  %17466 = vmatmul.mubr.msk.f32.gmra.mrb[114].mxu0 %vm722_vm1, %v17409_v32 }
 0xea9   : > { %v14431_v20 = vpop.f32.mrb[175].mxu1 }
 0xeaa   : > { %17468 = vmatprep.mubr.msk.f32.mxu0 %vm722_vm1, %v14431_v20 }
 0xeac   : > { %v17423_v36 = vpop.f32.mrb[160].mxu0  ;;  %17469 = vmatmul.mubr.msk.f32.gmra.mrb[116].mxu0 %vm722_vm1, %v17416_v62 }
 0xead   : > { %v14518_v19 = vpop.f32.mrb[161].mxu0 }
 0xeae   : > { %17471 = vmatprep.mubr.msk.f32.mxu0 %vm722_vm1, %v14518_v19 }
 0xeb0   : > { %v17428_v40 = vpop.f32.mrb[88].mxu0  ;;  %17472 = vmatmul.mubr.msk.f32.gmra.mrb[118].mxu0 %vm722_vm1, %v17423_v36  ;;  %v23941_v36 = vld [vmem:[#allocation67_spill] sm:$0xff] }
 0xeb1   : > { %v14890_v24 = vadd.f32 %v17428_v40, %v23327_v53  ;;  %v14691_v61 = vpop.f32.mrb[89].mxu0 }
 0xeb2   : > { %v14889_v57 = vadd.f32 %v23327_v53, %v14691_v61 }
 0xeb3   : > { %14922 = vst.msk [vmem:[%s23334_s30 + $0x8] sm:$0xff] %vm360_vm0, %v14890_v24  ;;  %v23942_v24 = vld [vmem:[#allocation63_spill] sm:$0xff] }
 0xeb4   : > { %14921 = vst.msk [vmem:[%s23334_s30] sm:$0xff] %vm360_vm0, %v14889_v57  ;;  %v17431_v5 = vpop.f32.mrb[90].mxu0 }
 0xeb5   : > { %v14892_v14 = vadd.f32 %v17431_v5, %v23327_v53  ;;  %v14701_v54 = vpop.f32.mrb[91].mxu0 }
 0xeb6   : > { %v14891_v51 = vadd.f32 %v23327_v53, %v14701_v54  ;;  %v23943_v54 = vld [vmem:[#allocation65_spill] sm:$0xff] }
 0xeb7   : > { %14924 = vst.msk [vmem:[%s23334_s30 + $0x18] sm:$0xff] %vm360_vm0, %v14892_v14 }
 0xeb8   : > { %14923 = vst.msk [vmem:[%s23334_s30 + $0x10] sm:$0xff] %vm360_vm0, %v14891_v51  ;;  %v17434_v27 = vpop.f32.mrb[92].mxu0 }
 0xeb9   : > { %v14894_v46 = vadd.f32 %v17434_v27, %v23327_v53  ;;  %v14711_v17 = vpop.f32.mrb[93].mxu0 }
 0xeba   : > { %v14893_v58 = vadd.f32 %v23327_v53, %v14711_v17 }
 0xebb   : > { %14926 = vst.msk [vmem:[%s23334_s30 + $0x28] sm:$0xff] %vm360_vm0, %v14894_v46  ;;  %v23944_v46 = vld [vmem:[#allocation64_spill] sm:$0xff] }
 0xebc   : > { %14925 = vst.msk [vmem:[%s23334_s30 + $0x20] sm:$0xff] %vm360_vm0, %v14893_v58  ;;  %v17437_v22 = vpop.f32.mrb[94].mxu0 }
 0xebd   : > { %v14896_v21 = vadd.f32 %v17437_v22, %v23327_v53  ;;  %v14721_v7 = vpop.f32.mrb[95].mxu0 }
 0xebe   : > { %v14895_v11 = vadd.f32 %v23327_v53, %v14721_v7  ;;  %v23945_v7 = vld [vmem:[#allocation69_spill] sm:$0xff] }
 0xebf   : > { %14928 = vst.msk [vmem:[%s23334_s30 + $0x38] sm:$0xff] %vm360_vm0, %v14896_v21 }
 0xec0   : > { %14927 = vst.msk [vmem:[%s23334_s30 + $0x30] sm:$0xff] %vm360_vm0, %v14895_v11  ;;  %v17440_v31 = vpop.f32.mrb[96].mxu0 }
 0xec1   : > { %v14898_v50 = vadd.f32 %v17440_v31, %v23327_v53  ;;  %v14731_v34 = vpop.f32.mrb[97].mxu0 }
 0xec2   : > { %v14897_v3 = vadd.f32 %v23327_v53, %v14731_v34 }
 0xec3   : > { %14930 = vst.msk [vmem:[%s23334_s30 + $0x48] sm:$0xff] %vm360_vm0, %v14898_v50  ;;  %v23946_v50 = vld [vmem:[#allocation66_spill] sm:$0xff] }
 0xec4   : > { %14929 = vst.msk [vmem:[%s23334_s30 + $0x40] sm:$0xff] %vm360_vm0, %v14897_v3  ;;  %v17443_v18 = vpop.f32.mrb[98].mxu0 }
 0xec5   : > { %v14900_v39 = vadd.f32 %v17443_v18, %v23327_v53  ;;  %v14741_v63 = vpop.f32.mrb[99].mxu0 }
 0xec6   : > { %v14899_v42 = vadd.f32 %v23327_v53, %v14741_v63  ;;  %v23947_v63 = vld [vmem:[#allocation71_spill] sm:$0xff] }
 0xec7   : > { %14932 = vst.msk [vmem:[%s23334_s30 + $0x58] sm:$0xff] %vm360_vm0, %v14900_v39 }
 0xec8   : > { %14931 = vst.msk [vmem:[%s23334_s30 + $0x50] sm:$0xff] %vm360_vm0, %v14899_v42  ;;  %v17446_v35 = vpop.f32.mrb[100].mxu0 }
 0xec9   : > { %v14902_v15 = vadd.f32 %v17446_v35, %v23327_v53  ;;  %v14751_v41 = vpop.f32.mrb[101].mxu0 }
 0xeca   : > { %v14901_v0 = vadd.f32 %v23327_v53, %v14751_v41 }
 0xecb   : > { %14934 = vst.msk [vmem:[%s23334_s30 + $0x68] sm:$0xff] %vm360_vm0, %v14902_v15  ;;  %v23948_v15 = vld [vmem:[#allocation81_spill] sm:$0xff] }
 0xecc   : > { %14933 = vst.msk [vmem:[%s23334_s30 + $0x60] sm:$0xff] %vm360_vm0, %v14901_v0  ;;  %v17449_v9 = vpop.f32.mrb[102].mxu0 }
 0xecd   : > { %v18124_v45 = vadd.f32 %v17449_v9, %v23933_v30  ;;  %v14761_v38 = vpop.f32.mrb[103].mxu0 }
 0xece   : > { %v18125_v25 = vadd.f32 %v14761_v38, %v23934_v23 }
 0xecf   : > { %v14904_v48 = vadd.f32 %v18124_v45, %v23327_v53  ;;  %v23949_v45 = vld [vmem:[#allocation31_spill] sm:$0xff] }
 0xed0   : > { %v14903_v2 = vadd.f32 %v18125_v25, %v23327_v53  ;;  %v23950_v25 = vld [vmem:[#allocation70_spill] sm:$0xff] }
 0xed1   : > { %14936 = vst.msk [vmem:[%s23334_s30 + $0x78] sm:$0xff] %vm360_vm0, %v14904_v48 }
 0xed2   : > { %14935 = vst.msk [vmem:[%s23334_s30 + $0x70] sm:$0xff] %vm360_vm0, %v14903_v2 }
 0xf64   : > { %v17452_v59 = vpop.f32.mrb[104].mxu0 }
 0xf65   : > { %v18126_v44 = vadd.f32 %v17452_v59, %v23935_v60  ;;  %v14771_v37 = vpop.f32.mrb[105].mxu0 }
 0xf66   : > { %v18127_v43 = vadd.f32 %v14771_v37, %v23936_v1 }
 0xf67   : > { %v14906_v16 = vadd.f32 %v18126_v44, %v23327_v53 }
 0xf68   : > { %v14905_v49 = vadd.f32 %v18127_v43, %v23327_v53  ;;  %v17455_v29 = vpop.f32.mrb[106].mxu0 }
 0xf69   : > { %14938 = vst.msk [vmem:[%s23334_s30 + $0x88] sm:$0xff] %vm360_vm0, %v14906_v16  ;;  %v18128_v47 = vadd.f32 %v17455_v29, %v23937_v13  ;;  %v14781_v8 = vpop.f32.mrb[107].mxu0 }
 0xf6a   : > { %14937 = vst.msk [vmem:[%s23334_s30 + $0x80] sm:$0xff] %vm360_vm0, %v14905_v49  ;;  %v18129_v33 = vadd.f32 %v14781_v8, %v23938_v56 }
 0xf6b   : > { %v14908_v26 = vadd.f32 %v18128_v47, %v23327_v53 }
 0xf6c   : > { %v14907_v52 = vadd.f32 %v18129_v33, %v23327_v53  ;;  %v17458_v28 = vpop.f32.mrb[108].mxu0 }
 0xf6d   : > { %14940 = vst.msk [vmem:[%s23334_s30 + $0x98] sm:$0xff] %vm360_vm0, %v14908_v26  ;;  %v18130_v10 = vadd.f32 %v17458_v28, %v23939_v4  ;;  %v14791_v12 = vpop.f32.mrb[109].mxu0 }
 0xf6e   : > { %14939 = vst.msk [vmem:[%s23334_s30 + $0x90] sm:$0xff] %vm360_vm0, %v14907_v52  ;;  %v18131_v32 = vadd.f32 %v14791_v12, %v23940_v6 }
 0xf6f   : > { %v14910_v55 = vadd.f32 %v18130_v10, %v23327_v53 }
 0xf70   : > { %v14909_v62 = vadd.f32 %v18131_v32, %v23327_v53 }
 0xf71   : > { %14942 = vst.msk [vmem:[%s23334_s30 + $0xa8] sm:$0xff] %vm360_vm0, %v14910_v55 }
 0xf72   : > { %14941 = vst.msk [vmem:[%s23334_s30 + $0xa0] sm:$0xff] %vm360_vm0, %v14909_v62 }
 0xf73   : > { %v17461_v20 = vpop.f32.mrb[110].mxu0 }
 0xf74   : > { %v18132_v19 = vadd.f32 %v17461_v20, %v23941_v36  ;;  %v14801_v40 = vpop.f32.mrb[111].mxu0 }
 0xf75   : > { %v18133_v61 = vadd.f32 %v14801_v40, %v23942_v24 }
 0xf76   : > { %v14912_v57 = vadd.f32 %v18132_v19, %v23327_v53 }
 0xf77   : > { %v14911_v5 = vadd.f32 %v18133_v61, %v23327_v53  ;;  %v17464_v14 = vpop.f32.mrb[112].mxu0 }
 0xf78   : > { %14944 = vst.msk [vmem:[%s23334_s30 + $0xb8] sm:$0xff] %vm360_vm0, %v14912_v57  ;;  %v18134_v51 = vadd.f32 %v17464_v14, %v23943_v54  ;;  %v14811_v27 = vpop.f32.mrb[113].mxu0 }
 0xf79   : > { %14943 = vst.msk [vmem:[%s23334_s30 + $0xb0] sm:$0xff] %vm360_vm0, %v14911_v5  ;;  %v18135_v17 = vadd.f32 %v14811_v27, %v23944_v46 }
 0xf7a   : > { %v14914_v58 = vadd.f32 %v18134_v51, %v23327_v53 }
 0xf7b   : > { %v14913_v22 = vadd.f32 %v18135_v17, %v23327_v53  ;;  %v17467_v21 = vpop.f32.mrb[114].mxu0 }
 0xf7c   : > { %14946 = vst.msk [vmem:[%s23334_s30 + $0xc8] sm:$0xff] %vm360_vm0, %v14914_v58  ;;  %v18136_v11 = vadd.f32 %v17467_v21, %v23945_v7  ;;  %v14821_v31 = vpop.f32.mrb[115].mxu0 }
 0xf7d   : > { %14945 = vst.msk [vmem:[%s23334_s30 + $0xc0] sm:$0xff] %vm360_vm0, %v14913_v22  ;;  %v18137_v34 = vadd.f32 %v14821_v31, %v23946_v50 }
 0xf7e   : > { %v14916_v3 = vadd.f32 %v18136_v11, %v23327_v53 }
 0xf7f   : > { %v14915_v18 = vadd.f32 %v18137_v34, %v23327_v53  ;;  %v17470_v39 = vpop.f32.mrb[116].mxu0 }
 0xf80   : > { %14948 = vst.msk [vmem:[%s23334_s30 + $0xd8] sm:$0xff] %vm360_vm0, %v14916_v3  ;;  %v18138_v42 = vadd.f32 %v17470_v39, %v23947_v63  ;;  %v14831_v35 = vpop.f32.mrb[117].mxu0 }
 0xf81   : > { %14947 = vst.msk [vmem:[%s23334_s30 + $0xd0] sm:$0xff] %vm360_vm0, %v14915_v18  ;;  %v18139_v41 = vadd.f32 %v14831_v35, %v23948_v15 }
 0xf82   : > { %v14918_v0 = vadd.f32 %v18138_v42, %v23327_v53 }
 0xf83   : > { %v14917_v9 = vadd.f32 %v18139_v41, %v23327_v53  ;;  %v17473_v30 = vpop.f32.mrb[118].mxu0 }
 0xf84   : > { %14950 = vst.msk [vmem:[%s23334_s30 + $0xe8] sm:$0xff] %vm360_vm0, %v14918_v0  ;;  %v18140_v38 = vadd.f32 %v17473_v30, %v23949_v45  ;;  %v14841_v23 = vpop.f32.mrb[119].mxu0 }
 0xf85   : > { %14949 = vst.msk [vmem:[%s23334_s30 + $0xe0] sm:$0xff] %vm360_vm0, %v14917_v9  ;;  %v18141_v48 = vadd.f32 %v14841_v23, %v23950_v25 }
 0xf86   : > { %v14920_v2 = vadd.f32 %v18140_v38, %v23327_v53 }
 0xf87   : > { %v14919_v59 = vadd.f32 %v18141_v48, %v23327_v53 }
 0xf88   : > { %14952 = vst.msk [vmem:[%s23334_s30 + $0xf8] sm:$0xff] %vm360_vm0, %v14920_v2 }
 0xf89   : > { %14951 = vst.msk [vmem:[%s23334_s30 + $0xf0] sm:$0xff] %vm360_vm0, %v14919_v59 }
 0xf8a   : > { %19591 = shalt.err (!%p19588_p4)
}
 0xf8b   : > { %s19592_s7 = scalar_lea.hbm %s23448_s8, 4096  ;;  %s19596_s29 = scalar_lea.hbm %s23505_s6, 8192 }
 0xf8c   : > { %p19593_p9 = scmp.ne.s32.totalorder %s23448_s8, %s19592_s7  ;;  %p19597_p8 = scmp.lt.u32.totalorder %s23448_s8, %s23505_s6 }
 0xf8d   : > { %p19598_p13 = scmp.lt.u32.totalorder %s19596_s29, %s19592_s7  ;;  %p19600_p10 = scmp.lt.u32.totalorder %s19592_s7, %s23448_s8 }
 0xf8e   : > { %p19594_p0 = pnand %p19593_p9, %p19863_p5 }
 0xf8f   : > { %p19599_p6 = por %p19598_p13, %p19597_p8 }
 0xf90   : > { %p19595_p11 = pneg %p19594_p0 }
 0xf91   : > { %p19601_p3 = por %p19600_p10, %p19599_p6 }
 0xf93   : > { %p19602_p7 = pnand %p19601_p3, %p19595_p11 }
 0xf95   : > { %19605 = shalt.err (!%p19602_p7)
}
 0xf96   : > { %s19672_s26 = smov 128   ;;  %s19673_s10 = smov 8  }
 0xf97   : > { %18234 = dma.vmem_to_hbm [thread:$0]  (%p19863_p5), %s23450_s9, 4096, %s23448_s8, %s14954_s25, %s19672_s26, %s19672_s26, %s19673_s10  }
 0xf98 PF: > { %s14983_s16 = sand.u32 1, %s19640_s21   ;;  %p23951_p12 = scmp.ne.s32.totalorder %s23634_s28, 0 }
 0xf99   : > { %p23952_p1 = scmp.ge.s32.totalorder %s19652_s24, 2  ;;  %s14984_s17 = scalar_lea.sflag [#allocation4], %s14983_s16 }
 0xf9b   : > { %p18251_p2 = pnand %p23952_p1, %p23951_p12 }
 0xf9d   : > { %19635 = dma.done.wait (!%p18251_p2), %s14984_s17, 4096  }
 0xf9e   : > { %19637 = vsyncadd (!%p18251_p2), %s14984_s17, 4294963200  ;;  %p21_p4 = scmp.ge.s32.totalorder %s19849_s18, 4   ;;  %s23953_s21 = smov %s19644_s22 }
 0xf9f   : > { %s23954_s22 = smov %s19648_s23  ;;  %s23955_s23 = smov %s19859_s14 }
 0xfa0   : > { %s23956_s24 = smov %s19849_s18  ;;  %23 = sbr.rel (!%p21_p4) target bundleno = 7 (0x7), region = 107 }
 0xfa7   :  { %14989 = vsyncpa [#allocation3], 1 }
 0xfa8   :  { %14991 = vsyncpa [#allocation3 + $0x1], 1 }
 0xfa9   :  { %14992 = vsyncpa [#allocation6], 1 }
 0xfaa   :  { %14993 = vsyncpa [#allocation9], 1 }
 0xfab   :  { %14994 = vsyncpa [#allocation4], 1 }
 0xfac   :  { %14996 = vsyncpa [#allocation4 + $0x1], 1 }

</bundles_post_ra>
